<compile_context>
chip_gen: v7x
topology: tpu7x:2x2x1
jax: 0.10.0
libtpu: 0.0.40
codegen_flags: <defaults>
</compile_context>

<pallas_src>
import math
from functools import partial

import jax
import jax.numpy as jnp
from jax.experimental import pallas as pl
from jax.experimental.pallas import tpu as pltpu

LN_EPS = 1e-12  # DFFConfig / HF ViT default layer_norm_eps


def _layernorm(x, w, b):
    mu = jnp.mean(x, axis=-1, keepdims=True)
    var = jnp.mean(jnp.square(x - mu), axis=-1, keepdims=True)
    return (x - mu) * jax.lax.rsqrt(var + LN_EPS) * w + b


# ----------------------------------- kernel ----------------------------------------
def dff_layer_kernel(
    x_ref, ln1w, ln1b, wqkv, bqkv, wo, bo, ln2w, ln2b, wi, bi, wp, bp, o_ref,
    *, num_heads, mlp_chunk,
):
    """Fused pre-LN ViT block for one batch element."""
    f32, bf16 = jnp.float32, jnp.bfloat16
    x = x_ref[...]                                  # (S, D) f32
    S, D = x.shape
    hd = D // num_heads
    scale = 1.0 / math.sqrt(hd)

    # ------------------------------ attention ------------------------------
    xn = _layernorm(x, ln1w[...], ln1b[...])
    # single wide (D, 3D) MXU matmul, bf16 operands / f32 accumulation
    qkv = jnp.dot(xn.astype(bf16), wqkv[...], preferred_element_type=f32) + bqkv[...]
    q = qkv[:, :D] * scale                          # fold 1/sqrt(hd) into q (once, small)
    k = qkv[:, D:2 * D]
    v = qkv[:, 2 * D:]

    def to_heads(t):  # (S, D) -> (H, S, hd); head slices are 128-lane aligned (hd=128)
        return jnp.stack(
            [t[:, h * hd:(h + 1) * hd] for h in range(num_heads)], axis=0
        ).astype(bf16)

    q3, k3, v3 = to_heads(q), to_heads(k), to_heads(v)

    scores = jnp.einsum("hqd,hkd->hqk", q3, k3, preferred_element_type=f32)  # (H, S, S)
    m = jnp.max(scores, axis=-1, keepdims=True)
    e = jnp.exp(scores - m)
    probs = e * pl.reciprocal(jnp.sum(e, axis=-1, keepdims=True), approx=True)
    ctx3 = jnp.einsum("hqk,hkd->hqd", probs.astype(bf16), v3,
                      preferred_element_type=f32)                            # (H, S, hd)
    ctx = jnp.concatenate([ctx3[h] for h in range(num_heads)], axis=-1)      # (S, D)

    attn = jnp.dot(ctx.astype(bf16), wo[...], preferred_element_type=f32) + bo[...]
    h1 = x + attn                                   # residual 1

    # --------------------------------- MLP ---------------------------------
    hn = _layernorm(h1, ln2w[...], ln2b[...]).astype(bf16)
    inter_sz = wi.shape[1]
    out = h1 + bp[...]                              # residual 2 + output-proj bias
    # chunk the intermediate dim: bounds VMEM / vreg pressure at real sizes
    for c in range(0, inter_sz, mlp_chunk):
        inter = (jnp.dot(hn, wi[:, c:c + mlp_chunk], preferred_element_type=f32)
                 + bi[:, c:c + mlp_chunk])
        # TODO(synk): HF "gelu" is the exact erf-GELU; tanh approximation used for
        # guaranteed Mosaic lowering (max abs deviation ~1e-3).
        inter = jax.nn.gelu(inter, approximate=True).astype(bf16)
        out = out + jnp.dot(inter, wp[c:c + mlp_chunk, :], preferred_element_type=f32)

    o_ref[...] = out.astype(o_ref.dtype)


# ----------------------------------- wrapper ----------------------------------------
def pack_dff_layer_params(p):
    """One-time packing: fuse Wq/Wk/Wv, cast matmul weights to bf16, 2-D biases."""
    bf16 = jnp.bfloat16
    r2 = lambda a: a.reshape(1, -1)
    return {
        "ln1w": r2(p["ln1w"]), "ln1b": r2(p["ln1b"]),
        "wqkv": jnp.concatenate([p["wq"], p["wk"], p["wv"]], axis=1).astype(bf16),
        "bqkv": r2(jnp.concatenate([p["bq"], p["bk"], p["bv"]])),
        "wo": p["wo"].astype(bf16), "bo": r2(p["bo"]),
        "ln2w": r2(p["ln2w"]), "ln2b": r2(p["ln2b"]),
        "wi": p["wi"].astype(bf16), "bi": r2(p["bi"]),
        "wp": p["wp"].astype(bf16), "bp": r2(p["bp"]),
    }


def dff_layer_forward(hidden_states, packed, *, num_heads):
    B, S, D = hidden_states.shape
    inter_sz = packed["wi"].shape[1]
    mlp_chunk = inter_sz if inter_sz <= 512 else 512
    assert inter_sz % mlp_chunk == 0
    assert D % num_heads == 0
    assert S % 8 == 0 and D % 128 == 0, "lane/sublane-dense layout expected"

    x2 = hidden_states.reshape(B * S, D)            # lane-dense 2-D token-row layout
    weights = (
        packed["ln1w"], packed["ln1b"], packed["wqkv"], packed["bqkv"],
        packed["wo"], packed["bo"], packed["ln2w"], packed["ln2b"],
        packed["wi"], packed["bi"], packed["wp"], packed["bp"],
    )
    w_specs = [pl.BlockSpec(w.shape, lambda i: (0, 0)) for w in weights]

    out = pl.pallas_call(
        partial(dff_layer_kernel, num_heads=num_heads, mlp_chunk=mlp_chunk),
        out_shape=jax.ShapeDtypeStruct((B * S, D), hidden_states.dtype),
        grid_spec=pltpu.PrefetchScalarGridSpec(
            num_scalar_prefetch=0,
            grid=(B,),                               # B >= 2 -> both v7x TCs busy
            in_specs=[pl.BlockSpec((S, D), lambda i: (i, 0))] + w_specs,
            out_specs=pl.BlockSpec((S, D), lambda i: (i, 0)),
        ),
        compiler_params=pltpu.CompilerParams(
            dimension_semantics=("parallel",),
            vmem_limit_bytes=32 * 1024 * 1024,       # explicit budget; fits v7x 64 MiB
        ),
    )(x2, *weights)
    return out.reshape(B, S, D)


# ------------------------------ pure-JAX reference -----------------------------------
def dff_layer_reference(x, p, num_heads):
    """Mirrors DFFLayer.forward (inference) with the same bf16 matmul precision."""
    f32, bf16 = jnp.float32, jnp.bfloat16
    B, S, D = x.shape
    hd = D // num_heads

    def ln(t, w, b):
        mu = jnp.mean(t, axis=-1, keepdims=True)
        var = jnp.mean(jnp.square(t - mu), axis=-1, keepdims=True)
        return (t - mu) * jax.lax.rsqrt(var + LN_EPS) * w + b

    def mm(a, w, b):
        return jnp.dot(a.astype(bf16), w.astype(bf16), preferred_element_type=f32) + b

    xn = ln(x, p["ln1w"], p["ln1b"])
    q = mm(xn, p["wq"], p["bq"]) / math.sqrt(hd)
    k = mm(xn, p["wk"], p["bk"])
    v = mm(xn, p["wv"], p["bv"])

    def heads(t):
        return t.reshape(B, S, num_heads, hd).transpose(0, 2, 1, 3).astype(bf16)

    qh, kh, vh = heads(q), heads(k), heads(v)
    scores = jnp.einsum("bhqd,bhkd->bhqk", qh, kh, preferred_element_type=f32)
    probs = jax.nn.softmax(scores, axis=-1)
    ctx = jnp.einsum("bhqk,bhkd->bhqd", probs.astype(bf16), vh,
                     preferred_element_type=f32)
    ctx = ctx.transpose(0, 2, 1, 3).reshape(B, S, D)

    h1 = x + mm(ctx, p["wo"], p["bo"])
    hn = ln(h1, p["ln2w"], p["ln2b"])
    inter = jax.nn.gelu(mm(hn, p["wi"], p["bi"]), approximate=True)
    return h1 + mm(inter, p["wp"], p["bp"])


# --------------------------------- param init ---------------------------------------
def init_layer_params(key, hidden, intermediate, init_range=0.02):
    ks = jax.random.split(key, 13)
    nrm = lambda k, shape: (init_range * jax.random.normal(k, shape)).astype(jnp.float32)
    return {
        "ln1w": 1.0 + nrm(ks[0], (hidden,)), "ln1b": nrm(ks[1], (hidden,)),
        "wq": nrm(ks[2], (hidden, hidden)), "bq": nrm(ks[3], (hidden,)),
        "wk": nrm(ks[4], (hidden, hidden)), "bk": nrm(ks[5], (hidden,)),
        "wv": nrm(ks[6], (hidden, hidden)), "bv": nrm(ks[7], (hidden,)),
        "wo": nrm(ks[8], (hidden, hidden)), "bo": jnp.zeros((hidden,), jnp.float32),
        "ln2w": 1.0 + nrm(ks[9], (hidden,)), "ln2b": nrm(ks[10], (hidden,)),
        "wi": nrm(ks[11], (hidden, intermediate)),
        "bi": jnp.zeros((intermediate,), jnp.float32),
        "wp": nrm(ks[12], (intermediate, hidden)),
        "bp": jnp.zeros((hidden,), jnp.float32),
    }


# ------------------------------------- main ------------------------------------------
if __name__ == "__main__":
    # 128-aligned small-but-realistic block config (lane-dense D, 8-multiple S,
    # head_dim = 128 so every head slice is fully lane-aligned).
    B, S, D, I, H = 2, 128, 256, 1024, 2

    key = jax.random.PRNGKey(0)
    k_params, k_x = jax.random.split(key)
    params = init_layer_params(k_params, D, I)
    hidden_states = jax.random.normal(k_x, (B, S, D), dtype=jnp.float32)

    packed = pack_dff_layer_params(params)
    out = jax.block_until_ready(dff_layer_forward(hidden_states, packed, num_heads=H))

    assert out.shape == (B, S, D), out.shape
    assert bool(jnp.all(jnp.isfinite(out)))

    ref = jax.block_until_ready(dff_layer_reference(hidden_states, params, H))
    max_err = float(jnp.max(jnp.abs(out - ref)))
    assert max_err < 2e-2, f"max abs err vs reference: {max_err}"

    print("KERNEL_OK")
</pallas_src>

<mosaic_0001>
module attributes {stable_mosaic.version = 11 : i64} {
  func.func @dff_layer_kernel(%arg0: i32, %arg1: memref<128x256xf32, #tpu.memory_space<vmem>>, %arg2: memref<1x256xf32, #tpu.memory_space<vmem>>, %arg3: memref<1x256xf32, #tpu.memory_space<vmem>>, %arg4: memref<256x768xbf16, #tpu.memory_space<vmem>>, %arg5: memref<1x768xf32, #tpu.memory_space<vmem>>, %arg6: memref<256x256xbf16, #tpu.memory_space<vmem>>, %arg7: memref<1x256xf32, #tpu.memory_space<vmem>>, %arg8: memref<1x256xf32, #tpu.memory_space<vmem>>, %arg9: memref<1x256xf32, #tpu.memory_space<vmem>>, %arg10: memref<256x1024xbf16, #tpu.memory_space<vmem>>, %arg11: memref<1x1024xf32, #tpu.memory_space<vmem>>, %arg12: memref<1024x256xbf16, #tpu.memory_space<vmem>>, %arg13: memref<1x256xf32, #tpu.memory_space<vmem>>, %arg14: memref<128x256xf32, #tpu.memory_space<vmem>>) attributes {dimension_semantics = [#tpu.dimension_semantics<parallel>], iteration_bounds = array<i64: 2>, scalar_prefetch = 0 : i64, scratch_operands = 0 : i64, tpu.core_type = #tpu.core_type<tc>, window_params = [{transform_indices = @transform_0, window_bounds = array<i64: 128, 256>}, {pipeline_mode = #tpu.pipeline_mode<synchronous>, transform_indices = @transform_1, window_bounds = array<i64: 1, 256>}, {pipeline_mode = #tpu.pipeline_mode<synchronous>, transform_indices = @transform_2, window_bounds = array<i64: 1, 256>}, {pipeline_mode = #tpu.pipeline_mode<synchronous>, transform_indices = @transform_3, window_bounds = array<i64: 256, 768>}, {pipeline_mode = #tpu.pipeline_mode<synchronous>, transform_indices = @transform_4, window_bounds = array<i64: 1, 768>}, {pipeline_mode = #tpu.pipeline_mode<synchronous>, transform_indices = @transform_5, window_bounds = array<i64: 256, 256>}, {pipeline_mode = #tpu.pipeline_mode<synchronous>, transform_indices = @transform_6, window_bounds = array<i64: 1, 256>}, {pipeline_mode = #tpu.pipeline_mode<synchronous>, transform_indices = @transform_7, window_bounds = array<i64: 1, 256>}, {pipeline_mode = #tpu.pipeline_mode<synchronous>, transform_indices = @transform_8, window_bounds = array<i64: 1, 256>}, {pipeline_mode = #tpu.pipeline_mode<synchronous>, transform_indices = @transform_9, window_bounds = array<i64: 256, 1024>}, {pipeline_mode = #tpu.pipeline_mode<synchronous>, transform_indices = @transform_10, window_bounds = array<i64: 1, 1024>}, {pipeline_mode = #tpu.pipeline_mode<synchronous>, transform_indices = @transform_11, window_bounds = array<i64: 1024, 256>}, {pipeline_mode = #tpu.pipeline_mode<synchronous>, transform_indices = @transform_12, window_bounds = array<i64: 1, 256>}, {transform_indices = @transform_13, window_bounds = array<i64: 128, 256>}]} {
    %c0 = arith.constant 0 : index
    %c0_0 = arith.constant 0 : index
    %0 = vector.load %arg1[%c0, %c0_0] : memref<128x256xf32, #tpu.memory_space<vmem>>, vector<128x256xf32>
    %c0_1 = arith.constant 0 : index
    %c0_2 = arith.constant 0 : index
    %1 = vector.load %arg2[%c0_1, %c0_2] : memref<1x256xf32, #tpu.memory_space<vmem>>, vector<1x256xf32>
    %c0_3 = arith.constant 0 : index
    %c0_4 = arith.constant 0 : index
    %2 = vector.load %arg3[%c0_3, %c0_4] : memref<1x256xf32, #tpu.memory_space<vmem>>, vector<1x256xf32>
    %cst = arith.constant dense<0.000000e+00> : vector<128xf32>
    %3 = vector.multi_reduction <add>, %0, %cst [1] : vector<128x256xf32> to vector<128xf32>
    %4 = vector.shape_cast %3 : vector<128xf32> to vector<128x1xf32>
    %cst_5 = arith.constant 2.560000e+02 : f32
    %5 = vector.broadcast %cst_5 : f32 to vector<128x1xf32>
    %6 = arith.divf %4, %5 : vector<128x1xf32>
    %7 = vector.broadcast %6 : vector<128x1xf32> to vector<128x256xf32>
    %8 = arith.subf %0, %7 : vector<128x256xf32>
    %9 = arith.mulf %8, %8 : vector<128x256xf32>
    %cst_6 = arith.constant dense<0.000000e+00> : vector<128xf32>
    %10 = vector.multi_reduction <add>, %9, %cst_6 [1] : vector<128x256xf32> to vector<128xf32>
    %11 = vector.shape_cast %10 : vector<128xf32> to vector<128x1xf32>
    %cst_7 = arith.constant 2.560000e+02 : f32
    %12 = vector.broadcast %cst_7 : f32 to vector<128x1xf32>
    %13 = arith.divf %11, %12 : vector<128x1xf32>
    %14 = vector.broadcast %6 : vector<128x1xf32> to vector<128x256xf32>
    %15 = arith.subf %0, %14 : vector<128x256xf32>
    %cst_8 = arith.constant 9.99999996E-13 : f32
    %16 = vector.broadcast %cst_8 : f32 to vector<128x1xf32>
    %17 = arith.addf %13, %16 : vector<128x1xf32>
    %18 = math.rsqrt %17 : vector<128x1xf32>
    %19 = vector.broadcast %18 : vector<128x1xf32> to vector<128x256xf32>
    %20 = arith.mulf %15, %19 : vector<128x256xf32>
    %21 = vector.broadcast %1 : vector<1x256xf32> to vector<128x256xf32>
    %22 = arith.mulf %20, %21 : vector<128x256xf32>
    %23 = vector.broadcast %2 : vector<1x256xf32> to vector<128x256xf32>
    %24 = arith.addf %22, %23 : vector<128x256xf32>
    %25 = arith.truncf %24 : vector<128x256xf32> to vector<128x256xbf16>
    %c0_9 = arith.constant 0 : index
    %c0_10 = arith.constant 0 : index
    %26 = vector.load %arg4[%c0_9, %c0_10] : memref<256x768xbf16, #tpu.memory_space<vmem>>, vector<256x768xbf16>
    %cst_11 = arith.constant dense<0.000000e+00> : vector<128x768xf32>
    %27 = tpu.matmul %25, %26, %cst_11 {dimension_numbers = #tpu.dot_dimension_numbers<[1], [0], [0], [1], [0, 0, 1, 1], [], []>} : vector<128x256xbf16>, vector<256x768xbf16>, vector<128x768xf32> -> vector<128x768xf32>
    %c0_12 = arith.constant 0 : index
    %c0_13 = arith.constant 0 : index
    %28 = vector.load %arg5[%c0_12, %c0_13] : memref<1x768xf32, #tpu.memory_space<vmem>>, vector<1x768xf32>
    %29 = vector.broadcast %28 : vector<1x768xf32> to vector<128x768xf32>
    %30 = arith.addf %27, %29 : vector<128x768xf32>
    %31 = vector.extract_strided_slice %30 {offsets = [0, 0], sizes = [128, 256], strides = [1, 1]} : vector<128x768xf32> to vector<128x256xf32>
    %cst_14 = arith.constant 0.0883883461 : f32
    %32 = vector.broadcast %cst_14 : f32 to vector<128x256xf32>
    %33 = arith.mulf %31, %32 : vector<128x256xf32>
    %34 = vector.extract_strided_slice %30 {offsets = [0, 256], sizes = [128, 256], strides = [1, 1]} : vector<128x768xf32> to vector<128x256xf32>
    %35 = vector.extract_strided_slice %30 {offsets = [0, 512], sizes = [128, 256], strides = [1, 1]} : vector<128x768xf32> to vector<128x256xf32>
    %36 = vector.extract_strided_slice %33 {offsets = [0, 0], sizes = [128, 128], strides = [1, 1]} : vector<128x256xf32> to vector<128x128xf32>
    %37 = vector.extract_strided_slice %33 {offsets = [0, 128], sizes = [128, 128], strides = [1, 1]} : vector<128x256xf32> to vector<128x128xf32>
    %38 = vector.shape_cast %36 : vector<128x128xf32> to vector<1x128x128xf32>
    %39 = vector.shape_cast %37 : vector<128x128xf32> to vector<1x128x128xf32>
    %40 = tpu.concatenate %38, %39 in 0 : vector<1x128x128xf32>, vector<1x128x128xf32> -> vector<2x128x128xf32>
    %41 = arith.truncf %40 : vector<2x128x128xf32> to vector<2x128x128xbf16>
    %42 = vector.extract_strided_slice %34 {offsets = [0, 0], sizes = [128, 128], strides = [1, 1]} : vector<128x256xf32> to vector<128x128xf32>
    %43 = vector.extract_strided_slice %34 {offsets = [0, 128], sizes = [128, 128], strides = [1, 1]} : vector<128x256xf32> to vector<128x128xf32>
    %44 = vector.shape_cast %42 : vector<128x128xf32> to vector<1x128x128xf32>
    %45 = vector.shape_cast %43 : vector<128x128xf32> to vector<1x128x128xf32>
    %46 = tpu.concatenate %44, %45 in 0 : vector<1x128x128xf32>, vector<1x128x128xf32> -> vector<2x128x128xf32>
    %47 = arith.truncf %46 : vector<2x128x128xf32> to vector<2x128x128xbf16>
    %48 = vector.extract_strided_slice %35 {offsets = [0, 0], sizes = [128, 128], strides = [1, 1]} : vector<128x256xf32> to vector<128x128xf32>
    %49 = vector.extract_strided_slice %35 {offsets = [0, 128], sizes = [128, 128], strides = [1, 1]} : vector<128x256xf32> to vector<128x128xf32>
    %50 = vector.shape_cast %48 : vector<128x128xf32> to vector<1x128x128xf32>
    %51 = vector.shape_cast %49 : vector<128x128xf32> to vector<1x128x128xf32>
    %52 = tpu.concatenate %50, %51 in 0 : vector<1x128x128xf32>, vector<1x128x128xf32> -> vector<2x128x128xf32>
    %53 = arith.truncf %52 : vector<2x128x128xf32> to vector<2x128x128xbf16>
    "tpu.trace_start"() <{level = 10 : i32, message = "hqd,hkd->hqk"}> : () -> ()
    %cst_15 = arith.constant dense<0.000000e+00> : vector<2x128x128xf32>
    %54 = tpu.matmul %41, %47, %cst_15 {dimension_numbers = #tpu.dot_dimension_numbers<[2], [2], [1], [1], [0, 0, 0, 1, 1, 1], [0], [0]>} : vector<2x128x128xbf16>, vector<2x128x128xbf16>, vector<2x128x128xf32> -> vector<2x128x128xf32>
    "tpu.trace_stop"() : () -> ()
    %cst_16 = arith.constant dense<0xFF800000> : vector<2x128xf32>
    %55 = vector.multi_reduction <maximumf>, %54, %cst_16 [2] : vector<2x128x128xf32> to vector<2x128xf32>
    %56 = vector.shape_cast %55 : vector<2x128xf32> to vector<2x128x1xf32>
    %57 = vector.broadcast %56 : vector<2x128x1xf32> to vector<2x128x128xf32>
    %58 = arith.subf %54, %57 : vector<2x128x128xf32>
    %59 = math.exp %58 : vector<2x128x128xf32>
    %cst_17 = arith.constant dense<0.000000e+00> : vector<2x128xf32>
    %60 = vector.multi_reduction <add>, %59, %cst_17 [2] : vector<2x128x128xf32> to vector<2x128xf32>
    %61 = vector.shape_cast %60 : vector<2x128xf32> to vector<2x128x1xf32>
    %62 = tpu.reciprocal %61 {approx = true} : vector<2x128x1xf32> -> vector<2x128x1xf32>
    %63 = vector.broadcast %62 : vector<2x128x1xf32> to vector<2x128x128xf32>
    %64 = arith.mulf %59, %63 : vector<2x128x128xf32>
    %65 = arith.truncf %64 : vector<2x128x128xf32> to vector<2x128x128xbf16>
    "tpu.trace_start"() <{level = 10 : i32, message = "hqk,hkd->hqd"}> : () -> ()
    %cst_18 = arith.constant dense<0.000000e+00> : vector<2x128x128xf32>
    %66 = tpu.matmul %65, %53, %cst_18 {dimension_numbers = #tpu.dot_dimension_numbers<[2], [1], [1], [2], [0, 0, 0, 1, 1, 2], [0], [0]>} : vector<2x128x128xbf16>, vector<2x128x128xbf16>, vector<2x128x128xf32> -> vector<2x128x128xf32>
    "tpu.trace_stop"() : () -> ()
    %67 = vector.extract_strided_slice %66 {offsets = [0, 0, 0], sizes = [1, 128, 128], strides = [1, 1, 1]} : vector<2x128x128xf32> to vector<1x128x128xf32>
    %68 = vector.shape_cast %67 : vector<1x128x128xf32> to vector<128x128xf32>
    %69 = vector.extract_strided_slice %66 {offsets = [1, 0, 0], sizes = [1, 128, 128], strides = [1, 1, 1]} : vector<2x128x128xf32> to vector<1x128x128xf32>
    %70 = vector.shape_cast %69 : vector<1x128x128xf32> to vector<128x128xf32>
    %71 = tpu.concatenate %68, %70 in 1 : vector<128x128xf32>, vector<128x128xf32> -> vector<128x256xf32>
    %72 = arith.truncf %71 : vector<128x256xf32> to vector<128x256xbf16>
    %c0_19 = arith.constant 0 : index
    %c0_20 = arith.constant 0 : index
    %73 = vector.load %arg6[%c0_19, %c0_20] : memref<256x256xbf16, #tpu.memory_space<vmem>>, vector<256x256xbf16>
    %cst_21 = arith.constant dense<0.000000e+00> : vector<128x256xf32>
    %74 = tpu.matmul %72, %73, %cst_21 {dimension_numbers = #tpu.dot_dimension_numbers<[1], [0], [0], [1], [0, 0, 1, 1], [], []>} : vector<128x256xbf16>, vector<256x256xbf16>, vector<128x256xf32> -> vector<128x256xf32>
    %c0_22 = arith.constant 0 : index
    %c0_23 = arith.constant 0 : index
    %75 = vector.load %arg7[%c0_22, %c0_23] : memref<1x256xf32, #tpu.memory_space<vmem>>, vector<1x256xf32>
    %76 = vector.broadcast %75 : vector<1x256xf32> to vector<128x256xf32>
    %77 = arith.addf %74, %76 : vector<128x256xf32>
    %78 = arith.addf %0, %77 : vector<128x256xf32>
    %c0_24 = arith.constant 0 : index
    %c0_25 = arith.constant 0 : index
    %79 = vector.load %arg8[%c0_24, %c0_25] : memref<1x256xf32, #tpu.memory_space<vmem>>, vector<1x256xf32>
    %c0_26 = arith.constant 0 : index
    %c0_27 = arith.constant 0 : index
    %80 = vector.load %arg9[%c0_26, %c0_27] : memref<1x256xf32, #tpu.memory_space<vmem>>, vector<1x256xf32>
    %cst_28 = arith.constant dense<0.000000e+00> : vector<128xf32>
    %81 = vector.multi_reduction <add>, %78, %cst_28 [1] : vector<128x256xf32> to vector<128xf32>
    %82 = vector.shape_cast %81 : vector<128xf32> to vector<128x1xf32>
    %cst_29 = arith.constant 2.560000e+02 : f32
    %83 = vector.broadcast %cst_29 : f32 to vector<128x1xf32>
    %84 = arith.divf %82, %83 : vector<128x1xf32>
    %85 = vector.broadcast %84 : vector<128x1xf32> to vector<128x256xf32>
    %86 = arith.subf %78, %85 : vector<128x256xf32>
    %87 = arith.mulf %86, %86 : vector<128x256xf32>
    %cst_30 = arith.constant dense<0.000000e+00> : vector<128xf32>
    %88 = vector.multi_reduction <add>, %87, %cst_30 [1] : vector<128x256xf32> to vector<128xf32>
    %89 = vector.shape_cast %88 : vector<128xf32> to vector<128x1xf32>
    %cst_31 = arith.constant 2.560000e+02 : f32
    %90 = vector.broadcast %cst_31 : f32 to vector<128x1xf32>
    %91 = arith.divf %89, %90 : vector<128x1xf32>
    %92 = vector.broadcast %84 : vector<128x1xf32> to vector<128x256xf32>
    %93 = arith.subf %78, %92 : vector<128x256xf32>
    %cst_32 = arith.constant 9.99999996E-13 : f32
    %94 = vector.broadcast %cst_32 : f32 to vector<128x1xf32>
    %95 = arith.addf %91, %94 : vector<128x1xf32>
    %96 = math.rsqrt %95 : vector<128x1xf32>
    %97 = vector.broadcast %96 : vector<128x1xf32> to vector<128x256xf32>
    %98 = arith.mulf %93, %97 : vector<128x256xf32>
    %99 = vector.broadcast %79 : vector<1x256xf32> to vector<128x256xf32>
    %100 = arith.mulf %98, %99 : vector<128x256xf32>
    %101 = vector.broadcast %80 : vector<1x256xf32> to vector<128x256xf32>
    %102 = arith.addf %100, %101 : vector<128x256xf32>
    %103 = arith.truncf %102 : vector<128x256xf32> to vector<128x256xbf16>
    %c0_33 = arith.constant 0 : index
    %c0_34 = arith.constant 0 : index
    %104 = vector.load %arg13[%c0_33, %c0_34] : memref<1x256xf32, #tpu.memory_space<vmem>>, vector<1x256xf32>
    %105 = vector.broadcast %104 : vector<1x256xf32> to vector<128x256xf32>
    %106 = arith.addf %78, %105 : vector<128x256xf32>
    %c0_35 = arith.constant 0 : index
    %c0_36 = arith.constant 0 : index
    %107 = vector.load %arg10[%c0_35, %c0_36] : memref<256x1024xbf16, #tpu.memory_space<vmem>>, vector<256x512xbf16>
    %cst_37 = arith.constant dense<0.000000e+00> : vector<128x512xf32>
    %108 = tpu.matmul %103, %107, %cst_37 {dimension_numbers = #tpu.dot_dimension_numbers<[1], [0], [0], [1], [0, 0, 1, 1], [], []>} : vector<128x256xbf16>, vector<256x512xbf16>, vector<128x512xf32> -> vector<128x512xf32>
    %c0_38 = arith.constant 0 : index
    %c0_39 = arith.constant 0 : index
    %109 = vector.load %arg11[%c0_38, %c0_39] : memref<1x1024xf32, #tpu.memory_space<vmem>>, vector<1x512xf32>
    %110 = vector.broadcast %109 : vector<1x512xf32> to vector<128x512xf32>
    %111 = arith.addf %108, %110 : vector<128x512xf32>
    %112 = arith.mulf %111, %111 : vector<128x512xf32>
    %113 = arith.mulf %111, %112 : vector<128x512xf32>
    %cst_40 = arith.constant 4.471500e-02 : f32
    %114 = vector.broadcast %cst_40 : f32 to vector<128x512xf32>
    %115 = arith.mulf %114, %113 : vector<128x512xf32>
    %116 = arith.addf %111, %115 : vector<128x512xf32>
    %cst_41 = arith.constant 0.797884583 : f32
    %117 = vector.broadcast %cst_41 : f32 to vector<128x512xf32>
    %118 = arith.mulf %117, %116 : vector<128x512xf32>
    %119 = math.tanh %118 : vector<128x512xf32>
    %cst_42 = arith.constant 1.000000e+00 : f32
    %120 = vector.broadcast %cst_42 : f32 to vector<128x512xf32>
    %121 = arith.addf %120, %119 : vector<128x512xf32>
    %cst_43 = arith.constant 5.000000e-01 : f32
    %122 = vector.broadcast %cst_43 : f32 to vector<128x512xf32>
    %123 = arith.mulf %122, %121 : vector<128x512xf32>
    %124 = arith.mulf %111, %123 : vector<128x512xf32>
    %125 = arith.truncf %124 : vector<128x512xf32> to vector<128x512xbf16>
    %c0_44 = arith.constant 0 : index
    %c0_45 = arith.constant 0 : index
    %126 = vector.load %arg12[%c0_44, %c0_45] : memref<1024x256xbf16, #tpu.memory_space<vmem>>, vector<512x256xbf16>
    %cst_46 = arith.constant dense<0.000000e+00> : vector<128x256xf32>
    %127 = tpu.matmul %125, %126, %cst_46 {dimension_numbers = #tpu.dot_dimension_numbers<[1], [0], [0], [1], [0, 0, 1, 1], [], []>} : vector<128x512xbf16>, vector<512x256xbf16>, vector<128x256xf32> -> vector<128x256xf32>
    %128 = arith.addf %106, %127 : vector<128x256xf32>
    %c0_47 = arith.constant 0 : index
    %c512 = arith.constant 512 : index
    %129 = vector.load %arg10[%c0_47, %c512] : memref<256x1024xbf16, #tpu.memory_space<vmem>>, vector<256x512xbf16>
    %cst_48 = arith.constant dense<0.000000e+00> : vector<128x512xf32>
    %130 = tpu.matmul %103, %129, %cst_48 {dimension_numbers = #tpu.dot_dimension_numbers<[1], [0], [0], [1], [0, 0, 1, 1], [], []>} : vector<128x256xbf16>, vector<256x512xbf16>, vector<128x512xf32> -> vector<128x512xf32>
    %c0_49 = arith.constant 0 : index
    %c512_50 = arith.constant 512 : index
    %131 = vector.load %arg11[%c0_49, %c512_50] : memref<1x1024xf32, #tpu.memory_space<vmem>>, vector<1x512xf32>
    %132 = vector.broadcast %131 : vector<1x512xf32> to vector<128x512xf32>
    %133 = arith.addf %130, %132 : vector<128x512xf32>
    %134 = arith.mulf %133, %133 : vector<128x512xf32>
    %135 = arith.mulf %133, %134 : vector<128x512xf32>
    %cst_51 = arith.constant 4.471500e-02 : f32
    %136 = vector.broadcast %cst_51 : f32 to vector<128x512xf32>
    %137 = arith.mulf %136, %135 : vector<128x512xf32>
    %138 = arith.addf %133, %137 : vector<128x512xf32>
    %cst_52 = arith.constant 0.797884583 : f32
    %139 = vector.broadcast %cst_52 : f32 to vector<128x512xf32>
    %140 = arith.mulf %139, %138 : vector<128x512xf32>
    %141 = math.tanh %140 : vector<128x512xf32>
    %cst_53 = arith.constant 1.000000e+00 : f32
    %142 = vector.broadcast %cst_53 : f32 to vector<128x512xf32>
    %143 = arith.addf %142, %141 : vector<128x512xf32>
    %cst_54 = arith.constant 5.000000e-01 : f32
    %144 = vector.broadcast %cst_54 : f32 to vector<128x512xf32>
    %145 = arith.mulf %144, %143 : vector<128x512xf32>
    %146 = arith.mulf %133, %145 : vector<128x512xf32>
    %147 = arith.truncf %146 : vector<128x512xf32> to vector<128x512xbf16>
    %c512_55 = arith.constant 512 : index
    %c0_56 = arith.constant 0 : index
    %148 = vector.load %arg12[%c512_55, %c0_56] : memref<1024x256xbf16, #tpu.memory_space<vmem>>, vector<512x256xbf16>
    %cst_57 = arith.constant dense<0.000000e+00> : vector<128x256xf32>
    %149 = tpu.matmul %147, %148, %cst_57 {dimension_numbers = #tpu.dot_dimension_numbers<[1], [0], [0], [1], [0, 0, 1, 1], [], []>} : vector<128x512xbf16>, vector<512x256xbf16>, vector<128x256xf32> -> vector<128x256xf32>
    %150 = arith.addf %128, %149 : vector<128x256xf32>
    %c0_58 = arith.constant 0 : index
    %c0_59 = arith.constant 0 : index
    %151 = vector.load %arg14[%c0_58, %c0_59] : memref<128x256xf32, #tpu.memory_space<vmem>>, vector<128x256xf32>
    tpu.vector_store %arg14[%c0_58, %c0_59], %150 {strides = array<i32>} : memref<128x256xf32, #tpu.memory_space<vmem>>, vector<128x256xf32>,
    return
  }
  func.func @transform_0(%arg0: i32) -> (i32, i32) {
    %c0_i32 = arith.constant 0 : i32
    %c0_i32_0 = arith.constant 0 : i32
    return %arg0, %c0_i32 : i32, i32
  }
  func.func @transform_1(%arg0: i32) -> (i32, i32) {
    %c0_i32 = arith.constant 0 : i32
    %c0_i32_0 = arith.constant 0 : i32
    %c0_i32_1 = arith.constant 0 : i32
    return %c0_i32, %c0_i32_0 : i32, i32
  }
  func.func @transform_2(%arg0: i32) -> (i32, i32) {
    %c0_i32 = arith.constant 0 : i32
    %c0_i32_0 = arith.constant 0 : i32
    %c0_i32_1 = arith.constant 0 : i32
    return %c0_i32, %c0_i32_0 : i32, i32
  }
  func.func @transform_3(%arg0: i32) -> (i32, i32) {
    %c0_i32 = arith.constant 0 : i32
    %c0_i32_0 = arith.constant 0 : i32
    %c0_i32_1 = arith.constant 0 : i32
    return %c0_i32, %c0_i32_0 : i32, i32
  }
  func.func @transform_4(%arg0: i32) -> (i32, i32) {
    %c0_i32 = arith.constant 0 : i32
    %c0_i32_0 = arith.constant 0 : i32
    %c0_i32_1 = arith.constant 0 : i32
    return %c0_i32, %c0_i32_0 : i32, i32
  }
  func.func @transform_5(%arg0: i32) -> (i32, i32) {
    %c0_i32 = arith.constant 0 : i32
    %c0_i32_0 = arith.constant 0 : i32
    %c0_i32_1 = arith.constant 0 : i32
    return %c0_i32, %c0_i32_0 : i32, i32
  }
  func.func @transform_6(%arg0: i32) -> (i32, i32) {
    %c0_i32 = arith.constant 0 : i32
    %c0_i32_0 = arith.constant 0 : i32
    %c0_i32_1 = arith.constant 0 : i32
    return %c0_i32, %c0_i32_0 : i32, i32
  }
  func.func @transform_7(%arg0: i32) -> (i32, i32) {
    %c0_i32 = arith.constant 0 : i32
    %c0_i32_0 = arith.constant 0 : i32
    %c0_i32_1 = arith.constant 0 : i32
    return %c0_i32, %c0_i32_0 : i32, i32
  }
  func.func @transform_8(%arg0: i32) -> (i32, i32) {
    %c0_i32 = arith.constant 0 : i32
    %c0_i32_0 = arith.constant 0 : i32
    %c0_i32_1 = arith.constant 0 : i32
    return %c0_i32, %c0_i32_0 : i32, i32
  }
  func.func @transform_9(%arg0: i32) -> (i32, i32) {
    %c0_i32 = arith.constant 0 : i32
    %c0_i32_0 = arith.constant 0 : i32
    %c0_i32_1 = arith.constant 0 : i32
    return %c0_i32, %c0_i32_0 : i32, i32
  }
  func.func @transform_10(%arg0: i32) -> (i32, i32) {
    %c0_i32 = arith.constant 0 : i32
    %c0_i32_0 = arith.constant 0 : i32
    %c0_i32_1 = arith.constant 0 : i32
    return %c0_i32, %c0_i32_0 : i32, i32
  }
  func.func @transform_11(%arg0: i32) -> (i32, i32) {
    %c0_i32 = arith.constant 0 : i32
    %c0_i32_0 = arith.constant 0 : i32
    %c0_i32_1 = arith.constant 0 : i32
    return %c0_i32, %c0_i32_0 : i32, i32
  }
  func.func @transform_12(%arg0: i32) -> (i32, i32) {
    %c0_i32 = arith.constant 0 : i32
    %c0_i32_0 = arith.constant 0 : i32
    %c0_i32_1 = arith.constant 0 : i32
    return %c0_i32, %c0_i32_0 : i32, i32
  }
  func.func @transform_13(%arg0: i32) -> (i32, i32) {
    %c0_i32 = arith.constant 0 : i32
    %c0_i32_0 = arith.constant 0 : i32
    return %arg0, %c0_i32 : i32, i32
  }
}

</mosaic_0001>

<bundles_post_ra>
// kernel: tpu_custom_call.1
= control target key start
LH: loop header
LB: loop body
LE: loop exit
PB: predicated region body
PF: predicated region fallthrough
CT: control target
= control target key end

     0   :  { %s13278_s0 = inlined_call_operand.hbm [shape: f32[256,256], index: 0, kind: input, shape index: {}]   ;;  %s13279_s1 = inlined_call_operand.hbm [shape: f32[1,256], index: 1, kind: input, shape index: {}]   ;;  %s13280_s2 = inlined_call_operand.hbm [shape: f32[1,256], index: 2, kind: input, shape index: {}]   ;;  %s13281_s3 = inlined_call_operand.hbm [shape: bf16[256,768], index: 3, kind: input, shape index: {}]   ;;  %s13282_s4 = inlined_call_operand.vmem [shape: f32[1,768], index: 4, kind: input, shape index: {}]   ;;  %s13283_s5 = inlined_call_operand.hbm [shape: bf16[256,256], index: 5, kind: input, shape index: {}]   ;;  %s13284_s6 = inlined_call_operand.vmem [shape: f32[1,256], index: 6, kind: input, shape index: {}]   ;;  %s13285_s7 = inlined_call_operand.vmem [shape: f32[1,256], index: 7, kind: input, shape index: {}]   ;;  %s13286_s8 = inlined_call_operand.vmem [shape: f32[1,256], index: 8, kind: input, shape index: {}]   ;;  %s13287_s9 = inlined_call_operand.hbm [shape: bf16[256,1024], index: 9, kind: input, shape index: {}]   ;;  %s13288_s10 = inlined_call_operand.vmem [shape: f32[1,1024], index: 10, kind: input, shape index: {}]   ;;  %s13289_s11 = inlined_call_operand.hbm [shape: bf16[1024,256], index: 11, kind: input, shape index: {}]   ;;  %s13290_s12 = inlined_call_operand.vmem [shape: f32[1,256], index: 12, kind: input, shape index: {}]   ;;  %s13291_s13 = inlined_call_operand.hbm [shape: f32[256,256], index: 13, kind: output, shape index: {}]  }
   0x1   :  { %13430 = sst [smem:[#allocation154_spill]] %s13279_s1 }
   0x2   :  { %13431 = sst [smem:[#allocation155_spill]] %s13281_s3 }
   0x3   :  { %13432 = sst [smem:[#allocation156_spill]] %s13285_s7 }
   0x4   :  { %13433 = sst [smem:[#allocation157_spill]] %s13286_s8 }
   0x5   :  { %13434 = sst [smem:[#allocation158_spill]] %s13288_s10 }
   0x6   :  { %13435 = sst [smem:[#allocation159_spill]] %s13290_s12 }
   0x7   :  { %13436 = sst [smem:[#allocation160_spill]] %s13291_s13 }
   0x8   :  { %18 = vsyncpa [#allocation3], 0 }
   0x9   :  { %20 = vsyncpa [#allocation3 + $0x1], 0 }
   0xa   :  { %21 = vsyncpa [#allocation6], 0 }
   0xb   :  { %22 = vsyncpa [#allocation9], 0 }
   0xc   :  { %23 = vsyncpa [#allocation12], 0 }
   0xd   :  { %24 = vsyncpa [#allocation4], 0 }
   0xe   :  { %26 = vsyncpa [#allocation4 + $0x1], 0  ;;  %s9452_s25 = smov 0   ;;  %s9454_s26 = smov 0  }
   0xf   :  { %s9456_s27 = smov 0   ;;  %s9458_s28 = smov 0  }
  0x10 LB: > { %s9364_s29 = smov [#allocation5]   ;;  %s9473_s14 = sadd.s32 4294967295, %s9362_s28   ;;  %s9362_s28 = sphi %s9458_s28, %s13913_s28   ;;  %s9358_s27 = sphi %s9456_s27, %s13912_s27   ;;  %s9354_s26 = sphi %s9454_s26, %s13911_s26   ;;  %s9350_s25 = sphi %s9452_s25, %s13910_s25  }
  0x11   : > { %s354_s30 = sshll.u32 %s9364_s29, 4  ;;  %p7369_p0 = scmp.ge.s32.totalorder %s9362_s28, 1  ;;  %s355_s30 = int_to_ptr.vmem [resolvable:$true] %s354_s30 }
  0x12   : > { %p13293_p1 = scmp.eq.s32.totalorder %s9473_s14, 0  ;;  %p341_p2 = scmp.lt.s32.totalorder %s9362_s28, 3 }
  0x13   : > { %s9365_s16 = smov [#allocation8]   ;;  %s9366_s19 = smov [#allocation11]  }
  0x14   : > { %p9478_p3 = pnand %p7369_p0, %p341_p2  ;;  %s375_s17 = sshll.u32 %s9365_s16, 4  ;;  %s9485_s17 = int_to_ptr.vmem [resolvable:$true] %s375_s17 }
  0x15   : > { %s413_s20 = sshll.u32 %s9366_s19, 4  ;;  %s13439_s1 = sld [smem:[#allocation154_spill]]  ;;  %s9493_s20 = int_to_ptr.vmem [resolvable:$true] %s413_s20 }
  0x16   : > { %s13437_s15 = scalar_select %p9478_p3, 1, 0 }
  0x17   : > { %p8132_p5 = pneg %p9478_p3 }
  0x19   : > { %p9489_p6 = pnand %p8132_p5, %p13293_p1 }
  0x1b   : > { %s9086_s23 = scalar_lea.hbm %s13439_s1, 32  ;;  %p9503_p8 = pneg %p9489_p6 }
  0x1c   : > { %p9087_p7 = scmp.ne.s32.totalorder %s13439_s1, %s9086_s23  ;;  %p9093_p11 = scmp.lt.u32.totalorder %s9086_s23, %s13439_s1 }
  0x1e   : > { %p9089_p9 = pnand %p9503_p8, %p9087_p7 }
  0x20   : > { %p9090_p10 = pneg %p9089_p9 }
  0x22   : > { %p9095_p12 = pnand %p9093_p11, %p9090_p10 }
  0x24   : > { %9098 = shalt.err (!%p9095_p12)
}
  0x25   : > { %s9099_s21 = scalar_lea.vmem %s355_s30, 32  ;;  %p9107_p5 = scmp.lt.s32.totalorder %s355_s30, %s355_s30 }
  0x26   : > { %p9100_p13 = scmp.ne.s32.totalorder %s355_s30, %s9099_s21  ;;  %p9108_p4 = scmp.lt.s32.totalorder %s9099_s21, %s9099_s21 }
  0x28   : > { %p9102_p0 = pnand %p9100_p13, %p9503_p8  ;;  %p9109_p1 = por %p9108_p4, %p9107_p5 }
  0x2a   : > { %p9103_p2 = pneg %p9102_p0 }
  0x2c   : > { %p9110_p3 = pnand %p9109_p1, %p9103_p2 }
  0x2e   : > { %9113 = shalt.err (!%p9110_p3)
}
  0x2f   : > { %8135 = dma.hbm_to_vmem [thread:$0]  (!%p9489_p6), %s13439_s1, 32, %s355_s30, [#allocation6]  }
  0x30   : > { %s13441_s3 = sld [smem:[#allocation155_spill]] }
  0x36   : > { %s9114_s29 = scalar_lea.hbm %s13441_s3, 12288 }
  0x37   : > { %p9115_p7 = scmp.ne.s32.totalorder %s13441_s3, %s9114_s29  ;;  %p9121_p1 = scmp.lt.u32.totalorder %s9114_s29, %s13441_s3 }
  0x39   : > { %p9117_p9 = pnand %p9115_p7, %p9503_p8 }
  0x3b   : > { %p9118_p4 = pneg %p9117_p9 }
  0x3d   : > { %p9123_p3 = pnand %p9121_p1, %p9118_p4 }
  0x3f   : > { %9126 = shalt.err (!%p9123_p3)
}
  0x40   : > { %s9127_s30 = scalar_lea.vmem %s9485_s17, 12288  ;;  %p9135_p13 = scmp.lt.s32.totalorder %s9485_s17, %s9485_s17 }
  0x41   : > { %p9128_p10 = scmp.ne.s32.totalorder %s9485_s17, %s9127_s30  ;;  %p9136_p0 = scmp.lt.s32.totalorder %s9127_s30, %s9127_s30 }
  0x43   : > { %p9130_p11 = pnand %p9128_p10, %p9503_p8  ;;  %p9137_p2 = por %p9136_p0, %p9135_p13 }
  0x45   : > { %p9131_p12 = pneg %p9130_p11 }
  0x47   : > { %p9138_p5 = pnand %p9137_p2, %p9131_p12 }
  0x49   : > { %9141 = shalt.err (!%p9138_p5)
}
  0x4a   : > { %s9367_s12 = smov 384   ;;  %s9368_s10 = smov 24  }
  0x4b   : > { %8141 = dma.hbm_to_vmem [thread:$0]  (!%p9489_p6), %s13441_s3, 12288, %s9485_s17, [#allocation9], %s9367_s12, %s9367_s12, %s9368_s10  }
  0x4c   : > { %s9142_s29 = scalar_lea.hbm %s13287_s9, 16384 }
  0x4d   : > { %p9143_p7 = scmp.ne.s32.totalorder %s13287_s9, %s9142_s29  ;;  %p9149_p1 = scmp.lt.u32.totalorder %s9142_s29, %s13287_s9 }
  0x4f   : > { %p9145_p9 = pnand %p9143_p7, %p9503_p8 }
  0x51   : > { %p9146_p4 = pneg %p9145_p9 }
  0x53   : > { %p9151_p3 = pnand %p9149_p1, %p9146_p4 }
  0x55   : > { %9154 = shalt.err (!%p9151_p3)
}
  0x56   : > { %s9155_s17 = scalar_lea.vmem %s9493_s20, 16384  ;;  %p9163_p13 = scmp.lt.s32.totalorder %s9493_s20, %s9493_s20 }
  0x57   : > { %p9156_p10 = scmp.ne.s32.totalorder %s9493_s20, %s9155_s17  ;;  %p9164_p0 = scmp.lt.s32.totalorder %s9155_s17, %s9155_s17 }
  0x59   : > { %p9158_p11 = pnand %p9156_p10, %p9503_p8  ;;  %p9165_p2 = por %p9164_p0, %p9163_p13 }
  0x5b   : > { %p9159_p12 = pneg %p9158_p11 }
  0x5d   : > { %p9166_p5 = pnand %p9165_p2, %p9159_p12 }
  0x5f   : > { %9169 = shalt.err (!%p9166_p5)
}
  0x60   : > { %s9369_s12 = smov 512   ;;  %s9370_s1 = smov 32  }
  0x61   : > { %8147 = dma.hbm_to_vmem [thread:$0]  (!%p9489_p6), %s13287_s9, 16384, %s9493_s20, [#allocation12], %s9369_s12, %s9369_s12, %s9370_s1  }
  0x62   : > { %s9371_s24 = smov [#allocation7]   ;;  %s9372_s23 = smov [#allocation10]  }
  0x63   : > { %s365_s13 = sshll.u32 %s9371_s24, 4  ;;  %s391_s29 = sshll.u32 %s9372_s23, 4  ;;  %s366_s13 = int_to_ptr.vmem [resolvable:$true] %s365_s13  ;;  %s392_s29 = int_to_ptr.vmem [resolvable:$true] %s391_s29 }
  0x64   : > { %s9170_s30 = scalar_lea.hbm %s13280_s2, 32 }
  0x65   : > { %p9171_p7 = scmp.ne.s32.totalorder %s13280_s2, %s9170_s30  ;;  %p9177_p1 = scmp.lt.u32.totalorder %s9170_s30, %s13280_s2 }
  0x67   : > { %p9173_p9 = pnand %p9171_p7, %p9503_p8 }
  0x69   : > { %p9174_p4 = pneg %p9173_p9 }
  0x6b   : > { %p9179_p3 = pnand %p9177_p1, %p9174_p4 }
  0x6d   : > { %9182 = shalt.err (!%p9179_p3)
}
  0x6e   : > { %s9183_s20 = scalar_lea.vmem %s366_s13, 32  ;;  %p9191_p13 = scmp.lt.s32.totalorder %s366_s13, %s366_s13 }
  0x6f   : > { %p9184_p10 = scmp.ne.s32.totalorder %s366_s13, %s9183_s20  ;;  %p9192_p0 = scmp.lt.s32.totalorder %s9183_s20, %s9183_s20 }
  0x71   : > { %p9186_p11 = pnand %p9184_p10, %p9503_p8  ;;  %p9193_p2 = por %p9192_p0, %p9191_p13 }
  0x73   : > { %p9187_p12 = pneg %p9186_p11 }
  0x75   : > { %p9194_p5 = pnand %p9193_p2, %p9187_p12 }
  0x77   : > { %9197 = shalt.err (!%p9194_p5)
}
  0x78   : > { %8138 = dma.hbm_to_vmem [thread:$0]  (!%p9489_p6), %s13280_s2, 32, %s366_s13, [#allocation6]  }
  0x79   : > { %s9198_s1 = scalar_lea.hbm %s13283_s5, 4096 }
  0x7a   : > { %p9199_p7 = scmp.ne.s32.totalorder %s13283_s5, %s9198_s1  ;;  %p9205_p1 = scmp.lt.u32.totalorder %s9198_s1, %s13283_s5 }
  0x7c   : > { %p9201_p9 = pnand %p9199_p7, %p9503_p8 }
  0x7e   : > { %p9202_p4 = pneg %p9201_p9 }
  0x80   : > { %p9207_p3 = pnand %p9205_p1, %p9202_p4 }
  0x82   : > { %9210 = shalt.err (!%p9207_p3)
}
  0x83   : > { %s9211_s19 = scalar_lea.vmem %s392_s29, 4096  ;;  %p9219_p13 = scmp.lt.s32.totalorder %s392_s29, %s392_s29 }
  0x84   : > { %p9212_p10 = scmp.ne.s32.totalorder %s392_s29, %s9211_s19  ;;  %p9220_p0 = scmp.lt.s32.totalorder %s9211_s19, %s9211_s19 }
  0x86   : > { %p9214_p11 = pnand %p9212_p10, %p9503_p8  ;;  %p9221_p2 = por %p9220_p0, %p9219_p13 }
  0x88   : > { %p9215_p12 = pneg %p9214_p11 }
  0x8a   : > { %p9222_p5 = pnand %p9221_p2, %p9215_p12 }
  0x8c   : > { %9225 = shalt.err (!%p9222_p5)
}
  0x8d   : > { %s9373_s13 = smov 128   ;;  %s9374_s21 = smov 8  }
  0x8e   : > { %8144 = dma.hbm_to_vmem [thread:$0]  (!%p9489_p6), %s13283_s5, 4096, %s392_s29, [#allocation9], %s9373_s13, %s9373_s13, %s9374_s21  }
  0x8f   : > { %s9375_s20 = smov [#allocation13]   ;;  %s9226_s8 = scalar_lea.hbm %s13289_s11, 16384 }
  0x90   : > { %s429_s3 = sshll.u32 %s9375_s20, 4  ;;  %p9227_p7 = scmp.ne.s32.totalorder %s13289_s11, %s9226_s8  ;;  %s430_s3 = int_to_ptr.vmem [resolvable:$true] %s429_s3 }
  0x91   : > { %p9233_p1 = scmp.lt.u32.totalorder %s9226_s8, %s13289_s11 }
  0x92   : > { %p9229_p9 = pnand %p9227_p7, %p9503_p8 }
  0x94   : > { %p9230_p4 = pneg %p9229_p9 }
  0x96   : > { %p9235_p3 = pnand %p9233_p1, %p9230_p4 }
  0x98   : > { %9238 = shalt.err (!%p9235_p3)
}
  0x99   : > { %s9239_s29 = scalar_lea.vmem %s430_s3, 16384  ;;  %p9247_p13 = scmp.lt.s32.totalorder %s430_s3, %s430_s3 }
  0x9a   : > { %p9240_p10 = scmp.ne.s32.totalorder %s430_s3, %s9239_s29  ;;  %p9248_p0 = scmp.lt.s32.totalorder %s9239_s29, %s9239_s29 }
  0x9c   : > { %p9242_p11 = pnand %p9240_p10, %p9503_p8  ;;  %p9249_p2 = por %p9248_p0, %p9247_p13 }
  0x9e   : > { %p9243_p12 = pneg %p9242_p11 }
  0xa0   : > { %p9250_p5 = pnand %p9249_p2, %p9243_p12 }
  0xa2   : > { %9253 = shalt.err (!%p9250_p5)
}
  0xa3   : > { %8150 = dma.hbm_to_vmem [thread:$0]  (!%p9489_p6), %s13289_s11, 16384, %s430_s3, [#allocation12], %s9373_s13, %s9373_s13, %s9374_s21  }
  0xa4   : > { %s7368_s16 = sadd.s32 4294967294, %s9362_s28   ;;  %s9621_s18 = sadd.s32 1, %s9362_s28  }
  0xa5   : > { %s36_s30 = ssub.s32 %s9362_s28, %s9621_s18  ;;  %s39_s17 = sadd.s32 1, %s9358_s27 }
  0xa6   : > { %p37_p8 = scmp.eq.s32.totalorder %s36_s30, 0  ;;  %p46_p7 = scmp.ne.s32.totalorder %s9358_s27, %s9354_s26 }
  0xa7   : > { %p47_p9 = scmp.eq.s32.totalorder %s9362_s28, 0  ;;  %p52_p4 = scmp.ne.s32.totalorder %s9354_s26, %s9350_s25 }
  0xa8   : > { %s9632_s20 = scalar_select %p37_p8, %s9358_s27, %s39_s17  }
  0xa9   : > { %p9634_p1 = por %p47_p9, %p46_p7  ;;  %p13443_p3 = scmp.eq.s32.totalorder %s9473_s14, 0 }
  0xaa   : > { %p328_p10 = scmp.eq.s32.totalorder %s9473_s14, 1  ;;  %p334_p11 = scmp.eq.s32.totalorder %s7368_s16, 1 }
  0xab   : > { %p9640_p6 = por %p13443_p3, %p52_p4  ;;  %p8165_p12 = scmp.lt.s32.totalorder %s9362_s28, 2 }
  0xac   : > { %s446_s21 = sand.u32 1, %s9358_s27   ;;  %p9647_p13 = por %p328_p10, %p46_p7 }
  0xad   : > { %p9651_p0 = por %p334_p11, %p52_p4  ;;  %s7377_s8 = sshll.u32 %s446_s21, 8 }
  0xae   : > { %s13445_s3 = scalar_select %p9647_p13, 1, 0 }
  0xaf   : > { %s13446_s7 = scalar_select %p9651_p0, 1, 0 }
  0xb0   : > { %s7781_s1 = sshll.u32 %s9362_s28, 12  ;;  %s450_s29 = scalar_lea.vmem [#allocation2], %s7377_s8 }
  0xb1   : > { %s9659_s24 = scalar_lea.hbm %s13278_s0, %s7781_s1  ;;  %s458_s23 = sshll.u32 %s450_s29, 4  ;;  %s9661_s23 = int_to_ptr.vmem [resolvable:$true] %s458_s23 }
  0xb2   : > { %p9665_p2 = pnand %p8165_p12, %p9634_p1  ;;  %s9669_s16 = scalar_lea.sflag [#allocation3], %s446_s21 }
  0xb3   : > { %s9254_s30 = scalar_lea.hbm %s9659_s24, 4096  ;;  %s9259_s12 = scalar_lea.hbm %s13278_s0, 8192 }
  0xb4   : > { %p9255_p5 = scmp.ne.s32.totalorder %s9659_s24, %s9254_s30  ;;  %p9256_p8 = pneg %p9665_p2 }
  0xb5   : > { %p9260_p4 = scmp.lt.u32.totalorder %s9659_s24, %s13278_s0  ;;  %p9261_p1 = scmp.lt.u32.totalorder %s9259_s12, %s9254_s30 }
  0xb6   : > { %p9257_p7 = pnand %p9256_p8, %p9255_p5  ;;  %p9263_p10 = scmp.lt.u32.totalorder %s9254_s30, %s9659_s24 }
  0xb7   : > { %p9262_p3 = por %p9261_p1, %p9260_p4 }
  0xb8   : > { %p9258_p9 = pneg %p9257_p7 }
  0xb9   : > { %p9264_p11 = por %p9263_p10, %p9262_p3 }
  0xbb   : > { %p9265_p12 = pnand %p9264_p11, %p9258_p9 }
  0xbd   : > { %9268 = shalt.err (!%p9265_p12)
}
  0xbe   : > { %s9269_s21 = scalar_lea.vmem %s9661_s23, 4096  ;;  %s9376_s22 = smov [#allocation2]  }
  0xbf   : > { %p9270_p5 = scmp.ne.s32.totalorder %s9661_s23, %s9269_s21  ;;  %s9274_s29 = sshll.u32 %s9376_s22, 4  ;;  %s9275_s29 = int_to_ptr.vmem [resolvable:$false] %s9274_s29 }
  0xc0   : > { %s9276_s17 = scalar_lea.vmem %s9275_s29, 8192  ;;  %p9277_p13 = scmp.lt.s32.totalorder %s9661_s23, %s9275_s29 }
  0xc1   : > { %p9272_p7 = pnand %p9270_p5, %p9256_p8  ;;  %p9278_p4 = scmp.lt.s32.totalorder %s9276_s17, %s9269_s21 }
  0xc3   : > { %p9273_p0 = pneg %p9272_p7  ;;  %p9279_p1 = por %p9278_p4, %p9277_p13 }
  0xc5   : > { %p9280_p3 = pnand %p9279_p1, %p9273_p0 }
  0xc7   : > { %9283 = shalt.err (!%p9280_p3)
}
  0xc8   : > { %s9377_s30 = smov 256   ;;  %s9378_s8 = smov 16  }
  0xc9   : > { %8154 = dma.hbm_to_vmem [thread:$0]  (!%p9665_p2), %s9659_s24, 4096, %s9661_s23, %s9669_s16, %s9377_s30, %s9377_s30, %s9378_s8  }
  0xca   : > { %p13448_p8 = scmp.ne.s32.totalorder %s13437_s15, 0 }
  0xcc   : > { %470 = sbr.rel (%p13448_p8) target bundleno = 2971 (0xb9b), region = 72 }
  0xd3   : > { %s9700_s12 = sand.u32 1, %s9354_s26  }
  0xd4   : > { %s7382_s1 = sshll.u32 %s9700_s12, 8  ;;  %s473_s10 = scalar_lea.sflag [#allocation3], %s9700_s12 }
  0xd5   : > { %s9706_s21 = scalar_lea.vmem [#allocation2], %s7382_s1 }
  0xd6   : > { %9329 = dma.done.wait (%p9640_p6), %s473_s10, 4096  }
  0xd7   : > { %9331 = vsyncadd (%p9640_p6), %s473_s10, 4294963200  ;;  %p13449_p13 = scmp.eq.s32.totalorder %s9473_s14, 0 }
  0xd9   : > { %9333 = dma.done.wait (%p13449_p13), [#allocation6], 64   ;;  %p13450_p0 = pmov %p13449_p13 }
  0xdb   : > { %9335 = vsyncadd (%p13450_p0), [#allocation6], 4294967232  ;;  %p13451_p2 = pmov %p13450_p0 }
  0xdc   : > { %p13452_p9 = pmov %p13450_p0 }
  0xdd   : > { %9337 = dma.done.wait (%p13451_p2), [#allocation9], 16384  }
  0xde   : > { %9339 = vsyncadd (%p13452_p9), [#allocation9], 4294950912  ;;  %p13453_p10 = pmov %p13450_p0 }
  0xdf   : > { %p13454_p11 = pmov %p13450_p0 }
  0xe0   : > { %9341 = dma.done.wait (%p13453_p10), [#allocation12], 32768  }
  0xe1   : > { %9343 = vsyncadd (%p13454_p11), [#allocation12], 4294934528  ;;  %v9725_v0 = vld [vmem:[%s9706_s21] sm:$0xff]  ;;  %v9728_v1 = vld [vmem:[%s9706_s21 + $0x8] sm:$0xff]  ;;  %s13491_s22 = sld [smem:[#allocation156_spill]]  ;;  %s13492_s30 = sld [smem:[#allocation157_spill]] }
  0xe2   : > { %v9731_v2 = vld [vmem:[%s9706_s21 + $0x20] sm:$0xff]  ;;  %v580_v3 = vadd.f32 %v9728_v1, %v9725_v0  ;;  %v9736_v4 = vld [vmem:[%s9706_s21 + $0x28] sm:$0xff]  ;;  %v9739_v5 = vld [vmem:[%s9706_s21 + $0x10] sm:$0xff]  ;;  %s13137_s29 = scalar_lea.vmem [#allocation14], %s7382_s1  ;;  %s7783_s1 = sshll.u32 %s9473_s14, 12 }
  0xe3   : > { %v9742_v6 = vld [vmem:[%s9706_s21 + $0x18] sm:$0xff]  ;;  %v586_v7 = vadd.f32 %v9736_v4, %v9731_v2  ;;  %v9747_v8 = vld [vmem:[%s9706_s21 + $0x30] sm:$0xff]  ;;  %v9757_v12 = vld [vmem:[%s9706_s21 + $0x40] sm:$0xff]  ;;  %s7238_s17 = sshll.u32 %s13137_s29, 4  ;;  %s13906_s14 = sld [smem:[#allocation160_spill]]  ;;  %s13231_s17 = int_to_ptr.vmem [resolvable:$true] %s7238_s17 }
  0xe4   : > { %v9750_v9 = vld [vmem:[%s9706_s21 + $0x38] sm:$0xff]  ;;  %581 = vadd.xlane.f32.xlu0 %v580_v3  ;;  %v583_v10 = vadd.f32 %v9742_v6, %v9739_v5  ;;  %v9760_v13 = vld [vmem:[%s9706_s21 + $0x48] sm:$0xff]  ;;  %v9763_v14 = vld [vmem:[%s9706_s21 + $0x50] sm:$0xff]  ;;  %s7224_s15 = scalar_lea.sflag [#allocation4], %s9700_s12  ;;  %s9284_s13 = scalar_lea.vmem %s13231_s17, 4096 }
  0xe5   : > { %587 = vadd.xlane.f32.xlu1 %v586_v7  ;;  %v589_v11 = vadd.f32 %v9750_v9, %v9747_v8  ;;  %v9766_v15 = vld [vmem:[%s9706_s21 + $0x58] sm:$0xff]  ;;  %v592_v16 = vadd.f32 %v9760_v13, %v9757_v12  ;;  %v9773_v18 = vld [vmem:[%s9706_s21 + $0x60] sm:$0xff]  ;;  %v9776_v19 = vld [vmem:[%s9706_s21 + $0x68] sm:$0xff]  ;;  %p9285_p6 = scmp.ne.s32.totalorder %s13231_s17, %s9284_s13  ;;  %p13907_p12 = scmp.ne.s32.totalorder %s13445_s3, 0 }
  0xe6   : > { %v595_v17 = vadd.f32 %v9766_v15, %v9763_v14  ;;  %v9779_v20 = vld [vmem:[%s9706_s21 + $0x70] sm:$0xff]  ;;  %v9782_v21 = vld [vmem:[%s9706_s21 + $0x78] sm:$0xff]  ;;  %v9785_v22 = vld [vmem:[%s9706_s21 + $0x80] sm:$0xff]  ;;  %v598_v24 = vadd.f32 %v9776_v19, %v9773_v18  ;;  %s9379_s24 = smov [#allocation14]  }
  0xe7   : > { %v9788_v23 = vld [vmem:[%s9706_s21 + $0x88] sm:$0xff]  ;;  %v9793_v25 = vld [vmem:[%s9706_s21 + $0x90] sm:$0xff]  ;;  %v9796_v26 = vld [vmem:[%s9706_s21 + $0x98] sm:$0xff]  ;;  %v601_v27 = vadd.f32 %v9782_v21, %v9779_v20  ;;  %p9286_p5 = pnand %p9285_p6, %p13907_p12  ;;  %s9288_s23 = sshll.u32 %s9379_s24, 4  ;;  %s9289_s23 = int_to_ptr.vmem [resolvable:$false] %s9288_s23 }
  0xe8   : > { %584 = vadd.xlane.f32.xlu0 %v583_v10  ;;  %v9801_v28 = vld [vmem:[%s9706_s21 + $0xa0] sm:$0xff]  ;;  %v9804_v29 = vld [vmem:[%s9706_s21 + $0xa8] sm:$0xff]  ;;  %v604_v30 = vadd.f32 %v9788_v23, %v9785_v22  ;;  %v9809_v31 = vld [vmem:[%s9706_s21 + $0xb0] sm:$0xff]  ;;  %v607_v33 = vadd.f32 %v9796_v26, %v9793_v25  ;;  %s9290_s19 = scalar_lea.vmem %s9289_s23, 8192  ;;  %p9291_p4 = scmp.lt.s32.totalorder %s13231_s17, %s9289_s23 }
  0xe9   : > { %590 = vadd.xlane.f32.xlu1 %v589_v11  ;;  %v9812_v32 = vld [vmem:[%s9706_s21 + $0xb8] sm:$0xff]  ;;  %v9817_v34 = vld [vmem:[%s9706_s21 + $0xc0] sm:$0xff]  ;;  %v9820_v35 = vld [vmem:[%s9706_s21 + $0xc8] sm:$0xff]  ;;  %v610_v36 = vadd.f32 %v9804_v29, %v9801_v28  ;;  %s13229_s10 = scalar_lea.hbm %s13906_s14, %s7783_s1  ;;  %p9287_p7 = pneg %p9286_p5 }
  0xea   : > { %v9825_v37 = vld [vmem:[%s9706_s21 + $0xd0] sm:$0xff]  ;;  %v9828_v38 = vld [vmem:[%s9706_s21 + $0xd8] sm:$0xff]  ;;  %v613_v39 = vadd.f32 %v9812_v32, %v9809_v31  ;;  %v9833_v40 = vld [vmem:[%s9706_s21 + $0xe0] sm:$0xff]  ;;  %v616_v42 = vadd.f32 %v9820_v35, %v9817_v34  ;;  %p9292_p1 = scmp.lt.s32.totalorder %s9290_s19, %s9284_s13 }
  0xeb   : > { %v9836_v41 = vld [vmem:[%s9706_s21 + $0xe8] sm:$0xff]  ;;  %v9841_v43 = vld [vmem:[%s9706_s21 + $0xf0] sm:$0xff]  ;;  %v9844_v44 = vld [vmem:[%s9706_s21 + $0xf8] sm:$0xff]  ;;  %v619_v45 = vadd.f32 %v9828_v38, %v9825_v37 }
  0xec   : > { %593 = vadd.xlane.f32.xlu0 %v592_v16  ;;  %v622_v46 = vadd.f32 %v9836_v41, %v9833_v40  ;;  %v625_v47 = vadd.f32 %v9844_v44, %v9841_v43  ;;  %v8221_v48 = vld [vmem:[#allocation8 + $0x4] ss:$24 sps:$4 sm:$0xff]   ;;  %v8225_v50 = vld [vmem:[#allocation8] ss:$24 sps:$4 sm:$0xff]   ;;  %v8227_v52 = vld [vmem:[#allocation8 + $0x34] ss:$24 sps:$4 sm:$0xff]   ;;  %p9293_p3 = por %p9292_p1, %p9291_p4 }
  0xed   : > { %596 = vadd.xlane.f32.xlu1 %v595_v17  ;;  %v8223_v49 = vld [vmem:[#allocation8 + $0xc] ss:$24 sps:$4 sm:$0xff]   ;;  %v8226_v51 = vld [vmem:[#allocation8 + $0x8] ss:$24 sps:$4 sm:$0xff]   ;;  %v8229_v53 = vld [vmem:[#allocation8 + $0x3c] ss:$24 sps:$4 sm:$0xff]   ;;  %1547 = vmatprep.subr.bf16.mxu0 %v8221_v48 }
  0xee   : > { %1660 = vmatprep.subr.bf16.mxu1 %v8223_v49  ;;  %1548 = vmatpush1.bf16.msra.mxu0 %v8225_v50  ;;  %v8231_v54 = vld [vmem:[#allocation8 + $0x30] ss:$24 sps:$4 sm:$0xff]   ;;  %v8233_v56 = vld [vmem:[#allocation8 + $0x64] ss:$24 sps:$4 sm:$0xff]   ;;  %v8237_v58 = vld [vmem:[#allocation8 + $0x60] ss:$24 sps:$4 sm:$0xff]   ;;  %p9294_p8 = pnand %p9293_p3, %p9287_p7 }
  0xef   : > { %1661 = vmatpush1.bf16.msra.mxu1 %v8226_v51  ;;  %v8232_v55 = vld [vmem:[#allocation8 + $0x38] ss:$24 sps:$4 sm:$0xff]   ;;  %1549 = vmatprep.subr.bf16.mxu0 %v8227_v52  ;;  %v8235_v57 = vld [vmem:[#allocation8 + $0x6c] ss:$24 sps:$4 sm:$0xff]   ;;  %v8238_v59 = vld [vmem:[#allocation8 + $0x68] ss:$24 sps:$4 sm:$0xff]  }
  0xf0   : > { %599 = vadd.xlane.f32.xlu0 %v598_v24  ;;  %1662 = vmatprep.subr.bf16.mxu1 %v8229_v53  ;;  %v8239_v60 = vld [vmem:[#allocation8 + $0x94] ss:$24 sps:$4 sm:$0xff]   ;;  %v8243_v62 = vld [vmem:[#allocation8 + $0x90] ss:$24 sps:$4 sm:$0xff]   ;;  %v8245_v3 = vld [vmem:[#allocation8 + $0xc4] ss:$24 sps:$4 sm:$0xff]  }
  0xf1   : > { %602 = vadd.xlane.f32.xlu1 %v601_v27  ;;  %v8241_v61 = vld [vmem:[#allocation8 + $0x9c] ss:$24 sps:$4 sm:$0xff]   ;;  %v8244_v63 = vld [vmem:[#allocation8 + $0x98] ss:$24 sps:$4 sm:$0xff]   ;;  %v8247_v7 = vld [vmem:[#allocation8 + $0xcc] ss:$24 sps:$4 sm:$0xff]  }
  0xf2   : > { %1550 = vmatpush1.bf16.msra.mxu0 %v8231_v54  ;;  %v8249_v10 = vld [vmem:[#allocation8 + $0xc0] ss:$24 sps:$4 sm:$0xff]   ;;  %v8251_v16 = vld [vmem:[#allocation8 + $0xf4] ss:$24 sps:$4 sm:$0xff]   ;;  %v8255_v24 = vld [vmem:[#allocation8 + $0xf0] ss:$24 sps:$4 sm:$0xff]  }
  0xf3   : > { %1663 = vmatpush1.bf16.msra.mxu1 %v8232_v55  ;;  %1551 = vmatprep.subr.bf16.mxu0 %v8233_v56  ;;  %v8250_v11 = vld [vmem:[#allocation8 + $0xc8] ss:$24 sps:$4 sm:$0xff]   ;;  %v8253_v17 = vld [vmem:[#allocation8 + $0xfc] ss:$24 sps:$4 sm:$0xff]   ;;  %v8256_v27 = vld [vmem:[#allocation8 + $0xf8] ss:$24 sps:$4 sm:$0xff]  }
  0xf4   : > { %605 = vadd.xlane.f32.xlu0 %v604_v30  ;;  %1664 = vmatprep.subr.bf16.mxu1 %v8235_v57  ;;  %v8257_v30 = vld [vmem:[#allocation8 + $0x124] ss:$24 sps:$4 sm:$0xff]   ;;  %v8273_v50 = vld [vmem:[#allocation8 + $0x180] ss:$24 sps:$4 sm:$0xff]  }
  0xf5   : > { %608 = vadd.xlane.f32.xlu1 %v607_v33  ;;  %v8259_v33 = vld [vmem:[#allocation8 + $0x12c] ss:$24 sps:$4 sm:$0xff]   ;;  %v8274_v51 = vld [vmem:[#allocation8 + $0x188] ss:$24 sps:$4 sm:$0xff]  }
  0xf6   : > { %1552 = vmatpush1.bf16.msra.mxu0 %v8237_v58  ;;  %v8269_v48 = vld [vmem:[#allocation8 + $0x184] ss:$24 sps:$4 sm:$0xff]  }
  0xf7   : > { %1665 = vmatpush1.bf16.msra.mxu1 %v8238_v59  ;;  %1553 = vmatprep.subr.bf16.mxu0 %v8239_v60  ;;  %v8271_v49 = vld [vmem:[#allocation8 + $0x18c] ss:$24 sps:$4 sm:$0xff]  }
  0xf8   : > { %611 = vadd.xlane.f32.xlu0 %v610_v36  ;;  %1666 = vmatprep.subr.bf16.mxu1 %v8241_v61  ;;  %v8261_v36 = vld [vmem:[#allocation8 + $0x120] ss:$24 sps:$4 sm:$0xff]  }
  0xf9   : > { %614 = vadd.xlane.f32.xlu1 %v613_v39  ;;  %v8262_v39 = vld [vmem:[#allocation8 + $0x128] ss:$24 sps:$4 sm:$0xff]  }
  0xfa   : > { %1554 = vmatpush1.bf16.msra.mxu0 %v8243_v62 }
  0xfb   : > { %1667 = vmatpush1.bf16.msra.mxu1 %v8244_v63  ;;  %1555 = vmatprep.subr.bf16.mxu0 %v8245_v3 }
  0xfc   : > { %617 = vadd.xlane.f32.xlu0 %v616_v42  ;;  %1668 = vmatprep.subr.bf16.mxu1 %v8247_v7  ;;  %v8263_v42 = vld [vmem:[#allocation8 + $0x154] ss:$24 sps:$4 sm:$0xff]  }
  0xfd   : > { %620 = vadd.xlane.f32.xlu1 %v619_v45  ;;  %v8265_v45 = vld [vmem:[#allocation8 + $0x15c] ss:$24 sps:$4 sm:$0xff]  }
  0xfe   : > { %1556 = vmatpush1.bf16.msra.mxu0 %v8249_v10 }
  0xff   : > { %1669 = vmatpush1.bf16.msra.mxu1 %v8250_v11  ;;  %1557 = vmatprep.subr.bf16.mxu0 %v8251_v16 }
 0x100   : > { %623 = vadd.xlane.f32.xlu0 %v622_v46  ;;  %1670 = vmatprep.subr.bf16.mxu1 %v8253_v17  ;;  %v8267_v46 = vld [vmem:[#allocation8 + $0x150] ss:$24 sps:$4 sm:$0xff]  }
 0x101   : > { %626 = vadd.xlane.f32.xlu1 %v625_v47  ;;  %v8268_v47 = vld [vmem:[#allocation8 + $0x158] ss:$24 sps:$4 sm:$0xff]  }
 0x102   : > { %1558 = vmatpush1.bf16.msra.mxu0 %v8255_v24 }
 0x103   : > { %1671 = vmatpush1.bf16.msra.mxu1 %v8256_v27  ;;  %1559 = vmatprep.subr.bf16.mxu0 %v8257_v30 }
 0x104   : > { %1672 = vmatprep.subr.bf16.mxu1 %v8259_v33 }
 0x106   : > { %1560 = vmatpush1.bf16.msra.mxu0 %v8261_v36 }
 0x107   : > { %1673 = vmatpush1.bf16.msra.mxu1 %v8262_v39  ;;  %1561 = vmatprep.subr.bf16.mxu0 %v8263_v42 }
 0x108   : > { %1674 = vmatprep.subr.bf16.mxu1 %v8265_v45 }
 0x10a   : > { %1562 = vmatpush1.bf16.msra.mxu0 %v8267_v46 }
 0x10b   : > { %1675 = vmatpush1.bf16.msra.mxu1 %v8268_v47  ;;  %1563 = vmatprep.subr.bf16.mxu0 %v8269_v48 }
 0x10c   : > { %1676 = vmatprep.subr.bf16.mxu1 %v8271_v49 }
 0x10e   : > { %1564 = vmatpush1.bf16.msra.mxu0 %v8273_v50 }
 0x10f   : > { %1677 = vmatpush1.bf16.msra.mxu1 %v8274_v51 }
 0x171   : > { %v582_v52 = vpop.xlane.xlu0 %581 }
 0x172   : > { %v629_v53 = vmul.f32 0.00390625, %v582_v52  ;;  %v588_v54 = vpop.xlane.xlu1 %587 }
 0x173   : > { %v631_v55 = vmul.f32 0.00390625, %v588_v54 }
 0x174   : > { %v9853_v56 = vsub.f32 %v9725_v0, %v629_v53  ;;  %v9856_v57 = vsub.f32 %v9728_v1, %v629_v53 }
 0x175   : > { %v9859_v58 = vsub.f32 %v9731_v2, %v631_v55  ;;  %v9862_v59 = vsub.f32 %v9736_v4, %v631_v55  ;;  %v585_v60 = vpop.xlane.xlu0 %584 }
 0x176   : > { %v630_v61 = vmul.f32 0.00390625, %v585_v60  ;;  %v591_v62 = vpop.xlane.xlu1 %590  ;;  %v677_v63 = vmul.f32 %v9853_v56, %v9853_v56  ;;  %v678_v3 = vmul.f32 %v9856_v57, %v9856_v57 }
 0x177   : > { %v632_v0 = vmul.f32 0.00390625, %v591_v62  ;;  %v681_v1 = vmul.f32 %v9859_v58, %v9859_v58  ;;  %v682_v2 = vmul.f32 %v9862_v59, %v9862_v59 }
 0x178   : > { %v9873_v7 = vsub.f32 %v9739_v5, %v630_v61  ;;  %v9876_v4 = vsub.f32 %v9742_v6, %v630_v61  ;;  %v709_v10 = vadd.f32 %v678_v3, %v677_v63 }
 0x179   : > { %v9879_v11 = vsub.f32 %v9747_v8, %v632_v0  ;;  %v9882_v16 = vsub.f32 %v9750_v9, %v632_v0  ;;  %v594_v17 = vpop.xlane.xlu0 %593  ;;  %v715_v30 = vadd.f32 %v682_v2, %v681_v1 }
 0x17a   : > { %v633_v24 = vmul.f32 0.00390625, %v594_v17  ;;  %710 = vadd.xlane.f32.xlu0 %v709_v10  ;;  %v597_v27 = vpop.xlane.xlu1 %596  ;;  %v679_v33 = vmul.f32 %v9873_v7, %v9873_v7  ;;  %v680_v5 = vmul.f32 %v9876_v4, %v9876_v4 }
 0x17b   : > { %v634_v6 = vmul.f32 0.00390625, %v597_v27  ;;  %v683_v36 = vmul.f32 %v9879_v11, %v9879_v11  ;;  %v684_v8 = vmul.f32 %v9882_v16, %v9882_v16 }
 0x17c   : > { %v9893_v9 = vsub.f32 %v9757_v12, %v633_v24  ;;  %v9896_v39 = vsub.f32 %v9760_v13, %v633_v24  ;;  %v712_v42 = vadd.f32 %v680_v5, %v679_v33 }
 0x17d   : > { %v9899_v45 = vsub.f32 %v9763_v14, %v634_v6  ;;  %v9902_v46 = vsub.f32 %v9766_v15, %v634_v6  ;;  %v600_v47 = vpop.xlane.xlu0 %599  ;;  %v718_v50 = vadd.f32 %v684_v8, %v683_v36  ;;  %v8275_v6 = vld [vmem:[#allocation8 + $0x1b4] ss:$24 sps:$4 sm:$0xff]  }
 0x17e   : > { %v635_v48 = vmul.f32 0.00390625, %v600_v47  ;;  %716 = vadd.xlane.f32.xlu0 %v715_v30  ;;  %713 = vadd.xlane.f32.xlu1 %v712_v42  ;;  %v603_v49 = vpop.xlane.xlu1 %602  ;;  %v685_v12 = vmul.f32 %v9893_v9, %v9893_v9  ;;  %v686_v13 = vmul.f32 %v9896_v39, %v9896_v39  ;;  %v8277_v36 = vld [vmem:[#allocation8 + $0x1bc] ss:$24 sps:$4 sm:$0xff]   ;;  %v8279_v42 = vld [vmem:[#allocation8 + $0x1b0] ss:$24 sps:$4 sm:$0xff]  }
 0x17f   : > { %v636_v51 = vmul.f32 0.00390625, %v603_v49  ;;  %v687_v14 = vmul.f32 %v9899_v45, %v9899_v45  ;;  %v688_v15 = vmul.f32 %v9902_v46, %v9902_v46  ;;  %v8280_v47 = vld [vmem:[#allocation8 + $0x1b8] ss:$24 sps:$4 sm:$0xff]   ;;  %1565 = vmatprep.subr.bf16.mxu0 %v8275_v6  ;;  %1678 = vmatprep.subr.bf16.mxu1 %v8277_v36  ;;  %v8289_v6 = vld [vmem:[#allocation8 + $0x21c] ss:$24 sps:$4 sm:$0xff]  }
 0x180   : > { %v9913_v52 = vsub.f32 %v9773_v18, %v635_v48  ;;  %v9916_v53 = vsub.f32 %v9776_v19, %v635_v48  ;;  %v721_v54 = vadd.f32 %v686_v13, %v685_v12  ;;  %1566 = vmatpush1.bf16.msra.mxu0 %v8279_v42  ;;  %1679 = vmatpush1.bf16.msra.mxu1 %v8280_v47  ;;  %v8292_v42 = vld [vmem:[#allocation8 + $0x218] ss:$24 sps:$4 sm:$0xff]  }
 0x181   : > { %v9919_v55 = vsub.f32 %v9779_v20, %v636_v51  ;;  %v9922_v60 = vsub.f32 %v9782_v21, %v636_v51  ;;  %v606_v61 = vpop.xlane.xlu0 %605  ;;  %v724_v3 = vadd.f32 %v688_v15, %v687_v14 }
 0x182   : > { %v637_v62 = vmul.f32 0.00390625, %v606_v61  ;;  %719 = vadd.xlane.f32.xlu1 %v718_v50  ;;  %722 = vadd.xlane.f32.xlu0 %v721_v54  ;;  %v609_v63 = vpop.xlane.xlu1 %608  ;;  %v689_v18 = vmul.f32 %v9913_v52, %v9913_v52  ;;  %v690_v19 = vmul.f32 %v9916_v53, %v9916_v53 }
 0x183   : > { %v638_v0 = vmul.f32 0.00390625, %v609_v63  ;;  %v691_v20 = vmul.f32 %v9919_v55, %v9919_v55  ;;  %v692_v21 = vmul.f32 %v9922_v60, %v9922_v60  ;;  %v8283_v63 = vld [vmem:[#allocation8 + $0x1ec] ss:$24 sps:$4 sm:$0xff]  }
 0x184   : > { %v9933_v1 = vsub.f32 %v9785_v22, %v637_v62  ;;  %v9936_v2 = vsub.f32 %v9788_v23, %v637_v62  ;;  %v727_v10 = vadd.f32 %v690_v19, %v689_v18  ;;  %v8281_v62 = vld [vmem:[#allocation8 + $0x1e4] ss:$24 sps:$4 sm:$0xff]   ;;  %1680 = vmatprep.subr.bf16.mxu1 %v8283_v63  ;;  %v8304_v63 = vld [vmem:[#allocation8 + $0x278] ss:$24 sps:$4 sm:$0xff]  }
 0x185   : > { %v9939_v17 = vsub.f32 %v9793_v25, %v638_v0  ;;  %v9942_v24 = vsub.f32 %v9796_v26, %v638_v0  ;;  %v612_v27 = vpop.xlane.xlu0 %611  ;;  %v730_v5 = vadd.f32 %v692_v21, %v691_v20  ;;  %v8285_v0 = vld [vmem:[#allocation8 + $0x1e0] ss:$24 sps:$4 sm:$0xff]   ;;  %1567 = vmatprep.subr.bf16.mxu0 %v8281_v62  ;;  %v8303_v62 = vld [vmem:[#allocation8 + $0x270] ss:$24 sps:$4 sm:$0xff]  }
 0x186   : > { %v639_v30 = vmul.f32 0.00390625, %v612_v27  ;;  %725 = vadd.xlane.f32.xlu1 %v724_v3  ;;  %728 = vadd.xlane.f32.xlu0 %v727_v10  ;;  %v615_v33 = vpop.xlane.xlu1 %614  ;;  %v693_v22 = vmul.f32 %v9933_v1, %v9933_v1  ;;  %v694_v23 = vmul.f32 %v9936_v2, %v9936_v2  ;;  %v8286_v20 = vld [vmem:[#allocation8 + $0x1e8] ss:$24 sps:$4 sm:$0xff]  }
 0x187   : > { %v640_v8 = vmul.f32 0.00390625, %v615_v33  ;;  %v695_v25 = vmul.f32 %v9939_v17, %v9939_v17  ;;  %v696_v26 = vmul.f32 %v9942_v24, %v9942_v24  ;;  %1568 = vmatpush1.bf16.msra.mxu0 %v8285_v0  ;;  %1681 = vmatpush1.bf16.msra.mxu1 %v8286_v20  ;;  %v8307_v0 = vld [vmem:[#allocation8 + $0x2ac] ss:$24 sps:$4 sm:$0xff]   ;;  %v8309_v20 = vld [vmem:[#allocation8 + $0x2a0] ss:$24 sps:$4 sm:$0xff]  }
 0x188   : > { %v9953_v48 = vsub.f32 %v9801_v28, %v639_v30  ;;  %v9956_v49 = vsub.f32 %v9804_v29, %v639_v30  ;;  %v733_v50 = vadd.f32 %v694_v23, %v693_v22  ;;  %v8287_v23 = vld [vmem:[#allocation8 + $0x214] ss:$24 sps:$4 sm:$0xff]   ;;  %1682 = vmatprep.subr.bf16.mxu1 %v8289_v6 }
 0x189   : > { %v9959_v12 = vsub.f32 %v9809_v31, %v640_v8  ;;  %v9962_v13 = vsub.f32 %v9812_v32, %v640_v8  ;;  %v618_v51 = vpop.xlane.xlu0 %617  ;;  %v736_v15 = vadd.f32 %v696_v26, %v695_v25  ;;  %v8291_v26 = vld [vmem:[#allocation8 + $0x210] ss:$24 sps:$4 sm:$0xff]   ;;  %1569 = vmatprep.subr.bf16.mxu0 %v8287_v23  ;;  %v838_v23 = vlaneseq }
 0x18a   : > { %v641_v14 = vmul.f32 0.00390625, %v618_v51  ;;  %731 = vadd.xlane.f32.xlu1 %v730_v5  ;;  %734 = vadd.xlane.f32.xlu0 %v733_v50  ;;  %v621_v28 = vpop.xlane.xlu1 %620  ;;  %v697_v29 = vmul.f32 %v9953_v48, %v9953_v48  ;;  %v698_v54 = vmul.f32 %v9956_v49, %v9956_v49 }
 0x18b   : > { %v642_v61 = vmul.f32 0.00390625, %v621_v28  ;;  %v699_v31 = vmul.f32 %v9959_v12, %v9959_v12  ;;  %v700_v32 = vmul.f32 %v9962_v13, %v9962_v13  ;;  %1570 = vmatpush1.bf16.msra.mxu0 %v8291_v26  ;;  %1683 = vmatpush1.bf16.msra.mxu1 %v8292_v42  ;;  %v8295_v28 = vld [vmem:[#allocation8 + $0x24c] ss:$24 sps:$4 sm:$0xff]  }
 0x18c   : > { %v9973_v3 = vsub.f32 %v9817_v34, %v641_v14  ;;  %v9976_v18 = vsub.f32 %v9820_v35, %v641_v14  ;;  %v739_v19 = vadd.f32 %v698_v54, %v697_v29  ;;  %v8297_v29 = vld [vmem:[#allocation8 + $0x240] ss:$24 sps:$4 sm:$0xff]   ;;  %1684 = vmatprep.subr.bf16.mxu1 %v8295_v28 }
 0x18d   : > { %v9979_v21 = vsub.f32 %v9825_v37, %v642_v61  ;;  %v9982_v10 = vsub.f32 %v9828_v38, %v642_v61  ;;  %v624_v27 = vpop.xlane.xlu0 %623  ;;  %v742_v33 = vadd.f32 %v700_v32, %v699_v31  ;;  %v8298_v54 = vld [vmem:[#allocation8 + $0x248] ss:$24 sps:$4 sm:$0xff]   ;;  %v8299_v31 = vld [vmem:[#allocation8 + $0x274] ss:$24 sps:$4 sm:$0xff]  }
 0x18e   : > { %v643_v30 = vmul.f32 0.00390625, %v624_v27  ;;  %737 = vadd.xlane.f32.xlu1 %v736_v15  ;;  %740 = vadd.xlane.f32.xlu0 %v739_v19  ;;  %v627_v34 = vpop.xlane.xlu1 %626  ;;  %v701_v35 = vmul.f32 %v9973_v3, %v9973_v3  ;;  %v702_v5 = vmul.f32 %v9976_v18, %v9976_v18  ;;  %v8301_v32 = vld [vmem:[#allocation8 + $0x27c] ss:$24 sps:$4 sm:$0xff]   ;;  %v8310_v27 = vld [vmem:[#allocation8 + $0x2a8] ss:$24 sps:$4 sm:$0xff]  }
 0x18f   : > { %v644_v22 = vmul.f32 0.00390625, %v627_v34  ;;  %v703_v37 = vmul.f32 %v9979_v21, %v9979_v21  ;;  %v704_v38 = vmul.f32 %v9982_v10, %v9982_v10  ;;  %1685 = vmatpush1.bf16.msra.mxu1 %v8298_v54  ;;  %v8305_v19 = vld [vmem:[#allocation8 + $0x2a4] ss:$24 sps:$4 sm:$0xff]  }
 0x190   : > { %v9993_v36 = vsub.f32 %v9833_v40, %v643_v30  ;;  %v9996_v8 = vsub.f32 %v9836_v41, %v643_v30  ;;  %v745_v25 = vadd.f32 %v702_v5, %v701_v35  ;;  %1686 = vmatprep.subr.bf16.mxu1 %v8301_v32  ;;  %v8311_v30 = vld [vmem:[#allocation8 + $0x2d4] ss:$24 sps:$4 sm:$0xff]   ;;  %v8316_v35 = vld [vmem:[#allocation8 + $0x2d8] ss:$24 sps:$4 sm:$0xff]  }
 0x191   : > { %v9999_v47 = vsub.f32 %v9841_v43, %v644_v22  ;;  %v10002_v50 = vsub.f32 %v9844_v44, %v644_v22  ;;  %v748_v51 = vadd.f32 %v704_v38, %v703_v37  ;;  %v8293_v44 = vld [vmem:[#allocation8 + $0x244] ss:$24 sps:$4 sm:$0xff]   ;;  %v8319_v5 = vld [vmem:[#allocation8 + $0x14] ss:$24 sps:$4 sm:$0xff]  }
 0x192   : > { %743 = vadd.xlane.f32.xlu1 %v742_v33  ;;  %746 = vadd.xlane.f32.xlu0 %v745_v25  ;;  %v705_v40 = vmul.f32 %v9993_v36, %v9993_v36  ;;  %v706_v41 = vmul.f32 %v9996_v8, %v9996_v8  ;;  %v8313_v34 = vld [vmem:[#allocation8 + $0x2dc] ss:$24 sps:$4 sm:$0xff]   ;;  %v8315_v33 = vld [vmem:[#allocation8 + $0x2d0] ss:$24 sps:$4 sm:$0xff]  }
 0x193   : > { %v707_v14 = vmul.f32 %v9999_v47, %v9999_v47  ;;  %v708_v43 = vmul.f32 %v10002_v50, %v10002_v50  ;;  %1571 = vmatprep.subr.bf16.mxu0 %v8293_v44  ;;  %1687 = vmatpush1.bf16.msra.mxu1 %v8304_v63 }
 0x194   : > { %v751_v15 = vadd.f32 %v706_v41, %v705_v40  ;;  %1572 = vmatpush1.bf16.msra.mxu0 %v8297_v29  ;;  %1688 = vmatprep.subr.bf16.mxu1 %v8307_v0  ;;  %v10012_v41 = vshrl.u32 %v838_v23, 7 }
 0x195   : > { %v754_v61 = vadd.f32 %v708_v43, %v707_v14  ;;  %1573 = vmatprep.subr.bf16.mxu0 %v8299_v31 }
 0x196   : > { %749 = vadd.xlane.f32.xlu1 %v748_v51  ;;  %752 = vadd.xlane.f32.xlu0 %v751_v15  ;;  %v10015_v54 = vsub.s32 1, %v10012_v41 }
 0x197   : > { %1689 = vmatpush1.bf16.msra.mxu1 %v8310_v27  ;;  %v579_v27 = vld [vmem:[#allocation7] sm:$0x3] }
 0x198   : > { %1574 = vmatpush1.bf16.msra.mxu0 %v8303_v62  ;;  %1690 = vmatprep.subr.bf16.mxu1 %v8313_v34  ;;  %13455 = vst [vmem:[#allocation20_spill] sm:$0xff] %v10015_v54  ;;  %v578_v62 = vld [vmem:[#allocation5] sm:$0x3]  ;;  %v10029_v23 = vrot.slane %v579_v27, %v10015_v54 }
 0x199   : > { %1575 = vmatprep.subr.bf16.mxu0 %v8305_v19 }
 0x19a   : > { %755 = vadd.xlane.f32.xlu1 %v754_v61  ;;  %v10018_v61 = vsub.s32 0, %v10012_v41 }
 0x19b   : > { %1691 = vmatpush1.bf16.msra.mxu1 %v8316_v35 }
 0x19c   : > { %1576 = vmatpush1.bf16.msra.mxu0 %v8309_v20  ;;  %13456 = vst [vmem:[#allocation21_spill] sm:$0xff] %v10018_v61  ;;  %v10024_v34 = vrot.slane %v578_v62, %v10018_v61 }
 0x19d   : > { %1577 = vmatprep.subr.bf16.mxu0 %v8311_v30  ;;  %v10021_v30 = vrot.slane %v578_v62, %v10015_v54 }
 0x1a0   : > { %1578 = vmatpush1.bf16.msra.mxu0 %v8315_v33 }
 0x1a1   : > { %1773 = vmatprep.subr.bf16.mxu0 %v8319_v5 }
 0x207   : > { %v711_v22 = vpop.xlane.xlu0 %710 }
 0x208   : > { %v757_v37 = vmul.f32 0.00390625, %v711_v22 }
 0x20a   : > { %v773_v38 = vadd.f32 1e-12, %v757_v37 }
 0x20b   : > { %v714_v6 = vpop.xlane.xlu1 %713  ;;  %v717_v25 = vpop.xlane.xlu0 %716 }
 0x20c   : > { %8605 = vrsqrt.f32 %v773_v38  ;;  %v758_v26 = vmul.f32 0.00390625, %v714_v6  ;;  %v759_v42 = vmul.f32 0.00390625, %v717_v25 }
 0x20e   : > { %v774_v51 = vadd.f32 1e-12, %v758_v26  ;;  %v775_v40 = vadd.f32 1e-12, %v759_v42 }
 0x20f   : > { %v720_v14 = vpop.xlane.xlu1 %719  ;;  %v723_v43 = vpop.xlane.xlu0 %722 }
 0x210   : > { %8607 = vrsqrt.f32 %v774_v51  ;;  %v760_v44 = vmul.f32 0.00390625, %v720_v14  ;;  %v761_v28 = vmul.f32 0.00390625, %v723_v43  ;;  %v10034_v51 = vrot.slane %v579_v27, %v10018_v61 }
 0x211   : > { %8609 = vrsqrt.f32 %v775_v40 }
 0x212   : > { %v776_v15 = vadd.f32 1e-12, %v760_v44  ;;  %v777_v29 = vadd.f32 1e-12, %v761_v28 }
 0x213   : > { %v726_v31 = vpop.xlane.xlu1 %725  ;;  %v729_v32 = vpop.xlane.xlu0 %728 }
 0x214   : > { %8611 = vrsqrt.f32 %v776_v15  ;;  %v762_v63 = vmul.f32 0.00390625, %v726_v31  ;;  %v763_v19 = vmul.f32 0.00390625, %v729_v32 }
 0x215   : > { %8613 = vrsqrt.f32 %v777_v29 }
 0x216   : > { %v8606_v0 = vpop.eup %8605  ;;  %v778_v20 = vadd.f32 1e-12, %v762_v63  ;;  %v779_v33 = vadd.f32 1e-12, %v763_v19 }
 0x217   : > { %v732_v35 = vpop.xlane.xlu1 %731  ;;  %v806_v5 = vmul.f32 %v8606_v0, %v9856_v57  ;;  %v805_v22 = vmul.f32 %v8606_v0, %v9853_v56  ;;  %v735_v38 = vpop.xlane.xlu0 %734 }
 0x218   : > { %8615 = vrsqrt.f32 %v778_v20  ;;  %v764_v37 = vmul.f32 0.00390625, %v732_v35  ;;  %v765_v43 = vmul.f32 0.00390625, %v735_v38  ;;  %v8317_v38 = vld [vmem:[#allocation8 + $0x10] ss:$24 sps:$4 sm:$0xff]  }
 0x219   : > { %v849_v26 = vmul.f32 %v10021_v30, %v806_v5  ;;  %v848_v42 = vmul.f32 %v10024_v34, %v805_v22  ;;  %8617 = vrsqrt.f32 %v779_v33 }
 0x21a   : > { %v8608_v6 = vpop.eup %8607  ;;  %v780_v25 = vadd.f32 1e-12, %v764_v37  ;;  %v781_v33 = vadd.f32 1e-12, %v765_v43 }
 0x21b   : > { %v8610_v40 = vpop.eup %8609  ;;  %v738_v57 = vpop.xlane.xlu1 %737  ;;  %v808_v56 = vmul.f32 %v8608_v6, %v9876_v4  ;;  %v807_v14 = vmul.f32 %v8608_v6, %v9873_v7  ;;  %v892_v62 = vadd.f32 %v10029_v23, %v849_v26  ;;  %v891_v63 = vadd.f32 %v10034_v51, %v848_v42 }
 0x21c   : > { %8619 = vrsqrt.f32 %v780_v25  ;;  %v766_v44 = vmul.f32 0.00390625, %v738_v57  ;;  %v810_v28 = vmul.f32 %v8610_v40, %v9862_v59  ;;  %v809_v35 = vmul.f32 %v8610_v40, %v9859_v58  ;;  %v741_v5 = vpop.xlane.xlu0 %740 }
 0x21d   : > { %v851_v15 = vmul.f32 %v10021_v30, %v808_v56  ;;  %v850_v29 = vmul.f32 %v10024_v34, %v807_v14  ;;  %v767_v56 = vmul.f32 0.00390625, %v741_v5 }
 0x21e   : > { %v8612_v31 = vpop.eup %8611  ;;  %v782_v32 = vadd.f32 1e-12, %v766_v44  ;;  %v853_v19 = vmul.f32 %v10021_v30, %v810_v28  ;;  %v852_v14 = vmul.f32 %v10024_v34, %v809_v35  ;;  %v8320_v28 = vld [vmem:[#allocation8 + $0x40] ss:$24 sps:$4 sm:$0xff]  }
 0x21f   : > { %v744_v4 = vpop.xlane.xlu1 %743  ;;  %v894_v7 = vadd.f32 %v10029_v23, %v851_v15  ;;  %v893_v0 = vadd.f32 %v10034_v51, %v850_v29  ;;  %v812_v20 = vmul.f32 %v8612_v31, %v9882_v16  ;;  %v811_v59 = vmul.f32 %v8612_v31, %v9879_v11  ;;  %v8614_v27 = vpop.eup %8613  ;;  %v8322_v16 = vld [vmem:[#allocation8 + $0x44] ss:$24 sps:$4 sm:$0xff]  }
 0x220   : > { %8621 = vrsqrt.f32 %v782_v32  ;;  %v768_v26 = vmul.f32 0.00390625, %v744_v4  ;;  %v896_v42 = vadd.f32 %v10029_v23, %v853_v19  ;;  %v814_v40 = vmul.f32 %v8614_v27, %v9896_v39 }
 0x221   : > { %v10049_v22 = vpack.c.bf16 %v894_v7, %v892_v62  ;;  %v10051_v37 = vpack.c.bf16 %v893_v0, %v891_v63  ;;  %v855_v6 = vmul.f32 %v10021_v30, %v812_v20  ;;  %v854_v11 = vmul.f32 %v10024_v34, %v811_v59  ;;  %v747_v20 = vpop.xlane.xlu0 %746 }
 0x222   : > { %v8616_v25 = vpop.eup %8615  ;;  %8623 = vrsqrt.f32 %v781_v33  ;;  %v857_v15 = vmul.f32 %v10021_v30, %v814_v40  ;;  %v784_v31 = vadd.f32 1e-12, %v768_v26  ;;  %v783_v19 = vadd.f32 1e-12, %v767_v56  ;;  %v8328_v26 = vld [vmem:[#allocation8 + $0xa4] ss:$24 sps:$4 sm:$0xff]  }
 0x223   : > { %1579 = vmatprep.mubr.bf16.mxu0 %v10049_v22  ;;  %1692 = vmatprep.mubr.bf16.mxu1 %v10049_v22  ;;  %v898_v58 = vadd.f32 %v10029_v23, %v855_v6  ;;  %v816_v57 = vmul.f32 %v8616_v25, %v9902_v46  ;;  %v8618_v43 = vpop.eup %8617  ;;  %v897_v39 = vadd.f32 %v10034_v51, %v854_v11  ;;  %v8325_v46 = vld [vmem:[#allocation8 + $0x74] ss:$24 sps:$4 sm:$0xff]   ;;  %v750_v62 = vpop.xlane.xlu1 %749 }
 0x224   : > { %1580 = vmatmul.mubr.bf16.vlgmr.msra.gmra.mrb[0].mxu0 %v10051_v37  ;;  %1693 = vmatmul.mubr.bf16.vlgmr.msra.gmra.mrb[0].mxu1 %v10051_v37  ;;  %v815_v63 = vmul.f32 %v8616_v25, %v9899_v45  ;;  %v895_v4 = vadd.f32 %v10034_v51, %v852_v14  ;;  %v813_v0 = vmul.f32 %v8614_v27, %v9893_v9  ;;  %8625 = vrsqrt.f32 %v784_v31  ;;  %v8323_v45 = vld [vmem:[#allocation8 + $0x70] ss:$24 sps:$4 sm:$0xff]   ;;  %v8331_v14 = vld [vmem:[#allocation8 + $0xd4] ss:$24 sps:$4 sm:$0xff]  }
 0x225   : > { %1774 = vmatpush1.bf16.msra.mxu0 %v8317_v38  ;;  %v10064_v44 = vpack.c.bf16 %v898_v58, %v896_v42  ;;  %v859_v32 = vmul.f32 %v10021_v30, %v816_v57  ;;  %v900_v59 = vadd.f32 %v10029_v23, %v857_v15  ;;  %v818_v33 = vmul.f32 %v8618_v43, %v9916_v53  ;;  %v8326_v58 = vld [vmem:[#allocation8 + $0xa0] ss:$24 sps:$4 sm:$0xff]  }
 0x226   : > { %v8620_v29 = vpop.eup %8619  ;;  %1775 = vmatprep.subr.bf16.mxu0 %v8322_v16  ;;  %v770_v5 = vmul.f32 0.00390625, %v750_v62  ;;  %v10078_v38 = vpack.c.bf16 %v897_v39, %v895_v4  ;;  %v858_v6 = vmul.f32 %v10024_v34, %v815_v63  ;;  %8627 = vrsqrt.f32 %v783_v19 }
 0x227   : > { %1589 = vmatprep.mubr.bf16.mxu0 %v10064_v44  ;;  %1702 = vmatprep.mubr.bf16.mxu1 %v10064_v44  ;;  %v902_v7 = vadd.f32 %v10029_v23, %v859_v32  ;;  %v820_v35 = vmul.f32 %v8620_v29, %v9922_v60  ;;  %v769_v42 = vmul.f32 0.00390625, %v747_v20  ;;  %v856_v53 = vmul.f32 %v10024_v34, %v813_v0  ;;  %v756_v56 = vpop.xlane.xlu1 %755  ;;  %v753_v32 = vpop.xlane.xlu0 %752 }
 0x228   : > { %v861_v60 = vmul.f32 %v10021_v30, %v818_v33  ;;  %v786_v11 = vadd.f32 1e-12, %v770_v5  ;;  %v901_v40 = vadd.f32 %v10034_v51, %v858_v6  ;;  %v819_v57 = vmul.f32 %v8620_v29, %v9919_v55  ;;  %v8329_v29 = vld [vmem:[#allocation8 + $0xd0] ss:$24 sps:$4 sm:$0xff]   ;;  %v8337_v6 = vld [vmem:[#allocation8 + $0x134] ss:$24 sps:$4 sm:$0xff]  }
 0x229   : > { %1776 = vmatpush1.bf16.msra.mxu0 %v8320_v28  ;;  %v10081_v25 = vpack.c.bf16 %v902_v7, %v900_v59  ;;  %v863_v9 = vmul.f32 %v10021_v30, %v820_v35  ;;  %v785_v31 = vadd.f32 1e-12, %v769_v42  ;;  %v899_v39 = vadd.f32 %v10034_v51, %v856_v53  ;;  %v8334_v7 = vld [vmem:[#allocation8 + $0x104] ss:$24 sps:$4 sm:$0xff]   ;;  %v8332_v35 = vld [vmem:[#allocation8 + $0x100] ss:$24 sps:$4 sm:$0xff]  }
 0x22a   : > { %1777 = vmatprep.subr.bf16.mxu0 %v8325_v46  ;;  %v8622_v27 = vpop.eup %8621  ;;  %v817_v46 = vmul.f32 %v8618_v43, %v9913_v52  ;;  %v904_v62 = vadd.f32 %v10029_v23, %v861_v60  ;;  %8629 = vrsqrt.f32 %v786_v11  ;;  %v772_v19 = vmul.f32 0.00390625, %v756_v56 }
 0x22b   : > { %v906_v28 = vadd.f32 %v10029_v23, %v863_v9  ;;  %v824_v15 = vmul.f32 %v8622_v27, %v9942_v24  ;;  %v10098_v55 = vpack.c.bf16 %v901_v40, %v899_v39  ;;  %v862_v4 = vmul.f32 %v10024_v34, %v819_v57  ;;  %v8343_v39 = vld [vmem:[#allocation8 + $0x194] ss:$24 sps:$4 sm:$0xff]  }
 0x22c   : > { %1590 = vmatmul.mubr.bf16.gmra.mrb[4].mxu0 %v10078_v38  ;;  %1703 = vmatmul.mubr.bf16.gmra.mrb[4].mxu1 %v10078_v38  ;;  %v8624_v16 = vpop.eup %8623  ;;  %8631 = vrsqrt.f32 %v785_v31  ;;  %v771_v43 = vmul.f32 0.00390625, %v753_v32  ;;  %v788_v33 = vadd.f32 1e-12, %v772_v19 }
 0x22d   : > { %1599 = vmatprep.mubr.bf16.mxu0 %v10081_v25  ;;  %1712 = vmatprep.mubr.bf16.mxu1 %v10081_v25  ;;  %v822_v63 = vmul.f32 %v8624_v16, %v9936_v2  ;;  %v10101_v24 = vpack.c.bf16 %v906_v28, %v904_v62  ;;  %v867_v0 = vmul.f32 %v10021_v30, %v824_v15  ;;  %v8338_v28 = vld [vmem:[#allocation8 + $0x160] ss:$24 sps:$4 sm:$0xff]  }
 0x22e   : > { %1778 = vmatpush1.bf16.msra.mxu0 %v8323_v45  ;;  %v8626_v52 = vpop.eup %8625  ;;  %v860_v2 = vmul.f32 %v10024_v34, %v817_v46  ;;  %v905_v5 = vadd.f32 %v10034_v51, %v862_v4  ;;  %v823_v45 = vmul.f32 %v8622_v27, %v9939_v17  ;;  %v787_v42 = vadd.f32 1e-12, %v771_v43  ;;  %v8335_v17 = vld [vmem:[#allocation8 + $0x130] ss:$24 sps:$4 sm:$0xff]  }
 0x22f   : > { %1779 = vmatprep.subr.bf16.mxu0 %v8328_v26  ;;  %v865_v20 = vmul.f32 %v10021_v30, %v822_v63  ;;  %v910_v26 = vadd.f32 %v10029_v23, %v867_v0  ;;  %v828_v9 = vmul.f32 %v8626_v52, %v9962_v13  ;;  %v821_v60 = vmul.f32 %v8624_v16, %v9933_v1  ;;  %v8340_v13 = vld [vmem:[#allocation8 + $0x164] ss:$24 sps:$4 sm:$0xff]  }
 0x230   : > { %v8628_v59 = vpop.eup %8627  ;;  %v903_v53 = vadd.f32 %v10034_v51, %v860_v2  ;;  %8633 = vrsqrt.f32 %v788_v33  ;;  %v866_v27 = vmul.f32 %v10024_v34, %v823_v45  ;;  %v827_v31 = vmul.f32 %v8626_v52, %v9959_v12  ;;  %v8346_v52 = vld [vmem:[#allocation8 + $0x1c4] ss:$24 sps:$4 sm:$0xff]  }
 0x231   : > { %v908_v11 = vadd.f32 %v10029_v23, %v865_v20  ;;  %v871_v56 = vmul.f32 %v10021_v30, %v828_v9  ;;  %8635 = vrsqrt.f32 %v787_v42  ;;  %v864_v1 = vmul.f32 %v10024_v34, %v821_v60  ;;  %v8344_v20 = vld [vmem:[#allocation8 + $0x1c0] ss:$24 sps:$4 sm:$0xff]   ;;  %v8347_v60 = vld [vmem:[#allocation8 + $0x1f0] ss:$24 sps:$4 sm:$0xff]  }
 0x232   : > { %1780 = vmatpush1.bf16.msra.mxu0 %v8326_v58  ;;  %v826_v58 = vmul.f32 %v8628_v59, %v9956_v49  ;;  %v10118_v40 = vpack.c.bf16 %v905_v5, %v903_v53  ;;  %v909_v15 = vadd.f32 %v10034_v51, %v866_v27  ;;  %v825_v63 = vmul.f32 %v8628_v59, %v9953_v48 }
 0x233   : > { %1781 = vmatprep.subr.bf16.mxu0 %v8331_v14  ;;  %v10121_v57 = vpack.c.bf16 %v910_v26, %v908_v11  ;;  %v914_v46 = vadd.f32 %v10029_v23, %v871_v56  ;;  %v907_v62 = vadd.f32 %v10034_v51, %v864_v1  ;;  %v870_v12 = vmul.f32 %v10024_v34, %v827_v31  ;;  %v8355_v56 = vld [vmem:[#allocation8 + $0x254] ss:$24 sps:$4 sm:$0xff]  }
 0x234   : > { %1600 = vmatmul.mubr.bf16.gmra.mrb[8].mxu0 %v10098_v55  ;;  %1713 = vmatmul.mubr.bf16.gmra.mrb[8].mxu1 %v10098_v55  ;;  %v8630_v14 = vpop.eup %8629  ;;  %v869_v49 = vmul.f32 %v10021_v30, %v826_v58  ;;  %v868_v48 = vmul.f32 %v10024_v34, %v825_v63  ;;  %v8352_v58 = vld [vmem:[#allocation8 + $0x224] ss:$24 sps:$4 sm:$0xff]   ;;  %v8359_v63 = vld [vmem:[#allocation8 + $0x2b0] ss:$24 sps:$4 sm:$0xff]  }
 0x235   : > { %1609 = vmatprep.mubr.bf16.mxu0 %v10101_v24  ;;  %1722 = vmatprep.mubr.bf16.mxu1 %v10101_v24  ;;  %v832_v32 = vmul.f32 %v8630_v14, %v9982_v10  ;;  %v10138_v4 = vpack.c.bf16 %v909_v15, %v907_v62  ;;  %v913_v59 = vadd.f32 %v10034_v51, %v870_v12  ;;  %v8353_v15 = vld [vmem:[#allocation8 + $0x250] ss:$24 sps:$4 sm:$0xff]  }
 0x236   : > { %1782 = vmatpush1.bf16.msra.mxu0 %v8329_v29  ;;  %v8632_v16 = vpop.eup %8631  ;;  %v912_v19 = vadd.f32 %v10029_v23, %v869_v49  ;;  %v831_v33 = vmul.f32 %v8630_v14, %v9979_v21 }
 0x237   : > { %1783 = vmatprep.subr.bf16.mxu0 %v8334_v7  ;;  %v830_v29 = vmul.f32 %v8632_v16, %v9976_v18  ;;  %v8341_v7 = vld [vmem:[#allocation8 + $0x190] ss:$24 sps:$4 sm:$0xff]   ;;  %v875_v10 = vmul.f32 %v10021_v30, %v832_v32  ;;  %v829_v26 = vmul.f32 %v8632_v16, %v9973_v3 }
 0x238   : > { %v10141_v0 = vpack.c.bf16 %v914_v46, %v912_v19  ;;  %v874_v11 = vmul.f32 %v10024_v34, %v831_v33  ;;  %v8356_v46 = vld [vmem:[#allocation8 + $0x280] ss:$24 sps:$4 sm:$0xff]   ;;  %v8364_v19 = vld [vmem:[#allocation8 + $0x2e4] ss:$24 sps:$4 sm:$0xff]  }
 0x239   : > { %v873_v18 = vmul.f32 %v10021_v30, %v830_v29  ;;  %v918_v5 = vadd.f32 %v10029_v23, %v875_v10 }
 0x23a   : > { %1784 = vmatpush1.bf16.msra.mxu0 %v8332_v35  ;;  %v8634_v43 = vpop.eup %8633  ;;  %v8349_v35 = vld [vmem:[#allocation8 + $0x1f4] ss:$24 sps:$4 sm:$0xff]   ;;  %v917_v27 = vadd.f32 %v10034_v51, %v874_v11 }
 0x23b   : > { %1785 = vmatprep.subr.bf16.mxu0 %v8337_v6  ;;  %v8636_v2 = vpop.eup %8635  ;;  %v836_v45 = vmul.f32 %v8634_v43, %v10002_v50  ;;  %v911_v6 = vadd.f32 %v10034_v51, %v868_v48  ;;  %v916_v9 = vadd.f32 %v10029_v23, %v873_v18  ;;  %v872_v50 = vmul.f32 %v10024_v34, %v829_v26 }
 0x23c   : > { %1610 = vmatmul.mubr.bf16.gmra.mrb[12].mxu0 %v10118_v40  ;;  %1723 = vmatmul.mubr.bf16.gmra.mrb[12].mxu1 %v10118_v40  ;;  %v834_v42 = vmul.f32 %v8636_v2, %v9996_v8  ;;  %v8350_v8 = vld [vmem:[#allocation8 + $0x220] ss:$24 sps:$4 sm:$0xff]   ;;  %v833_v49 = vmul.f32 %v8636_v2, %v9993_v36 }
 0x23d   : > { %1619 = vmatprep.mubr.bf16.mxu0 %v10121_v57  ;;  %1732 = vmatprep.mubr.bf16.mxu1 %v10121_v57  ;;  %v933_v53 = vpack.c.bf16 %v913_v59, %v911_v6  ;;  %v936_v21 = vpack.c.bf16 %v918_v5, %v916_v9  ;;  %v915_v1 = vadd.f32 %v10034_v51, %v872_v50 }
 0x23e   : > { %1786 = vmatpush1.bf16.msra.mxu0 %v8335_v17  ;;  %v879_v17 = vmul.f32 %v10021_v30, %v836_v45  ;;  %v877_v3 = vmul.f32 %v10021_v30, %v834_v42 }
 0x23f   : > { %1787 = vmatprep.subr.bf16.mxu0 %v8340_v13  ;;  %v835_v13 = vmul.f32 %v8634_v43, %v9999_v47  ;;  %v876_v47 = vmul.f32 %v10024_v34, %v833_v49 }
 0x240   : > { %v922_v14 = vadd.f32 %v10029_v23, %v879_v17  ;;  %v920_v16 = vadd.f32 %v10029_v23, %v877_v3  ;;  %v8361_v23 = vld [vmem:[#allocation8 + $0x2b4] ss:$24 sps:$4 sm:$0xff]  }
 0x241   : > { %v878_v30 = vmul.f32 %v10024_v34, %v835_v13  ;;  %v919_v32 = vadd.f32 %v10034_v51, %v876_v47  ;;  %v8362_v34 = vld [vmem:[#allocation8 + $0x2e0] ss:$24 sps:$4 sm:$0xff]  }
 0x242   : > { %1788 = vmatpush1.bf16.msra.mxu0 %v8338_v28  ;;  %v935_v28 = vpack.c.bf16 %v917_v27, %v915_v1  ;;  %v938_v31 = vpack.c.bf16 %v922_v14, %v920_v16 }
 0x243   : > { %1789 = vmatprep.subr.bf16.mxu0 %v8343_v39  ;;  %v8358_v39 = vld [vmem:[#allocation8 + $0x284] ss:$24 sps:$4 sm:$0xff]   ;;  %v921_v36 = vadd.f32 %v10034_v51, %v878_v30 }
 0x244   : > { %1620 = vmatmul.mubr.bf16.gmra.mrb[16].mxu0 %v10138_v4  ;;  %1733 = vmatmul.mubr.bf16.gmra.mrb[16].mxu1 %v10138_v4  ;;  %v10186_v51 = vld [vmem:[%s13282_s4] sm:$0x3f] }
 0x245   : > { %1629 = vmatprep.mubr.bf16.mxu0 %v10141_v0  ;;  %1742 = vmatprep.mubr.bf16.mxu1 %v10141_v0  ;;  %v937_v62 = vpack.c.bf16 %v921_v36, %v919_v32 }
 0x246   : > { %1790 = vmatpush1.bf16.msra.mxu0 %v8341_v7 }
 0x247   : > { %1791 = vmatprep.subr.bf16.mxu0 %v8346_v52 }
 0x24a   : > { %1792 = vmatpush1.bf16.msra.mxu0 %v8344_v20 }
 0x24b   : > { %1793 = vmatprep.subr.bf16.mxu0 %v8349_v35 }
 0x24c   : > { %1630 = vmatmul.mubr.bf16.gmra.mrb[20].mxu0 %v933_v53  ;;  %1743 = vmatmul.mubr.bf16.gmra.mrb[20].mxu1 %v933_v53 }
 0x24d   : > { %1639 = vmatprep.mubr.bf16.mxu0 %v936_v21  ;;  %1752 = vmatprep.mubr.bf16.mxu1 %v936_v21 }
 0x24e   : > { %1794 = vmatpush1.bf16.msra.mxu0 %v8347_v60 }
 0x24f   : > { %1795 = vmatprep.subr.bf16.mxu0 %v8352_v58 }
 0x252   : > { %1796 = vmatpush1.bf16.msra.mxu0 %v8350_v8 }
 0x253   : > { %1797 = vmatprep.subr.bf16.mxu0 %v8355_v56 }
 0x254   : > { %1640 = vmatmul.mubr.bf16.gmra.mrb[24].mxu0 %v935_v28  ;;  %1753 = vmatmul.mubr.bf16.gmra.mrb[24].mxu1 %v935_v28 }
 0x255   : > { %1649 = vmatprep.mubr.bf16.mxu0 %v938_v31  ;;  %1762 = vmatprep.mubr.bf16.mxu1 %v938_v31 }
 0x256   : > { %1798 = vmatpush1.bf16.msra.mxu0 %v8353_v15 }
 0x257   : > { %1799 = vmatprep.subr.bf16.mxu0 %v8358_v39 }
 0x25a   : > { %1800 = vmatpush1.bf16.msra.mxu0 %v8356_v46 }
 0x25b   : > { %1801 = vmatprep.subr.bf16.mxu0 %v8361_v23 }
 0x25c   : > { %1650 = vmatmul.mubr.bf16.gmra.mrb[28].mxu0 %v937_v62  ;;  %1763 = vmatmul.mubr.bf16.gmra.mrb[28].mxu1 %v937_v62 }
 0x25d   : > { %1805 = vmatprep.mubr.bf16.mxu0 %v10049_v22  ;;  %v10189_v22 = vsub.s32 2, %v10012_v41 }
 0x25e   : > { %1802 = vmatpush1.bf16.msra.mxu0 %v8359_v63 }
 0x25f   : > { %1803 = vmatprep.subr.bf16.mxu0 %v8364_v19  ;;  %13457 = vst [vmem:[#allocation22_spill] sm:$0xff] %v10189_v22 }
 0x262   : > { %1804 = vmatpush1.bf16.msra.mxu0 %v8362_v34 }
 0x265   : > { %1806 = vmatmul.mubr.bf16.vlgmr.msra.gmra.mrb[32].mxu0 %v10051_v37  ;;  %v10192_v37 = vsub.s32 3, %v10012_v41 }
 0x266   : > { %1815 = vmatprep.mubr.bf16.mxu0 %v10064_v44  ;;  %v10196_v44 = vrot.slane %v10186_v51, %v10018_v61 }
 0x267   : > { %13458 = vst [vmem:[#allocation23_spill] sm:$0xff] %v10192_v37 }
 0x26d   : > { %1816 = vmatmul.mubr.bf16.gmra.mrb[36].mxu0 %v10078_v38  ;;  %v10200_v38 = vrot.slane %v10186_v51, %v10015_v54 }
 0x26e   : > { %1825 = vmatprep.mubr.bf16.mxu0 %v10081_v25  ;;  %v10204_v25 = vrot.slane %v10186_v51, %v10189_v22 }
 0x275   : > { %1826 = vmatmul.mubr.bf16.gmra.mrb[40].mxu0 %v10098_v55 }
 0x276   : > { %1835 = vmatprep.mubr.bf16.mxu0 %v10101_v24 }
 0x27d   : > { %1836 = vmatmul.mubr.bf16.gmra.mrb[44].mxu0 %v10118_v40  ;;  %v10208_v40 = vrot.slane %v10186_v51, %v10192_v37 }
 0x27e   : > { %1845 = vmatprep.mubr.bf16.mxu0 %v10121_v57 }
 0x285   : > { %1846 = vmatmul.mubr.bf16.gmra.mrb[48].mxu0 %v10138_v4 }
 0x286   : > { %1855 = vmatprep.mubr.bf16.mxu0 %v10141_v0 }
 0x28d   : > { %1856 = vmatmul.mubr.bf16.gmra.mrb[52].mxu0 %v933_v53 }
 0x28e   : > { %1865 = vmatprep.mubr.bf16.mxu0 %v936_v21 }
 0x295   : > { %1866 = vmatmul.mubr.bf16.gmra.mrb[56].mxu0 %v935_v28 }
 0x296   : > { %1875 = vmatprep.mubr.bf16.mxu0 %v938_v31 }
 0x29d   : > { %1876 = vmatmul.mubr.bf16.gmra.mrb[60].mxu0 %v937_v62 }
 0x2f7   : > { %v1581_v55 = vpop.f32.mrb[0].mxu0  ;;  %v1694_v24 = vpop.f32.mrb[0].mxu1 }
 0x2f8   : > { %v1582_v57 = vadd.f32 %v1581_v55, %v10196_v44  ;;  %v1583_v29 = vpop.f32.mrb[1].mxu0  ;;  %v1696_v4 = vpop.f32.mrb[1].mxu1  ;;  %v1695_v52 = vadd.f32 %v1694_v24, %v10204_v25 }
 0x2f9   : > { %v1584_v7 = vadd.f32 %v1583_v29, %v10200_v38  ;;  %v1585_v12 = vpop.f32.mrb[2].mxu0  ;;  %v1698_v0 = vpop.f32.mrb[2].mxu1  ;;  %v1697_v2 = vadd.f32 %v1696_v4, %v10208_v40 }
 0x2fa   : > { %v1586_v10 = vadd.f32 %v1585_v12, %v10196_v44  ;;  %v1699_v43 = vadd.f32 %v1698_v0, %v10204_v25  ;;  %v1587_v48 = vpop.f32.mrb[3].mxu0  ;;  %v1700_v18 = vpop.f32.mrb[3].mxu1  ;;  %v1886_v33 = vmul.f32 0.088388346, %v1582_v57 }
 0x2fb   : > { %v1588_v20 = vadd.f32 %v1587_v48, %v10200_v38  ;;  %v1701_v59 = vadd.f32 %v1700_v18, %v10208_v40  ;;  %v1887_v45 = vmul.f32 0.088388346, %v1584_v7 }
 0x2fc   : > { %v1888_v35 = vmul.f32 0.088388346, %v1586_v10  ;;  %v1934_v5 = vpack.c.bf16 %v1699_v43, %v1695_v52 }
 0x2fd   : > { %v1889_v6 = vmul.f32 0.088388346, %v1588_v20  ;;  %v1942_v26 = vpack.c.bf16 %v1701_v59, %v1697_v2 }
 0x2fe   : > { %v1918_v9 = vpack.c.bf16 %v1888_v35, %v1886_v33  ;;  %7848 = vmatprep.subr.bf16.mxu1 %v1934_v5 }
 0x2ff   : > { %v1926_v42 = vpack.c.bf16 %v1889_v6, %v1887_v45  ;;  %v1591_v53 = vpop.f32.mrb[4].mxu0  ;;  %v1704_v60 = vpop.f32.mrb[4].mxu1  ;;  %7849 = vmatpush3.bf16.xpose.msra.mxu1 %v1934_v5  ;;  %7880 = vmatprep.subr.bf16.mxu0 %v1942_v26 }
 0x300   : > { %v1592_v11 = vadd.f32 %v1591_v53, %v10196_v44  ;;  %v1593_v21 = vpop.f32.mrb[5].mxu0  ;;  %v1706_v58 = vpop.f32.mrb[5].mxu1  ;;  %7864 = vmatprep.mubr.bf16.mxu1 %v1918_v9  ;;  %7881 = vmatpush3.bf16.xpose.msra.mxu0 %v1942_v26  ;;  %v1705_v8 = vadd.f32 %v1704_v60, %v10204_v25 }
 0x301   : > { %v1594_v17 = vadd.f32 %v1593_v21, %v10200_v38  ;;  %v1595_v50 = vpop.f32.mrb[6].mxu0  ;;  %v1708_v3 = vpop.f32.mrb[6].mxu1  ;;  %7896 = vmatprep.mubr.bf16.mxu0 %v1926_v42  ;;  %v1707_v1 = vadd.f32 %v1706_v58, %v10208_v40 }
 0x302   : > { %v1596_v27 = vadd.f32 %v1595_v50, %v10196_v44  ;;  %v1709_v13 = vadd.f32 %v1708_v3, %v10204_v25  ;;  %v1597_v56 = vpop.f32.mrb[7].mxu0  ;;  %v1710_v14 = vpop.f32.mrb[7].mxu1  ;;  %v10226_v28 = vmul.f32 0.088388346, %v1592_v11 }
 0x303   : > { %v1598_v49 = vadd.f32 %v1597_v56, %v10200_v38  ;;  %v1711_v16 = vadd.f32 %v1710_v14, %v10208_v40  ;;  %v10230_v31 = vmul.f32 0.088388346, %v1594_v17 }
 0x304   : > { %v10228_v15 = vmul.f32 0.088388346, %v1596_v27  ;;  %v1935_v30 = vpack.c.bf16 %v1709_v13, %v1705_v8 }
 0x305   : > { %v10232_v39 = vmul.f32 0.088388346, %v1598_v49  ;;  %v1943_v47 = vpack.c.bf16 %v1711_v16, %v1707_v1 }
 0x306   : > { %v1919_v46 = vpack.c.bf16 %v10228_v15, %v10226_v28  ;;  %7850 = vmatprep.subr.bf16.mxu1 %v1935_v30 }
 0x307   : > { %v1927_v36 = vpack.c.bf16 %v10232_v39, %v10230_v31  ;;  %v1601_v23 = vpop.f32.mrb[8].mxu0  ;;  %v1714_v32 = vpop.f32.mrb[8].mxu1  ;;  %7851 = vmatpush3.bf16.xpose.msra.mxu1 %v1935_v30  ;;  %7882 = vmatprep.subr.bf16.mxu0 %v1943_v47 }
 0x308   : > { %v1602_v62 = vadd.f32 %v1601_v23, %v10196_v44  ;;  %v1603_v63 = vpop.f32.mrb[9].mxu0  ;;  %v1716_v19 = vpop.f32.mrb[9].mxu1  ;;  %7883 = vmatpush3.bf16.xpose.msra.mxu0 %v1943_v47  ;;  %v1715_v57 = vadd.f32 %v1714_v32, %v10204_v25 }
 0x309   : > { %v1604_v34 = vadd.f32 %v1603_v63, %v10200_v38  ;;  %v1605_v55 = vpop.f32.mrb[10].mxu0  ;;  %v1718_v24 = vpop.f32.mrb[10].mxu1  ;;  %v1717_v0 = vadd.f32 %v1716_v19, %v10208_v40 }
 0x30a   : > { %v1606_v29 = vadd.f32 %v1605_v55, %v10196_v44  ;;  %v1719_v4 = vadd.f32 %v1718_v24, %v10204_v25  ;;  %v1607_v7 = vpop.f32.mrb[11].mxu0  ;;  %v1720_v12 = vpop.f32.mrb[11].mxu1  ;;  %v10246_v43 = vmul.f32 0.088388346, %v1602_v62 }
 0x30b   : > { %v1608_v52 = vadd.f32 %v1607_v7, %v10200_v38  ;;  %v1721_v10 = vadd.f32 %v1720_v12, %v10208_v40  ;;  %v10250_v2 = vmul.f32 0.088388346, %v1604_v34 }
 0x30c   : > { %v10248_v48 = vmul.f32 0.088388346, %v1606_v29  ;;  %v1936_v18 = vpack.c.bf16 %v1719_v4, %v1715_v57 }
 0x30d   : > { %v10252_v20 = vmul.f32 0.088388346, %v1608_v52  ;;  %v1944_v59 = vpack.c.bf16 %v1721_v10, %v1717_v0 }
 0x30e   : > { %v1920_v33 = vpack.c.bf16 %v10248_v48, %v10246_v43  ;;  %7852 = vmatprep.subr.bf16.mxu1 %v1936_v18 }
 0x30f   : > { %v1928_v35 = vpack.c.bf16 %v10252_v20, %v10250_v2  ;;  %v1611_v5 = vpop.f32.mrb[12].mxu0  ;;  %v1724_v45 = vpop.f32.mrb[12].mxu1  ;;  %7853 = vmatpush3.bf16.xpose.msra.mxu1 %v1936_v18  ;;  %7884 = vmatprep.subr.bf16.mxu0 %v1944_v59 }
 0x310   : > { %v1612_v6 = vadd.f32 %v1611_v5, %v10196_v44  ;;  %v1613_v26 = vpop.f32.mrb[13].mxu0  ;;  %v1726_v9 = vpop.f32.mrb[13].mxu1  ;;  %7885 = vmatpush3.bf16.xpose.msra.mxu0 %v1944_v59  ;;  %v1725_v11 = vadd.f32 %v1724_v45, %v10204_v25 }
 0x311   : > { %v1614_v42 = vadd.f32 %v1613_v26, %v10200_v38  ;;  %v1615_v53 = vpop.f32.mrb[14].mxu0  ;;  %v1728_v60 = vpop.f32.mrb[14].mxu1  ;;  %v1727_v3 = vadd.f32 %v1726_v9, %v10208_v40 }
 0x312   : > { %v1616_v21 = vadd.f32 %v1615_v53, %v10196_v44  ;;  %v1729_v58 = vadd.f32 %v1728_v60, %v10204_v25  ;;  %v1617_v17 = vpop.f32.mrb[15].mxu0  ;;  %v1730_v50 = vpop.f32.mrb[15].mxu1  ;;  %v10266_v13 = vmul.f32 0.088388346, %v1612_v6 }
 0x313   : > { %v1618_v8 = vadd.f32 %v1617_v17, %v10200_v38  ;;  %v1731_v27 = vadd.f32 %v1730_v50, %v10208_v40  ;;  %v10270_v1 = vmul.f32 0.088388346, %v1614_v42 }
 0x314   : > { %v10268_v56 = vmul.f32 0.088388346, %v1616_v21  ;;  %v1937_v14 = vpack.c.bf16 %v1729_v58, %v1725_v11 }
 0x315   : > { %v10272_v49 = vmul.f32 0.088388346, %v1618_v8  ;;  %v1945_v16 = vpack.c.bf16 %v1731_v27, %v1727_v3 }
 0x316   : > { %v1921_v30 = vpack.c.bf16 %v10268_v56, %v10266_v13  ;;  %7854 = vmatprep.subr.bf16.mxu1 %v1937_v14 }
 0x317   : > { %v1929_v47 = vpack.c.bf16 %v10272_v49, %v10270_v1  ;;  %v1621_v23 = vpop.f32.mrb[16].mxu0  ;;  %v1734_v32 = vpop.f32.mrb[16].mxu1  ;;  %7855 = vmatpush3.bf16.xpose.msra.mxu1 %v1937_v14  ;;  %7886 = vmatprep.subr.bf16.mxu0 %v1945_v16 }
 0x318   : > { %v1622_v62 = vadd.f32 %v1621_v23, %v10196_v44  ;;  %v1623_v63 = vpop.f32.mrb[17].mxu0  ;;  %v1736_v19 = vpop.f32.mrb[17].mxu1  ;;  %7887 = vmatpush3.bf16.xpose.msra.mxu0 %v1945_v16  ;;  %v1735_v57 = vadd.f32 %v1734_v32, %v10204_v25 }
 0x319   : > { %v1624_v34 = vadd.f32 %v1623_v63, %v10200_v38  ;;  %v1625_v55 = vpop.f32.mrb[18].mxu0  ;;  %v1738_v24 = vpop.f32.mrb[18].mxu1  ;;  %v1737_v0 = vadd.f32 %v1736_v19, %v10208_v40 }
 0x31a   : > { %v1626_v29 = vadd.f32 %v1625_v55, %v10196_v44  ;;  %v1739_v4 = vadd.f32 %v1738_v24, %v10204_v25  ;;  %v1627_v7 = vpop.f32.mrb[19].mxu0  ;;  %v1740_v12 = vpop.f32.mrb[19].mxu1  ;;  %v10286_v18 = vmul.f32 0.088388346, %v1622_v62 }
 0x31b   : > { %v1628_v52 = vadd.f32 %v1627_v7, %v10200_v38  ;;  %v1741_v10 = vadd.f32 %v1740_v12, %v10208_v40  ;;  %v10290_v45 = vmul.f32 0.088388346, %v1624_v34 }
 0x31c   : > { %v10288_v59 = vmul.f32 0.088388346, %v1626_v29  ;;  %v1938_v5 = vpack.c.bf16 %v1739_v4, %v1735_v57 }
 0x31d   : > { %v10292_v6 = vmul.f32 0.088388346, %v1628_v52  ;;  %v1946_v26 = vpack.c.bf16 %v1741_v10, %v1737_v0 }
 0x31e   : > { %v1922_v9 = vpack.c.bf16 %v10288_v59, %v10286_v18  ;;  %7856 = vmatprep.subr.bf16.mxu1 %v1938_v5 }
 0x31f   : > { %v1930_v42 = vpack.c.bf16 %v10292_v6, %v10290_v45  ;;  %v1631_v53 = vpop.f32.mrb[20].mxu0  ;;  %v1744_v60 = vpop.f32.mrb[20].mxu1  ;;  %7857 = vmatpush3.bf16.xpose.msra.mxu1 %v1938_v5  ;;  %7888 = vmatprep.subr.bf16.mxu0 %v1946_v26 }
 0x320   : > { %v1632_v11 = vadd.f32 %v1631_v53, %v10196_v44  ;;  %v1633_v21 = vpop.f32.mrb[21].mxu0  ;;  %v1746_v58 = vpop.f32.mrb[21].mxu1  ;;  %7889 = vmatpush3.bf16.xpose.msra.mxu0 %v1946_v26  ;;  %v1745_v8 = vadd.f32 %v1744_v60, %v10204_v25 }
 0x321   : > { %v1634_v17 = vadd.f32 %v1633_v21, %v10200_v38  ;;  %v1635_v50 = vpop.f32.mrb[22].mxu0  ;;  %v1748_v3 = vpop.f32.mrb[22].mxu1  ;;  %v1747_v32 = vadd.f32 %v1746_v58, %v10208_v40 }
 0x322   : > { %v1636_v27 = vadd.f32 %v1635_v50, %v10196_v44  ;;  %v1749_v14 = vadd.f32 %v1748_v3, %v10204_v25  ;;  %v1637_v16 = vpop.f32.mrb[23].mxu0  ;;  %v1750_v23 = vpop.f32.mrb[23].mxu1  ;;  %v10306_v19 = vmul.f32 0.088388346, %v1632_v11 }
 0x323   : > { %v1638_v62 = vadd.f32 %v1637_v16, %v10200_v38  ;;  %v1751_v63 = vadd.f32 %v1750_v23, %v10208_v40  ;;  %v10310_v24 = vmul.f32 0.088388346, %v1634_v17 }
 0x324   : > { %v10308_v34 = vmul.f32 0.088388346, %v1636_v27  ;;  %v1939_v55 = vpack.c.bf16 %v1749_v14, %v1745_v8 }
 0x325   : > { %v10312_v57 = vmul.f32 0.088388346, %v1638_v62  ;;  %v1947_v29 = vpack.c.bf16 %v1751_v63, %v1747_v32 }
 0x326   : > { %v1923_v4 = vpack.c.bf16 %v10308_v34, %v10306_v19  ;;  %7858 = vmatprep.subr.bf16.mxu1 %v1939_v55 }
 0x327   : > { %v1931_v7 = vpack.c.bf16 %v10312_v57, %v10310_v24  ;;  %v1641_v12 = vpop.f32.mrb[24].mxu0  ;;  %v1754_v0 = vpop.f32.mrb[24].mxu1  ;;  %7859 = vmatpush3.bf16.xpose.msra.mxu1 %v1939_v55  ;;  %7890 = vmatprep.subr.bf16.mxu0 %v1947_v29 }
 0x328   : > { %v1642_v52 = vadd.f32 %v1641_v12, %v10196_v44  ;;  %v1643_v10 = vpop.f32.mrb[25].mxu0  ;;  %v1756_v5 = vpop.f32.mrb[25].mxu1  ;;  %7891 = vmatpush3.bf16.xpose.msra.mxu0 %v1947_v29  ;;  %v1755_v11 = vadd.f32 %v1754_v0, %v10204_v25 }
 0x329   : > { %v1644_v26 = vadd.f32 %v1643_v10, %v10200_v38  ;;  %v1645_v53 = vpop.f32.mrb[26].mxu0  ;;  %v1758_v60 = vpop.f32.mrb[26].mxu1  ;;  %v1757_v3 = vadd.f32 %v1756_v5, %v10208_v40 }
 0x32a   : > { %v1646_v21 = vadd.f32 %v1645_v53, %v10196_v44  ;;  %v1759_v58 = vadd.f32 %v1758_v60, %v10204_v25  ;;  %v1647_v17 = vpop.f32.mrb[27].mxu0  ;;  %v1760_v50 = vpop.f32.mrb[27].mxu1  ;;  %v10326_v14 = vmul.f32 0.088388346, %v1642_v52 }
 0x32b   : > { %v1648_v8 = vadd.f32 %v1647_v17, %v10200_v38  ;;  %v1761_v27 = vadd.f32 %v1760_v50, %v10208_v40  ;;  %v10330_v32 = vmul.f32 0.088388346, %v1644_v26 }
 0x32c   : > { %v10328_v16 = vmul.f32 0.088388346, %v1646_v21  ;;  %v1940_v23 = vpack.c.bf16 %v1759_v58, %v1755_v11 }
 0x32d   : > { %v10332_v62 = vmul.f32 0.088388346, %v1648_v8  ;;  %v1948_v63 = vpack.c.bf16 %v1761_v27, %v1757_v3 }
 0x32e   : > { %v1924_v55 = vpack.c.bf16 %v10328_v16, %v10326_v14  ;;  %7860 = vmatprep.subr.bf16.mxu1 %v1940_v23 }
 0x32f   : > { %v1932_v29 = vpack.c.bf16 %v10332_v62, %v10330_v32  ;;  %v1651_v12 = vpop.f32.mrb[28].mxu0  ;;  %v1764_v0 = vpop.f32.mrb[28].mxu1  ;;  %7861 = vmatpush3.bf16.xpose.msra.mxu1 %v1940_v23  ;;  %7892 = vmatprep.subr.bf16.mxu0 %v1948_v63  ;;  %v1055_v23 = vsub.s32 4, %v10012_v41 }
 0x330   : > { %v1652_v52 = vadd.f32 %v1651_v12, %v10196_v44  ;;  %v1653_v10 = vpop.f32.mrb[29].mxu0  ;;  %v1766_v5 = vpop.f32.mrb[29].mxu1  ;;  %7893 = vmatpush3.bf16.xpose.msra.mxu0 %v1948_v63  ;;  %v1765_v11 = vadd.f32 %v1764_v0, %v10204_v25  ;;  %v1059_v0 = vsub.s32 5, %v10012_v41 }
 0x331   : > { %v1654_v26 = vadd.f32 %v1653_v10, %v10200_v38  ;;  %v1655_v53 = vpop.f32.mrb[30].mxu0  ;;  %v1768_v60 = vpop.f32.mrb[30].mxu1  ;;  %v1767_v3 = vadd.f32 %v1766_v5, %v10208_v40 }
 0x332   : > { %v1656_v21 = vadd.f32 %v1655_v53, %v10196_v44  ;;  %v1769_v58 = vadd.f32 %v1768_v60, %v10204_v25  ;;  %v1657_v17 = vpop.f32.mrb[31].mxu0  ;;  %v1770_v50 = vpop.f32.mrb[31].mxu1  ;;  %v10347_v63 = vmul.f32 0.088388346, %v1652_v52  ;;  %v10364_v41 = vrot.slane %v10186_v51, %v1059_v0 }
 0x333   : > { %v1658_v8 = vadd.f32 %v1657_v17, %v10200_v38  ;;  %v1771_v27 = vadd.f32 %v1770_v50, %v10208_v40  ;;  %v10352_v44 = vmul.f32 0.088388346, %v1654_v26  ;;  %v10361_v40 = vrot.slane %v10186_v51, %v1055_v23 }
 0x334   : > { %v10349_v12 = vmul.f32 0.088388346, %v1656_v21  ;;  %v1941_v10 = vpack.c.bf16 %v1769_v58, %v1765_v11 }
 0x335   : > { %v10354_v25 = vmul.f32 0.088388346, %v1658_v8  ;;  %v1949_v53 = vpack.c.bf16 %v1771_v27, %v1767_v3 }
 0x336   : > { %v1925_v5 = vpack.c.bf16 %v10349_v12, %v10347_v63  ;;  %7862 = vmatprep.subr.bf16.mxu1 %v1941_v10 }
 0x337   : > { %v1933_v38 = vpack.c.bf16 %v10354_v25, %v10352_v44  ;;  %7863 = vmatpush3.bf16.xpose.msra.mxu1 %v1941_v10  ;;  %7894 = vmatprep.subr.bf16.mxu0 %v1949_v53 }
 0x338   : > { %v1807_v52 = vpop.f32.mrb[32].mxu0  ;;  %7895 = vmatpush3.bf16.xpose.msra.mxu0 %v1949_v53 }
 0x339   : > { %v1809_v26 = vpop.f32.mrb[33].mxu0  ;;  %v1808_v11 = vadd.f32 %v1807_v52, %v10361_v40 }
 0x33a   : > { %v1811_v60 = vpop.f32.mrb[34].mxu0  ;;  %v1810_v17 = vadd.f32 %v1809_v26, %v10364_v41 }
 0x33b   : > { %v1812_v21 = vadd.f32 %v1811_v60, %v10361_v40  ;;  %v1813_v58 = vpop.f32.mrb[35].mxu0 }
 0x33c   : > { %v1814_v50 = vadd.f32 %v1813_v58, %v10364_v41 }
 0x33d   : > { %v1950_v3 = vpack.c.bf16 %v1812_v21, %v1808_v11 }
 0x33e   : > { %v1958_v8 = vpack.c.bf16 %v1814_v50, %v1810_v17  ;;  %7865 = vmatmul.mubr.bf16.vlgmr.msra.gmra.mrb[32].mxu1 %v1919_v46 }
 0x33f   : > { %7912 = vmatprep.subr.bf16.mxu0 %v1950_v3  ;;  %7868 = vmatprep.mubr.bf16.mxu1 %v1920_v33 }
 0x340   : > { %v1817_v51 = vpop.f32.mrb[36].mxu0  ;;  %7897 = vmatmul.mubr.bf16.vlgmr.msra.gmra.mrb[64].mxu0 %v1927_v36  ;;  %7944 = vmatprep.subr.bf16.mxu1 %v1958_v8 }
 0x341   : > { %v1819_v27 = vpop.f32.mrb[37].mxu0  ;;  %7900 = vmatprep.mubr.bf16.mxu0 %v1928_v35  ;;  %7913 = vmatpush3.bf16.msra.mxu0 %v1950_v3  ;;  %v1818_v15 = vadd.f32 %v1817_v51, %v10361_v40 }
 0x342   : > { %7945 = vmatpush3.bf16.msra.mxu1 %v1958_v8  ;;  %v1821_v28 = vpop.f32.mrb[38].mxu0  ;;  %v1820_v48 = vadd.f32 %v1819_v27, %v10364_v41 }
 0x343   : > { %v1822_v46 = vadd.f32 %v1821_v28, %v10361_v40  ;;  %v1823_v43 = vpop.f32.mrb[39].mxu0 }
 0x344   : > { %v1824_v33 = vadd.f32 %v1823_v43, %v10364_v41 }
 0x345   : > { %v1951_v31 = vpack.c.bf16 %v1822_v46, %v1818_v15 }
 0x346   : > { %v1959_v39 = vpack.c.bf16 %v1824_v33, %v1820_v48  ;;  %7869 = vmatmul.mubr.bf16.gmra.mrb[36].mxu1 %v1921_v30 }
 0x347   : > { %7914 = vmatprep.subr.bf16.mxu0 %v1951_v31  ;;  %7872 = vmatprep.mubr.bf16.mxu1 %v1922_v9 }
 0x348   : > { %v1827_v36 = vpop.f32.mrb[40].mxu0  ;;  %7901 = vmatmul.mubr.bf16.gmra.mrb[68].mxu0 %v1929_v47  ;;  %7946 = vmatprep.subr.bf16.mxu1 %v1959_v39 }
 0x349   : > { %7915 = vmatpush3.bf16.msra.mxu0 %v1951_v31  ;;  %v1829_v2 = vpop.f32.mrb[41].mxu0  ;;  %7904 = vmatprep.mubr.bf16.mxu0 %v1930_v42  ;;  %v1828_v35 = vadd.f32 %v1827_v36, %v10361_v40 }
 0x34a   : > { %7947 = vmatpush3.bf16.msra.mxu1 %v1959_v39  ;;  %v1831_v20 = vpop.f32.mrb[42].mxu0  ;;  %v1830_v30 = vadd.f32 %v1829_v2, %v10364_v41 }
 0x34b   : > { %v1832_v13 = vadd.f32 %v1831_v20, %v10361_v40  ;;  %v1833_v56 = vpop.f32.mrb[43].mxu0 }
 0x34c   : > { %v1834_v18 = vadd.f32 %v1833_v56, %v10364_v41 }
 0x34d   : > { %v1952_v1 = vpack.c.bf16 %v1832_v13, %v1828_v35 }
 0x34e   : > { %v1960_v49 = vpack.c.bf16 %v1834_v18, %v1830_v30  ;;  %7873 = vmatmul.mubr.bf16.gmra.mrb[40].mxu1 %v1923_v4 }
 0x34f   : > { %7916 = vmatprep.subr.bf16.mxu0 %v1952_v1  ;;  %7876 = vmatprep.mubr.bf16.mxu1 %v1924_v55 }
 0x350   : > { %v1837_v47 = vpop.f32.mrb[44].mxu0  ;;  %7905 = vmatmul.mubr.bf16.gmra.mrb[72].mxu0 %v1931_v7  ;;  %7948 = vmatprep.subr.bf16.mxu1 %v1960_v49 }
 0x351   : > { %7917 = vmatpush3.bf16.msra.mxu0 %v1952_v1  ;;  %v1839_v59 = vpop.f32.mrb[45].mxu0  ;;  %7908 = vmatprep.mubr.bf16.mxu0 %v1932_v29  ;;  %v1838_v6 = vadd.f32 %v1837_v47, %v10361_v40 }
 0x352   : > { %7949 = vmatpush3.bf16.msra.mxu1 %v1960_v49  ;;  %v1841_v45 = vpop.f32.mrb[46].mxu0  ;;  %v1840_v19 = vadd.f32 %v1839_v59, %v10364_v41 }
 0x353   : > { %v1842_v9 = vadd.f32 %v1841_v45, %v10361_v40  ;;  %v1843_v42 = vpop.f32.mrb[47].mxu0 }
 0x354   : > { %v1844_v34 = vadd.f32 %v1843_v42, %v10364_v41 }
 0x355   : > { %v1953_v24 = vpack.c.bf16 %v1842_v9, %v1838_v6 }
 0x356   : > { %v1961_v57 = vpack.c.bf16 %v1844_v34, %v1840_v19  ;;  %7877 = vmatmul.mubr.bf16.gmra.mrb[44].mxu1 %v1925_v5 }
 0x357   : > { %7918 = vmatprep.subr.bf16.mxu0 %v1953_v24 }
 0x358   : > { %v1847_v4 = vpop.f32.mrb[48].mxu0  ;;  %7909 = vmatmul.mubr.bf16.gmra.mrb[76].mxu0 %v1933_v38  ;;  %7950 = vmatprep.subr.bf16.mxu1 %v1961_v57 }
 0x359   : > { %7919 = vmatpush3.bf16.msra.mxu0 %v1953_v24  ;;  %v1849_v7 = vpop.f32.mrb[49].mxu0  ;;  %7951 = vmatpush3.bf16.msra.mxu1 %v1961_v57  ;;  %v1848_v16 = vadd.f32 %v1847_v4, %v10361_v40 }
 0x35a   : > { %v1851_v14 = vpop.f32.mrb[50].mxu0  ;;  %v1850_v55 = vadd.f32 %v1849_v7, %v10364_v41 }
 0x35b   : > { %v1852_v32 = vadd.f32 %v1851_v14, %v10361_v40  ;;  %v1853_v62 = vpop.f32.mrb[51].mxu0 }
 0x35c   : > { %v1854_v29 = vadd.f32 %v1853_v62, %v10364_v41 }
 0x35d   : > { %v1954_v23 = vpack.c.bf16 %v1852_v32, %v1848_v16 }
 0x35e   : > { %v1962_v63 = vpack.c.bf16 %v1854_v29, %v1850_v55 }
 0x35f   : > { %7920 = vmatprep.subr.bf16.mxu0 %v1954_v23 }
 0x360   : > { %v1857_v12 = vpop.f32.mrb[52].mxu0  ;;  %7921 = vmatpush3.bf16.msra.mxu0 %v1954_v23  ;;  %7952 = vmatprep.subr.bf16.mxu1 %v1962_v63 }
 0x361   : > { %v1859_v10 = vpop.f32.mrb[53].mxu0  ;;  %7953 = vmatpush3.bf16.msra.mxu1 %v1962_v63  ;;  %v1858_v44 = vadd.f32 %v1857_v12, %v10361_v40 }
 0x362   : > { %v1861_v0 = vpop.f32.mrb[54].mxu0  ;;  %v1860_v5 = vadd.f32 %v1859_v10, %v10364_v41 }
 0x363   : > { %v1862_v25 = vadd.f32 %v1861_v0, %v10361_v40  ;;  %v1863_v53 = vpop.f32.mrb[55].mxu0 }
 0x364   : > { %v1864_v38 = vadd.f32 %v1863_v53, %v10364_v41 }
 0x365   : > { %v1955_v52 = vpack.c.bf16 %v1862_v25, %v1858_v44 }
 0x366   : > { %v1963_v26 = vpack.c.bf16 %v1864_v38, %v1860_v5 }
 0x367   : > { %7922 = vmatprep.subr.bf16.mxu0 %v1955_v52 }
 0x368   : > { %v1867_v60 = vpop.f32.mrb[56].mxu0  ;;  %7923 = vmatpush3.bf16.msra.mxu0 %v1955_v52  ;;  %7954 = vmatprep.subr.bf16.mxu1 %v1963_v26 }
 0x369   : > { %v1869_v11 = vpop.f32.mrb[57].mxu0  ;;  %7955 = vmatpush3.bf16.msra.mxu1 %v1963_v26  ;;  %v1868_v58 = vadd.f32 %v1867_v60, %v10361_v40 }
 0x36a   : > { %v1871_v21 = vpop.f32.mrb[58].mxu0  ;;  %v1870_v3 = vadd.f32 %v1869_v11, %v10364_v41 }
 0x36b   : > { %v1872_v17 = vadd.f32 %v1871_v21, %v10361_v40  ;;  %v1873_v50 = vpop.f32.mrb[59].mxu0 }
 0x36c   : > { %v1874_v8 = vadd.f32 %v1873_v50, %v10364_v41 }
 0x36d   : > { %v1956_v51 = vpack.c.bf16 %v1872_v17, %v1868_v58 }
 0x36e   : > { %v1964_v27 = vpack.c.bf16 %v1874_v8, %v1870_v3 }
 0x36f   : > { %7924 = vmatprep.subr.bf16.mxu0 %v1956_v51 }
 0x370   : > { %v1877_v28 = vpop.f32.mrb[60].mxu0  ;;  %7925 = vmatpush3.bf16.msra.mxu0 %v1956_v51  ;;  %7956 = vmatprep.subr.bf16.mxu1 %v1964_v27 }
 0x371   : > { %v1879_v15 = vpop.f32.mrb[61].mxu0  ;;  %7957 = vmatpush3.bf16.msra.mxu1 %v1964_v27  ;;  %v1878_v43 = vadd.f32 %v1877_v28, %v10361_v40 }
 0x372   : > { %v1881_v46 = vpop.f32.mrb[62].mxu0  ;;  %v1880_v31 = vadd.f32 %v1879_v15, %v10364_v41 }
 0x373   : > { %v1882_v48 = vadd.f32 %v1881_v46, %v10361_v40  ;;  %v1883_v33 = vpop.f32.mrb[63].mxu0 }
 0x374   : > { %v1884_v39 = vadd.f32 %v1883_v33, %v10364_v41 }
 0x375   : > { %v1957_v36 = vpack.c.bf16 %v1882_v48, %v1878_v43 }
 0x376   : > { %v1965_v2 = vpack.c.bf16 %v1884_v39, %v1880_v31 }
 0x377   : > { %7926 = vmatprep.subr.bf16.mxu0 %v1957_v36 }
 0x378   : > { %7927 = vmatpush3.bf16.msra.mxu0 %v1957_v36  ;;  %7958 = vmatprep.subr.bf16.mxu1 %v1965_v2 }
 0x379   : > { %7959 = vmatpush3.bf16.msra.mxu1 %v1965_v2 }
 0x411   : > { %v10440_v20 = vpop.f32.mrb[32].mxu1 }
 0x412   : > { %v10442_v35 = vpop.f32.mrb[33].mxu1 }
 0x413   : > { %v10444_v13 = vpop.f32.mrb[64].mxu0  ;;  %2160 = vmax.xlane.f32.xlu0 %v10442_v35  ;;  %v10447_v40 = vpop.f32.mrb[34].mxu1 }
 0x414   : > { %v10449_v56 = vpop.f32.mrb[65].mxu0  ;;  %v10451_v30 = vpop.f32.mrb[35].mxu1 }
 0x415   : > { %v10453_v41 = vpop.f32.mrb[66].mxu0  ;;  %2162 = vmax.xlane.f32.xlu1 %v10451_v30 }
 0x416   : > { %v10456_v18 = vpop.f32.mrb[67].mxu0 }
 0x417   : > { %2196 = vmax.xlane.f32.xlu0 %v10444_v13 }
 0x419   : > { %v10459_v1 = vpop.f32.mrb[36].mxu1  ;;  %2198 = vmax.xlane.f32.xlu1 %v10453_v41 }
 0x41a   : > { %v10462_v49 = vpop.f32.mrb[37].mxu1 }
 0x41b   : > { %v10464_v47 = vpop.f32.mrb[68].mxu0  ;;  %v10466_v59 = vpop.f32.mrb[38].mxu1  ;;  %2192 = vmax.xlane.f32.xlu0 %v10449_v56 }
 0x41c   : > { %v10469_v45 = vpop.f32.mrb[69].mxu0  ;;  %v10471_v6 = vpop.f32.mrb[39].mxu1 }
 0x41d   : > { %v10473_v9 = vpop.f32.mrb[70].mxu0  ;;  %2194 = vmax.xlane.f32.xlu1 %v10456_v18 }
 0x41e   : > { %v10476_v42 = vpop.f32.mrb[71].mxu0 }
 0x41f   : > { %2164 = vmax.xlane.f32.xlu0 %v10440_v20 }
 0x421   : > { %v10479_v19 = vpop.f32.mrb[40].mxu1  ;;  %2166 = vmax.xlane.f32.xlu1 %v10447_v40 }
 0x422   : > { %v10482_v34 = vpop.f32.mrb[41].mxu1 }
 0x423   : > { %v10484_v24 = vpop.f32.mrb[72].mxu0  ;;  %v10486_v57 = vpop.f32.mrb[42].mxu1  ;;  %2168 = vmax.xlane.f32.xlu0 %v10462_v49 }
 0x424   : > { %v10489_v4 = vpop.f32.mrb[73].mxu0  ;;  %v10491_v7 = vpop.f32.mrb[43].mxu1 }
 0x425   : > { %v10493_v14 = vpop.f32.mrb[74].mxu0  ;;  %2170 = vmax.xlane.f32.xlu1 %v10471_v6 }
 0x426   : > { %v10496_v16 = vpop.f32.mrb[75].mxu0 }
 0x427   : > { %2204 = vmax.xlane.f32.xlu0 %v10464_v47 }
 0x429   : > { %2206 = vmax.xlane.f32.xlu1 %v10473_v9  ;;  %v10500_v32 = vpop.f32.mrb[44].mxu1 }
 0x42a   : > { %v10502_v62 = vpop.f32.mrb[45].mxu1 }
 0x42b   : > { %v10504_v55 = vpop.f32.mrb[76].mxu0  ;;  %2200 = vmax.xlane.f32.xlu0 %v10469_v45  ;;  %v10507_v29 = vpop.f32.mrb[46].mxu1 }
 0x42c   : > { %v10509_v23 = vpop.f32.mrb[77].mxu0  ;;  %v10511_v63 = vpop.f32.mrb[47].mxu1 }
 0x42d   : > { %v10513_v12 = vpop.f32.mrb[78].mxu0  ;;  %2202 = vmax.xlane.f32.xlu1 %v10476_v42 }
 0x42e   : > { %v10516_v10 = vpop.f32.mrb[79].mxu0 }
 0x42f   : > { %2172 = vmax.xlane.f32.xlu0 %v10459_v1 }
 0x431   : > { %2174 = vmax.xlane.f32.xlu1 %v10466_v59 }
 0x433   : > { %2176 = vmax.xlane.f32.xlu0 %v10482_v34 }
 0x435   : > { %2178 = vmax.xlane.f32.xlu1 %v10491_v7 }
 0x437   : > { %2212 = vmax.xlane.f32.xlu0 %v10484_v24 }
 0x439   : > { %2214 = vmax.xlane.f32.xlu1 %v10493_v14 }
 0x43b   : > { %2208 = vmax.xlane.f32.xlu0 %v10489_v4 }
 0x43d   : > { %2210 = vmax.xlane.f32.xlu1 %v10496_v16 }
 0x43f   : > { %2180 = vmax.xlane.f32.xlu0 %v10479_v19 }
 0x441   : > { %2182 = vmax.xlane.f32.xlu1 %v10486_v57 }
 0x443   : > { %2184 = vmax.xlane.f32.xlu0 %v10502_v62 }
 0x445   : > { %2186 = vmax.xlane.f32.xlu1 %v10511_v63 }
 0x447   : > { %2220 = vmax.xlane.f32.xlu0 %v10504_v55 }
 0x449   : > { %2222 = vmax.xlane.f32.xlu1 %v10513_v12 }
 0x44b   : > { %2216 = vmax.xlane.f32.xlu0 %v10509_v23 }
 0x44d   : > { %2218 = vmax.xlane.f32.xlu1 %v10516_v10 }
 0x44f   : > { %2188 = vmax.xlane.f32.xlu0 %v10500_v32 }
 0x451   : > { %2190 = vmax.xlane.f32.xlu1 %v10507_v29 }
 0x4a0   : > { %v2161_v0 = vpop.xlane.xlu0 %2160 }
 0x4a1   : > { %v2224_v44 = vsub.f32 %v10442_v35, %v2161_v0 }
 0x4a2   : > { %v2163_v25 = vpop.xlane.xlu1 %2162 }
 0x4a3   : > { %v2256_v53 = vmul.f32 1.442695, %v2224_v44  ;;  %v2225_v5 = vsub.f32 %v10451_v30, %v2163_v25 }
 0x4a4   : > { %v2197_v38 = vpop.xlane.xlu0 %2196 }
 0x4a5   : > { %8637 = vpow2.f32 %v2256_v53  ;;  %v2258_v52 = vmul.f32 1.442695, %v2225_v5  ;;  %v2242_v26 = vsub.f32 %v10444_v13, %v2197_v38 }
 0x4a6   : > { %v2199_v60 = vpop.xlane.xlu1 %2198 }
 0x4a7   : > { %8639 = vpow2.f32 %v2258_v52  ;;  %v2292_v11 = vmul.f32 1.442695, %v2242_v26  ;;  %v2243_v21 = vsub.f32 %v10453_v41, %v2199_v60 }
 0x4a8   : > { %v2193_v58 = vpop.xlane.xlu0 %2192 }
 0x4a9   : > { %8641 = vpow2.f32 %v2292_v11  ;;  %v2294_v17 = vmul.f32 1.442695, %v2243_v21  ;;  %v2240_v50 = vsub.f32 %v10449_v56, %v2193_v58 }
 0x4aa   : > { %v2195_v3 = vpop.xlane.xlu1 %2194 }
 0x4ab   : > { %8643 = vpow2.f32 %v2294_v17  ;;  %v2288_v8 = vmul.f32 1.442695, %v2240_v50  ;;  %v2241_v51 = vsub.f32 %v10456_v18, %v2195_v3 }
 0x4ac   : > { %v2165_v27 = vpop.xlane.xlu0 %2164 }
 0x4ad   : > { %8645 = vpow2.f32 %v2288_v8  ;;  %v2290_v28 = vmul.f32 1.442695, %v2241_v51  ;;  %v2226_v15 = vsub.f32 %v10440_v20, %v2165_v27 }
 0x4ae   : > { %v2167_v46 = vpop.xlane.xlu1 %2166 }
 0x4af   : > { %v10543_v43 = vpop.eup %8637  ;;  %8647 = vpow2.f32 %v2290_v28  ;;  %v2260_v48 = vmul.f32 1.442695, %v2226_v15  ;;  %v2227_v33 = vsub.f32 %v10447_v40, %v2167_v46 }
 0x4b0   : > { %v2169_v31 = vpop.xlane.xlu0 %2168  ;;  %2320 = vadd.xlane.f32.xlu0 %v10543_v43 }
 0x4b1   : > { %v10547_v39 = vpop.eup %8639  ;;  %8649 = vpow2.f32 %v2260_v48  ;;  %v2262_v36 = vmul.f32 1.442695, %v2227_v33  ;;  %v2228_v2 = vsub.f32 %v10462_v49, %v2169_v31 }
 0x4b2   : > { %v2171_v35 = vpop.xlane.xlu1 %2170  ;;  %2322 = vadd.xlane.f32.xlu1 %v10547_v39 }
 0x4b3   : > { %v10551_v20 = vpop.eup %8641  ;;  %8651 = vpow2.f32 %v2262_v36  ;;  %v2264_v13 = vmul.f32 1.442695, %v2228_v2  ;;  %v2229_v56 = vsub.f32 %v10471_v6, %v2171_v35 }
 0x4b4   : > { %v2205_v30 = vpop.xlane.xlu0 %2204  ;;  %2356 = vadd.xlane.f32.xlu0 %v10551_v20 }
 0x4b5   : > { %v10555_v40 = vpop.eup %8643  ;;  %8653 = vpow2.f32 %v2264_v13  ;;  %v2266_v41 = vmul.f32 1.442695, %v2229_v56  ;;  %v2246_v18 = vsub.f32 %v10464_v47, %v2205_v30 }
 0x4b6   : > { %v2207_v0 = vpop.xlane.xlu1 %2206  ;;  %2358 = vadd.xlane.f32.xlu1 %v10555_v40 }
 0x4b7   : > { %v10559_v49 = vpop.eup %8645  ;;  %8655 = vpow2.f32 %v2266_v41  ;;  %v2300_v44 = vmul.f32 1.442695, %v2246_v18  ;;  %v2247_v25 = vsub.f32 %v10473_v9, %v2207_v0 }
 0x4b8   : > { %v2201_v53 = vpop.xlane.xlu0 %2200  ;;  %2352 = vadd.xlane.f32.xlu0 %v10559_v49 }
 0x4b9   : > { %v10563_v6 = vpop.eup %8647  ;;  %8657 = vpow2.f32 %v2300_v44  ;;  %v2302_v5 = vmul.f32 1.442695, %v2247_v25  ;;  %v2244_v38 = vsub.f32 %v10469_v45, %v2201_v53 }
 0x4ba   : > { %v2203_v52 = vpop.xlane.xlu1 %2202  ;;  %2354 = vadd.xlane.f32.xlu1 %v10563_v6 }
 0x4bb   : > { %v10567_v47 = vpop.eup %8649  ;;  %8659 = vpow2.f32 %v2302_v5  ;;  %v2296_v26 = vmul.f32 1.442695, %v2244_v38  ;;  %v2245_v60 = vsub.f32 %v10476_v42, %v2203_v52 }
 0x4bc   : > { %v2173_v11 = vpop.xlane.xlu0 %2172  ;;  %2324 = vadd.xlane.f32.xlu0 %v10567_v47 }
 0x4bd   : > { %v10571_v9 = vpop.eup %8651  ;;  %8661 = vpow2.f32 %v2296_v26  ;;  %v2298_v21 = vmul.f32 1.442695, %v2245_v60  ;;  %v2230_v58 = vsub.f32 %v10459_v1, %v2173_v11 }
 0x4be   : > { %v2175_v17 = vpop.xlane.xlu1 %2174  ;;  %2326 = vadd.xlane.f32.xlu1 %v10571_v9 }
 0x4bf   : > { %v10575_v45 = vpop.eup %8653  ;;  %8663 = vpow2.f32 %v2298_v21  ;;  %v2268_v50 = vmul.f32 1.442695, %v2230_v58  ;;  %v2231_v3 = vsub.f32 %v10466_v59, %v2175_v17 }
 0x4c0   : > { %v2177_v8 = vpop.xlane.xlu0 %2176  ;;  %2328 = vadd.xlane.f32.xlu0 %v10575_v45 }
 0x4c1   : > { %v10579_v42 = vpop.eup %8655  ;;  %8665 = vpow2.f32 %v2268_v50  ;;  %v2270_v51 = vmul.f32 1.442695, %v2231_v3  ;;  %v2232_v27 = vsub.f32 %v10482_v34, %v2177_v8 }
 0x4c2   : > { %v2179_v28 = vpop.xlane.xlu1 %2178  ;;  %2330 = vadd.xlane.f32.xlu1 %v10579_v42 }
 0x4c3   : > { %v10583_v1 = vpop.eup %8657  ;;  %8667 = vpow2.f32 %v2270_v51  ;;  %v2272_v15 = vmul.f32 1.442695, %v2232_v27  ;;  %v2233_v46 = vsub.f32 %v10491_v7, %v2179_v28 }
 0x4c4   : > { %v2213_v48 = vpop.xlane.xlu0 %2212  ;;  %2364 = vadd.xlane.f32.xlu0 %v10583_v1 }
 0x4c5   : > { %v10587_v59 = vpop.eup %8659  ;;  %8669 = vpow2.f32 %v2272_v15  ;;  %v2274_v33 = vmul.f32 1.442695, %v2233_v46  ;;  %v2250_v31 = vsub.f32 %v10484_v24, %v2213_v48 }
 0x4c6   : > { %v2215_v36 = vpop.xlane.xlu1 %2214  ;;  %2366 = vadd.xlane.f32.xlu1 %v10587_v59 }
 0x4c7   : > { %v10591_v34 = vpop.eup %8661  ;;  %8671 = vpow2.f32 %v2274_v33  ;;  %v2308_v2 = vmul.f32 1.442695, %v2250_v31  ;;  %v2251_v35 = vsub.f32 %v10493_v14, %v2215_v36 }
 0x4c8   : > { %v2209_v13 = vpop.xlane.xlu0 %2208  ;;  %2360 = vadd.xlane.f32.xlu0 %v10591_v34 }
 0x4c9   : > { %v10595_v7 = vpop.eup %8663  ;;  %8673 = vpow2.f32 %v2308_v2  ;;  %v2310_v56 = vmul.f32 1.442695, %v2251_v35  ;;  %v2248_v30 = vsub.f32 %v10489_v4, %v2209_v13 }
 0x4ca   : > { %v2211_v41 = vpop.xlane.xlu1 %2210  ;;  %2362 = vadd.xlane.f32.xlu1 %v10595_v7 }
 0x4cb   : > { %v10599_v24 = vpop.eup %8665  ;;  %8675 = vpow2.f32 %v2310_v56  ;;  %v2304_v18 = vmul.f32 1.442695, %v2248_v30  ;;  %v2249_v0 = vsub.f32 %v10496_v16, %v2211_v41 }
 0x4cc   : > { %v2181_v44 = vpop.xlane.xlu0 %2180  ;;  %2332 = vadd.xlane.f32.xlu0 %v10599_v24 }
 0x4cd   : > { %v10603_v14 = vpop.eup %8667  ;;  %8677 = vpow2.f32 %v2304_v18  ;;  %v2306_v25 = vmul.f32 1.442695, %v2249_v0  ;;  %v2234_v53 = vsub.f32 %v10479_v19, %v2181_v44 }
 0x4ce   : > { %v2183_v5 = vpop.xlane.xlu1 %2182  ;;  %2334 = vadd.xlane.f32.xlu1 %v10603_v14 }
 0x4cf   : > { %v10607_v4 = vpop.eup %8669  ;;  %8679 = vpow2.f32 %v2306_v25  ;;  %v2276_v38 = vmul.f32 1.442695, %v2234_v53  ;;  %v2235_v52 = vsub.f32 %v10486_v57, %v2183_v5  ;;  %v8367_v5 = vld [vmem:[#allocation10 + $0x4] ss:$8 sps:$4 sm:$0xff]  }
 0x4d0   : > { %2336 = vadd.xlane.f32.xlu0 %v10607_v4  ;;  %v2185_v16 = vpop.xlane.xlu0 %2184  ;;  %2878 = vmatprep.subr.bf16.mxu0 %v8367_v5 }
 0x4d1   : > { %v10611_v26 = vpop.eup %8671  ;;  %8681 = vpow2.f32 %v2276_v38  ;;  %v2278_v60 = vmul.f32 1.442695, %v2235_v52  ;;  %v2236_v11 = vsub.f32 %v10502_v62, %v2185_v16 }
 0x4d2   : > { %2338 = vadd.xlane.f32.xlu1 %v10611_v26  ;;  %v2187_v19 = vpop.xlane.xlu1 %2186 }
 0x4d3   : > { %v10615_v21 = vpop.eup %8673  ;;  %8683 = vpow2.f32 %v2278_v60  ;;  %v2280_v58 = vmul.f32 1.442695, %v2236_v11  ;;  %v2237_v17 = vsub.f32 %v10511_v63, %v2187_v19 }
 0x4d4   : > { %2372 = vadd.xlane.f32.xlu0 %v10615_v21  ;;  %v2221_v57 = vpop.xlane.xlu0 %2220 }
 0x4d5   : > { %v10619_v50 = vpop.eup %8675  ;;  %8685 = vpow2.f32 %v2280_v58  ;;  %v2282_v3 = vmul.f32 1.442695, %v2237_v17  ;;  %v2254_v8 = vsub.f32 %v10504_v55, %v2221_v57 }
 0x4d6   : > { %2374 = vadd.xlane.f32.xlu1 %v10619_v50  ;;  %v2223_v62 = vpop.xlane.xlu1 %2222 }
 0x4d7   : > { %v10623_v51 = vpop.eup %8677  ;;  %8687 = vpow2.f32 %v2282_v3  ;;  %v2316_v27 = vmul.f32 1.442695, %v2254_v8  ;;  %v2255_v28 = vsub.f32 %v10513_v12, %v2223_v62 }
 0x4d8   : > { %2368 = vadd.xlane.f32.xlu0 %v10623_v51  ;;  %v2217_v63 = vpop.xlane.xlu0 %2216 }
 0x4d9   : > { %v10627_v15 = vpop.eup %8679  ;;  %8689 = vpow2.f32 %v2316_v27  ;;  %v2318_v46 = vmul.f32 1.442695, %v2255_v28  ;;  %v2252_v48 = vsub.f32 %v10509_v23, %v2217_v63 }
 0x4da   : > { %2370 = vadd.xlane.f32.xlu1 %v10627_v15  ;;  %v2219_v55 = vpop.xlane.xlu1 %2218 }
 0x4db   : > { %v10631_v33 = vpop.eup %8681  ;;  %8691 = vpow2.f32 %v2318_v46  ;;  %v2312_v31 = vmul.f32 1.442695, %v2252_v48  ;;  %v2253_v36 = vsub.f32 %v10516_v10, %v2219_v55 }
 0x4dc   : > { %2340 = vadd.xlane.f32.xlu0 %v10631_v33  ;;  %v2189_v12 = vpop.xlane.xlu0 %2188 }
 0x4dd   : > { %v10635_v2 = vpop.eup %8683  ;;  %8693 = vpow2.f32 %v2312_v31  ;;  %v2314_v35 = vmul.f32 1.442695, %v2253_v36  ;;  %v2238_v13 = vsub.f32 %v10500_v32, %v2189_v12 }
 0x4de   : > { %2342 = vadd.xlane.f32.xlu1 %v10635_v2  ;;  %v2191_v23 = vpop.xlane.xlu1 %2190 }
 0x4df   : > { %v10639_v56 = vpop.eup %8685  ;;  %8695 = vpow2.f32 %v2314_v35  ;;  %v2284_v30 = vmul.f32 1.442695, %v2238_v13  ;;  %v2239_v41 = vsub.f32 %v10507_v29, %v2191_v23 }
 0x4e0   : > { %2344 = vadd.xlane.f32.xlu0 %v10639_v56 }
 0x4e1   : > { %v10643_v10 = vpop.eup %8687  ;;  %8697 = vpow2.f32 %v2284_v30  ;;  %v2286_v18 = vmul.f32 1.442695, %v2239_v41 }
 0x4e2   : > { %2346 = vadd.xlane.f32.xlu1 %v10643_v10 }
 0x4e3   : > { %v10646_v0 = vpop.eup %8689  ;;  %8699 = vpow2.f32 %v2286_v18 }
 0x4e4   : > { %2380 = vadd.xlane.f32.xlu0 %v10646_v0 }
 0x4e5   : > { %v10649_v32 = vpop.eup %8691 }
 0x4e6   : > { %2382 = vadd.xlane.f32.xlu1 %v10649_v32 }
 0x4e7   : > { %v10652_v44 = vpop.eup %8693 }
 0x4e8   : > { %2376 = vadd.xlane.f32.xlu0 %v10652_v44 }
 0x4e9   : > { %v10655_v29 = vpop.eup %8695 }
 0x4ea   : > { %2378 = vadd.xlane.f32.xlu1 %v10655_v29 }
 0x4eb   : > { %v10658_v25 = vpop.eup %8697 }
 0x4ec   : > { %2348 = vadd.xlane.f32.xlu0 %v10658_v25 }
 0x4ed   : > { %v10661_v53 = vpop.eup %8699 }
 0x4ee   : > { %2350 = vadd.xlane.f32.xlu1 %v10661_v53 }
 0x53d   : > { %v2321_v38 = vpop.xlane.xlu0 %2320 }
 0x53e   : > { %8701 = vrcp.f32 %v2321_v38 }
 0x53f   : > { %v2323_v52 = vpop.xlane.xlu1 %2322 }
 0x540   : > { %8703 = vrcp.f32 %v2323_v52 }
 0x541   : > { %v2357_v16 = vpop.xlane.xlu0 %2356 }
 0x543   : > { %v2359_v60 = vpop.xlane.xlu1 %2358 }
 0x544   : > { %8705 = vrcp.f32 %v2359_v60 }
 0x545   : > { %v2353_v11 = vpop.xlane.xlu0 %2352 }
 0x546   : > { %8707 = vrcp.f32 %v2353_v11 }
 0x547   : > { %8709 = vrcp.f32 %v2357_v16  ;;  %v2355_v19 = vpop.xlane.xlu1 %2354 }
 0x548   : > { %v8702_v58 = vpop.eup %8701  ;;  %8711 = vrcp.f32 %v2355_v19 }
 0x549   : > { %v2325_v17 = vpop.xlane.xlu0 %2324  ;;  %v2416_v8 = vmul.f32 %v8702_v58, %v10543_v43 }
 0x54a   : > { %v8704_v57 = vpop.eup %8703  ;;  %8713 = vrcp.f32 %v2325_v17 }
 0x54b   : > { %v2327_v3 = vpop.xlane.xlu1 %2326  ;;  %v2417_v62 = vmul.f32 %v8704_v57, %v10547_v39 }
 0x54c   : > { %8715 = vrcp.f32 %v2327_v3  ;;  %v8373_v3 = vld [vmem:[#allocation10 + $0x24] ss:$8 sps:$4 sm:$0xff]  }
 0x54d   : > { %v2329_v27 = vpop.xlane.xlu0 %2328  ;;  %v2448_v28 = vpack.c.bf16 %v2417_v62, %v2416_v8 }
 0x54e   : > { %8717 = vrcp.f32 %v2329_v27  ;;  %v8706_v63 = vpop.eup %8705 }
 0x54f   : > { %7928 = vmatprep.mubr.bf16.mxu0 %v2448_v28  ;;  %v2331_v46 = vpop.xlane.xlu1 %2330  ;;  %v2435_v12 = vmul.f32 %v8706_v63, %v10555_v40  ;;  %v8371_v28 = vld [vmem:[#allocation10 + $0x20] ss:$8 sps:$4 sm:$0xff]  }
 0x550   : > { %v8708_v48 = vpop.eup %8707  ;;  %8719 = vrcp.f32 %v2331_v46 }
 0x551   : > { %v8710_v55 = vpop.eup %8709  ;;  %v2365_v31 = vpop.xlane.xlu0 %2364  ;;  %v2432_v13 = vmul.f32 %v8708_v48, %v10559_v49  ;;  %v8365_v49 = vld [vmem:[#allocation10] ss:$8 sps:$4 sm:$0xff]  }
 0x552   : > { %v8712_v36 = vpop.eup %8711  ;;  %v2434_v23 = vmul.f32 %v8710_v55, %v10551_v20  ;;  %v8370_v20 = vld [vmem:[#allocation10 + $0x14] ss:$8 sps:$4 sm:$0xff]  }
 0x553   : > { %v2367_v35 = vpop.xlane.xlu1 %2366  ;;  %v2433_v43 = vmul.f32 %v8712_v36, %v10563_v6 }
 0x554   : > { %v8714_v39 = vpop.eup %8713  ;;  %8721 = vrcp.f32 %v2367_v35  ;;  %v2457_v5 = vpack.c.bf16 %v2435_v12, %v2434_v23  ;;  %v8379_v23 = vld [vmem:[#allocation10 + $0x44] ss:$8 sps:$4 sm:$0xff]  }
 0x555   : > { %v2361_v30 = vpop.xlane.xlu0 %2360  ;;  %v2456_v41 = vpack.c.bf16 %v2433_v43, %v2432_v13  ;;  %v2418_v38 = vmul.f32 %v8714_v39, %v10567_v47  ;;  %v8374_v13 = vld [vmem:[#allocation10 + $0x30] ss:$8 sps:$4 sm:$0xff]  }
 0x556   : > { %v8716_v18 = vpop.eup %8715  ;;  %8723 = vrcp.f32 %v2361_v30 }
 0x557   : > { %v2419_v52 = vmul.f32 %v8716_v18, %v10571_v9  ;;  %8725 = vrcp.f32 %v2365_v31  ;;  %7960 = vmatprep.mubr.bf16.mxu1 %v2456_v41  ;;  %v2363_v40 = vpop.xlane.xlu1 %2362  ;;  %v8368_v9 = vld [vmem:[#allocation10 + $0x10] ss:$8 sps:$4 sm:$0xff]  }
 0x558   : > { %v8718_v16 = vpop.eup %8717  ;;  %8727 = vrcp.f32 %v2363_v40  ;;  %7961 = vmatmul.mubr.bf16.vlgmr.msra.gmra.mrb[48].mxu1 %v2457_v5 }
 0x559   : > { %v2333_v6 = vpop.xlane.xlu0 %2332  ;;  %v2449_v60 = vpack.c.bf16 %v2419_v52, %v2418_v38  ;;  %v2420_v58 = vmul.f32 %v8718_v16, %v10575_v45  ;;  %v8376_v45 = vld [vmem:[#allocation10 + $0x34] ss:$8 sps:$4 sm:$0xff]  }
 0x55a   : > { %v8720_v11 = vpop.eup %8719  ;;  %8729 = vrcp.f32 %v2333_v6  ;;  %v8382_v52 = vld [vmem:[#allocation10 + $0x54] ss:$8 sps:$4 sm:$0xff]  }
 0x55b   : > { %7929 = vmatmul.mubr.bf16.vlgmr.msra.gmra.mrb[80].mxu0 %v2449_v60  ;;  %v2335_v19 = vpop.xlane.xlu1 %2334  ;;  %v2421_v47 = vmul.f32 %v8720_v11, %v10579_v42 }
 0x55c   : > { %8731 = vrcp.f32 %v2335_v19  ;;  %2879 = vmatpush1.bf16.msra.mxu0 %v8365_v49 }
 0x55d   : > { %v2337_v17 = vpop.xlane.xlu0 %2336  ;;  %v2450_v57 = vpack.c.bf16 %v2421_v47, %v2420_v58  ;;  %2880 = vmatprep.subr.bf16.mxu0 %v8370_v20  ;;  %v8385_v20 = vld [vmem:[#allocation10 + $0x64] ss:$8 sps:$4 sm:$0xff]   ;;  %v8383_v47 = vld [vmem:[#allocation10 + $0x60] ss:$8 sps:$4 sm:$0xff]  }
 0x55e   : > { %8733 = vrcp.f32 %v2337_v17  ;;  %v8722_v8 = vpop.eup %8721 }
 0x55f   : > { %7932 = vmatprep.mubr.bf16.mxu0 %v2450_v57  ;;  %v2339_v62 = vpop.xlane.xlu1 %2338  ;;  %v2439_v48 = vmul.f32 %v8722_v8, %v10587_v59 }
 0x560   : > { %v8724_v27 = vpop.eup %8723  ;;  %8735 = vrcp.f32 %v2339_v62  ;;  %2881 = vmatpush1.bf16.msra.mxu0 %v8368_v9 }
 0x561   : > { %v8726_v63 = vpop.eup %8725  ;;  %v2373_v46 = vpop.xlane.xlu0 %2372  ;;  %2882 = vmatprep.subr.bf16.mxu0 %v8373_v3  ;;  %v2436_v31 = vmul.f32 %v8724_v27, %v10591_v34 }
 0x562   : > { %v8728_v42 = vpop.eup %8727  ;;  %v2438_v35 = vmul.f32 %v8726_v63, %v10583_v1  ;;  %v8377_v1 = vld [vmem:[#allocation10 + $0x40] ss:$8 sps:$4 sm:$0xff]   ;;  %v8386_v63 = vld [vmem:[#allocation10 + $0x70] ss:$8 sps:$4 sm:$0xff]  }
 0x563   : > { %v2375_v55 = vpop.xlane.xlu1 %2374  ;;  %v2437_v36 = vmul.f32 %v8728_v42, %v10595_v7  ;;  %v8391_v42 = vld [vmem:[#allocation10 + $0x84] ss:$8 sps:$4 sm:$0xff]  }
 0x564   : > { %v8730_v12 = vpop.eup %8729  ;;  %2883 = vmatpush1.bf16.msra.mxu0 %v8371_v28  ;;  %8737 = vrcp.f32 %v2375_v55  ;;  %v2459_v41 = vpack.c.bf16 %v2439_v48, %v2438_v35  ;;  %v8394_v35 = vld [vmem:[#allocation10 + $0x94] ss:$8 sps:$4 sm:$0xff]  }
 0x565   : > { %v2369_v43 = vpop.xlane.xlu0 %2368  ;;  %v2458_v39 = vpack.c.bf16 %v2437_v36, %v2436_v31  ;;  %2884 = vmatprep.subr.bf16.mxu0 %v8376_v45  ;;  %v2422_v34 = vmul.f32 %v8730_v12, %v10599_v24  ;;  %v8380_v24 = vld [vmem:[#allocation10 + $0x50] ss:$8 sps:$4 sm:$0xff]  }
 0x566   : > { %v8732_v30 = vpop.eup %8731  ;;  %8739 = vrcp.f32 %v2369_v43 }
 0x567   : > { %8741 = vrcp.f32 %v2373_v46  ;;  %7964 = vmatprep.mubr.bf16.mxu1 %v2458_v39  ;;  %v2371_v59 = vpop.xlane.xlu1 %2370  ;;  %v2423_v7 = vmul.f32 %v8732_v30, %v10603_v14  ;;  %v8397_v30 = vld [vmem:[#allocation10 + $0xa4] ss:$8 sps:$4 sm:$0xff]  }
 0x568   : > { %v8734_v18 = vpop.eup %8733  ;;  %8743 = vrcp.f32 %v2371_v59  ;;  %7965 = vmatmul.mubr.bf16.gmra.mrb[52].mxu1 %v2459_v41  ;;  %2885 = vmatpush1.bf16.msra.mxu0 %v8374_v13 }
 0x569   : > { %v2341_v5 = vpop.xlane.xlu0 %2340  ;;  %v2451_v38 = vpack.c.bf16 %v2423_v7, %v2422_v34  ;;  %2886 = vmatprep.subr.bf16.mxu0 %v8379_v23  ;;  %v2424_v49 = vmul.f32 %v8734_v18, %v10607_v4  ;;  %v8388_v4 = vld [vmem:[#allocation10 + $0x74] ss:$8 sps:$4 sm:$0xff]   ;;  %v8395_v34 = vld [vmem:[#allocation10 + $0xa0] ss:$8 sps:$4 sm:$0xff]  }
 0x56a   : > { %v8736_v40 = vpop.eup %8735  ;;  %8745 = vrcp.f32 %v2341_v5  ;;  %v8400_v18 = vld [vmem:[#allocation10 + $0xb4] ss:$8 sps:$4 sm:$0xff]  }
 0x56b   : > { %7933 = vmatmul.mubr.bf16.gmra.mrb[84].mxu0 %v2451_v38  ;;  %v2343_v16 = vpop.xlane.xlu1 %2342  ;;  %v2425_v6 = vmul.f32 %v8736_v40, %v10611_v26  ;;  %v8398_v40 = vld [vmem:[#allocation10 + $0xb0] ss:$8 sps:$4 sm:$0xff]  }
 0x56c   : > { %8747 = vrcp.f32 %v2343_v16  ;;  %2887 = vmatpush1.bf16.msra.mxu0 %v8377_v1 }
 0x56d   : > { %v2345_v14 = vpop.xlane.xlu0 %2344  ;;  %v2452_v60 = vpack.c.bf16 %v2425_v6, %v2424_v49  ;;  %2888 = vmatprep.subr.bf16.mxu0 %v8382_v52  ;;  %v8403_v49 = vld [vmem:[#allocation10 + $0xc4] ss:$8 sps:$4 sm:$0xff]  }
 0x56e   : > { %8749 = vrcp.f32 %v2345_v14  ;;  %v8738_v11 = vpop.eup %8737 }
 0x56f   : > { %7936 = vmatprep.mubr.bf16.mxu0 %v2452_v60  ;;  %v2347_v19 = vpop.xlane.xlu1 %2346  ;;  %v2443_v57 = vmul.f32 %v8738_v11, %v10619_v50  ;;  %v8409_v11 = vld [vmem:[#allocation10 + $0xe4] ss:$8 sps:$4 sm:$0xff]  }
 0x570   : > { %v8740_v58 = vpop.eup %8739  ;;  %8751 = vrcp.f32 %v2347_v19  ;;  %2889 = vmatpush1.bf16.msra.mxu0 %v8380_v24  ;;  %v8410_v19 = vld [vmem:[#allocation10 + $0xf0] ss:$8 sps:$4 sm:$0xff]  }
 0x571   : > { %v8742_v9 = vpop.eup %8741  ;;  %v2381_v17 = vpop.xlane.xlu0 %2380  ;;  %2890 = vmatprep.subr.bf16.mxu0 %v8385_v20  ;;  %v2440_v8 = vmul.f32 %v8740_v58, %v10623_v51  ;;  %v8407_v20 = vld [vmem:[#allocation10 + $0xe0] ss:$8 sps:$4 sm:$0xff]   ;;  %v8412_v58 = vld [vmem:[#allocation10 + $0xf4] ss:$8 sps:$4 sm:$0xff]  }
 0x572   : > { %v8744_v26 = vpop.eup %8743  ;;  %v2442_v28 = vmul.f32 %v8742_v9, %v10615_v21  ;;  %v8389_v21 = vld [vmem:[#allocation10 + $0x80] ss:$8 sps:$4 sm:$0xff]  }
 0x573   : > { %v2383_v3 = vpop.xlane.xlu1 %2382  ;;  %v2441_v62 = vmul.f32 %v8744_v26, %v10627_v15 }
 0x574   : > { %v8746_v27 = vpop.eup %8745  ;;  %2891 = vmatpush1.bf16.msra.mxu0 %v8383_v47  ;;  %8753 = vrcp.f32 %v2383_v3  ;;  %v2461_v55 = vpack.c.bf16 %v2443_v57, %v2442_v28 }
 0x575   : > { %v2377_v46 = vpop.xlane.xlu0 %2376  ;;  %v2460_v45 = vpack.c.bf16 %v2441_v62, %v2440_v8  ;;  %2892 = vmatprep.subr.bf16.mxu0 %v8388_v4  ;;  %v2426_v51 = vmul.f32 %v8746_v27, %v10631_v33  ;;  %v8392_v33 = vld [vmem:[#allocation10 + $0x90] ss:$8 sps:$4 sm:$0xff]  }
 0x576   : > { %v8748_v48 = vpop.eup %8747  ;;  %8755 = vrcp.f32 %v2377_v46 }
 0x577   : > { %8757 = vrcp.f32 %v2381_v17  ;;  %7968 = vmatprep.mubr.bf16.mxu1 %v2460_v45  ;;  %v2379_v50 = vpop.xlane.xlu1 %2378  ;;  %v2427_v15 = vmul.f32 %v8748_v48, %v10635_v2 }
 0x578   : > { %v8750_v31 = vpop.eup %8749  ;;  %8759 = vrcp.f32 %v2379_v50  ;;  %7969 = vmatmul.mubr.bf16.gmra.mrb[56].mxu1 %v2461_v55  ;;  %2893 = vmatpush1.bf16.msra.mxu0 %v8386_v63 }
 0x579   : > { %v2349_v36 = vpop.xlane.xlu0 %2348  ;;  %v2453_v12 = vpack.c.bf16 %v2427_v15, %v2426_v51  ;;  %2894 = vmatprep.subr.bf16.mxu0 %v8391_v42  ;;  %v2428_v39 = vmul.f32 %v8750_v31, %v10639_v56 }
 0x57a   : > { %v8752_v13 = vpop.eup %8751  ;;  %8761 = vrcp.f32 %v2349_v36 }
 0x57b   : > { %7937 = vmatmul.mubr.bf16.gmra.mrb[88].mxu0 %v2453_v12  ;;  %v2351_v43 = vpop.xlane.xlu1 %2350  ;;  %v2429_v23 = vmul.f32 %v8752_v13, %v10643_v10 }
 0x57c   : > { %8763 = vrcp.f32 %v2351_v43  ;;  %2895 = vmatpush1.bf16.msra.mxu0 %v8389_v21 }
 0x57d   : > { %v2454_v2 = vpack.c.bf16 %v2429_v23, %v2428_v39  ;;  %2896 = vmatprep.subr.bf16.mxu0 %v8394_v35 }
 0x57e   : > { %v8754_v41 = vpop.eup %8753 }
 0x57f   : > { %7940 = vmatprep.mubr.bf16.mxu0 %v2454_v2  ;;  %v2447_v5 = vmul.f32 %v8754_v41, %v10649_v32  ;;  %v8401_v32 = vld [vmem:[#allocation10 + $0xc0] ss:$8 sps:$4 sm:$0xff]  }
 0x580   : > { %v8756_v59 = vpop.eup %8755  ;;  %2897 = vmatpush1.bf16.msra.mxu0 %v8392_v33 }
 0x581   : > { %v8758_v7 = vpop.eup %8757  ;;  %2898 = vmatprep.subr.bf16.mxu0 %v8397_v30  ;;  %v2444_v56 = vmul.f32 %v8756_v59, %v10652_v44 }
 0x582   : > { %v8760_v1 = vpop.eup %8759  ;;  %v2446_v52 = vmul.f32 %v8758_v7, %v10646_v0  ;;  %v8404_v0 = vld [vmem:[#allocation10 + $0xd0] ss:$8 sps:$4 sm:$0xff]  }
 0x583   : > { %v2445_v10 = vmul.f32 %v8760_v1, %v10655_v29  ;;  %v8406_v29 = vld [vmem:[#allocation10 + $0xd4] ss:$8 sps:$4 sm:$0xff]  }
 0x584   : > { %v8762_v38 = vpop.eup %8761  ;;  %2899 = vmatpush1.bf16.msra.mxu0 %v8395_v34  ;;  %v2463_v24 = vpack.c.bf16 %v2447_v5, %v2446_v52 }
 0x585   : > { %v2462_v16 = vpack.c.bf16 %v2445_v10, %v2444_v56  ;;  %2900 = vmatprep.subr.bf16.mxu0 %v8400_v18  ;;  %v2430_v14 = vmul.f32 %v8762_v38, %v10658_v25 }
 0x586   : > { %v8764_v6 = vpop.eup %8763 }
 0x587   : > { %7972 = vmatprep.mubr.bf16.mxu1 %v2462_v16  ;;  %v2431_v60 = vmul.f32 %v8764_v6, %v10661_v53  ;;  %v2706_v6 = vld [vmem:[%s13284_s6] sm:$0x3] }
 0x588   : > { %7973 = vmatmul.mubr.bf16.gmra.mrb[60].mxu1 %v2463_v24  ;;  %2901 = vmatpush1.bf16.msra.mxu0 %v8398_v40  ;;  %v10700_v24 = vrot.slane %v2706_v6, %v10018_v61 }
 0x589   : > { %v2455_v44 = vpack.c.bf16 %v2431_v60, %v2430_v14  ;;  %2902 = vmatprep.subr.bf16.mxu0 %v8403_v49  ;;  %v10703_v14 = vrot.slane %v2706_v6, %v10015_v54 }
 0x58b   : > { %7941 = vmatmul.mubr.bf16.gmra.mrb[92].mxu0 %v2455_v44 }
 0x58c   : > { %2903 = vmatpush1.bf16.msra.mxu0 %v8401_v32 }
 0x58d   : > { %2904 = vmatprep.subr.bf16.mxu0 %v8406_v29 }
 0x590   : > { %2905 = vmatpush1.bf16.msra.mxu0 %v8404_v0 }
 0x591   : > { %2906 = vmatprep.subr.bf16.mxu0 %v8409_v11 }
 0x594   : > { %2907 = vmatpush1.bf16.msra.mxu0 %v8407_v20  ;;  %v9053_v20 = vld [vmem:[%s9706_s21] sm:$0xff] }
 0x595   : > { %2908 = vmatprep.subr.bf16.mxu0 %v8412_v58 }
 0x598   : > { %2909 = vmatpush1.bf16.msra.mxu0 %v8410_v19 }
 0x62b   : > { %v7962_v25 = vpop.f32.mrb[48].mxu1 }
 0x62c   : > { %v2595_v53 = vpop.f32.mrb[49].mxu1 }
 0x62d   : > { %v7963_v47 = vpop.f32.mrb[50].mxu1 }
 0x62e   : > { %v2661_v9 = vpack.c.bf16 %v7963_v47, %v7962_v25  ;;  %v7930_v17 = vpop.f32.mrb[80].mxu0  ;;  %v2598_v4 = vpop.f32.mrb[51].mxu1  ;;  %v9054_v25 = vld [vmem:[%s9706_s21 + $0x8] sm:$0xff] }
 0x62f   : > { %v2659_v26 = vpack.c.bf16 %v2598_v4, %v2595_v53  ;;  %v2498_v57 = vpop.f32.mrb[81].mxu0  ;;  %v9056_v4 = vld [vmem:[%s9706_s21 + $0x18] sm:$0xff] }
 0x630   : > { %v7931_v3 = vpop.f32.mrb[82].mxu0 }
 0x631   : > { %v2660_v8 = vpack.c.bf16 %v7931_v3, %v7930_v17  ;;  %v2501_v62 = vpop.f32.mrb[83].mxu0  ;;  %2910 = vmatprep.mubr.bf16.mxu0 %v2659_v26 }
 0x632   : > { %v2658_v27 = vpack.c.bf16 %v2501_v62, %v2498_v57 }
 0x634   : > { %2911 = vmatmul.mubr.bf16.vlgmr.msra.gmra.mrb[96].mxu0 %v2658_v27 }
 0x635   : > { %2920 = vmatprep.mubr.bf16.mxu0 %v2661_v9  ;;  %v9055_v9 = vld [vmem:[%s9706_s21 + $0x10] sm:$0xff] }
 0x63b   : > { %v7966_v28 = vpop.f32.mrb[52].mxu1 }
 0x63c   : > { %v2611_v63 = vpop.f32.mrb[53].mxu1  ;;  %2921 = vmatmul.mubr.bf16.gmra.mrb[100].mxu0 %v2660_v8 }
 0x63d   : > { %v7967_v46 = vpop.f32.mrb[54].mxu1 }
 0x63e   : > { %v2665_v45 = vpack.c.bf16 %v7967_v46, %v7966_v28  ;;  %v7934_v42 = vpop.f32.mrb[84].mxu0  ;;  %v2614_v48 = vpop.f32.mrb[55].mxu1  ;;  %v9057_v46 = vld [vmem:[%s9706_s21 + $0x20] sm:$0xff] }
 0x63f   : > { %v2663_v55 = vpack.c.bf16 %v2614_v48, %v2611_v63  ;;  %v2514_v50 = vpop.f32.mrb[85].mxu0 }
 0x640   : > { %v7935_v51 = vpop.f32.mrb[86].mxu0 }
 0x641   : > { %v2664_v15 = vpack.c.bf16 %v7935_v51, %v7934_v42  ;;  %v2517_v31 = vpop.f32.mrb[87].mxu0  ;;  %2930 = vmatprep.mubr.bf16.mxu0 %v2663_v55  ;;  %v9058_v55 = vld [vmem:[%s9706_s21 + $0x28] sm:$0xff] }
 0x642   : > { %v2662_v21 = vpack.c.bf16 %v2517_v31, %v2514_v50 }
 0x644   : > { %2931 = vmatmul.mubr.bf16.gmra.mrb[104].mxu0 %v2662_v21  ;;  %v9060_v21 = vld [vmem:[%s9706_s21 + $0x38] sm:$0xff] }
 0x645   : > { %2940 = vmatprep.mubr.bf16.mxu0 %v2665_v45 }
 0x64b   : > { %v7970_v36 = vpop.f32.mrb[56].mxu1 }
 0x64c   : > { %v2627_v12 = vpop.f32.mrb[57].mxu1  ;;  %2941 = vmatmul.mubr.bf16.gmra.mrb[108].mxu0 %v2664_v15  ;;  %v9059_v15 = vld [vmem:[%s9706_s21 + $0x30] sm:$0xff] }
 0x64d   : > { %v7971_v35 = vpop.f32.mrb[58].mxu1 }
 0x64e   : > { %v2669_v13 = vpack.c.bf16 %v7971_v35, %v7970_v36  ;;  %v7938_v43 = vpop.f32.mrb[88].mxu0  ;;  %v2630_v39 = vpop.f32.mrb[59].mxu1 }
 0x64f   : > { %v2667_v23 = vpack.c.bf16 %v2630_v39, %v2627_v12  ;;  %v2530_v33 = vpop.f32.mrb[89].mxu0 }
 0x650   : > { %v7939_v2 = vpop.f32.mrb[90].mxu0 }
 0x651   : > { %v2668_v30 = vpack.c.bf16 %v7939_v2, %v7938_v43  ;;  %v2533_v41 = vpop.f32.mrb[91].mxu0  ;;  %2950 = vmatprep.mubr.bf16.mxu0 %v2667_v23  ;;  %v9061_v2 = vld [vmem:[%s9706_s21 + $0x40] sm:$0xff] }
 0x652   : > { %v2666_v59 = vpack.c.bf16 %v2533_v41, %v2530_v33 }
 0x654   : > { %2951 = vmatmul.mubr.bf16.gmra.mrb[112].mxu0 %v2666_v59 }
 0x655   : > { %2960 = vmatprep.mubr.bf16.mxu0 %v2669_v13 }
 0x65b   : > { %v7974_v34 = vpop.f32.mrb[60].mxu1 }
 0x65c   : > { %v2643_v7 = vpop.f32.mrb[61].mxu1  ;;  %2961 = vmatmul.mubr.bf16.gmra.mrb[116].mxu0 %v2668_v30 }
 0x65d   : > { %v7975_v18 = vpop.f32.mrb[62].mxu1 }
 0x65e   : > { %v2673_v1 = vpack.c.bf16 %v7975_v18, %v7974_v34  ;;  %v7942_v5 = vpop.f32.mrb[92].mxu0  ;;  %v2646_v56 = vpop.f32.mrb[63].mxu1  ;;  %v9062_v34 = vld [vmem:[%s9706_s21 + $0x48] sm:$0xff] }
 0x65f   : > { %v2671_v10 = vpack.c.bf16 %v2646_v56, %v2643_v7  ;;  %v2546_v38 = vpop.f32.mrb[93].mxu0  ;;  %v9064_v56 = vld [vmem:[%s9706_s21 + $0x58] sm:$0xff] }
 0x660   : > { %v7943_v52 = vpop.f32.mrb[94].mxu0 }
 0x661   : > { %v2672_v40 = vpack.c.bf16 %v7943_v52, %v7942_v5  ;;  %v2549_v16 = vpop.f32.mrb[95].mxu0  ;;  %2970 = vmatprep.mubr.bf16.mxu0 %v2671_v10 }
 0x662   : > { %v2670_v49 = vpack.c.bf16 %v2549_v16, %v2546_v38 }
 0x664   : > { %2971 = vmatmul.mubr.bf16.gmra.mrb[120].mxu0 %v2670_v49 }
 0x665   : > { %2980 = vmatprep.mubr.bf16.mxu0 %v2673_v1  ;;  %v9063_v1 = vld [vmem:[%s9706_s21 + $0x50] sm:$0xff] }
 0x66c   : > { %2981 = vmatmul.mubr.bf16.gmra.mrb[124].mxu0 %v2672_v40 }
 0x707   : > { %v2912_v60 = vpop.f32.mrb[96].mxu0 }
 0x708   : > { %v2913_v32 = vadd.f32 %v2912_v60, %v10700_v24  ;;  %v2914_v44 = vpop.f32.mrb[97].mxu0 }
 0x709   : > { %v2915_v29 = vadd.f32 %v2914_v44, %v10703_v14  ;;  %v2916_v0 = vpop.f32.mrb[98].mxu0 }
 0x70a   : > { %v10708_v11 = vadd.f32 %v9053_v20, %v2913_v32  ;;  %v2917_v19 = vadd.f32 %v2916_v0, %v10700_v24  ;;  %v2918_v58 = vpop.f32.mrb[99].mxu0  ;;  %v9065_v32 = vld [vmem:[%s9706_s21 + $0x60] sm:$0xff]  ;;  %v9066_v20 = vld [vmem:[%s9706_s21 + $0x68] sm:$0xff] }
 0x70b   : > { %v10712_v53 = vadd.f32 %v9054_v25, %v2915_v29  ;;  %v2919_v47 = vadd.f32 %v2918_v58, %v10703_v14  ;;  %v9067_v25 = vld [vmem:[%s9706_s21 + $0x70] sm:$0xff] }
 0x70c   : > { %13459 = vst [vmem:[#allocation24_spill] sm:$0xff] %v10708_v11  ;;  %v10716_v17 = vadd.f32 %v9055_v9, %v2917_v19  ;;  %v9068_v9 = vld [vmem:[%s9706_s21 + $0x78] sm:$0xff] }
 0x70d   : > { %13460 = vst [vmem:[#allocation25_spill] sm:$0xff] %v10712_v53  ;;  %v10719_v26 = vadd.f32 %v9056_v4, %v2919_v47  ;;  %v3025_v57 = vadd.f32 %v10712_v53, %v10708_v11 }
 0x70e   : > { %13461 = vst [vmem:[#allocation26_spill] sm:$0xff] %v10716_v17 }
 0x70f   : > { %13462 = vst [vmem:[#allocation27_spill] sm:$0xff] %v10719_v26  ;;  %v2922_v3 = vpop.f32.mrb[100].mxu0  ;;  %3026 = vadd.xlane.f32.xlu0 %v3025_v57  ;;  %v3028_v8 = vadd.f32 %v10719_v26, %v10716_v17 }
 0x710   : > { %v2923_v62 = vadd.f32 %v2922_v3, %v10700_v24  ;;  %v2924_v27 = vpop.f32.mrb[101].mxu0 }
 0x711   : > { %v2925_v28 = vadd.f32 %v2924_v27, %v10703_v14  ;;  %v2926_v63 = vpop.f32.mrb[102].mxu0  ;;  %3029 = vadd.xlane.f32.xlu1 %v3028_v8 }
 0x712   : > { %v10728_v45 = vadd.f32 %v9057_v46, %v2923_v62  ;;  %v2927_v42 = vadd.f32 %v2926_v63, %v10700_v24  ;;  %v2928_v48 = vpop.f32.mrb[103].mxu0  ;;  %v9069_v46 = vld [vmem:[%s9706_s21 + $0x80] sm:$0xff] }
 0x713   : > { %v10732_v50 = vadd.f32 %v9058_v55, %v2925_v28  ;;  %v2929_v51 = vadd.f32 %v2928_v48, %v10703_v14 }
 0x714   : > { %13463 = vst [vmem:[#allocation28_spill] sm:$0xff] %v10728_v45  ;;  %v10736_v31 = vadd.f32 %v9059_v15, %v2927_v42 }
 0x715   : > { %13464 = vst [vmem:[#allocation29_spill] sm:$0xff] %v10732_v50  ;;  %v10739_v36 = vadd.f32 %v9060_v21, %v2929_v51  ;;  %v3031_v12 = vadd.f32 %v10732_v50, %v10728_v45  ;;  %v9070_v51 = vld [vmem:[%s9706_s21 + $0x88] sm:$0xff] }
 0x716   : > { %13465 = vst [vmem:[#allocation30_spill] sm:$0xff] %v10736_v31 }
 0x717   : > { %13466 = vst [vmem:[#allocation31_spill] sm:$0xff] %v10739_v36  ;;  %v2932_v35 = vpop.f32.mrb[104].mxu0  ;;  %3032 = vadd.xlane.f32.xlu0 %v3031_v12  ;;  %v3034_v13 = vadd.f32 %v10739_v36, %v10736_v31  ;;  %v9071_v12 = vld [vmem:[%s9706_s21 + $0x90] sm:$0xff] }
 0x718   : > { %v2933_v43 = vadd.f32 %v2932_v35, %v10700_v24  ;;  %v2934_v39 = vpop.f32.mrb[105].mxu0 }
 0x719   : > { %v2935_v23 = vadd.f32 %v2934_v39, %v10703_v14  ;;  %v2936_v33 = vpop.f32.mrb[106].mxu0  ;;  %3035 = vadd.xlane.f32.xlu1 %v3034_v13  ;;  %v9072_v13 = vld [vmem:[%s9706_s21 + $0x98] sm:$0xff] }
 0x71a   : > { %v10748_v30 = vadd.f32 %v9061_v2, %v2933_v43  ;;  %v2937_v41 = vadd.f32 %v2936_v33, %v10700_v24  ;;  %v2938_v59 = vpop.f32.mrb[107].mxu0 }
 0x71b   : > { %v10752_v7 = vadd.f32 %v9062_v34, %v2935_v23  ;;  %v2939_v18 = vadd.f32 %v2938_v59, %v10703_v14 }
 0x71c   : > { %13467 = vst [vmem:[#allocation32_spill] sm:$0xff] %v10748_v30  ;;  %v10756_v5 = vadd.f32 %v9063_v1, %v2937_v41 }
 0x71d   : > { %13468 = vst [vmem:[#allocation33_spill] sm:$0xff] %v10752_v7  ;;  %v10759_v10 = vadd.f32 %v9064_v56, %v2939_v18  ;;  %v3037_v38 = vadd.f32 %v10752_v7, %v10748_v30  ;;  %v9073_v18 = vld [vmem:[%s9706_s21 + $0xa0] sm:$0xff] }
 0x71e   : > { %13469 = vst [vmem:[#allocation34_spill] sm:$0xff] %v10756_v5 }
 0x71f   : > { %13470 = vst [vmem:[#allocation35_spill] sm:$0xff] %v10759_v10  ;;  %v2942_v52 = vpop.f32.mrb[108].mxu0  ;;  %3038 = vadd.xlane.f32.xlu0 %v3037_v38  ;;  %v3040_v40 = vadd.f32 %v10759_v10, %v10756_v5 }
 0x720   : > { %v2943_v16 = vadd.f32 %v2942_v52, %v10700_v24  ;;  %v2944_v49 = vpop.f32.mrb[109].mxu0  ;;  %v9074_v52 = vld [vmem:[%s9706_s21 + $0xa8] sm:$0xff] }
 0x721   : > { %v2945_v6 = vadd.f32 %v2944_v49, %v10703_v14  ;;  %v2946_v60 = vpop.f32.mrb[110].mxu0  ;;  %3041 = vadd.xlane.f32.xlu1 %v3040_v40  ;;  %v9075_v49 = vld [vmem:[%s9706_s21 + $0xb0] sm:$0xff] }
 0x722   : > { %v10768_v44 = vadd.f32 %v9065_v32, %v2943_v16  ;;  %v2947_v29 = vadd.f32 %v2946_v60, %v10700_v24  ;;  %v2948_v0 = vpop.f32.mrb[111].mxu0  ;;  %v9076_v60 = vld [vmem:[%s9706_s21 + $0xb8] sm:$0xff] }
 0x723   : > { %v10772_v19 = vadd.f32 %v9066_v20, %v2945_v6  ;;  %v2949_v58 = vadd.f32 %v2948_v0, %v10703_v14 }
 0x724   : > { %13471 = vst [vmem:[#allocation36_spill] sm:$0xff] %v10768_v44  ;;  %v10776_v47 = vadd.f32 %v9067_v25, %v2947_v29 }
 0x725   : > { %13472 = vst [vmem:[#allocation37_spill] sm:$0xff] %v10772_v19  ;;  %v10779_v4 = vadd.f32 %v9068_v9, %v2949_v58  ;;  %v3043_v57 = vadd.f32 %v10772_v19, %v10768_v44 }
 0x726   : > { %13473 = vst [vmem:[#allocation38_spill] sm:$0xff] %v10776_v47 }
 0x727   : > { %13474 = vst [vmem:[#allocation39_spill] sm:$0xff] %v10779_v4  ;;  %v2952_v3 = vpop.f32.mrb[112].mxu0  ;;  %3044 = vadd.xlane.f32.xlu0 %v3043_v57  ;;  %v3046_v8 = vadd.f32 %v10779_v4, %v10776_v47 }
 0x728   : > { %v2953_v62 = vadd.f32 %v2952_v3, %v10700_v24  ;;  %v2954_v27 = vpop.f32.mrb[113].mxu0  ;;  %v9077_v3 = vld [vmem:[%s9706_s21 + $0xc0] sm:$0xff] }
 0x729   : > { %v2955_v28 = vadd.f32 %v2954_v27, %v10703_v14  ;;  %v2956_v63 = vpop.f32.mrb[114].mxu0  ;;  %3047 = vadd.xlane.f32.xlu1 %v3046_v8 }
 0x72a   : > { %v10788_v42 = vadd.f32 %v9069_v46, %v2953_v62  ;;  %v2957_v48 = vadd.f32 %v2956_v63, %v10700_v24  ;;  %v2958_v55 = vpop.f32.mrb[115].mxu0 }
 0x72b   : > { %v10792_v15 = vadd.f32 %v9070_v51, %v2955_v28  ;;  %v2959_v21 = vadd.f32 %v2958_v55, %v10703_v14  ;;  %v9078_v28 = vld [vmem:[%s9706_s21 + $0xc8] sm:$0xff]  ;;  %v9080_v51 = vld [vmem:[%s9706_s21 + $0xd8] sm:$0xff] }
 0x72c   : > { %13475 = vst [vmem:[#allocation40_spill] sm:$0xff] %v10788_v42  ;;  %v10796_v35 = vadd.f32 %v9071_v12, %v2957_v48  ;;  %v9079_v48 = vld [vmem:[%s9706_s21 + $0xd0] sm:$0xff] }
 0x72d   : > { %13476 = vst [vmem:[#allocation41_spill] sm:$0xff] %v10792_v15  ;;  %v10799_v43 = vadd.f32 %v9072_v13, %v2959_v21  ;;  %v3049_v39 = vadd.f32 %v10792_v15, %v10788_v42 }
 0x72e   : > { %13477 = vst [vmem:[#allocation42_spill] sm:$0xff] %v10796_v35 }
 0x72f   : > { %13478 = vst [vmem:[#allocation43_spill] sm:$0xff] %v10799_v43  ;;  %v2962_v23 = vpop.f32.mrb[116].mxu0  ;;  %3050 = vadd.xlane.f32.xlu0 %v3049_v39  ;;  %v3052_v33 = vadd.f32 %v10799_v43, %v10796_v35 }
 0x730   : > { %v2963_v2 = vadd.f32 %v2962_v23, %v10700_v24  ;;  %v2964_v41 = vpop.f32.mrb[117].mxu0 }
 0x731   : > { %v2965_v59 = vadd.f32 %v2964_v41, %v10703_v14  ;;  %v2966_v34 = vpop.f32.mrb[118].mxu0  ;;  %3053 = vadd.xlane.f32.xlu1 %v3052_v33 }
 0x732   : > { %v10808_v1 = vadd.f32 %v9073_v18, %v2963_v2  ;;  %v2967_v56 = vadd.f32 %v2966_v34, %v10700_v24  ;;  %v2968_v38 = vpop.f32.mrb[119].mxu0 }
 0x733   : > { %v10812_v40 = vadd.f32 %v9074_v52, %v2965_v59  ;;  %v2969_v16 = vadd.f32 %v2968_v38, %v10703_v14  ;;  %v9081_v59 = vld [vmem:[%s9706_s21 + $0xe0] sm:$0xff]  ;;  %v9082_v38 = vld [vmem:[%s9706_s21 + $0xe8] sm:$0xff] }
 0x734   : > { %13479 = vst [vmem:[#allocation44_spill] sm:$0xff] %v10808_v1  ;;  %v10816_v6 = vadd.f32 %v9075_v49, %v2967_v56  ;;  %v9083_v49 = vld [vmem:[%s9706_s21 + $0xf0] sm:$0xff] }
 0x735   : > { %13480 = vst [vmem:[#allocation45_spill] sm:$0xff] %v10812_v40  ;;  %v10819_v32 = vadd.f32 %v9076_v60, %v2969_v16  ;;  %v3055_v29 = vadd.f32 %v10812_v40, %v10808_v1 }
 0x736   : > { %13481 = vst [vmem:[#allocation46_spill] sm:$0xff] %v10816_v6 }
 0x737   : > { %13482 = vst [vmem:[#allocation47_spill] sm:$0xff] %v10819_v32  ;;  %3056 = vadd.xlane.f32.xlu0 %v3055_v29  ;;  %v2972_v0 = vpop.f32.mrb[120].mxu0  ;;  %v3058_v20 = vadd.f32 %v10819_v32, %v10816_v6  ;;  %v9084_v29 = vld [vmem:[%s9706_s21 + $0xf8] sm:$0xff]  ;;  %s13494_s21 = sld [smem:[#allocation158_spill]] }
 0x738   : > { %v2973_v58 = vadd.f32 %v2972_v0, %v10700_v24  ;;  %v2974_v25 = vpop.f32.mrb[121].mxu0 }
 0x739   : > { %v2975_v9 = vadd.f32 %v2974_v25, %v10703_v14  ;;  %3059 = vadd.xlane.f32.xlu1 %v3058_v20  ;;  %v2976_v57 = vpop.f32.mrb[122].mxu0  ;;  %v3429_v25 = vld [vmem:[#allocation11 + $0x20] sm:$0xff] }
 0x73a   : > { %v10828_v8 = vadd.f32 %v9077_v3, %v2973_v58  ;;  %v2977_v62 = vadd.f32 %v2976_v57, %v10700_v24  ;;  %v2978_v27 = vpop.f32.mrb[123].mxu0 }
 0x73b   : > { %v10832_v63 = vadd.f32 %v9078_v28, %v2975_v9  ;;  %v2979_v46 = vadd.f32 %v2978_v27, %v10703_v14  ;;  %v3428_v9 = vld [vmem:[#allocation11 + $0x8] sm:$0xff]  ;;  %v3433_v27 = vld [vmem:[#allocation11 + $0x60] sm:$0xff] }
 0x73c   : > { %13483 = vst [vmem:[#allocation48_spill] sm:$0xff] %v10828_v8  ;;  %v10836_v55 = vadd.f32 %v9079_v48, %v2977_v62  ;;  %v3431_v62 = vld [vmem:[#allocation11 + $0x40] sm:$0xff] }
 0x73d   : > { %13484 = vst [vmem:[#allocation49_spill] sm:$0xff] %v10832_v63  ;;  %v10839_v21 = vadd.f32 %v9080_v51, %v2979_v46  ;;  %v3061_v12 = vadd.f32 %v10832_v63, %v10828_v8  ;;  %v7523_v48 = vcombine.high %v3431_v62, %v3433_v27  ;;  %v3432_v51 = vld [vmem:[#allocation11 + $0x48] sm:$0xff] }
 0x73e   : > { %13485 = vst [vmem:[#allocation50_spill] sm:$0xff] %v10836_v55 }
 0x73f   : > { %13486 = vst [vmem:[#allocation51_spill] sm:$0xff] %v10839_v21  ;;  %v2982_v13 = vpop.f32.mrb[124].mxu0  ;;  %3062 = vadd.xlane.f32.xlu0 %v3061_v12  ;;  %v3064_v39 = vadd.f32 %v10839_v21, %v10836_v55  ;;  %v3434_v12 = vld [vmem:[#allocation11 + $0x68] sm:$0xff] }
 0x740   : > { %v2983_v23 = vadd.f32 %v2982_v13, %v10700_v24  ;;  %v2984_v33 = vpop.f32.mrb[125].mxu0  ;;  %v3435_v13 = vld [vmem:[#allocation11 + $0x80] sm:$0xff] }
 0x741   : > { %v2985_v2 = vadd.f32 %v2984_v33, %v10703_v14  ;;  %v2986_v41 = vpop.f32.mrb[126].mxu0  ;;  %3065 = vadd.xlane.f32.xlu1 %v3064_v39  ;;  %v7525_v39 = vcombine.high %v3432_v51, %v3434_v12  ;;  %v3436_v33 = vld [vmem:[#allocation11 + $0x88] sm:$0xff] }
 0x742   : > { %v10848_v34 = vadd.f32 %v9081_v59, %v2983_v23  ;;  %v2987_v18 = vadd.f32 %v2986_v41, %v10700_v24  ;;  %v2988_v56 = vpop.f32.mrb[127].mxu0  ;;  %v3427_v24 = vld [vmem:[#allocation11] sm:$0xff]  ;;  %v7522_v41 = vcombine.low %v3431_v62, %v3433_v27  ;;  %v7524_v59 = vcombine.low %v3432_v51, %v3434_v12  ;;  %v3448_v12 = vld [vmem:[#allocation11 + $0x148] sm:$0xff] }
 0x743   : > { %v10852_v52 = vadd.f32 %v9082_v38, %v2985_v2  ;;  %v2989_v16 = vadd.f32 %v2988_v56, %v10703_v14  ;;  %v7518_v57 = vcombine.low %v3427_v24, %v3429_v25  ;;  %v7519_v3 = vcombine.high %v3427_v24, %v3429_v25  ;;  %v3430_v14 = vld [vmem:[#allocation11 + $0x28] sm:$0xff]  ;;  %v3437_v23 = vld [vmem:[#allocation11 + $0xa0] sm:$0xff] }
 0x744   : > { %13487 = vst [vmem:[#allocation52_spill] sm:$0xff] %v10848_v34  ;;  %v10856_v60 = vadd.f32 %v9083_v49, %v2987_v18  ;;  %v7520_v28 = vcombine.low %v3428_v9, %v3430_v14  ;;  %v7521_v46 = vcombine.high %v3428_v9, %v3430_v14  ;;  %v3438_v2 = vld [vmem:[#allocation11 + $0xa8] sm:$0xff]  ;;  %v7527_v18 = vcombine.high %v3435_v13, %v3437_v23  ;;  %v3439_v38 = vld [vmem:[#allocation11 + $0xc0] sm:$0xff] }
 0x745   : > { %13488 = vst [vmem:[#allocation53_spill] sm:$0xff] %v10852_v52  ;;  %v10859_v0 = vadd.f32 %v9084_v29, %v2989_v16  ;;  %v3067_v20 = vadd.f32 %v10852_v52, %v10848_v34  ;;  %3833 = vmatprep.subr.bf16.mxu1 %v7519_v3  ;;  %v7529_v56 = vcombine.high %v3436_v33, %v3438_v2  ;;  %v3441_v16 = vld [vmem:[#allocation11 + $0xe0] sm:$0xff]  ;;  %v3440_v49 = vld [vmem:[#allocation11 + $0xc8] sm:$0xff] }
 0x746   : > { %13489 = vst [vmem:[#allocation54_spill] sm:$0xff] %v10856_v60  ;;  %3946 = vmatprep.subr.bf16.mxu0 %v7521_v46  ;;  %3834 = vmatpush1.bf16.msra.mxu1 %v7518_v57  ;;  %v3442_v29 = vld [vmem:[#allocation11 + $0xe8] sm:$0xff]  ;;  %v7531_v24 = vcombine.high %v3439_v38, %v3441_v16  ;;  %v3443_v9 = vld [vmem:[#allocation11 + $0x100] sm:$0xff]  ;;  %v7530_v62 = vcombine.low %v3439_v38, %v3441_v16 }
 0x747   : > { %13490 = vst [vmem:[#allocation55_spill] sm:$0xff] %v10859_v0  ;;  %3068 = vadd.xlane.f32.xlu0 %v3067_v20  ;;  %v3070_v58 = vadd.f32 %v10859_v0, %v10856_v60  ;;  %3947 = vmatpush1.bf16.msra.mxu0 %v7520_v28  ;;  %v7526_v20 = vcombine.low %v3435_v13, %v3437_v23  ;;  %v3445_v57 = vld [vmem:[#allocation11 + $0x120] sm:$0xff]  ;;  %v3444_v3 = vld [vmem:[#allocation11 + $0x108] sm:$0xff] }
 0x748   : > { %3835 = vmatprep.subr.bf16.mxu1 %v7523_v48  ;;  %3948 = vmatprep.subr.bf16.mxu0 %v7525_v39  ;;  %v7533_v25 = vcombine.high %v3440_v49, %v3442_v29  ;;  %v3446_v14 = vld [vmem:[#allocation11 + $0x128] sm:$0xff]  ;;  %v7532_v27 = vcombine.low %v3440_v49, %v3442_v29  ;;  %v7535_v28 = vcombine.high %v3443_v9, %v3445_v57  ;;  %v3447_v48 = vld [vmem:[#allocation11 + $0x140] sm:$0xff] }
 0x749   : > { %3071 = vadd.xlane.f32.xlu1 %v3070_v58  ;;  %v7528_v58 = vcombine.low %v3436_v33, %v3438_v2  ;;  %v7537_v46 = vcombine.high %v3444_v3, %v3446_v14  ;;  %v3449_v51 = vld [vmem:[#allocation11 + $0x160] sm:$0xff]  ;;  %v3450_v13 = vld [vmem:[#allocation11 + $0x168] sm:$0xff]  ;;  %v7534_v39 = vcombine.low %v3443_v9, %v3445_v57  ;;  %v7536_v23 = vcombine.low %v3444_v3, %v3446_v14 }
 0x74a   : > { %3836 = vmatpush1.bf16.msra.mxu1 %v7522_v41  ;;  %v7539_v33 = vcombine.high %v3447_v48, %v3449_v51  ;;  %v7541_v2 = vcombine.high %v3448_v12, %v3450_v13  ;;  %v3451_v41 = vld [vmem:[#allocation11 + $0x180] sm:$0xff]  ;;  %v7538_v38 = vcombine.low %v3447_v48, %v3449_v51  ;;  %v7540_v16 = vcombine.low %v3448_v12, %v3450_v13 }
 0x74b   : > { %3949 = vmatpush1.bf16.msra.mxu0 %v7524_v59  ;;  %3837 = vmatprep.subr.bf16.mxu1 %v7527_v18  ;;  %v3453_v59 = vld [vmem:[#allocation11 + $0x1a0] sm:$0xff]  ;;  %v3452_v18 = vld [vmem:[#allocation11 + $0x188] sm:$0xff] }
 0x74c   : > { %3950 = vmatprep.subr.bf16.mxu0 %v7529_v56  ;;  %v3454_v56 = vld [vmem:[#allocation11 + $0x1a8] sm:$0xff]  ;;  %v7543_v49 = vcombine.high %v3451_v41, %v3453_v59  ;;  %v7542_v9 = vcombine.low %v3451_v41, %v3453_v59 }
 0x74d   : > { %v7545_v29 = vcombine.high %v3452_v18, %v3454_v56  ;;  %v7544_v57 = vcombine.low %v3452_v18, %v3454_v56 }
 0x74e   : > { %3838 = vmatpush1.bf16.msra.mxu1 %v7526_v20  ;;  %v3455_v20 = vld [vmem:[#allocation11 + $0x1c0] sm:$0xff] }
 0x74f   : > { %3951 = vmatpush1.bf16.msra.mxu0 %v7528_v58  ;;  %3839 = vmatprep.subr.bf16.mxu1 %v7531_v24  ;;  %v3457_v58 = vld [vmem:[#allocation11 + $0x1e0] sm:$0xff]  ;;  %v3456_v24 = vld [vmem:[#allocation11 + $0x1c8] sm:$0xff] }
 0x750   : > { %3952 = vmatprep.subr.bf16.mxu0 %v7533_v25  ;;  %v3458_v25 = vld [vmem:[#allocation11 + $0x1e8] sm:$0xff]  ;;  %v7547_v3 = vcombine.high %v3455_v20, %v3457_v58  ;;  %v7546_v48 = vcombine.low %v3455_v20, %v3457_v58 }
 0x751   : > { %v7549_v14 = vcombine.high %v3456_v24, %v3458_v25  ;;  %v7548_v51 = vcombine.low %v3456_v24, %v3458_v25 }
 0x752   : > { %3840 = vmatpush1.bf16.msra.mxu1 %v7530_v62  ;;  %v3459_v62 = vld [vmem:[#allocation11 + $0x200] sm:$0xff] }
 0x753   : > { %3953 = vmatpush1.bf16.msra.mxu0 %v7532_v27  ;;  %3841 = vmatprep.subr.bf16.mxu1 %v7535_v28  ;;  %v3461_v27 = vld [vmem:[#allocation11 + $0x220] sm:$0xff]  ;;  %v3460_v28 = vld [vmem:[#allocation11 + $0x208] sm:$0xff] }
 0x754   : > { %3954 = vmatprep.subr.bf16.mxu0 %v7537_v46  ;;  %v3462_v46 = vld [vmem:[#allocation11 + $0x228] sm:$0xff]  ;;  %v7551_v12 = vcombine.high %v3459_v62, %v3461_v27  ;;  %v7550_v41 = vcombine.low %v3459_v62, %v3461_v27 }
 0x755   : > { %v7553_v13 = vcombine.high %v3460_v28, %v3462_v46  ;;  %v7552_v59 = vcombine.low %v3460_v28, %v3462_v46 }
 0x756   : > { %3842 = vmatpush1.bf16.msra.mxu1 %v7534_v39  ;;  %v3463_v39 = vld [vmem:[#allocation11 + $0x240] sm:$0xff] }
 0x757   : > { %3955 = vmatpush1.bf16.msra.mxu0 %v7536_v23  ;;  %3843 = vmatprep.subr.bf16.mxu1 %v7539_v33  ;;  %v3465_v23 = vld [vmem:[#allocation11 + $0x260] sm:$0xff]  ;;  %v3464_v33 = vld [vmem:[#allocation11 + $0x248] sm:$0xff] }
 0x758   : > { %3956 = vmatprep.subr.bf16.mxu0 %v7541_v2  ;;  %v3466_v2 = vld [vmem:[#allocation11 + $0x268] sm:$0xff]  ;;  %v7555_v18 = vcombine.high %v3463_v39, %v3465_v23 }
 0x759   : > { %v7557_v56 = vcombine.high %v3464_v33, %v3466_v2 }
 0x75a   : > { %3844 = vmatpush1.bf16.msra.mxu1 %v7538_v38  ;;  %v7554_v38 = vcombine.low %v3463_v39, %v3465_v23 }
 0x75b   : > { %3957 = vmatpush1.bf16.msra.mxu0 %v7540_v16  ;;  %3845 = vmatprep.subr.bf16.mxu1 %v7543_v49  ;;  %v7556_v16 = vcombine.low %v3464_v33, %v3466_v2 }
 0x75c   : > { %3958 = vmatprep.subr.bf16.mxu0 %v7545_v29 }
 0x75e   : > { %3846 = vmatpush1.bf16.msra.mxu1 %v7542_v9 }
 0x75f   : > { %3959 = vmatpush1.bf16.msra.mxu0 %v7544_v57  ;;  %3847 = vmatprep.subr.bf16.mxu1 %v7547_v3 }
 0x760   : > { %3960 = vmatprep.subr.bf16.mxu0 %v7549_v14 }
 0x762   : > { %3848 = vmatpush1.bf16.msra.mxu1 %v7546_v48 }
 0x763   : > { %3961 = vmatpush1.bf16.msra.mxu0 %v7548_v51  ;;  %3849 = vmatprep.subr.bf16.mxu1 %v7551_v12 }
 0x764   : > { %3962 = vmatprep.subr.bf16.mxu0 %v7553_v13 }
 0x766   : > { %3850 = vmatpush1.bf16.msra.mxu1 %v7550_v41 }
 0x767   : > { %3963 = vmatpush1.bf16.msra.mxu0 %v7552_v59  ;;  %3851 = vmatprep.subr.bf16.mxu1 %v7555_v18 }
 0x768   : > { %3964 = vmatprep.subr.bf16.mxu0 %v7557_v56 }
 0x76a   : > { %3852 = vmatpush1.bf16.msra.mxu1 %v7554_v38 }
 0x76b   : > { %3965 = vmatpush1.bf16.msra.mxu0 %v7556_v16 }
 0x79c   : > { %v3027_v49 = vpop.xlane.xlu0 %3026 }
 0x79d   : > { %v3073_v29 = vmul.f32 0.00390625, %v3027_v49 }
 0x79e   : > { %v3030_v20 = vpop.xlane.xlu1 %3029 }
 0x79f   : > { %v10866_v58 = vsub.f32 %v10708_v11, %v3073_v29  ;;  %v10869_v24 = vsub.f32 %v10712_v53, %v3073_v29  ;;  %v3074_v25 = vmul.f32 0.00390625, %v3030_v20 }
 0x7a1   : > { %v3121_v9 = vmul.f32 %v10866_v58, %v10866_v58  ;;  %v3122_v57 = vmul.f32 %v10869_v24, %v10869_v24  ;;  %v10876_v3 = vsub.f32 %v10716_v17, %v3074_v25  ;;  %v10879_v14 = vsub.f32 %v10719_v26, %v3074_v25 }
 0x7a3   : > { %v3123_v62 = vmul.f32 %v10876_v3, %v10876_v3  ;;  %v3124_v27 = vmul.f32 %v10879_v14, %v10879_v14  ;;  %v3153_v28 = vadd.f32 %v3122_v57, %v3121_v9 }
 0x7a4   : > { %v3033_v46 = vpop.xlane.xlu0 %3032 }
 0x7a5   : > { %v3075_v48 = vmul.f32 0.00390625, %v3033_v46  ;;  %3154 = vadd.xlane.f32.xlu0 %v3153_v28  ;;  %v3156_v51 = vadd.f32 %v3124_v27, %v3123_v62 }
 0x7a6   : > { %v3036_v12 = vpop.xlane.xlu1 %3035 }
 0x7a7   : > { %v10886_v13 = vsub.f32 %v10728_v45, %v3075_v48  ;;  %v10889_v39 = vsub.f32 %v10732_v50, %v3075_v48  ;;  %v3076_v23 = vmul.f32 0.00390625, %v3036_v12  ;;  %3157 = vadd.xlane.f32.xlu1 %v3156_v51 }
 0x7a9   : > { %v3125_v33 = vmul.f32 %v10886_v13, %v10886_v13  ;;  %v3126_v2 = vmul.f32 %v10889_v39, %v10889_v39  ;;  %v10896_v41 = vsub.f32 %v10736_v31, %v3076_v23  ;;  %v10899_v59 = vsub.f32 %v10739_v36, %v3076_v23 }
 0x7ab   : > { %v3127_v18 = vmul.f32 %v10896_v41, %v10896_v41  ;;  %v3128_v56 = vmul.f32 %v10899_v59, %v10899_v59  ;;  %v3159_v38 = vadd.f32 %v3126_v2, %v3125_v33 }
 0x7ac   : > { %v3039_v16 = vpop.xlane.xlu0 %3038 }
 0x7ad   : > { %v3077_v49 = vmul.f32 0.00390625, %v3039_v16  ;;  %3160 = vadd.xlane.f32.xlu0 %v3159_v38  ;;  %v3162_v29 = vadd.f32 %v3128_v56, %v3127_v18 }
 0x7ae   : > { %v3042_v20 = vpop.xlane.xlu1 %3041 }
 0x7af   : > { %v10906_v25 = vsub.f32 %v10748_v30, %v3077_v49  ;;  %v10909_v9 = vsub.f32 %v10752_v7, %v3077_v49  ;;  %v3078_v57 = vmul.f32 0.00390625, %v3042_v20  ;;  %3163 = vadd.xlane.f32.xlu1 %v3162_v29  ;;  %v3473_v7 = vld [vmem:[#allocation11 + $0x2e0] sm:$0xff]  ;;  %v3472_v30 = vld [vmem:[#allocation11 + $0x2c8] sm:$0xff] }
 0x7b1   : > { %v3129_v62 = vmul.f32 %v10906_v25, %v10906_v25  ;;  %v3130_v27 = vmul.f32 %v10909_v9, %v10909_v9  ;;  %v10916_v28 = vsub.f32 %v10756_v5, %v3078_v57  ;;  %v10919_v46 = vsub.f32 %v10759_v10, %v3078_v57  ;;  %v3471_v5 = vld [vmem:[#allocation11 + $0x2c0] sm:$0xff] }
 0x7b3   : > { %v3131_v48 = vmul.f32 %v10916_v28, %v10916_v28  ;;  %v3132_v51 = vmul.f32 %v10919_v46, %v10919_v46  ;;  %v3165_v12 = vadd.f32 %v3130_v27, %v3129_v62  ;;  %v3467_v62 = vld [vmem:[#allocation11 + $0x280] sm:$0xff] }
 0x7b4   : > { %v3045_v23 = vpop.xlane.xlu0 %3044  ;;  %v3469_v27 = vld [vmem:[#allocation11 + $0x2a0] sm:$0xff] }
 0x7b5   : > { %v3079_v33 = vmul.f32 0.00390625, %v3045_v23  ;;  %3166 = vadd.xlane.f32.xlu0 %v3165_v12  ;;  %v3168_v2 = vadd.f32 %v3132_v51, %v3131_v48  ;;  %v3468_v48 = vld [vmem:[#allocation11 + $0x288] sm:$0xff] }
 0x7b6   : > { %v3048_v18 = vpop.xlane.xlu1 %3047 }
 0x7b7   : > { %v10926_v56 = vsub.f32 %v10768_v44, %v3079_v33  ;;  %v10929_v38 = vsub.f32 %v10772_v19, %v3079_v33  ;;  %v3080_v16 = vmul.f32 0.00390625, %v3048_v18  ;;  %3169 = vadd.xlane.f32.xlu1 %v3168_v2  ;;  %v7559_v33 = vcombine.high %v3467_v62, %v3469_v27  ;;  %v3470_v2 = vld [vmem:[#allocation11 + $0x2a8] sm:$0xff] }
 0x7b8   : > { %v7558_v19 = vcombine.low %v3467_v62, %v3469_v27  ;;  %v7560_v44 = vcombine.low %v3468_v48, %v3470_v2  ;;  %v7563_v62 = vcombine.high %v3471_v5, %v3473_v7  ;;  %v3474_v27 = vld [vmem:[#allocation11 + $0x2e8] sm:$0xff] }
 0x7b9   : > { %v3133_v49 = vmul.f32 %v10926_v56, %v10926_v56  ;;  %v3134_v29 = vmul.f32 %v10929_v38, %v10929_v38  ;;  %v10936_v20 = vsub.f32 %v10776_v47, %v3080_v16  ;;  %v10939_v57 = vsub.f32 %v10779_v4, %v3080_v16  ;;  %3853 = vmatprep.subr.bf16.mxu1 %v7559_v33 }
 0x7ba   : > { %v7561_v47 = vcombine.high %v3468_v48, %v3470_v2  ;;  %3854 = vmatpush1.bf16.msra.mxu1 %v7558_v19  ;;  %v7562_v48 = vcombine.low %v3471_v5, %v3473_v7  ;;  %v3476_v7 = vld [vmem:[#allocation11 + $0x308] sm:$0xff] }
 0x7bb   : > { %v3135_v51 = vmul.f32 %v10936_v20, %v10936_v20  ;;  %v3136_v12 = vmul.f32 %v10939_v57, %v10939_v57  ;;  %v3171_v23 = vadd.f32 %v3134_v29, %v3133_v49  ;;  %3855 = vmatprep.subr.bf16.mxu1 %v7563_v62 }
 0x7bc   : > { %v3051_v18 = vpop.xlane.xlu0 %3050  ;;  %3966 = vmatprep.subr.bf16.mxu0 %v7561_v47 }
 0x7bd   : > { %v3081_v10 = vmul.f32 0.00390625, %v3051_v18  ;;  %3172 = vadd.xlane.f32.xlu0 %v3171_v23  ;;  %v3174_v16 = vadd.f32 %v3136_v12, %v3135_v51  ;;  %3967 = vmatpush1.bf16.msra.mxu0 %v7560_v44  ;;  %v7564_v51 = vcombine.low %v3472_v30, %v3474_v27  ;;  %v7565_v12 = vcombine.high %v3472_v30, %v3474_v27  ;;  %v3475_v44 = vld [vmem:[#allocation11 + $0x300] sm:$0xff]  ;;  %v3478_v18 = vld [vmem:[#allocation11 + $0x328] sm:$0xff] }
 0x7be   : > { %v3054_v4 = vpop.xlane.xlu1 %3053  ;;  %3856 = vmatpush1.bf16.msra.mxu1 %v7562_v48 }
 0x7bf   : > { %v10946_v36 = vsub.f32 %v10788_v42, %v3081_v10  ;;  %v10949_v49 = vsub.f32 %v10792_v15, %v3081_v10  ;;  %v3082_v29 = vmul.f32 0.00390625, %v3054_v4  ;;  %3175 = vadd.xlane.f32.xlu1 %v3174_v16  ;;  %3968 = vmatprep.subr.bf16.mxu0 %v7565_v12  ;;  %v3477_v4 = vld [vmem:[#allocation11 + $0x320] sm:$0xff]  ;;  %v3480_v42 = vld [vmem:[#allocation11 + $0x348] sm:$0xff] }
 0x7c0   : > { %v7567_v2 = vcombine.high %v3475_v44, %v3477_v4  ;;  %v7566_v27 = vcombine.low %v3475_v44, %v3477_v4  ;;  %v3481_v15 = vld [vmem:[#allocation11 + $0x360] sm:$0xff]  ;;  %v3482_v44 = vld [vmem:[#allocation11 + $0x368] sm:$0xff] }
 0x7c1   : > { %v3137_v19 = vmul.f32 %v10946_v36, %v10946_v36  ;;  %v3138_v47 = vmul.f32 %v10949_v49, %v10949_v49  ;;  %v10956_v23 = vsub.f32 %v10796_v35, %v3082_v29  ;;  %v10959_v10 = vsub.f32 %v10799_v43, %v3082_v29  ;;  %3969 = vmatpush1.bf16.msra.mxu0 %v7564_v51  ;;  %v3479_v35 = vld [vmem:[#allocation11 + $0x340] sm:$0xff] }
 0x7c2   : > { %v7568_v29 = vcombine.low %v3476_v7, %v3478_v18  ;;  %v7569_v43 = vcombine.high %v3476_v7, %v3478_v18  ;;  %3857 = vmatprep.subr.bf16.mxu1 %v7567_v2  ;;  %v7570_v4 = vcombine.low %v3479_v35, %v3481_v15  ;;  %v7572_v7 = vcombine.low %v3480_v42, %v3482_v44  ;;  %v3483_v18 = vld [vmem:[#allocation11 + $0x380] sm:$0xff] }
 0x7c3   : > { %v3139_v30 = vmul.f32 %v10956_v23, %v10956_v23  ;;  %v3140_v5 = vmul.f32 %v10959_v10, %v10959_v10  ;;  %v3177_v33 = vadd.f32 %v3138_v47, %v3137_v19  ;;  %3858 = vmatpush1.bf16.msra.mxu1 %v7566_v27  ;;  %v7571_v47 = vcombine.high %v3479_v35, %v3481_v15  ;;  %v3484_v15 = vld [vmem:[#allocation11 + $0x388] sm:$0xff] }
 0x7c4   : > { %v3057_v16 = vpop.xlane.xlu0 %3056  ;;  %3970 = vmatprep.subr.bf16.mxu0 %v7569_v43 }
 0x7c5   : > { %v3083_v62 = vmul.f32 0.00390625, %v3057_v16  ;;  %3178 = vadd.xlane.f32.xlu0 %v3177_v33  ;;  %v3180_v48 = vadd.f32 %v3140_v5, %v3139_v30  ;;  %3971 = vmatpush1.bf16.msra.mxu0 %v7568_v29  ;;  %v7573_v30 = vcombine.high %v3480_v42, %v3482_v44  ;;  %v3485_v16 = vld [vmem:[#allocation11 + $0x3a0] sm:$0xff] }
 0x7c6   : > { %v3060_v12 = vpop.xlane.xlu1 %3059  ;;  %3859 = vmatprep.subr.bf16.mxu1 %v7571_v47  ;;  %v7575_v29 = vcombine.high %v3483_v18, %v3485_v16 }
 0x7c7   : > { %v10966_v31 = vsub.f32 %v10808_v1, %v3083_v62  ;;  %v10969_v51 = vsub.f32 %v10812_v40, %v3083_v62  ;;  %v3084_v19 = vmul.f32 0.00390625, %v3060_v12  ;;  %3181 = vadd.xlane.f32.xlu1 %v3180_v48  ;;  %3972 = vmatprep.subr.bf16.mxu0 %v7573_v30  ;;  %v3486_v62 = vld [vmem:[#allocation11 + $0x3a8] sm:$0xff]  ;;  %v7574_v12 = vcombine.low %v3483_v18, %v3485_v16 }
 0x7c8   : > { %3860 = vmatpush1.bf16.msra.mxu1 %v7570_v4  ;;  %v7577_v44 = vcombine.high %v3484_v15, %v3486_v62  ;;  %v3488_v40 = vld [vmem:[#allocation11 + $0x3c8] sm:$0xff] }
 0x7c9   : > { %v3141_v43 = vmul.f32 %v10966_v31, %v10966_v31  ;;  %v3142_v5 = vmul.f32 %v10969_v51, %v10969_v51  ;;  %v10976_v33 = vsub.f32 %v10816_v6, %v3084_v19  ;;  %v10979_v2 = vsub.f32 %v10819_v32, %v3084_v19  ;;  %3973 = vmatpush1.bf16.msra.mxu0 %v7572_v7  ;;  %v3487_v32 = vld [vmem:[#allocation11 + $0x3c0] sm:$0xff]  ;;  %v3490_v18 = vld [vmem:[#allocation11 + $0x3e8] sm:$0xff] }
 0x7ca   : > { %v7576_v19 = vcombine.low %v3484_v15, %v3486_v62  ;;  %3861 = vmatprep.subr.bf16.mxu1 %v7575_v29  ;;  %3974 = vmatprep.subr.bf16.mxu0 %v7577_v44  ;;  %v3489_v6 = vld [vmem:[#allocation11 + $0x3e0] sm:$0xff]  ;;  %v7580_v15 = vcombine.low %v3488_v40, %v3490_v18 }
 0x7cb   : > { %v3143_v42 = vmul.f32 %v10976_v33, %v10976_v33  ;;  %v3144_v35 = vmul.f32 %v10979_v2, %v10979_v2  ;;  %v3183_v27 = vadd.f32 %v3142_v5, %v3141_v43  ;;  %v7579_v5 = vcombine.high %v3487_v32, %v3489_v6 }
 0x7cc   : > { %v3063_v48 = vpop.xlane.xlu0 %3062  ;;  %3862 = vmatpush1.bf16.msra.mxu1 %v7574_v12  ;;  %v7578_v16 = vcombine.low %v3487_v32, %v3489_v6  ;;  %v11003_v6 = vld [vmem:[#allocation11 + $0x30] sm:$0xff] }
 0x7cd   : > { %v3085_v47 = vmul.f32 0.00390625, %v3063_v48  ;;  %3184 = vadd.xlane.f32.xlu0 %v3183_v27  ;;  %v3186_v4 = vadd.f32 %v3144_v35, %v3143_v42  ;;  %3975 = vmatpush1.bf16.msra.mxu0 %v7576_v19  ;;  %v7581_v42 = vcombine.high %v3488_v40, %v3490_v18  ;;  %v11001_v48 = vld [vmem:[#allocation11 + $0x10] sm:$0xff] }
 0x7ce   : > { %v3066_v30 = vpop.xlane.xlu1 %3065  ;;  %3863 = vmatprep.subr.bf16.mxu1 %v7579_v5  ;;  %v7647_v19 = vcombine.high %v11001_v48, %v11003_v6 }
 0x7cf   : > { %v10986_v1 = vsub.f32 %v10828_v8, %v3085_v47  ;;  %v10989_v7 = vsub.f32 %v10832_v63, %v3085_v47  ;;  %v3086_v43 = vmul.f32 0.00390625, %v3066_v30  ;;  %3187 = vadd.xlane.f32.xlu1 %v3186_v4  ;;  %3976 = vmatprep.subr.bf16.mxu0 %v7581_v42  ;;  %v5321_v8 = vld [vmem:[#allocation11 + $0xd0] sm:$0xff] }
 0x7d0   : > { %3864 = vmatpush1.bf16.msra.mxu1 %v7578_v16 }
 0x7d1   : > { %v3145_v35 = vmul.f32 %v10986_v1, %v10986_v1  ;;  %v3146_v27 = vmul.f32 %v10989_v7, %v10989_v7  ;;  %v10996_v29 = vsub.f32 %v10836_v55, %v3086_v43  ;;  %v10999_v62 = vsub.f32 %v10839_v21, %v3086_v43  ;;  %3977 = vmatpush1.bf16.msra.mxu0 %v7580_v15 }
 0x7d2   : > { %5715 = vmatprep.subr.bf16.mxu0 %v7647_v19 }
 0x7d3   : > { %v3147_v40 = vmul.f32 %v10996_v29, %v10996_v29  ;;  %v3148_v32 = vmul.f32 %v10999_v62, %v10999_v62  ;;  %v3189_v12 = vadd.f32 %v3146_v27, %v3145_v35 }
 0x7d4   : > { %v3069_v44 = vpop.xlane.xlu0 %3068 }
 0x7d5   : > { %v3087_v4 = vmul.f32 0.00390625, %v3069_v44  ;;  %3190 = vadd.xlane.f32.xlu0 %v3189_v12  ;;  %v3192_v30 = vadd.f32 %v3148_v32, %v3147_v40 }
 0x7d6   : > { %v3072_v43 = vpop.xlane.xlu1 %3071 }
 0x7d7   : > { %v11014_v5 = vsub.f32 %v10848_v34, %v3087_v4  ;;  %v11017_v18 = vsub.f32 %v10852_v52, %v3087_v4  ;;  %v3088_v16 = vmul.f32 0.00390625, %v3072_v43  ;;  %3193 = vadd.xlane.f32.xlu1 %v3192_v30  ;;  %v3023_v34 = vld [vmem:[%s13491_s22] sm:$0x3]  ;;  %s13871_s22 = sld [smem:[#allocation159_spill]] }
 0x7d9   : > { %v3149_v15 = vmul.f32 %v11014_v5, %v11014_v5  ;;  %v3150_v42 = vmul.f32 %v11017_v18, %v11017_v18  ;;  %v11024_v35 = vsub.f32 %v10856_v60, %v3088_v16  ;;  %v11027_v27 = vsub.f32 %v10859_v0, %v3088_v16 }
 0x7db   : > { %v3151_v40 = vmul.f32 %v11024_v35, %v11024_v35  ;;  %v3152_v32 = vmul.f32 %v11027_v27, %v11027_v27  ;;  %v3195_v12 = vadd.f32 %v3150_v42, %v3149_v15 }
 0x7dd   : > { %3196 = vadd.xlane.f32.xlu0 %v3195_v12  ;;  %v3198_v19 = vadd.f32 %v3152_v32, %v3151_v40  ;;  %v11037_v40 = vrot.slane %v3023_v34, %v10018_v61  ;;  %v3024_v32 = vld [vmem:[%s13492_s30] sm:$0x3] }
 0x7df   : > { %3199 = vadd.xlane.f32.xlu1 %v3198_v19 }
 0x832   : > { %v3155_v44 = vpop.xlane.xlu0 %3154 }
 0x833   : > { %v3201_v4 = vmul.f32 0.00390625, %v3155_v44  ;;  %v11048_v44 = vrot.slane %v3024_v32, %v10018_v61 }
 0x834   : > { %v3158_v30 = vpop.xlane.xlu1 %3157 }
 0x835   : > { %v3217_v43 = vadd.f32 1e-12, %v3201_v4  ;;  %v3202_v47 = vmul.f32 0.00390625, %v3158_v30  ;;  %v11051_v4 = vrot.slane %v3024_v32, %v10015_v54 }
 0x837   : > { %8765 = vrsqrt.f32 %v3217_v43  ;;  %v3218_v60 = vadd.f32 1e-12, %v3202_v47 }
 0x839   : > { %8767 = vrsqrt.f32 %v3218_v60  ;;  %v11043_v60 = vrot.slane %v3023_v34, %v10015_v54 }
 0x83a   : > { %v3161_v16 = vpop.xlane.xlu0 %3160 }
 0x83b   : > { %v3203_v0 = vmul.f32 0.00390625, %v3161_v16 }
 0x83c   : > { %v3164_v52 = vpop.xlane.xlu1 %3163 }
 0x83d   : > { %v3219_v21 = vadd.f32 1e-12, %v3203_v0  ;;  %v3204_v15 = vmul.f32 0.00390625, %v3164_v52 }
 0x83f   : > { %8769 = vrsqrt.f32 %v3219_v21  ;;  %v3220_v42 = vadd.f32 1e-12, %v3204_v15 }
 0x841   : > { %v8766_v47 = vpop.eup %8765  ;;  %8771 = vrsqrt.f32 %v3220_v42 }
 0x842   : > { %v3249_v12 = vmul.f32 %v8766_v47, %v10866_v58  ;;  %v3250_v19 = vmul.f32 %v8766_v47, %v10869_v24  ;;  %v3167_v0 = vpop.xlane.xlu0 %3166 }
 0x843   : > { %v8768_v52 = vpop.eup %8767  ;;  %v3205_v21 = vmul.f32 0.00390625, %v3167_v0 }
 0x844   : > { %v3292_v30 = vmul.f32 %v11037_v40, %v3249_v12  ;;  %v3251_v34 = vmul.f32 %v8768_v52, %v10876_v3  ;;  %v3252_v43 = vmul.f32 %v8768_v52, %v10879_v14  ;;  %v3170_v16 = vpop.xlane.xlu1 %3169  ;;  %v3293_v58 = vmul.f32 %v11043_v60, %v3250_v19  ;;  %v5313_v14 = vld [vmem:[#allocation11 + $0x50] sm:$0xff] }
 0x845   : > { %v3221_v15 = vadd.f32 1e-12, %v3205_v21  ;;  %v3206_v24 = vmul.f32 0.00390625, %v3170_v16  ;;  %v5315_v52 = vld [vmem:[#allocation11 + $0x70] sm:$0xff] }
 0x846   : > { %v3294_v42 = vmul.f32 %v11037_v40, %v3251_v34  ;;  %v3295_v47 = vmul.f32 %v11043_v60, %v3252_v43  ;;  %v3336_v32 = vadd.f32 %v11051_v4, %v3293_v58  ;;  %v3335_v12 = vadd.f32 %v11048_v44, %v3292_v30 }
 0x847   : > { %8773 = vrsqrt.f32 %v3221_v15  ;;  %v3222_v0 = vadd.f32 1e-12, %v3206_v24  ;;  %v7651_v24 = vcombine.high %v5313_v14, %v5315_v52 }
 0x848   : > { %v3338_v55 = vadd.f32 %v11051_v4, %v3295_v47  ;;  %v3337_v3 = vadd.f32 %v11048_v44, %v3294_v42 }
 0x849   : > { %v8770_v63 = vpop.eup %8769  ;;  %8775 = vrsqrt.f32 %v3222_v0 }
 0x84a   : > { %v3253_v19 = vmul.f32 %v8770_v63, %v10886_v13  ;;  %v3254_v21 = vmul.f32 %v8770_v63, %v10889_v39  ;;  %v3173_v34 = vpop.xlane.xlu0 %3172  ;;  %v11065_v43 = vpack.c.bf16 %v3338_v55, %v3336_v32  ;;  %v11067_v16 = vpack.c.bf16 %v3337_v3, %v3335_v12  ;;  %v5317_v63 = vld [vmem:[#allocation11 + $0x90] sm:$0xff] }
 0x84b   : > { %v8772_v58 = vpop.eup %8771  ;;  %v3207_v15 = vmul.f32 0.00390625, %v3173_v34  ;;  %v5319_v39 = vld [vmem:[#allocation11 + $0xb0] sm:$0xff] }
 0x84c   : > { %v3255_v30 = vmul.f32 %v8772_v58, %v10896_v41  ;;  %v3256_v42 = vmul.f32 %v8772_v58, %v10899_v59  ;;  %v3176_v47 = vpop.xlane.xlu1 %3175  ;;  %3865 = vmatprep.mubr.bf16.mxu1 %v11065_v43  ;;  %3978 = vmatprep.mubr.bf16.mxu0 %v11065_v43  ;;  %v3297_v13 = vmul.f32 %v11043_v60, %v3254_v21 }
 0x84d   : > { %v3223_v55 = vadd.f32 1e-12, %v3207_v15  ;;  %v3208_v0 = vmul.f32 0.00390625, %v3176_v47  ;;  %3866 = vmatmul.mubr.bf16.vlgmr.msra.gmra.mrb[64].mxu1 %v11067_v16  ;;  %3979 = vmatmul.mubr.bf16.vlgmr.msra.gmra.mrb[128].mxu0 %v11067_v16  ;;  %v3296_v32 = vmul.f32 %v11037_v40, %v3253_v19  ;;  %v13493_v41 = vcombine.low %v11001_v48, %v11003_v6  ;;  %v5323_v48 = vld [vmem:[#allocation11 + $0xf0] sm:$0xff] }
 0x84e   : > { %v7650_v59 = vcombine.low %v5313_v14, %v5315_v52  ;;  %v3299_v12 = vmul.f32 %v11043_v60, %v3256_v42  ;;  %v3298_v3 = vmul.f32 %v11037_v40, %v3255_v30  ;;  %v7655_v34 = vcombine.high %v5317_v63, %v5319_v39 }
 0x84f   : > { %5716 = vmatpush1.bf16.msra.mxu0 %v13493_v41  ;;  %8777 = vrsqrt.f32 %v3223_v55  ;;  %v3224_v21 = vadd.f32 1e-12, %v3208_v0  ;;  %v3340_v58 = vadd.f32 %v11051_v4, %v3297_v13  ;;  %v3339_v47 = vadd.f32 %v11048_v44, %v3296_v32 }
 0x850   : > { %5717 = vmatprep.subr.bf16.mxu0 %v7651_v24  ;;  %v3342_v15 = vadd.f32 %v11051_v4, %v3299_v12  ;;  %v3341_v19 = vadd.f32 %v11048_v44, %v3298_v3  ;;  %v7654_v14 = vcombine.low %v5317_v63, %v5319_v39  ;;  %v7659_v32 = vcombine.high %v5321_v8, %v5323_v48  ;;  %v5327_v63 = vld [vmem:[#allocation11 + $0x130] sm:$0xff] }
 0x851   : > { %v8774_v6 = vpop.eup %8773  ;;  %8779 = vrsqrt.f32 %v3224_v21 }
 0x852   : > { %v3257_v52 = vmul.f32 %v8774_v6, %v10906_v25  ;;  %v3258_v30 = vmul.f32 %v8774_v6, %v10909_v9  ;;  %v3179_v24 = vpop.xlane.xlu0 %3178  ;;  %v11088_v42 = vpack.c.bf16 %v3342_v15, %v3340_v58  ;;  %v11090_v13 = vpack.c.bf16 %v3341_v19, %v3339_v47  ;;  %v5325_v9 = vld [vmem:[#allocation11 + $0x110] sm:$0xff] }
 0x853   : > { %5718 = vmatpush1.bf16.msra.mxu0 %v7650_v59  ;;  %v8776_v55 = vpop.eup %8775  ;;  %v3209_v0 = vmul.f32 0.00390625, %v3179_v24  ;;  %v7663_v15 = vcombine.high %v5325_v9, %v5327_v63  ;;  %v5329_v24 = vld [vmem:[#allocation11 + $0x150] sm:$0xff] }
 0x854   : > { %5719 = vmatprep.subr.bf16.mxu0 %v7655_v34  ;;  %v3259_v41 = vmul.f32 %v8776_v55, %v10916_v28  ;;  %v3260_v12 = vmul.f32 %v8776_v55, %v10919_v46  ;;  %v3182_v3 = vpop.xlane.xlu1 %3181  ;;  %3875 = vmatprep.mubr.bf16.mxu1 %v11088_v42  ;;  %v3301_v25 = vmul.f32 %v11043_v60, %v3258_v30 }
 0x855   : > { %3988 = vmatprep.mubr.bf16.mxu0 %v11088_v42  ;;  %v3225_v39 = vadd.f32 1e-12, %v3209_v0  ;;  %v3210_v59 = vmul.f32 0.00390625, %v3182_v3  ;;  %3876 = vmatmul.mubr.bf16.gmra.mrb[68].mxu1 %v11090_v13  ;;  %v3300_v21 = vmul.f32 %v11037_v40, %v3257_v52  ;;  %v7658_v28 = vcombine.low %v5321_v8, %v5323_v48  ;;  %v5331_v52 = vld [vmem:[#allocation11 + $0x170] sm:$0xff] }
 0x856   : > { %3989 = vmatmul.mubr.bf16.gmra.mrb[132].mxu0 %v11090_v13  ;;  %v3303_v46 = vmul.f32 %v11043_v60, %v3260_v12  ;;  %v3302_v34 = vmul.f32 %v11037_v40, %v3259_v41  ;;  %v3344_v47 = vadd.f32 %v11051_v4, %v3301_v25  ;;  %v7662_v8 = vcombine.low %v5325_v9, %v5327_v63  ;;  %v5335_v9 = vld [vmem:[#allocation11 + $0x1b0] sm:$0xff] }
 0x857   : > { %5720 = vmatpush1.bf16.msra.mxu0 %v7654_v14  ;;  %8781 = vrsqrt.f32 %v3225_v39  ;;  %v3226_v58 = vadd.f32 1e-12, %v3210_v59  ;;  %v3343_v6 = vadd.f32 %v11048_v44, %v3300_v21  ;;  %v7667_v25 = vcombine.high %v5329_v24, %v5331_v52 }
 0x858   : > { %5721 = vmatprep.subr.bf16.mxu0 %v7659_v32  ;;  %v3346_v19 = vadd.f32 %v11051_v4, %v3303_v46  ;;  %v3345_v30 = vadd.f32 %v11048_v44, %v3302_v34 }
 0x859   : > { %v8778_v14 = vpop.eup %8777  ;;  %8783 = vrsqrt.f32 %v3226_v58 }
 0x85a   : > { %v3261_v48 = vmul.f32 %v8778_v14, %v10926_v56  ;;  %v3262_v55 = vmul.f32 %v8778_v14, %v10929_v38  ;;  %v3185_v0 = vpop.xlane.xlu0 %3184  ;;  %v11108_v32 = vpack.c.bf16 %v3346_v19, %v3344_v47  ;;  %v11110_v41 = vpack.c.bf16 %v3345_v30, %v3343_v6  ;;  %v5333_v38 = vld [vmem:[#allocation11 + $0x190] sm:$0xff] }
 0x85b   : > { %5722 = vmatpush1.bf16.msra.mxu0 %v7658_v28  ;;  %v8780_v12 = vpop.eup %8779  ;;  %v3211_v3 = vmul.f32 0.00390625, %v3185_v0  ;;  %v5337_v14 = vld [vmem:[#allocation11 + $0x1d0] sm:$0xff] }
 0x85c   : > { %5723 = vmatprep.subr.bf16.mxu0 %v7663_v15  ;;  %v3263_v39 = vmul.f32 %v8780_v12, %v10936_v20  ;;  %v3264_v59 = vmul.f32 %v8780_v12, %v10939_v57  ;;  %v3188_v21 = vpop.xlane.xlu1 %3187  ;;  %3885 = vmatprep.mubr.bf16.mxu1 %v11108_v32  ;;  %v3305_v56 = vmul.f32 %v11043_v60, %v3262_v55 }
 0x85d   : > { %3998 = vmatprep.mubr.bf16.mxu0 %v11108_v32  ;;  %v3227_v63 = vadd.f32 1e-12, %v3211_v3  ;;  %v3212_v28 = vmul.f32 0.00390625, %v3188_v21  ;;  %3886 = vmatmul.mubr.bf16.gmra.mrb[72].mxu1 %v11110_v41  ;;  %v3304_v46 = vmul.f32 %v11037_v40, %v3261_v48  ;;  %v7666_v20 = vcombine.low %v5329_v24, %v5331_v52  ;;  %v5339_v48 = vld [vmem:[#allocation11 + $0x1f0] sm:$0xff] }
 0x85e   : > { %3999 = vmatmul.mubr.bf16.gmra.mrb[136].mxu0 %v11110_v41  ;;  %v3307_v57 = vmul.f32 %v11043_v60, %v3264_v59  ;;  %v3306_v34 = vmul.f32 %v11037_v40, %v3263_v39  ;;  %v7671_v15 = vcombine.high %v5333_v38, %v5335_v9  ;;  %v3348_v47 = vadd.f32 %v11051_v4, %v3305_v56 }
 0x85f   : > { %5724 = vmatpush1.bf16.msra.mxu0 %v7662_v8  ;;  %8785 = vrsqrt.f32 %v3227_v63  ;;  %v3228_v58 = vadd.f32 1e-12, %v3212_v28  ;;  %v3347_v6 = vadd.f32 %v11048_v44, %v3304_v46  ;;  %v7670_v24 = vcombine.low %v5333_v38, %v5335_v9  ;;  %v5343_v38 = vld [vmem:[#allocation11 + $0x230] sm:$0xff] }
 0x860   : > { %5725 = vmatprep.subr.bf16.mxu0 %v7667_v25  ;;  %v3350_v19 = vadd.f32 %v11051_v4, %v3307_v57  ;;  %v3349_v30 = vadd.f32 %v11048_v44, %v3306_v34  ;;  %v7675_v59 = vcombine.high %v5337_v14, %v5339_v48 }
 0x861   : > { %v8782_v8 = vpop.eup %8781  ;;  %8787 = vrsqrt.f32 %v3228_v58 }
 0x862   : > { %v3265_v52 = vmul.f32 %v8782_v8, %v10946_v36  ;;  %v3266_v55 = vmul.f32 %v8782_v8, %v10949_v49  ;;  %v3191_v0 = vpop.xlane.xlu0 %3190  ;;  %v11128_v12 = vpack.c.bf16 %v3350_v19, %v3348_v47  ;;  %v11130_v3 = vpack.c.bf16 %v3349_v30, %v3347_v6  ;;  %v5341_v49 = vld [vmem:[#allocation11 + $0x210] sm:$0xff] }
 0x863   : > { %5726 = vmatpush1.bf16.msra.mxu0 %v7666_v20  ;;  %v8784_v25 = vpop.eup %8783  ;;  %v3213_v39 = vmul.f32 0.00390625, %v3191_v0  ;;  %v7679_v34 = vcombine.high %v5341_v49, %v5343_v38  ;;  %v5345_v6 = vld [vmem:[#allocation11 + $0x250] sm:$0xff] }
 0x864   : > { %5727 = vmatprep.subr.bf16.mxu0 %v7671_v15  ;;  %v3267_v21 = vmul.f32 %v8784_v25, %v10956_v23  ;;  %v3268_v56 = vmul.f32 %v8784_v25, %v10959_v10  ;;  %v3194_v63 = vpop.xlane.xlu1 %3193  ;;  %3895 = vmatprep.mubr.bf16.mxu1 %v11128_v12  ;;  %v3309_v36 = vmul.f32 %v11043_v60, %v3266_v55  ;;  %v5347_v30 = vld [vmem:[#allocation11 + $0x270] sm:$0xff] }
 0x865   : > { %4008 = vmatprep.mubr.bf16.mxu0 %v11128_v12  ;;  %v3229_v9 = vadd.f32 1e-12, %v3213_v39  ;;  %v3214_v28 = vmul.f32 0.00390625, %v3194_v63  ;;  %3896 = vmatmul.mubr.bf16.gmra.mrb[76].mxu1 %v11130_v3  ;;  %v3308_v46 = vmul.f32 %v11037_v40, %v3265_v52  ;;  %v7674_v23 = vcombine.low %v5337_v14, %v5339_v48 }
 0x866   : > { %4009 = vmatmul.mubr.bf16.gmra.mrb[140].mxu0 %v11130_v3  ;;  %v3311_v10 = vmul.f32 %v11043_v60, %v3268_v56  ;;  %v3310_v20 = vmul.f32 %v11037_v40, %v3267_v21  ;;  %v3352_v58 = vadd.f32 %v11051_v4, %v3309_v36  ;;  %v7678_v14 = vcombine.low %v5341_v49, %v5343_v38  ;;  %v5351_v36 = vld [vmem:[#allocation11 + $0x2b0] sm:$0xff] }
 0x867   : > { %5728 = vmatpush1.bf16.msra.mxu0 %v7670_v24  ;;  %8789 = vrsqrt.f32 %v3229_v9  ;;  %v3230_v57 = vadd.f32 1e-12, %v3214_v28  ;;  %v3351_v47 = vadd.f32 %v11048_v44, %v3308_v46 }
 0x868   : > { %5729 = vmatprep.subr.bf16.mxu0 %v7675_v59  ;;  %v3354_v15 = vadd.f32 %v11051_v4, %v3311_v10  ;;  %v3353_v19 = vadd.f32 %v11048_v44, %v3310_v20  ;;  %v7683_v59 = vcombine.high %v5345_v6, %v5347_v30 }
 0x869   : > { %v8786_v8 = vpop.eup %8785  ;;  %8791 = vrsqrt.f32 %v3230_v57 }
 0x86a   : > { %v3269_v48 = vmul.f32 %v8786_v8, %v10966_v31  ;;  %v3270_v24 = vmul.f32 %v8786_v8, %v10969_v51  ;;  %v3197_v52 = vpop.xlane.xlu0 %3196  ;;  %v11148_v55 = vpack.c.bf16 %v3354_v15, %v3352_v58  ;;  %v11150_v0 = vpack.c.bf16 %v3353_v19, %v3351_v47  ;;  %v5349_v51 = vld [vmem:[#allocation11 + $0x290] sm:$0xff] }
 0x86b   : > { %5730 = vmatpush1.bf16.msra.mxu0 %v7674_v23  ;;  %v8788_v25 = vpop.eup %8787  ;;  %v3215_v39 = vmul.f32 0.00390625, %v3197_v52  ;;  %v7687_v23 = vcombine.high %v5349_v51, %v5351_v36  ;;  %v5353_v58 = vld [vmem:[#allocation11 + $0x2d0] sm:$0xff]  ;;  %v7686_v19 = vcombine.low %v5349_v51, %v5351_v36 }
 0x86c   : > { %5731 = vmatprep.subr.bf16.mxu0 %v7679_v34  ;;  %v3271_v21 = vmul.f32 %v8788_v25, %v10976_v33  ;;  %v3272_v56 = vmul.f32 %v8788_v25, %v10979_v2  ;;  %v3200_v63 = vpop.xlane.xlu1 %3199  ;;  %3905 = vmatprep.mubr.bf16.mxu1 %v11148_v55  ;;  %v3313_v31 = vmul.f32 %v11043_v60, %v3270_v24  ;;  %v5355_v15 = vld [vmem:[#allocation11 + $0x2f0] sm:$0xff] }
 0x86d   : > { %4018 = vmatprep.mubr.bf16.mxu0 %v11148_v55  ;;  %v3231_v49 = vadd.f32 1e-12, %v3215_v39  ;;  %v3216_v38 = vmul.f32 0.00390625, %v3200_v63  ;;  %3906 = vmatmul.mubr.bf16.gmra.mrb[80].mxu1 %v11150_v0  ;;  %v3312_v9 = vmul.f32 %v11037_v40, %v3269_v48  ;;  %v7682_v33 = vcombine.low %v5345_v6, %v5347_v30  ;;  %v5357_v39 = vld [vmem:[#allocation11 + $0x310] sm:$0xff] }
 0x86e   : > { %4019 = vmatmul.mubr.bf16.gmra.mrb[144].mxu0 %v11150_v0  ;;  %v3315_v2 = vmul.f32 %v11043_v60, %v3272_v56  ;;  %v3314_v28 = vmul.f32 %v11037_v40, %v3271_v21  ;;  %v3356_v10 = vadd.f32 %v11051_v4, %v3313_v31  ;;  %v7691_v24 = vcombine.high %v5353_v58, %v5355_v15 }
 0x86f   : > { %5732 = vmatpush1.bf16.msra.mxu0 %v7678_v14  ;;  %8793 = vrsqrt.f32 %v3231_v49  ;;  %v3232_v46 = vadd.f32 1e-12, %v3216_v38  ;;  %v3355_v57 = vadd.f32 %v11048_v44, %v3312_v9  ;;  %v7690_v21 = vcombine.low %v5353_v58, %v5355_v15  ;;  %v5361_v49 = vld [vmem:[#allocation11 + $0x350] sm:$0xff] }
 0x870   : > { %5733 = vmatprep.subr.bf16.mxu0 %v7683_v59  ;;  %v3358_v20 = vadd.f32 %v11051_v4, %v3315_v2  ;;  %v3357_v34 = vadd.f32 %v11048_v44, %v3314_v28  ;;  %v5363_v38 = vld [vmem:[#allocation11 + $0x370] sm:$0xff] }
 0x871   : > { %v8790_v47 = vpop.eup %8789  ;;  %8795 = vrsqrt.f32 %v3232_v46  ;;  %v5365_v58 = vld [vmem:[#allocation11 + $0x390] sm:$0xff] }
 0x872   : > { %v3273_v6 = vmul.f32 %v8790_v47, %v10986_v1  ;;  %v3274_v30 = vmul.f32 %v8790_v47, %v10989_v7  ;;  %v11168_v8 = vpack.c.bf16 %v3358_v20, %v3356_v10  ;;  %v11170_v14 = vpack.c.bf16 %v3357_v34, %v3355_v57  ;;  %v5359_v7 = vld [vmem:[#allocation11 + $0x330] sm:$0xff] }
 0x873   : > { %5734 = vmatpush1.bf16.msra.mxu0 %v7682_v33  ;;  %v8792_v48 = vpop.eup %8791  ;;  %v7695_v56 = vcombine.high %v5357_v39, %v5359_v7  ;;  %v7694_v33 = vcombine.low %v5357_v39, %v5359_v7  ;;  %v7699_v20 = vcombine.high %v5361_v49, %v5363_v38  ;;  %v7698_v47 = vcombine.low %v5361_v49, %v5363_v38  ;;  %v5371_v39 = vld [vmem:[#allocation11 + $0x3f0] sm:$0xff] }
 0x874   : > { %5735 = vmatprep.subr.bf16.mxu0 %v7687_v23  ;;  %v3275_v52 = vmul.f32 %v8792_v48, %v10996_v29  ;;  %v3276_v25 = vmul.f32 %v8792_v48, %v10999_v62  ;;  %3915 = vmatprep.mubr.bf16.mxu1 %v11168_v8  ;;  %v3317_v1 = vmul.f32 %v11043_v60, %v3274_v30  ;;  %v8424_v49 = vld [vmem:[#allocation13 + $0x34] ss:$8 sps:$4 sm:$0xff]  }
 0x875   : > { %4028 = vmatprep.mubr.bf16.mxu0 %v11168_v8  ;;  %3916 = vmatmul.mubr.bf16.gmra.mrb[84].mxu1 %v11170_v14  ;;  %v3316_v59 = vmul.f32 %v11037_v40, %v3273_v6  ;;  %v8415_v6 = vld [vmem:[#allocation13 + $0x4] ss:$8 sps:$4 sm:$0xff]  }
 0x876   : > { %4029 = vmatmul.mubr.bf16.gmra.mrb[148].mxu0 %v11170_v14  ;;  %v3319_v29 = vmul.f32 %v11043_v60, %v3276_v25  ;;  %v3318_v62 = vmul.f32 %v11037_v40, %v3275_v52  ;;  %v3360_v63 = vadd.f32 %v11051_v4, %v3317_v1  ;;  %v5369_v1 = vld [vmem:[#allocation11 + $0x3d0] sm:$0xff]  ;;  %5051 = vmatprep.subr.bf16.mxu1 %v8415_v6  ;;  %v8433_v6 = vld [vmem:[#allocation13 + $0x64] ss:$8 sps:$4 sm:$0xff]  }
 0x877   : > { %5736 = vmatpush1.bf16.msra.mxu0 %v7686_v19  ;;  %v3359_v51 = vadd.f32 %v11048_v44, %v3316_v59  ;;  %v8413_v19 = vld [vmem:[#allocation13] ss:$8 sps:$4 sm:$0xff]   ;;  %v7707_v59 = vcombine.high %v5369_v1, %v5371_v39 }
 0x878   : > { %5737 = vmatprep.subr.bf16.mxu0 %v7691_v24  ;;  %v3362_v31 = vadd.f32 %v11051_v4, %v3319_v29  ;;  %v3361_v36 = vadd.f32 %v11048_v44, %v3318_v62  ;;  %5052 = vmatpush1.bf16.msra.mxu1 %v8413_v19  ;;  %v8418_v29 = vld [vmem:[#allocation13 + $0x14] ss:$8 sps:$4 sm:$0xff]   ;;  %v7706_v62 = vcombine.low %v5369_v1, %v5371_v39  ;;  %v8428_v19 = vld [vmem:[#allocation13 + $0x50] ss:$8 sps:$4 sm:$0xff]  }
 0x879   : > { %v8794_v9 = vpop.eup %8793  ;;  %5053 = vmatprep.subr.bf16.mxu1 %v8418_v29  ;;  %v5340_v29 = vld [vmem:[#allocation11 + $0x1f8] sm:$0xff] }
 0x87a   : > { %v3277_v2 = vmul.f32 %v8794_v9, %v11014_v5  ;;  %v3278_v28 = vmul.f32 %v8794_v9, %v11017_v18  ;;  %v11188_v46 = vpack.c.bf16 %v3362_v31, %v3360_v63  ;;  %v11190_v23 = vpack.c.bf16 %v3361_v36, %v3359_v51  ;;  %v5367_v18 = vld [vmem:[#allocation11 + $0x3b0] sm:$0xff]  ;;  %v5314_v31 = vld [vmem:[#allocation11 + $0x58] sm:$0xff]  ;;  %v8419_v36 = vld [vmem:[#allocation13 + $0x20] ss:$8 sps:$4 sm:$0xff]  }
 0x87b   : > { %5738 = vmatpush1.bf16.msra.mxu0 %v7690_v21  ;;  %v8796_v10 = vpop.eup %8795  ;;  %v7703_v30 = vcombine.high %v5365_v58, %v5367_v18  ;;  %v7702_v7 = vcombine.low %v5365_v58, %v5367_v18  ;;  %v5312_v21 = vld [vmem:[#allocation11 + $0x38] sm:$0xff]  ;;  %v8425_v58 = vld [vmem:[#allocation13 + $0x40] ss:$8 sps:$4 sm:$0xff]  }
 0x87c   : > { %5739 = vmatprep.subr.bf16.mxu0 %v7695_v56  ;;  %v3279_v57 = vmul.f32 %v8796_v10, %v11024_v35  ;;  %v3280_v34 = vmul.f32 %v8796_v10, %v11027_v27  ;;  %3925 = vmatprep.mubr.bf16.mxu1 %v11188_v46  ;;  %v3321_v5 = vmul.f32 %v11043_v60, %v3278_v28  ;;  %v8421_v56 = vld [vmem:[#allocation13 + $0x24] ss:$8 sps:$4 sm:$0xff]   ;;  %v5316_v51 = vld [vmem:[#allocation11 + $0x78] sm:$0xff] }
 0x87d   : > { %4038 = vmatprep.mubr.bf16.mxu0 %v11188_v46  ;;  %3926 = vmatmul.mubr.bf16.gmra.mrb[88].mxu1 %v11190_v23  ;;  %v3320_v15 = vmul.f32 %v11037_v40, %v3277_v2  ;;  %v7653_v9 = vcombine.high %v5314_v31, %v5316_v51  ;;  %v5320_v2 = vld [vmem:[#allocation11 + $0xb8] sm:$0xff]  ;;  %v8427_v10 = vld [vmem:[#allocation13 + $0x44] ss:$8 sps:$4 sm:$0xff]  }
 0x87e   : > { %4039 = vmatmul.mubr.bf16.gmra.mrb[152].mxu0 %v11190_v23  ;;  %v3323_v35 = vmul.f32 %v11043_v60, %v3280_v34  ;;  %v3322_v27 = vmul.f32 %v11037_v40, %v3279_v57  ;;  %v3364_v48 = vadd.f32 %v11051_v4, %v3321_v5  ;;  %v8422_v28 = vld [vmem:[#allocation13 + $0x30] ss:$8 sps:$4 sm:$0xff]   ;;  %v8430_v18 = vld [vmem:[#allocation13 + $0x54] ss:$8 sps:$4 sm:$0xff]  }
 0x87f   : > { %5740 = vmatpush1.bf16.msra.mxu0 %v7694_v33  ;;  %v3363_v52 = vadd.f32 %v11048_v44, %v3320_v15  ;;  %v5318_v33 = vld [vmem:[#allocation11 + $0x98] sm:$0xff] }
 0x880   : > { %5741 = vmatprep.subr.bf16.mxu0 %v7699_v20  ;;  %v3366_v24 = vadd.f32 %v11051_v4, %v3323_v35  ;;  %v3365_v25 = vadd.f32 %v11048_v44, %v3322_v27  ;;  %v5310_v4 = vld [vmem:[#allocation11 + $0x18] sm:$0xff]  ;;  %v7652_v20 = vcombine.low %v5314_v31, %v5316_v51  ;;  %v7657_v57 = vcombine.high %v5318_v33, %v5320_v2 }
 0x881   : > { %v8416_v44 = vld [vmem:[#allocation13 + $0x10] ss:$8 sps:$4 sm:$0xff]   ;;  %v7649_v63 = vcombine.high %v5310_v4, %v5312_v21  ;;  %v7648_v38 = vcombine.low %v5310_v4, %v5312_v21  ;;  %v7656_v15 = vcombine.low %v5318_v33, %v5320_v2 }
 0x882   : > { %v11206_v60 = vpack.c.bf16 %v3366_v24, %v3364_v48  ;;  %v11208_v40 = vpack.c.bf16 %v3365_v25, %v3363_v52  ;;  %5054 = vmatpush1.bf16.msra.mxu1 %v8416_v44  ;;  %v5322_v34 = vld [vmem:[#allocation11 + $0xd8] sm:$0xff]  ;;  %v8431_v25 = vld [vmem:[#allocation13 + $0x60] ss:$8 sps:$4 sm:$0xff]  }
 0x883   : > { %5742 = vmatpush1.bf16.msra.mxu0 %v7698_v47  ;;  %5055 = vmatprep.subr.bf16.mxu1 %v8421_v56  ;;  %v5324_v5 = vld [vmem:[#allocation11 + $0xf8] sm:$0xff] }
 0x884   : > { %5743 = vmatprep.subr.bf16.mxu0 %v7703_v30  ;;  %3935 = vmatprep.mubr.bf16.mxu1 %v11206_v60  ;;  %v7661_v47 = vcombine.high %v5322_v34, %v5324_v5  ;;  %v5326_v35 = vld [vmem:[#allocation11 + $0x118] sm:$0xff]  ;;  %v7660_v30 = vcombine.low %v5322_v34, %v5324_v5 }
 0x885   : > { %4048 = vmatprep.mubr.bf16.mxu0 %v11206_v60  ;;  %3936 = vmatmul.mubr.bf16.gmra.mrb[92].mxu1 %v11208_v40  ;;  %v5328_v27 = vld [vmem:[#allocation11 + $0x138] sm:$0xff] }
 0x886   : > { %4049 = vmatmul.mubr.bf16.gmra.mrb[156].mxu0 %v11208_v40  ;;  %5056 = vmatpush1.bf16.msra.mxu1 %v8419_v36  ;;  %v7665_v48 = vcombine.high %v5326_v35, %v5328_v27  ;;  %v5330_v24 = vld [vmem:[#allocation11 + $0x158] sm:$0xff]  ;;  %v7664_v1 = vcombine.low %v5326_v35, %v5328_v27 }
 0x887   : > { %5744 = vmatpush1.bf16.msra.mxu0 %v7702_v7  ;;  %5747 = vmatprep.mubr.bf16.mxu0 %v11065_v43  ;;  %v5332_v52 = vld [vmem:[#allocation11 + $0x178] sm:$0xff] }
 0x888   : > { %5745 = vmatprep.subr.bf16.mxu0 %v7707_v59  ;;  %5057 = vmatprep.subr.bf16.mxu1 %v8424_v49  ;;  %v7669_v39 = vcombine.high %v5330_v24, %v5332_v52  ;;  %v5334_v7 = vld [vmem:[#allocation11 + $0x198] sm:$0xff]  ;;  %v7668_v4 = vcombine.low %v5330_v24, %v5332_v52 }
 0x889   : > { %v5336_v59 = vld [vmem:[#allocation11 + $0x1b8] sm:$0xff] }
 0x88a   : > { %5058 = vmatpush1.bf16.msra.mxu1 %v8422_v28  ;;  %v7673_v21 = vcombine.high %v5334_v7, %v5336_v59  ;;  %v5338_v44 = vld [vmem:[#allocation11 + $0x1d8] sm:$0xff]  ;;  %v8439_v28 = vld [vmem:[#allocation13 + $0x84] ss:$8 sps:$4 sm:$0xff]  }
 0x88b   : > { %5746 = vmatpush1.bf16.msra.mxu0 %v7706_v62  ;;  %5059 = vmatprep.subr.bf16.mxu1 %v8427_v10  ;;  %v7672_v62 = vcombine.low %v5334_v7, %v5336_v59  ;;  %v7677_v56 = vcombine.high %v5338_v44, %v5340_v29  ;;  %v5344_v31 = vld [vmem:[#allocation11 + $0x238] sm:$0xff]  ;;  %v7676_v51 = vcombine.low %v5338_v44, %v5340_v29 }
 0x88c   : > { %5828 = vmatprep.subr.bf16.mxu0 %v7649_v63  ;;  %v5342_v63 = vld [vmem:[#allocation11 + $0x218] sm:$0xff] }
 0x88d   : > { %v8436_v36 = vld [vmem:[#allocation13 + $0x74] ss:$8 sps:$4 sm:$0xff]   ;;  %v7681_v49 = vcombine.high %v5342_v63, %v5344_v31  ;;  %v7680_v2 = vcombine.low %v5342_v63, %v5344_v31  ;;  %v8446_v29 = vld [vmem:[#allocation13 + $0xb0] ss:$8 sps:$4 sm:$0xff]  }
 0x88e   : > { %5748 = vmatmul.mubr.bf16.vlgmr.msra.gmra.mrb[160].mxu0 %v11067_v16  ;;  %5060 = vmatpush1.bf16.msra.mxu1 %v8425_v58  ;;  %v5348_v33 = vld [vmem:[#allocation11 + $0x278] sm:$0xff] }
 0x88f   : > { %5757 = vmatprep.mubr.bf16.mxu0 %v11088_v42  ;;  %5829 = vmatpush1.bf16.msra.mxu0 %v7648_v38  ;;  %v8434_v38 = vld [vmem:[#allocation13 + $0x70] ss:$8 sps:$4 sm:$0xff]   ;;  %v8442_v58 = vld [vmem:[#allocation13 + $0x94] ss:$8 sps:$4 sm:$0xff]  }
 0x890   : > { %5830 = vmatprep.subr.bf16.mxu0 %v7653_v9  ;;  %5061 = vmatprep.subr.bf16.mxu1 %v8430_v18  ;;  %v5346_v9 = vld [vmem:[#allocation11 + $0x258] sm:$0xff] }
 0x891   : > { %v7685_v10 = vcombine.high %v5346_v9, %v5348_v33  ;;  %v5352_v34 = vld [vmem:[#allocation11 + $0x2b8] sm:$0xff]  ;;  %v7684_v5 = vcombine.low %v5346_v9, %v5348_v33  ;;  %v8449_v9 = vld [vmem:[#allocation13 + $0xc0] ss:$8 sps:$4 sm:$0xff]  }
 0x892   : > { %5062 = vmatpush1.bf16.msra.mxu1 %v8428_v19  ;;  %v5356_v35 = vld [vmem:[#allocation11 + $0x2f8] sm:$0xff] }
 0x893   : > { %5831 = vmatpush1.bf16.msra.mxu0 %v7652_v20  ;;  %5063 = vmatprep.subr.bf16.mxu1 %v8433_v6  ;;  %v8437_v20 = vld [vmem:[#allocation13 + $0x80] ss:$8 sps:$4 sm:$0xff]   ;;  %v5358_v6 = vld [vmem:[#allocation11 + $0x318] sm:$0xff] }
 0x894   : > { %5832 = vmatprep.subr.bf16.mxu0 %v7657_v57  ;;  %v5350_v57 = vld [vmem:[#allocation11 + $0x298] sm:$0xff] }
 0x895   : > { %v7689_v18 = vcombine.high %v5350_v57, %v5352_v34  ;;  %v7688_v27 = vcombine.low %v5350_v57, %v5352_v34  ;;  %v5362_v52 = vld [vmem:[#allocation11 + $0x358] sm:$0xff] }
 0x896   : > { %5758 = vmatmul.mubr.bf16.gmra.mrb[164].mxu0 %v11090_v13  ;;  %5064 = vmatpush1.bf16.msra.mxu1 %v8431_v25  ;;  %v5364_v25 = vld [vmem:[#allocation11 + $0x378] sm:$0xff] }
 0x897   : > { %5767 = vmatprep.mubr.bf16.mxu0 %v11108_v32  ;;  %5833 = vmatpush1.bf16.msra.mxu0 %v7656_v15  ;;  %v8440_v15 = vld [vmem:[#allocation13 + $0x90] ss:$8 sps:$4 sm:$0xff]   ;;  %v7701_v59 = vcombine.high %v5362_v52, %v5364_v25  ;;  %v8448_v44 = vld [vmem:[#allocation13 + $0xb4] ss:$8 sps:$4 sm:$0xff]  }
 0x898   : > { %5834 = vmatprep.subr.bf16.mxu0 %v7661_v47  ;;  %5065 = vmatprep.subr.bf16.mxu1 %v8436_v36  ;;  %v5354_v47 = vld [vmem:[#allocation11 + $0x2d8] sm:$0xff] }
 0x899   : > { %v7693_v19 = vcombine.high %v5354_v47, %v5356_v35  ;;  %v5370_v63 = vld [vmem:[#allocation11 + $0x3d8] sm:$0xff] }
 0x89a   : > { %5066 = vmatpush1.bf16.msra.mxu1 %v8434_v38  ;;  %v5372_v31 = vld [vmem:[#allocation11 + $0x3f8] sm:$0xff]  ;;  %v8451_v38 = vld [vmem:[#allocation13 + $0xc4] ss:$8 sps:$4 sm:$0xff]  }
 0x89b   : > { %5835 = vmatpush1.bf16.msra.mxu0 %v7660_v30  ;;  %5067 = vmatprep.subr.bf16.mxu1 %v8439_v28  ;;  %v5360_v30 = vld [vmem:[#allocation11 + $0x338] sm:$0xff]  ;;  %v7709_v36 = vcombine.high %v5370_v63, %v5372_v31  ;;  %v8457_v28 = vld [vmem:[#allocation13 + $0xe4] ss:$8 sps:$4 sm:$0xff]  }
 0x89c   : > { %5836 = vmatprep.subr.bf16.mxu0 %v7665_v48  ;;  %v7692_v48 = vcombine.low %v5354_v47, %v5356_v35  ;;  %v7697_v24 = vcombine.high %v5358_v6, %v5360_v30  ;;  %v7696_v7 = vcombine.low %v5358_v6, %v5360_v30  ;;  %v8454_v33 = vld [vmem:[#allocation13 + $0xd4] ss:$8 sps:$4 sm:$0xff]  }
 0x89e   : > { %5768 = vmatmul.mubr.bf16.gmra.mrb[168].mxu0 %v11110_v41  ;;  %5068 = vmatpush1.bf16.msra.mxu1 %v8437_v20  ;;  %v8458_v20 = vld [vmem:[#allocation13 + $0xf0] ss:$8 sps:$4 sm:$0xff]  }
 0x89f   : > { %5777 = vmatprep.mubr.bf16.mxu0 %v11128_v12  ;;  %5837 = vmatpush1.bf16.msra.mxu0 %v7664_v1  ;;  %v8445_v1 = vld [vmem:[#allocation13 + $0xa4] ss:$8 sps:$4 sm:$0xff]  }
 0x8a0   : > { %5838 = vmatprep.subr.bf16.mxu0 %v7669_v39  ;;  %5069 = vmatprep.subr.bf16.mxu1 %v8442_v58  ;;  %v8443_v39 = vld [vmem:[#allocation13 + $0xa0] ss:$8 sps:$4 sm:$0xff]  }
 0x8a2   : > { %5070 = vmatpush1.bf16.msra.mxu1 %v8440_v15 }
 0x8a3   : > { %5839 = vmatpush1.bf16.msra.mxu0 %v7668_v4  ;;  %5071 = vmatprep.subr.bf16.mxu1 %v8445_v1  ;;  %v5366_v4 = vld [vmem:[#allocation11 + $0x398] sm:$0xff] }
 0x8a4   : > { %5840 = vmatprep.subr.bf16.mxu0 %v7673_v21  ;;  %v5368_v21 = vld [vmem:[#allocation11 + $0x3b8] sm:$0xff] }
 0x8a6   : > { %5778 = vmatmul.mubr.bf16.gmra.mrb[172].mxu0 %v11130_v3  ;;  %5072 = vmatpush1.bf16.msra.mxu1 %v8443_v39 }
 0x8a7   : > { %5787 = vmatprep.mubr.bf16.mxu0 %v11148_v55  ;;  %5841 = vmatpush1.bf16.msra.mxu0 %v7672_v62  ;;  %v7700_v62 = vcombine.low %v5362_v52, %v5364_v25 }
 0x8a8   : > { %5842 = vmatprep.subr.bf16.mxu0 %v7677_v56  ;;  %v7705_v56 = vcombine.high %v5366_v4, %v5368_v21  ;;  %5073 = vmatprep.subr.bf16.mxu1 %v8448_v44 }
 0x8aa   : > { %5074 = vmatpush1.bf16.msra.mxu1 %v8446_v29 }
 0x8ab   : > { %5843 = vmatpush1.bf16.msra.mxu0 %v7676_v51  ;;  %v7704_v51 = vcombine.low %v5366_v4, %v5368_v21  ;;  %5075 = vmatprep.subr.bf16.mxu1 %v8451_v38 }
 0x8ac   : > { %5844 = vmatprep.subr.bf16.mxu0 %v7681_v49  ;;  %v7708_v49 = vcombine.low %v5370_v63, %v5372_v31 }
 0x8ae   : > { %5788 = vmatmul.mubr.bf16.gmra.mrb[176].mxu0 %v11150_v0  ;;  %5076 = vmatpush1.bf16.msra.mxu1 %v8449_v9 }
 0x8af   : > { %5797 = vmatprep.mubr.bf16.mxu0 %v11168_v8  ;;  %5845 = vmatpush1.bf16.msra.mxu0 %v7680_v2  ;;  %v8452_v2 = vld [vmem:[#allocation13 + $0xd0] ss:$8 sps:$4 sm:$0xff]  }
 0x8b0   : > { %5846 = vmatprep.subr.bf16.mxu0 %v7685_v10  ;;  %5077 = vmatprep.subr.bf16.mxu1 %v8454_v33  ;;  %v8455_v10 = vld [vmem:[#allocation13 + $0xe0] ss:$8 sps:$4 sm:$0xff]  }
 0x8b2   : > { %5078 = vmatpush1.bf16.msra.mxu1 %v8452_v2 }
 0x8b3   : > { %5847 = vmatpush1.bf16.msra.mxu0 %v7684_v5  ;;  %5079 = vmatprep.subr.bf16.mxu1 %v8457_v28 }
 0x8b4   : > { %5848 = vmatprep.subr.bf16.mxu0 %v7689_v18 }
 0x8b6   : > { %5798 = vmatmul.mubr.bf16.gmra.mrb[180].mxu0 %v11170_v14  ;;  %5080 = vmatpush1.bf16.msra.mxu1 %v8455_v10 }
 0x8b7   : > { %5807 = vmatprep.mubr.bf16.mxu0 %v11188_v46  ;;  %5849 = vmatpush1.bf16.msra.mxu0 %v7688_v27 }
 0x8b8   : > { %5850 = vmatprep.subr.bf16.mxu0 %v7693_v19 }
 0x8bb   : > { %5851 = vmatpush1.bf16.msra.mxu0 %v7692_v48 }
 0x8bc   : > { %5852 = vmatprep.subr.bf16.mxu0 %v7697_v24 }
 0x8be   : > { %5808 = vmatmul.mubr.bf16.gmra.mrb[184].mxu0 %v11190_v23 }
 0x8bf   : > { %5817 = vmatprep.mubr.bf16.mxu0 %v11206_v60  ;;  %5853 = vmatpush1.bf16.msra.mxu0 %v7696_v7 }
 0x8c0   : > { %5854 = vmatprep.subr.bf16.mxu0 %v7701_v59 }
 0x8c3   : > { %5855 = vmatpush1.bf16.msra.mxu0 %v7700_v62 }
 0x8c4   : > { %5856 = vmatprep.subr.bf16.mxu0 %v7705_v56 }
 0x8c6   : > { %5818 = vmatmul.mubr.bf16.gmra.mrb[188].mxu0 %v11208_v40 }
 0x8c7   : > { %5857 = vmatpush1.bf16.msra.mxu0 %v7704_v51  ;;  %5860 = vmatprep.mubr.bf16.mxu0 %v11065_v43  ;;  %v8460_v43 = vld [vmem:[#allocation13 + $0xf4] ss:$8 sps:$4 sm:$0xff]  }
 0x8c8   : > { %5858 = vmatprep.subr.bf16.mxu0 %v7709_v36  ;;  %5081 = vmatprep.subr.bf16.mxu1 %v8460_v43 }
 0x8c9   : > { %5082 = vmatpush1.bf16.msra.mxu1 %v8458_v20 }
 0x8cb   : > { %5859 = vmatpush1.bf16.msra.mxu0 %v7708_v49 }
 0x8ce   : > { %5861 = vmatmul.mubr.bf16.vlgmr.msra.gmra.mrb[192].mxu0 %v11067_v16  ;;  %v8463_v16 = vld [vmem:[#allocation13 + $0x104] ss:$8 sps:$4 sm:$0xff]  }
 0x8cf   : > { %5870 = vmatprep.mubr.bf16.mxu0 %v11088_v42  ;;  %5164 = vmatprep.subr.bf16.mxu1 %v8463_v16  ;;  %v3491_v42 = vld [vmem:[%s13494_s21] sm:$0xf] }
 0x8d6   : > { %5871 = vmatmul.mubr.bf16.gmra.mrb[196].mxu0 %v11090_v13  ;;  %v11250_v13 = vrot.slane %v3491_v42, %v10018_v61 }
 0x8d7   : > { %5880 = vmatprep.mubr.bf16.mxu0 %v11108_v32  ;;  %v11253_v32 = vrot.slane %v3491_v42, %v10189_v22 }
 0x8de   : > { %5881 = vmatmul.mubr.bf16.gmra.mrb[200].mxu0 %v11110_v41  ;;  %v11256_v41 = vrot.slane %v3491_v42, %v10015_v54 }
 0x8df   : > { %5890 = vmatprep.mubr.bf16.mxu0 %v11128_v12  ;;  %v11259_v12 = vrot.slane %v3491_v42, %v10192_v37 }
 0x8e6   : > { %5891 = vmatmul.mubr.bf16.gmra.mrb[204].mxu0 %v11130_v3 }
 0x8e7   : > { %5900 = vmatprep.mubr.bf16.mxu0 %v11148_v55 }
 0x8ee   : > { %5901 = vmatmul.mubr.bf16.gmra.mrb[208].mxu0 %v11150_v0 }
 0x8ef   : > { %5910 = vmatprep.mubr.bf16.mxu0 %v11168_v8 }
 0x8f6   : > { %5911 = vmatmul.mubr.bf16.gmra.mrb[212].mxu0 %v11170_v14 }
 0x8f7   : > { %5920 = vmatprep.mubr.bf16.mxu0 %v11188_v46 }
 0x8fe   : > { %5921 = vmatmul.mubr.bf16.gmra.mrb[216].mxu0 %v11190_v23 }
 0x8ff   : > { %5930 = vmatprep.mubr.bf16.mxu0 %v11206_v60 }
 0x906   : > { %5931 = vmatmul.mubr.bf16.gmra.mrb[220].mxu0 %v11208_v40 }
 0x920   : > { %v3867_v3 = vpop.f32.mrb[64].mxu1  ;;  %v3980_v55 = vpop.f32.mrb[128].mxu0 }
 0x921   : > { %v11262_v0 = vadd.f32 %v3867_v3, %v11250_v13  ;;  %v11265_v8 = vadd.f32 %v3980_v55, %v11253_v32  ;;  %v3869_v14 = vpop.f32.mrb[65].mxu1  ;;  %v3982_v46 = vpop.f32.mrb[129].mxu0 }
 0x922   : > { %v11268_v23 = vadd.f32 %v3869_v14, %v11256_v41  ;;  %v11271_v60 = vadd.f32 %v3982_v46, %v11259_v12  ;;  %v3871_v40 = vpop.f32.mrb[66].mxu1  ;;  %v3984_v57 = vpop.f32.mrb[130].mxu0 }
 0x923   : > { %v4059_v34 = vmul.f32 %v11262_v0, %v11262_v0  ;;  %v4061_v5 = vmul.f32 %v11265_v8, %v11265_v8  ;;  %v11278_v58 = vadd.f32 %v3871_v40, %v11250_v13  ;;  %v11281_v18 = vadd.f32 %v3984_v57, %v11253_v32  ;;  %v3873_v15 = vpop.f32.mrb[67].mxu1  ;;  %v3986_v47 = vpop.f32.mrb[131].mxu0 }
 0x924   : > { %13495 = vst [vmem:[#allocation56_spill] sm:$0xff] %v11271_v60  ;;  %v4060_v35 = vmul.f32 %v11268_v23, %v11268_v23  ;;  %v4062_v27 = vmul.f32 %v11271_v60, %v11271_v60  ;;  %v11288_v19 = vadd.f32 %v3873_v15, %v11256_v41  ;;  %v11291_v6 = vadd.f32 %v3986_v47, %v11259_v12 }
 0x925   : > { %v4123_v30 = vmul.f32 %v4059_v34, %v11262_v0  ;;  %v4125_v48 = vmul.f32 %v4061_v5, %v11265_v8  ;;  %v4063_v24 = vmul.f32 %v11278_v58, %v11278_v58  ;;  %v4065_v52 = vmul.f32 %v11281_v18, %v11281_v18 }
 0x926   : > { %13496 = vst [vmem:[#allocation57_spill] sm:$0xff] %v11291_v6  ;;  %v4124_v25 = vmul.f32 %v4060_v35, %v11268_v23  ;;  %v4126_v1 = vmul.f32 %v4062_v27, %v11271_v60  ;;  %v4064_v39 = vmul.f32 %v11288_v19, %v11288_v19  ;;  %v4066_v7 = vmul.f32 %v11291_v6, %v11291_v6 }
 0x927   : > { %v4187_v59 = vmul.f32 0.044715, %v4123_v30  ;;  %v4189_v4 = vmul.f32 0.044715, %v4125_v48  ;;  %v4127_v21 = vmul.f32 %v4063_v24, %v11278_v58  ;;  %v4129_v44 = vmul.f32 %v4065_v52, %v11281_v18 }
 0x928   : > { %v4188_v29 = vmul.f32 0.044715, %v4124_v25  ;;  %v4190_v62 = vmul.f32 0.044715, %v4126_v1  ;;  %v4128_v56 = vmul.f32 %v4064_v39, %v11288_v19  ;;  %v4130_v63 = vmul.f32 %v4066_v7, %v11291_v6  ;;  %v3877_v31 = vpop.f32.mrb[68].mxu1 }
 0x929   : > { %v3990_v51 = vpop.f32.mrb[132].mxu0  ;;  %v4251_v36 = vadd.f32 %v4187_v59, %v11262_v0  ;;  %v4253_v49 = vadd.f32 %v4189_v4, %v11265_v8  ;;  %v4191_v38 = vmul.f32 0.044715, %v4127_v21  ;;  %v4193_v9 = vmul.f32 0.044715, %v4129_v44  ;;  %v3879_v33 = vpop.f32.mrb[69].mxu1 }
 0x92a   : > { %v3992_v2 = vpop.f32.mrb[133].mxu0  ;;  %v4252_v28 = vadd.f32 %v4188_v29, %v11268_v23  ;;  %v4254_v10 = vadd.f32 %v4190_v62, %v11271_v60  ;;  %v4192_v43 = vmul.f32 0.044715, %v4128_v56  ;;  %v4194_v20 = vmul.f32 0.044715, %v4130_v63  ;;  %v3881_v16 = vpop.f32.mrb[70].mxu1 }
 0x92b   : > { %v3994_v42 = vpop.f32.mrb[134].mxu0  ;;  %v4315_v3 = vmul.f32 0.7978846, %v4251_v36  ;;  %v4317_v55 = vmul.f32 0.7978846, %v4253_v49  ;;  %v4255_v14 = vadd.f32 %v4191_v38, %v11278_v58  ;;  %v4257_v46 = vadd.f32 %v4193_v9, %v11281_v18  ;;  %v3883_v40 = vpop.f32.mrb[71].mxu1 }
 0x92c   : > { %v3996_v57 = vpop.f32.mrb[135].mxu0  ;;  %v4316_v34 = vmul.f32 0.7978846, %v4252_v28  ;;  %v4318_v5 = vmul.f32 0.7978846, %v4254_v10  ;;  %v4256_v15 = vadd.f32 %v4192_v43, %v11288_v19  ;;  %v4258_v47 = vadd.f32 %v4194_v20, %v11291_v6 }
 0x92d   : > { %8797 = vtanh.f32 %v4315_v3  ;;  %v4319_v35 = vmul.f32 0.7978846, %v4255_v14  ;;  %v4321_v27 = vmul.f32 0.7978846, %v4257_v46  ;;  %v11318_v30 = vadd.f32 %v3877_v31, %v11250_v13 }
 0x92e   : > { %8799 = vtanh.f32 %v4317_v55  ;;  %v4320_v48 = vmul.f32 0.7978846, %v4256_v15  ;;  %v4322_v24 = vmul.f32 0.7978846, %v4258_v47  ;;  %v11321_v52 = vadd.f32 %v3990_v51, %v11253_v32 }
 0x92f   : > { %8801 = vtanh.f32 %v4316_v34  ;;  %v4067_v25 = vmul.f32 %v11318_v30, %v11318_v30  ;;  %v11326_v1 = vadd.f32 %v3879_v33, %v11256_v41  ;;  %v11329_v39 = vadd.f32 %v3992_v2, %v11259_v12 }
 0x930   : > { %13497 = vst [vmem:[#allocation58_spill] sm:$0xff] %v11321_v52  ;;  %8803 = vtanh.f32 %v4318_v5  ;;  %v4069_v7 = vmul.f32 %v11321_v52, %v11321_v52  ;;  %v11334_v59 = vadd.f32 %v3881_v16, %v11250_v13  ;;  %v11337_v4 = vadd.f32 %v3994_v42, %v11253_v32  ;;  %v11339_v21 = vpop.f32.mrb[72].mxu1 }
 0x931   : > { %13498 = vst [vmem:[#allocation59_spill] sm:$0xff] %v11329_v39  ;;  %v11341_v44 = vpop.f32.mrb[136].mxu0  ;;  %8805 = vtanh.f32 %v4319_v35  ;;  %v4131_v29 = vmul.f32 %v4067_v25, %v11318_v30  ;;  %v4068_v62 = vmul.f32 %v11326_v1, %v11326_v1  ;;  %v4070_v56 = vmul.f32 %v11329_v39, %v11329_v39  ;;  %v11348_v63 = vpop.f32.mrb[73].mxu1 }
 0x932   : > { %13499 = vst [vmem:[#allocation60_spill] sm:$0xff] %v11337_v4  ;;  %v11350_v31 = vpop.f32.mrb[137].mxu0  ;;  %8807 = vtanh.f32 %v4321_v27  ;;  %v4133_v51 = vmul.f32 %v4069_v7, %v11321_v52  ;;  %v4071_v36 = vmul.f32 %v11334_v59, %v11334_v59  ;;  %v4073_v49 = vmul.f32 %v11337_v4, %v11337_v4  ;;  %v11357_v38 = vpop.f32.mrb[74].mxu1 }
 0x933   : > { %v11359_v9 = vpop.f32.mrb[138].mxu0  ;;  %8809 = vtanh.f32 %v4320_v48  ;;  %v4195_v33 = vmul.f32 0.044715, %v4131_v29  ;;  %v4132_v2 = vmul.f32 %v4068_v62, %v11326_v1  ;;  %v4134_v28 = vmul.f32 %v4070_v56, %v11329_v39  ;;  %v11363_v10 = vpop.f32.mrb[75].mxu1 }
 0x934   : > { %v11365_v43 = vpop.f32.mrb[139].mxu0  ;;  %8811 = vtanh.f32 %v4322_v24  ;;  %v4197_v20 = vmul.f32 0.044715, %v4133_v51  ;;  %v4135_v16 = vmul.f32 %v4071_v36, %v11334_v59  ;;  %v4137_v42 = vmul.f32 %v4073_v49, %v11337_v4 }
 0x935   : > { %v4259_v3 = vadd.f32 %v4195_v33, %v11318_v30  ;;  %v4196_v55 = vmul.f32 0.044715, %v4132_v2  ;;  %v4198_v14 = vmul.f32 0.044715, %v4134_v28  ;;  %v11371_v46 = vadd.f32 %v3883_v40, %v11256_v41 }
 0x936   : > { %v4261_v34 = vadd.f32 %v4197_v20, %v11321_v52  ;;  %v4199_v5 = vmul.f32 0.044715, %v4135_v16  ;;  %v4201_v15 = vmul.f32 0.044715, %v4137_v42  ;;  %v11375_v47 = vadd.f32 %v3996_v57, %v11259_v12 }
 0x937   : > { %v8798_v35 = vpop.eup %8797  ;;  %v4323_v27 = vmul.f32 0.7978846, %v4259_v3  ;;  %v4260_v48 = vadd.f32 %v4196_v55, %v11326_v1  ;;  %v4262_v24 = vadd.f32 %v4198_v14, %v11329_v39  ;;  %v4072_v25 = vmul.f32 %v11371_v46, %v11371_v46 }
 0x938   : > { %13500 = vst [vmem:[#allocation61_spill] sm:$0xff] %v11375_v47  ;;  %v8800_v7 = vpop.eup %8799  ;;  %v4443_v29 = vadd.f32 1.0, %v8798_v35  ;;  %v4325_v40 = vmul.f32 0.7978846, %v4261_v34  ;;  %v4263_v62 = vadd.f32 %v4199_v5, %v11334_v59  ;;  %v4265_v56 = vadd.f32 %v4201_v15, %v11337_v4  ;;  %v11383_v51 = vpop.f32.mrb[76].mxu1 }
 0x939   : > { %v11385_v57 = vpop.f32.mrb[140].mxu0  ;;  %v11387_v36 = vpop.eup %8801  ;;  %v4445_v49 = vadd.f32 1.0, %v8800_v7  ;;  %8813 = vtanh.f32 %v4323_v27  ;;  %v4324_v33 = vmul.f32 0.7978846, %v4260_v48  ;;  %v4326_v2 = vmul.f32 0.7978846, %v4262_v24 }
 0x93a   : > { %v11389_v28 = vpop.f32.mrb[77].mxu1  ;;  %v11391_v20 = vpop.eup %8803  ;;  %v4507_v16 = vmul.f32 0.5, %v4443_v29  ;;  %8815 = vtanh.f32 %v4325_v40  ;;  %v4327_v42 = vmul.f32 0.7978846, %v4263_v62  ;;  %v4329_v3 = vmul.f32 0.7978846, %v4265_v56 }
 0x93b   : > { %13501 = vst [vmem:[#allocation62_spill] sm:$0xff] %v11391_v20  ;;  %v11393_v55 = vpop.f32.mrb[141].mxu0  ;;  %v8806_v14 = vpop.eup %8805  ;;  %v4509_v34 = vmul.f32 0.5, %v4445_v49  ;;  %8817 = vtanh.f32 %v4324_v33  ;;  %v4136_v5 = vmul.f32 %v4072_v25, %v11371_v46  ;;  %v4074_v15 = vmul.f32 %v11375_v47, %v11375_v47 }
 0x93c   : > { %v11398_v35 = vpop.f32.mrb[78].mxu1  ;;  %v11400_v27 = vpop.f32.mrb[142].mxu0  ;;  %v11403_v24 = vmul.f32 %v4507_v16, %v11262_v0  ;;  %v4447_v7 = vadd.f32 1.0, %v8806_v14  ;;  %8819 = vtanh.f32 %v4326_v2  ;;  %v11407_v29 = vadd.f32 %v11339_v21, %v11250_v13 }
 0x93d   : > { %v8808_v48 = vpop.eup %8807  ;;  %v11409_v40 = vpop.f32.mrb[79].mxu1  ;;  %v11416_v56 = vmul.f32 %v4509_v34, %v11265_v8  ;;  %8821 = vtanh.f32 %v4327_v42  ;;  %v4200_v33 = vmul.f32 0.044715, %v4136_v5  ;;  %v4138_v2 = vmul.f32 %v4074_v15, %v11375_v47 }
 0x93e   : > { %13502 = vst [vmem:[#allocation63_spill] sm:$0xff] %v11407_v29  ;;  %v11411_v25 = vpop.f32.mrb[143].mxu0  ;;  %v11413_v62 = vpop.eup %8809  ;;  %v4449_v49 = vadd.f32 1.0, %v8808_v48  ;;  %v4511_v16 = vmul.f32 0.5, %v4447_v7  ;;  %8823 = vtanh.f32 %v4329_v3  ;;  %v4075_v21 = vmul.f32 %v11407_v29, %v11407_v29 }
 0x93f   : > { %13503 = vst [vmem:[#allocation64_spill] sm:$0xff] %v11416_v56  ;;  %v11418_v0 = vpop.eup %8811  ;;  %v4264_v50 = vadd.f32 %v4200_v33, %v11371_v46  ;;  %v11426_v45 = vadd.f32 %v11341_v44, %v11253_v32  ;;  %v11430_v8 = vadd.f32 %v11348_v63, %v11256_v41  ;;  %v4202_v3 = vmul.f32 0.044715, %v4138_v2 }
 0x940   : > { %13504 = vst [vmem:[#allocation65_spill] sm:$0xff] %v11418_v0  ;;  %v4513_v14 = vmul.f32 0.5, %v4449_v49  ;;  %v11433_v42 = vmul.f32 %v4511_v16, %v11278_v58  ;;  %v4139_v34 = vmul.f32 %v4075_v21, %v11407_v29  ;;  %v11438_v5 = vadd.f32 %v11350_v31, %v11259_v12  ;;  %v11440_v15 = vpop.f32.mrb[80].mxu1 }
 0x941   : > { %13505 = vst [vmem:[#allocation66_spill] sm:$0xff] %v11426_v45  ;;  %13506 = vst [vmem:[#allocation67_spill] sm:$0xff] %v11430_v8  ;;  %v11442_v48 = vpop.f32.mrb[144].mxu0  ;;  %v4328_v7 = vmul.f32 0.7978846, %v4264_v50  ;;  %v4077_v63 = vmul.f32 %v11426_v45, %v11426_v45  ;;  %v4076_v58 = vmul.f32 %v11430_v8, %v11430_v8  ;;  %v11451_v49 = vpop.f32.mrb[81].mxu1  ;;  %v4266_v16 = vadd.f32 %v4202_v3, %v11375_v47 }
 0x942   : > { %13507 = vst [vmem:[#allocation68_spill] sm:$0xff] %v11438_v5  ;;  %v11445_v44 = vmul.f32 %v4513_v14, %v11281_v18  ;;  %v11453_v33 = vpop.f32.mrb[145].mxu0  ;;  %v4203_v2 = vmul.f32 0.044715, %v4139_v34  ;;  %v4078_v18 = vmul.f32 %v11438_v5, %v11438_v5  ;;  %v11460_v50 = vpop.f32.mrb[82].mxu1  ;;  %v11480_v4 = vadd.f32 %v11357_v38, %v11250_v13 }
 0x943   : > { %v11462_v21 = vpop.f32.mrb[146].mxu0  ;;  %v11464_v14 = vpop.eup %8813  ;;  %8825 = vtanh.f32 %v4328_v7  ;;  %v4141_v17 = vmul.f32 %v4077_v63, %v11426_v45  ;;  %v4140_v31 = vmul.f32 %v4076_v58, %v11430_v8  ;;  %v4330_v11 = vmul.f32 0.7978846, %v4266_v16 }
 0x944   : > { %13508 = vst [vmem:[#allocation69_spill] sm:$0xff] %v11445_v44  ;;  %v11470_v53 = vpop.f32.mrb[83].mxu1  ;;  %v11472_v3 = vpop.f32.mrb[147].mxu0  ;;  %v4267_v37 = vadd.f32 %v4203_v2, %v11407_v29  ;;  %v4142_v22 = vmul.f32 %v4078_v18, %v11438_v5  ;;  %13510 = vst [vmem:[#allocation71_spill] sm:$0xff] %v11480_v4  ;;  %v11486_v58 = vadd.f32 %v11359_v9, %v11253_v32 }
 0x945   : > { %v11474_v34 = vpop.eup %8815  ;;  %v4205_v63 = vmul.f32 0.044715, %v4141_v17  ;;  %v4204_v26 = vmul.f32 0.044715, %v4140_v31  ;;  %v11490_v52 = vadd.f32 %v11363_v10, %v11256_v41  ;;  %8827 = vtanh.f32 %v4330_v11 }
 0x946   : > { %13509 = vst [vmem:[#allocation70_spill] sm:$0xff] %v11474_v34  ;;  %v11482_v7 = vpop.eup %8817  ;;  %13511 = vst [vmem:[#allocation72_spill] sm:$0xff] %v11486_v58  ;;  %v4331_v2 = vmul.f32 0.7978846, %v4267_v37  ;;  %v4206_v18 = vmul.f32 0.044715, %v4142_v22  ;;  %v4079_v38 = vmul.f32 %v11480_v4, %v11480_v4  ;;  %v4081_v9 = vmul.f32 %v11486_v58, %v11486_v58 }
 0x947   : > { %13512 = vst [vmem:[#allocation73_spill] sm:$0xff] %v11490_v52  ;;  %v11492_v16 = vpop.eup %8819  ;;  %v4269_v17 = vadd.f32 %v4205_v63, %v11426_v45  ;;  %v4268_v31 = vadd.f32 %v4204_v26, %v11430_v8  ;;  %v4080_v10 = vmul.f32 %v11490_v52, %v11490_v52  ;;  %v11510_v11 = vadd.f32 %v11365_v43, %v11259_v12 }
 0x948   : > { %13513 = vst [vmem:[#allocation74_spill] sm:$0xff] %v11492_v16  ;;  %v11496_v34 = vpop.eup %8821  ;;  %8829 = vtanh.f32 %v4331_v2  ;;  %v4270_v22 = vadd.f32 %v4206_v18, %v11438_v5  ;;  %v4143_v37 = vmul.f32 %v4079_v38, %v11480_v4  ;;  %v11512_v63 = vpop.f32.mrb[84].mxu1  ;;  %v4145_v47 = vmul.f32 %v4081_v9, %v11486_v58 }
 0x949   : > { %v11504_v56 = vpop.eup %8823  ;;  %13515 = vst [vmem:[#allocation76_spill] sm:$0xff] %v11510_v11  ;;  %v11514_v26 = vpop.f32.mrb[148].mxu0  ;;  %v4333_v45 = vmul.f32 0.7978846, %v4269_v17  ;;  %v4332_v44 = vmul.f32 0.7978846, %v4268_v31  ;;  %v4144_v39 = vmul.f32 %v4080_v10, %v11490_v52  ;;  %v4082_v43 = vmul.f32 %v11510_v11, %v11510_v11 }
 0x94a   : > { %13514 = vst [vmem:[#allocation75_spill] sm:$0xff] %v11504_v56  ;;  %v11518_v56 = vpop.f32.mrb[85].mxu1  ;;  %v11520_v2 = vpop.f32.mrb[149].mxu0  ;;  %v4334_v18 = vmul.f32 0.7978846, %v4270_v22  ;;  %v11526_v5 = vadd.f32 %v11383_v51, %v11250_v13  ;;  %v11534_v10 = vadd.f32 %v11385_v57, %v11253_v32  ;;  %v11593_v29 = vadd.f32 %v11400_v27, %v11253_v32 }
 0x94b   : > { %v4207_v38 = vmul.f32 0.044715, %v4143_v37  ;;  %v11528_v16 = vpop.f32.mrb[86].mxu1  ;;  %v11530_v17 = vpop.f32.mrb[150].mxu0  ;;  %8831 = vtanh.f32 %v4333_v45  ;;  %v4209_v31 = vmul.f32 0.044715, %v4145_v47  ;;  %v4146_v51 = vmul.f32 %v4082_v43, %v11510_v11 }
 0x94c   : > { %13516 = vst [vmem:[#allocation77_spill] sm:$0xff] %v11526_v5  ;;  %v4208_v9 = vmul.f32 0.044715, %v4144_v39  ;;  %13517 = vst [vmem:[#allocation78_spill] sm:$0xff] %v11534_v10  ;;  %v11536_v22 = vpop.f32.mrb[87].mxu1  ;;  %v11538_v37 = vpop.f32.mrb[151].mxu0  ;;  %8833 = vtanh.f32 %v4332_v44  ;;  %v4083_v60 = vmul.f32 %v11526_v5, %v11526_v5  ;;  %v4085_v47 = vmul.f32 %v11534_v10, %v11534_v10 }
 0x94d   : > { %v4271_v6 = vadd.f32 %v4207_v38, %v11480_v4  ;;  %v11544_v0 = vpop.eup %8825  ;;  %8835 = vtanh.f32 %v4334_v18  ;;  %v4273_v45 = vadd.f32 %v4209_v31, %v11486_v58  ;;  %v4210_v20 = vmul.f32 0.044715, %v4146_v51  ;;  %13523 = vst [vmem:[#allocation84_spill] sm:$0xff] %v11593_v29 }
 0x94e   : > { %v4272_v39 = vadd.f32 %v4208_v9, %v11490_v52  ;;  %v4147_v44 = vmul.f32 %v4083_v60, %v11526_v5  ;;  %v11553_v38 = vadd.f32 %v11389_v28, %v11256_v41  ;;  %v4149_v61 = vmul.f32 %v4085_v47, %v11534_v10 }
 0x94f   : > { %v4335_v57 = vmul.f32 0.7978846, %v4271_v6  ;;  %v4337_v43 = vmul.f32 0.7978846, %v4273_v45  ;;  %v11558_v18 = vadd.f32 %v11393_v55, %v11259_v12  ;;  %v11560_v31 = vpop.eup %8827  ;;  %v4274_v6 = vadd.f32 %v4210_v20, %v11510_v11 }
 0x950   : > { %13518 = vst [vmem:[#allocation79_spill] sm:$0xff] %v11553_v38  ;;  %v4336_v54 = vmul.f32 0.7978846, %v4272_v39  ;;  %13520 = vst [vmem:[#allocation81_spill] sm:$0xff] %v11560_v31  ;;  %v4211_v9 = vmul.f32 0.044715, %v4147_v44  ;;  %v4084_v60 = vmul.f32 %v11553_v38, %v11553_v38  ;;  %v11573_v55 = vadd.f32 %v11398_v35, %v11250_v13 }
 0x951   : > { %13519 = vst [vmem:[#allocation80_spill] sm:$0xff] %v11558_v18  ;;  %8837 = vtanh.f32 %v4335_v57  ;;  %v11565_v51 = vpop.f32.mrb[88].mxu1  ;;  %v11567_v28 = vpop.f32.mrb[152].mxu0  ;;  %v4213_v45 = vmul.f32 0.044715, %v4149_v61  ;;  %v4086_v39 = vmul.f32 %v11558_v18, %v11558_v18  ;;  %v4089_v27 = vmul.f32 %v11593_v29, %v11593_v29 }
 0x952   : > { %8839 = vtanh.f32 %v4337_v43  ;;  %13521 = vst [vmem:[#allocation82_spill] sm:$0xff] %v11573_v55  ;;  %v11575_v47 = vpop.f32.mrb[89].mxu1  ;;  %v11577_v20 = vpop.f32.mrb[153].mxu0  ;;  %v4338_v44 = vmul.f32 0.7978846, %v4274_v6  ;;  %v4275_v58 = vadd.f32 %v4211_v9, %v11526_v5  ;;  %v4148_v43 = vmul.f32 %v4084_v60, %v11553_v38 }
 0x953   : > { %v11579_v57 = vpop.eup %8829  ;;  %8841 = vtanh.f32 %v4336_v54  ;;  %v11583_v61 = vpop.f32.mrb[90].mxu1  ;;  %v4277_v31 = vadd.f32 %v4213_v45, %v11534_v10  ;;  %v4150_v35 = vmul.f32 %v4086_v39, %v11558_v18  ;;  %v4087_v4 = vmul.f32 %v11573_v55, %v11573_v55 }
 0x954   : > { %13522 = vst [vmem:[#allocation83_spill] sm:$0xff] %v11579_v57  ;;  %v11585_v11 = vpop.f32.mrb[154].mxu0  ;;  %v11595_v54 = vpop.f32.mrb[91].mxu1  ;;  %8843 = vtanh.f32 %v4338_v44  ;;  %v4339_v9 = vmul.f32 0.7978846, %v4275_v58  ;;  %v11601_v5 = vadd.f32 %v11409_v40, %v11256_v41  ;;  %v11615_v40 = vadd.f32 %v11411_v25, %v11259_v12 }
 0x955   : > { %v11597_v6 = vpop.f32.mrb[155].mxu0  ;;  %v4212_v60 = vmul.f32 0.044715, %v4148_v43  ;;  %v11603_v45 = vpop.eup %8831  ;;  %v4341_v39 = vmul.f32 0.7978846, %v4277_v31  ;;  %v4151_v52 = vmul.f32 %v4087_v4, %v11573_v55 }
 0x956   : > { %13524 = vst [vmem:[#allocation85_spill] sm:$0xff] %v11601_v5  ;;  %13525 = vst [vmem:[#allocation86_spill] sm:$0xff] %v11603_v45  ;;  %v4214_v10 = vmul.f32 0.044715, %v4150_v35  ;;  %v11608_v8 = vpop.eup %8833  ;;  %8845 = vtanh.f32 %v4339_v9  ;;  %v4088_v58 = vmul.f32 %v11601_v5, %v11601_v5  ;;  %v4153_v35 = vmul.f32 %v4089_v27, %v11593_v29 }
 0x957   : > { %v4276_v44 = vadd.f32 %v4212_v60, %v11553_v38  ;;  %13526 = vst [vmem:[#allocation87_spill] sm:$0xff] %v11615_v40  ;;  %v11617_v43 = vpop.eup %8835  ;;  %8847 = vtanh.f32 %v4341_v39  ;;  %v4215_v31 = vmul.f32 0.044715, %v4151_v52  ;;  %v4090_v60 = vmul.f32 %v11615_v40, %v11615_v40 }
 0x958   : > { %13527 = vst [vmem:[#allocation88_spill] sm:$0xff] %v11617_v43  ;;  %v4278_v4 = vadd.f32 %v4214_v10, %v11558_v18  ;;  %v4152_v9 = vmul.f32 %v4088_v58, %v11601_v5  ;;  %v11626_v38 = vadd.f32 %v11440_v15, %v11250_v13  ;;  %v11628_v25 = vpop.f32.mrb[92].mxu1  ;;  %v4217_v52 = vmul.f32 0.044715, %v4153_v35 }
 0x959   : > { %v4340_v45 = vmul.f32 0.7978846, %v4276_v44  ;;  %v11630_v57 = vpop.f32.mrb[156].mxu0  ;;  %v4279_v10 = vadd.f32 %v4215_v31, %v11573_v55  ;;  %v11635_v27 = vadd.f32 %v11442_v48, %v11253_v32  ;;  %v11637_v44 = vpop.f32.mrb[93].mxu1  ;;  %v4154_v43 = vmul.f32 %v4090_v60, %v11615_v40 }
 0x95a   : > { %13528 = vst [vmem:[#allocation89_spill] sm:$0xff] %v11626_v38  ;;  %13529 = vst [vmem:[#allocation90_spill] sm:$0xff] %v11630_v57  ;;  %v4342_v39 = vmul.f32 0.7978846, %v4278_v4  ;;  %v11639_v58 = vpop.f32.mrb[157].mxu0  ;;  %v4091_v4 = vmul.f32 %v11626_v38, %v11626_v38  ;;  %v11646_v57 = vpop.f32.mrb[94].mxu1  ;;  %v4281_v55 = vadd.f32 %v4217_v52, %v11593_v29  ;;  %v11670_v29 = vadd.f32 %v11453_v33, %v11259_v12 }
 0x95b   : > { %13530 = vst [vmem:[#allocation91_spill] sm:$0xff] %v11635_v27  ;;  %13531 = vst [vmem:[#allocation92_spill] sm:$0xff] %v11637_v44  ;;  %v11641_v18 = vpop.eup %8837  ;;  %8849 = vtanh.f32 %v4340_v45  ;;  %v4216_v15 = vmul.f32 0.044715, %v4152_v9  ;;  %v11648_v31 = vpop.f32.mrb[158].mxu0 }
 0x95c   : > { %13532 = vst [vmem:[#allocation93_spill] sm:$0xff] %v11639_v58  ;;  %13533 = vst [vmem:[#allocation94_spill] sm:$0xff] %v11646_v57  ;;  %v11650_v35 = vpop.eup %8839  ;;  %8851 = vtanh.f32 %v4342_v39  ;;  %v4343_v48 = vmul.f32 0.7978846, %v4279_v10  ;;  %v4093_v58 = vmul.f32 %v11635_v27, %v11635_v27  ;;  %v11655_v45 = vpop.f32.mrb[95].mxu1  ;;  %v11665_v39 = vadd.f32 %v11451_v49, %v11256_v41 }
 0x95d   : > { %13534 = vst [vmem:[#allocation95_spill] sm:$0xff] %v11648_v31  ;;  %13535 = vst [vmem:[#allocation96_spill] sm:$0xff] %v11650_v35  ;;  %v11657_v9 = vpop.f32.mrb[159].mxu0  ;;  %v11659_v60 = vpop.eup %8841  ;;  %v4280_v44 = vadd.f32 %v4216_v15, %v11601_v5  ;;  %v4218_v57 = vmul.f32 0.044715, %v4154_v43  ;;  %v4155_v31 = vmul.f32 %v4091_v4, %v11626_v38 }
 0x95e   : > { %13536 = vst [vmem:[#allocation97_spill] sm:$0xff] %v11657_v9  ;;  %13537 = vst [vmem:[#allocation98_spill] sm:$0xff] %v11665_v39  ;;  %8853 = vtanh.f32 %v4343_v48  ;;  %v4345_v10 = vmul.f32 0.7978846, %v4281_v55  ;;  %v4157_v52 = vmul.f32 %v4093_v58, %v11635_v27  ;;  %v11672_v35 = vpop.eup %8843  ;;  %v4092_v4 = vmul.f32 %v11665_v39, %v11665_v39 }
 0x95f   : > { %13538 = vst [vmem:[#allocation99_spill] sm:$0xff] %v11670_v29  ;;  %13539 = vst [vmem:[#allocation100_spill] sm:$0xff] %v11672_v35  ;;  %v4344_v9 = vmul.f32 0.7978846, %v4280_v44  ;;  %v4282_v15 = vadd.f32 %v4218_v57, %v11615_v40  ;;  %v4219_v43 = vmul.f32 0.044715, %v4155_v31  ;;  %v4094_v55 = vmul.f32 %v11670_v29, %v11670_v29 }
 0x960   : > { %8855 = vtanh.f32 %v4345_v10  ;;  %v4221_v49 = vmul.f32 0.044715, %v4157_v52  ;;  %v11681_v58 = vadd.f32 %v11460_v50, %v11250_v13  ;;  %v11683_v33 = vpop.eup %8845  ;;  %v4156_v57 = vmul.f32 %v4092_v4, %v11665_v39 }
 0x961   : > { %8857 = vtanh.f32 %v4344_v9  ;;  %v4346_v48 = vmul.f32 0.7978846, %v4282_v15  ;;  %v4283_v44 = vadd.f32 %v4219_v43, %v11626_v38  ;;  %v11687_v31 = vpop.f32.mrb[160].mxu0  ;;  %v11689_v40 = vpop.eup %8847  ;;  %v4158_v52 = vmul.f32 %v4094_v55, %v11670_v29 }
 0x962   : > { %13540 = vst [vmem:[#allocation101_spill] sm:$0xff] %v11687_v31  ;;  %13541 = vst [vmem:[#allocation102_spill] sm:$0xff] %v11689_v40  ;;  %v4285_v10 = vadd.f32 %v4221_v49, %v11635_v27  ;;  %v4095_v50 = vmul.f32 %v11681_v58, %v11681_v58  ;;  %v11697_v35 = vadd.f32 %v11462_v21, %v11253_v32  ;;  %v11699_v9 = vpop.f32.mrb[161].mxu0  ;;  %v4220_v43 = vmul.f32 0.044715, %v4156_v57 }
 0x963   : > { %13543 = vst [vmem:[#allocation104_spill] sm:$0xff] %v11699_v9  ;;  %8859 = vtanh.f32 %v4346_v48  ;;  %v4347_v15 = vmul.f32 0.7978846, %v4283_v44  ;;  %v11703_v4 = vadd.f32 %v11470_v53, %v11256_v41  ;;  %v11705_v40 = vpop.f32.mrb[162].mxu0  ;;  %v4222_v55 = vmul.f32 0.044715, %v4158_v52 }
 0x964   : > { %13542 = vst [vmem:[#allocation103_spill] sm:$0xff] %v11697_v35  ;;  %13544 = vst [vmem:[#allocation105_spill] sm:$0xff] %v11705_v40  ;;  %v4349_v49 = vmul.f32 0.7978846, %v4285_v10  ;;  %v4159_v27 = vmul.f32 %v4095_v50, %v11681_v58  ;;  %v4097_v38 = vmul.f32 %v11697_v35, %v11697_v35  ;;  %v11710_v21 = vpop.f32.mrb[163].mxu0  ;;  %v4284_v48 = vadd.f32 %v4220_v43, %v11665_v39 }
 0x965   : > { %13545 = vst [vmem:[#allocation106_spill] sm:$0xff] %v11710_v21  ;;  %v11712_v31 = vpop.eup %8849  ;;  %8861 = vtanh.f32 %v4347_v15  ;;  %v4096_v53 = vmul.f32 %v11703_v4, %v11703_v4  ;;  %v11719_v44 = vadd.f32 %v11472_v3, %v11259_v12  ;;  %v4286_v10 = vadd.f32 %v4222_v55, %v11670_v29 }
 0x966   : > { %v11721_v57 = vpop.eup %8851  ;;  %8863 = vtanh.f32 %v4349_v49  ;;  %v4223_v52 = vmul.f32 0.044715, %v4159_v27  ;;  %v4161_v50 = vmul.f32 %v4097_v38, %v11697_v35  ;;  %v4348_v21 = vmul.f32 0.7978846, %v4284_v48 }
 0x967   : > { %13546 = vst [vmem:[#allocation107_spill] sm:$0xff] %v11719_v44  ;;  %13547 = vst [vmem:[#allocation108_spill] sm:$0xff] %v11721_v57  ;;  %v4160_v15 = vmul.f32 %v4096_v53, %v11703_v4  ;;  %v4098_v43 = vmul.f32 %v11719_v44, %v11719_v44  ;;  %v4444_v39 = vadd.f32 1.0, %v11387_v36  ;;  %v4350_v3 = vmul.f32 0.7978846, %v4286_v10 }
 0x968   : > { %v11729_v9 = vpop.eup %8853  ;;  %v4287_v40 = vadd.f32 %v4223_v52, %v11681_v58  ;;  %v4225_v57 = vmul.f32 0.044715, %v4161_v50  ;;  %v4448_v49 = vadd.f32 1.0, %v11413_v62  ;;  %8865 = vtanh.f32 %v4348_v21 }
 0x969   : > { %v4224_v27 = vmul.f32 0.044715, %v4160_v15  ;;  %v4162_v38 = vmul.f32 %v4098_v43, %v11719_v44  ;;  %v4508_v55 = vmul.f32 0.5, %v4444_v39  ;;  %v11734_v48 = vpop.f32.mrb[164].mxu0  ;;  %8867 = vtanh.f32 %v4350_v3 }
 0x96a   : > { %v11736_v53 = vpop.eup %8855  ;;  %v4351_v29 = vmul.f32 0.7978846, %v4287_v40  ;;  %v4289_v36 = vadd.f32 %v4225_v57, %v11697_v35  ;;  %v4512_v5 = vmul.f32 0.5, %v4448_v49  ;;  %v11739_v10 = vpop.f32.mrb[165].mxu0  ;;  %v11747_v39 = vadd.f32 %v11512_v63, %v11250_v13 }
 0x96b   : > { %13548 = vst [vmem:[#allocation109_spill] sm:$0xff] %v11736_v53  ;;  %v11741_v52 = vpop.eup %8857  ;;  %v4288_v62 = vadd.f32 %v4224_v27, %v11703_v4  ;;  %v4226_v21 = vmul.f32 0.044715, %v4162_v38  ;;  %v4572_v50 = vmul.f32 %v4508_v55, %v11268_v23  ;;  %v11749_v15 = vpop.f32.mrb[166].mxu0  ;;  %v11754_v43 = vadd.f32 %v11514_v26, %v11253_v32 }
 0x96c   : > { %13549 = vst [vmem:[#allocation110_spill] sm:$0xff] %v11747_v39  ;;  %13550 = vst [vmem:[#allocation111_spill] sm:$0xff] %v11749_v15  ;;  %8869 = vtanh.f32 %v4351_v29  ;;  %v4353_v40 = vmul.f32 0.7978846, %v4289_v36  ;;  %v4576_v57 = vmul.f32 %v4512_v5, %v11288_v19  ;;  %v11756_v3 = vpop.f32.mrb[167].mxu0  ;;  %v4099_v63 = vmul.f32 %v11747_v39, %v11747_v39 }
 0x96d   : > { %13551 = vst [vmem:[#allocation112_spill] sm:$0xff] %v11754_v43  ;;  %13552 = vst [vmem:[#allocation113_spill] sm:$0xff] %v11756_v3  ;;  %v11758_v49 = vpop.eup %8859  ;;  %v4352_v27 = vmul.f32 0.7978846, %v4288_v62  ;;  %v4290_v23 = vadd.f32 %v4226_v21, %v11719_v44  ;;  %v11765_v29 = vadd.f32 %v11518_v56, %v11256_v41  ;;  %v8461_v5 = vld [vmem:[#allocation13 + $0x100] ss:$8 sps:$4 sm:$0xff]   ;;  %v4101_v26 = vmul.f32 %v11754_v43, %v11754_v43 }
 0x96e   : > { %13553 = vst [vmem:[#allocation114_spill] sm:$0xff] %v11758_v49  ;;  %8871 = vtanh.f32 %v4353_v40  ;;  %v4636_v19 = vpack.c.bf16 %v4576_v57, %v4572_v50  ;;  %v11771_v38 = vadd.f32 %v11520_v2, %v11259_v12  ;;  %v4163_v62 = vmul.f32 %v4099_v63, %v11747_v39  ;;  %v8466_v21 = vld [vmem:[#allocation13 + $0x114] ss:$8 sps:$4 sm:$0xff]   ;;  %v8470_v15 = vld [vmem:[#allocation13 + $0x130] ss:$8 sps:$4 sm:$0xff]  }
 0x96f   : > { %13554 = vst [vmem:[#allocation115_spill] sm:$0xff] %v11765_v29  ;;  %v11773_v55 = vpop.eup %8861  ;;  %8873 = vtanh.f32 %v4352_v27  ;;  %v4354_v36 = vmul.f32 0.7978846, %v4290_v23  ;;  %v4100_v56 = vmul.f32 %v11765_v29, %v11765_v29  ;;  %v4165_v50 = vmul.f32 %v4101_v26, %v11754_v43 }
 0x970   : > { %13555 = vst [vmem:[#allocation116_spill] sm:$0xff] %v11771_v38  ;;  %v11778_v40 = vpop.eup %8863  ;;  %5083 = vmatprep.mubr.bf16.mxu1 %v4636_v19  ;;  %v4102_v57 = vmul.f32 %v11771_v38, %v11771_v38  ;;  %v11785_v2 = vadd.f32 %v11528_v16, %v11250_v13  ;;  %v11789_v27 = vadd.f32 %v11530_v17, %v11253_v32  ;;  %v4227_v63 = vmul.f32 0.044715, %v4163_v62 }
 0x971   : > { %13556 = vst [vmem:[#allocation117_spill] sm:$0xff] %v11778_v40  ;;  %8875 = vtanh.f32 %v4354_v36  ;;  %v13558_v23 = vpack.c.bf16 %v11433_v42, %v11403_v24  ;;  %v4164_v19 = vmul.f32 %v4100_v56, %v11765_v29  ;;  %v11797_v26 = vadd.f32 %v11536_v22, %v11256_v41  ;;  %v11799_v35 = vpop.f32.mrb[168].mxu0  ;;  %v8464_v40 = vld [vmem:[#allocation13 + $0x110] ss:$8 sps:$4 sm:$0xff]  }
 0x972   : > { %13557 = vst [vmem:[#allocation118_spill] sm:$0xff] %v11789_v27  ;;  %13559 = vst [vmem:[#allocation119_spill] sm:$0xff] %v11799_v35  ;;  %v4229_v16 = vmul.f32 0.044715, %v4165_v50  ;;  %v4166_v17 = vmul.f32 %v4102_v57, %v11771_v38  ;;  %v4103_v36 = vmul.f32 %v11785_v2, %v11785_v2  ;;  %v4105_v24 = vmul.f32 %v11789_v27, %v11789_v27  ;;  %v11806_v42 = vpop.f32.mrb[169].mxu0  ;;  %v11808_v62 = vpop.eup %8865 }
 0x973   : > { %5084 = vmatmul.mubr.bf16.vlgmr.msra.gmra.mrb[96].mxu1 %v13558_v23  ;;  %13560 = vst [vmem:[#allocation120_spill] sm:$0xff] %v11806_v42  ;;  %v4291_v22 = vadd.f32 %v4227_v63, %v11747_v39  ;;  %v4228_v56 = vmul.f32 0.044715, %v4164_v19  ;;  %v11815_v50 = vadd.f32 %v11538_v37, %v11259_v12  ;;  %v8469_v57 = vld [vmem:[#allocation13 + $0x124] ss:$8 sps:$4 sm:$0xff]   ;;  %v11817_v23 = vpop.f32.mrb[170].mxu0  ;;  %v11819_v44 = vpop.eup %8867 }
 0x974   : > { %5165 = vmatpush1.bf16.msra.mxu1 %v8461_v5  ;;  %v4104_v5 = vmul.f32 %v11797_v26, %v11797_v26  ;;  %13562 = vst [vmem:[#allocation122_spill] sm:$0xff] %v11817_v23  ;;  %13563 = vst [vmem:[#allocation123_spill] sm:$0xff] %v11819_v44  ;;  %v4293_v53 = vadd.f32 %v4229_v16, %v11754_v43  ;;  %v4230_v49 = vmul.f32 0.044715, %v4166_v17  ;;  %v11824_v63 = vpop.f32.mrb[171].mxu0 }
 0x975   : > { %5166 = vmatprep.subr.bf16.mxu1 %v8466_v21  ;;  %13561 = vst [vmem:[#allocation121_spill] sm:$0xff] %v11815_v50  ;;  %v4167_v42 = vmul.f32 %v4103_v36, %v11785_v2  ;;  %v4169_v21 = vmul.f32 %v4105_v24, %v11789_v27  ;;  %13564 = vst [vmem:[#allocation124_spill] sm:$0xff] %v11824_v63  ;;  %v4355_v19 = vmul.f32 0.7978846, %v4291_v22  ;;  %v8467_v23 = vld [vmem:[#allocation13 + $0x120] ss:$8 sps:$4 sm:$0xff]  }
 0x976   : > { %v4292_v35 = vadd.f32 %v4228_v56, %v11765_v29  ;;  %v4168_v37 = vmul.f32 %v4104_v5, %v11797_v26  ;;  %v4106_v39 = vmul.f32 %v11815_v50, %v11815_v50  ;;  %v11830_v3 = vpop.eup %8869  ;;  %v4357_v44 = vmul.f32 0.7978846, %v4293_v53  ;;  %v8472_v56 = vld [vmem:[#allocation13 + $0x134] ss:$8 sps:$4 sm:$0xff]  }
 0x977   : > { %v4294_v16 = vadd.f32 %v4230_v49, %v11771_v38  ;;  %v4231_v17 = vmul.f32 0.044715, %v4167_v42  ;;  %v4233_v36 = vmul.f32 0.044715, %v4169_v21  ;;  %8877 = vtanh.f32 %v4355_v19 }
 0x978   : > { %5167 = vmatpush1.bf16.msra.mxu1 %v8464_v40  ;;  %v4356_v24 = vmul.f32 0.7978846, %v4292_v35  ;;  %v4232_v43 = vmul.f32 0.044715, %v4168_v37  ;;  %v4170_v22 = vmul.f32 %v4106_v39, %v11815_v50  ;;  %v11834_v5 = vpop.eup %8871  ;;  %8879 = vtanh.f32 %v4357_v44  ;;  %v8475_v39 = vld [vmem:[#allocation13 + $0x144] ss:$8 sps:$4 sm:$0xff]  }
 0x979   : > { %5168 = vmatprep.subr.bf16.mxu1 %v8469_v57  ;;  %13565 = vst [vmem:[#allocation125_spill] sm:$0xff] %v11834_v5  ;;  %v4358_v63 = vmul.f32 0.7978846, %v4294_v16  ;;  %v4295_v29 = vadd.f32 %v4231_v17, %v11785_v2  ;;  %v4297_v53 = vadd.f32 %v4233_v36, %v11789_v27  ;;  %v11838_v49 = vpop.eup %8873  ;;  %v4452_v42 = vadd.f32 1.0, %v11482_v7  ;;  %v11842_v57 = vpop.f32.mrb[172].mxu0 }
 0x97a   : > { %8881 = vtanh.f32 %v4356_v24  ;;  %v4296_v40 = vadd.f32 %v4232_v43, %v11797_v26  ;;  %v4234_v35 = vmul.f32 0.044715, %v4170_v22  ;;  %v4456_v19 = vadd.f32 1.0, %v11544_v0  ;;  %v11845_v37 = vpop.f32.mrb[173].mxu0 }
 0x97b   : > { %8883 = vtanh.f32 %v4358_v63  ;;  %v4359_v21 = vmul.f32 0.7978846, %v4295_v29  ;;  %v4361_v44 = vmul.f32 0.7978846, %v4297_v53  ;;  %v11847_v16 = vpop.eup %8875  ;;  %v4516_v43 = vmul.f32 0.5, %v4452_v42  ;;  %v11851_v7 = vpop.f32.mrb[174].mxu0 }
 0x97c   : > { %5169 = vmatpush1.bf16.msra.mxu1 %v8467_v23  ;;  %13566 = vst [vmem:[#allocation126_spill] sm:$0xff] %v11847_v16  ;;  %v4360_v17 = vmul.f32 0.7978846, %v4296_v40  ;;  %v4298_v36 = vadd.f32 %v4234_v35, %v11815_v50  ;;  %v4451_v24 = vadd.f32 1.0, %v11464_v14  ;;  %v4520_v63 = vmul.f32 0.5, %v4456_v19  ;;  %v11858_v23 = vpop.f32.mrb[175].mxu0 }
 0x97d   : > { %5170 = vmatprep.subr.bf16.mxu1 %v8472_v56  ;;  %8885 = vtanh.f32 %v4359_v21  ;;  %v4455_v29 = vadd.f32 1.0, %v11496_v34  ;;  %v11856_v0 = vadd.f32 %v11565_v51, %v11250_v13  ;;  %v4580_v53 = vmul.f32 %v4516_v43, %v11326_v1  ;;  %v8473_v34 = vld [vmem:[#allocation13 + $0x140] ss:$8 sps:$4 sm:$0xff]   ;;  %v8478_v21 = vld [vmem:[#allocation13 + $0x154] ss:$8 sps:$4 sm:$0xff]  }
 0x97e   : > { %8887 = vtanh.f32 %v4361_v44  ;;  %v4362_v22 = vmul.f32 0.7978846, %v4298_v36  ;;  %v4515_v40 = vmul.f32 0.5, %v4451_v24  ;;  %v4584_v14 = vmul.f32 %v4520_v63, %v11371_v46 }
 0x97f   : > { %8889 = vtanh.f32 %v4360_v17  ;;  %v4519_v56 = vmul.f32 0.5, %v4455_v29  ;;  %v4107_v35 = vmul.f32 %v11856_v0, %v11856_v0  ;;  %v11867_v42 = vadd.f32 %v11567_v28, %v11253_v32 }
 0x980   : > { %5171 = vmatpush1.bf16.msra.mxu1 %v8470_v15  ;;  %8891 = vtanh.f32 %v4362_v22  ;;  %v4579_v51 = vmul.f32 %v4515_v40, %v11318_v30  ;;  %v11871_v1 = vadd.f32 %v11575_v47, %v11256_v41  ;;  %v4640_v46 = vpack.c.bf16 %v4584_v14, %v4580_v53 }
 0x981   : > { %13567 = vst [vmem:[#allocation127_spill] sm:$0xff] %v11867_v42  ;;  %5172 = vmatprep.subr.bf16.mxu1 %v8475_v39  ;;  %v4583_v44 = vmul.f32 %v4519_v56, %v11334_v59  ;;  %v4171_v19 = vmul.f32 %v4107_v35, %v11856_v0  ;;  %v11877_v15 = vadd.f32 %v11577_v20, %v11259_v12  ;;  %v11879_v30 = vpop.eup %8877  ;;  %v11893_v17 = vpop.f32.mrb[176].mxu0  ;;  %v8481_v56 = vld [vmem:[#allocation13 + $0x164] ss:$8 sps:$4 sm:$0xff]  }
 0x982   : > { %v4109_v28 = vmul.f32 %v11867_v42, %v11867_v42  ;;  %v4108_v47 = vmul.f32 %v11871_v1, %v11871_v1  ;;  %v11887_v39 = vadd.f32 %v11583_v61, %v11250_v13  ;;  %v11891_v59 = vadd.f32 %v11585_v11, %v11253_v32  ;;  %v11895_v20 = vpop.eup %8879  ;;  %5093 = vmatprep.mubr.bf16.mxu1 %v4640_v46  ;;  %v8476_v61 = vld [vmem:[#allocation13 + $0x150] ss:$8 sps:$4 sm:$0xff]   ;;  %v11903_v29 = vpop.f32.mrb[177].mxu0 }
 0x983   : > { %13568 = vst [vmem:[#allocation128_spill] sm:$0xff] %v11877_v15  ;;  %13570 = vst [vmem:[#allocation130_spill] sm:$0xff] %v11895_v20  ;;  %v4639_v36 = vpack.c.bf16 %v4583_v44, %v4579_v51  ;;  %v4235_v43 = vmul.f32 0.044715, %v4171_v19  ;;  %v4110_v24 = vmul.f32 %v11877_v15, %v11877_v15  ;;  %v11901_v63 = vadd.f32 %v11595_v54, %v11256_v41  ;;  %v11913_v54 = vpop.f32.mrb[178].mxu0 }
 0x984   : > { %13569 = vst [vmem:[#allocation129_spill] sm:$0xff] %v11891_v59  ;;  %5173 = vmatpush1.bf16.msra.mxu1 %v8473_v34  ;;  %v11905_v11 = vpop.eup %8881  ;;  %v4173_v22 = vmul.f32 %v4109_v28, %v11867_v42  ;;  %v4172_v53 = vmul.f32 %v4108_v47, %v11871_v1  ;;  %v4111_v40 = vmul.f32 %v11887_v39, %v11887_v39  ;;  %v11925_v19 = vpop.f32.mrb[179].mxu0 }
 0x985   : > { %v4113_v14 = vmul.f32 %v11891_v59, %v11891_v59  ;;  %5174 = vmatprep.subr.bf16.mxu1 %v8478_v21  ;;  %v11915_v35 = vpop.eup %8883  ;;  %5094 = vmatmul.mubr.bf16.gmra.mrb[100].mxu1 %v4639_v36  ;;  %v4299_v34 = vadd.f32 %v4235_v43, %v11856_v0  ;;  %v4174_v51 = vmul.f32 %v4110_v24, %v11877_v15 }
 0x986   : > { %13571 = vst [vmem:[#allocation131_spill] sm:$0xff] %v11915_v35  ;;  %v4112_v46 = vmul.f32 %v11901_v63, %v11901_v63  ;;  %v11923_v44 = vadd.f32 %v11597_v6, %v11259_v12  ;;  %13573 = vst [vmem:[#allocation133_spill] sm:$0xff] %v11925_v19  ;;  %v4237_v21 = vmul.f32 0.044715, %v4173_v22  ;;  %v4236_v28 = vmul.f32 0.044715, %v4172_v53 }
 0x987   : > { %v4175_v47 = vmul.f32 %v4111_v40, %v11887_v39  ;;  %v4177_v27 = vmul.f32 %v4113_v14, %v11891_v59  ;;  %v11929_v36 = vpop.eup %8885  ;;  %v4363_v43 = vmul.f32 0.7978846, %v4299_v34  ;;  %v4238_v20 = vmul.f32 0.044715, %v4174_v51  ;;  %v8479_v6 = vld [vmem:[#allocation13 + $0x160] ss:$8 sps:$4 sm:$0xff]  }
 0x988   : > { %13572 = vst [vmem:[#allocation132_spill] sm:$0xff] %v11923_v44  ;;  %v4176_v24 = vmul.f32 %v4112_v46, %v11901_v63  ;;  %v4114_v50 = vmul.f32 %v11923_v44, %v11923_v44  ;;  %5175 = vmatpush1.bf16.msra.mxu1 %v8476_v61  ;;  %v11934_v38 = vpop.eup %8887  ;;  %v4301_v22 = vadd.f32 %v4237_v21, %v11867_v42  ;;  %v8484_v14 = vld [vmem:[#allocation13 + $0x174] ss:$8 sps:$4 sm:$0xff]   ;;  %v8482_v61 = vld [vmem:[#allocation13 + $0x170] ss:$8 sps:$4 sm:$0xff]  }
 0x989   : > { %13574 = vst [vmem:[#allocation134_spill] sm:$0xff] %v11934_v38  ;;  %v4300_v53 = vadd.f32 %v4236_v28, %v11871_v1  ;;  %v4239_v40 = vmul.f32 0.044715, %v4175_v47  ;;  %v4241_v35 = vmul.f32 0.044715, %v4177_v27  ;;  %5176 = vmatprep.subr.bf16.mxu1 %v8481_v56  ;;  %v11938_v5 = vpop.eup %8889  ;;  %8893 = vtanh.f32 %v4363_v43  ;;  %v11946_v56 = vpop.f32.mrb[180].mxu0 }
 0x98a   : > { %v4302_v34 = vadd.f32 %v4238_v20, %v11877_v15  ;;  %v4240_v51 = vmul.f32 0.044715, %v4176_v24  ;;  %v4178_v46 = vmul.f32 %v4114_v50, %v11923_v44  ;;  %v11942_v16 = vpop.eup %8891  ;;  %v4365_v38 = vmul.f32 0.7978846, %v4301_v22  ;;  %v8487_v27 = vld [vmem:[#allocation13 + $0x184] ss:$8 sps:$4 sm:$0xff]  }
 0x98b   : > { %13575 = vst [vmem:[#allocation135_spill] sm:$0xff] %v11942_v16  ;;  %v4364_v19 = vmul.f32 0.7978846, %v4300_v53  ;;  %v4303_v21 = vadd.f32 %v4239_v40, %v11887_v39  ;;  %v4305_v28 = vadd.f32 %v4241_v35, %v11891_v59  ;;  %v4460_v20 = vadd.f32 1.0, %v11608_v8  ;;  %v11950_v50 = vpop.f32.mrb[181].mxu0 }
 0x98c   : > { %v4366_v47 = vmul.f32 0.7978846, %v4302_v34  ;;  %v4304_v43 = vadd.f32 %v4240_v51, %v11901_v63  ;;  %v4242_v42 = vmul.f32 0.044715, %v4178_v46  ;;  %5177 = vmatpush1.bf16.msra.mxu1 %v8479_v6  ;;  %13576 = vst [vmem:[#allocation136_spill] sm:$0xff] %v11950_v50  ;;  %8895 = vtanh.f32 %v4365_v38  ;;  %v11953_v40 = vpop.f32.mrb[182].mxu0 }
 0x98d   : > { %v4367_v24 = vmul.f32 0.7978846, %v4303_v21  ;;  %v4369_v22 = vmul.f32 0.7978846, %v4305_v28  ;;  %v4464_v53 = vadd.f32 1.0, %v11659_v60  ;;  %5178 = vmatprep.subr.bf16.mxu1 %v8484_v14  ;;  %13577 = vst [vmem:[#allocation137_spill] sm:$0xff] %v11953_v40  ;;  %8897 = vtanh.f32 %v4364_v19 }
 0x98e   : > { %v4368_v35 = vmul.f32 0.7978846, %v4304_v43  ;;  %v4306_v34 = vadd.f32 %v4242_v42, %v11923_v44  ;;  %v4524_v59 = vmul.f32 0.5, %v4460_v20  ;;  %v11956_v51 = vpop.f32.mrb[183].mxu0  ;;  %8899 = vtanh.f32 %v4366_v47  ;;  %v13579_v6 = vld [vmem:[#allocation83_spill] sm:$0xff]  ;;  %v13581_v42 = vld [vmem:[#allocation73_spill] sm:$0xff] }
 0x98f   : > { %13578 = vst [vmem:[#allocation138_spill] sm:$0xff] %v11956_v51  ;;  %v4528_v8 = vmul.f32 0.5, %v4464_v53  ;;  %v4459_v46 = vadd.f32 1.0, %v13579_v6  ;;  %v4463_v38 = vadd.f32 1.0, %v11641_v18  ;;  %8901 = vtanh.f32 %v4367_v24  ;;  %v13580_v28 = vld [vmem:[#allocation67_spill] sm:$0xff]  ;;  %v13582_v24 = vld [vmem:[#allocation90_spill] sm:$0xff] }
 0x990   : > { %v4370_v21 = vmul.f32 0.7978846, %v4306_v34  ;;  %v4588_v60 = vmul.f32 %v4524_v59, %v13580_v28  ;;  %v11963_v14 = vadd.f32 %v11628_v25, %v11250_v13  ;;  %5179 = vmatpush1.bf16.msra.mxu1 %v8482_v61  ;;  %v8485_v19 = vld [vmem:[#allocation13 + $0x180] ss:$8 sps:$4 sm:$0xff]   ;;  %8903 = vtanh.f32 %v4369_v22  ;;  %v8490_v61 = vld [vmem:[#allocation13 + $0x194] ss:$8 sps:$4 sm:$0xff]  }
 0x991   : > { %v4592_v43 = vmul.f32 %v4528_v8, %v13581_v42  ;;  %v4523_v20 = vmul.f32 0.5, %v4459_v46  ;;  %v4527_v47 = vmul.f32 0.5, %v4463_v38  ;;  %5180 = vmatprep.subr.bf16.mxu1 %v8487_v27  ;;  %8905 = vtanh.f32 %v4368_v35  ;;  %v13584_v59 = vld [vmem:[#allocation92_spill] sm:$0xff]  ;;  %v13585_v34 = vld [vmem:[#allocation63_spill] sm:$0xff]  ;;  %v11978_v27 = vpop.f32.mrb[184].mxu0 }
 0x992   : > { %v4115_v18 = vmul.f32 %v11963_v14, %v11963_v14  ;;  %v11970_v53 = vadd.f32 %v13582_v24, %v11253_v32  ;;  %v11974_v25 = vadd.f32 %v13584_v59, %v11256_v41  ;;  %8907 = vtanh.f32 %v4370_v21  ;;  %v13586_v6 = vld [vmem:[#allocation71_spill] sm:$0xff]  ;;  %13587 = vst [vmem:[#allocation67_spill] sm:$0xff] %v11978_v27  ;;  %v13588_v24 = vld [vmem:[#allocation93_spill] sm:$0xff] }
 0x993   : > { %v4644_v22 = vpack.c.bf16 %v4592_v43, %v4588_v60  ;;  %v4587_v8 = vmul.f32 %v4523_v20, %v13585_v34  ;;  %v4591_v46 = vmul.f32 %v4527_v47, %v13586_v6  ;;  %v11980_v35 = vpop.eup %8893  ;;  %v11989_v21 = vadd.f32 %v13588_v24, %v11259_v12  ;;  %v8488_v60 = vld [vmem:[#allocation13 + $0x190] ss:$8 sps:$4 sm:$0xff]   ;;  %v11991_v43 = vpop.f32.mrb[185].mxu0  ;;  %v8493_v24 = vld [vmem:[#allocation13 + $0x1a4] ss:$8 sps:$4 sm:$0xff]  }
 0x994   : > { %13583 = vst [vmem:[#allocation83_spill] sm:$0xff] %v11970_v53  ;;  %v4179_v38 = vmul.f32 %v4115_v18, %v11963_v14  ;;  %v4117_v28 = vmul.f32 %v11970_v53, %v11970_v53  ;;  %v4116_v42 = vmul.f32 %v11974_v25, %v11974_v25  ;;  %5181 = vmatpush1.bf16.msra.mxu1 %v8485_v19  ;;  %13590 = vst [vmem:[#allocation90_spill] sm:$0xff] %v11991_v43  ;;  %v13591_v47 = vld [vmem:[#allocation94_spill] sm:$0xff]  ;;  %v13592_v18 = vld [vmem:[#allocation95_spill] sm:$0xff]  ;;  %v12005_v44 = vpop.f32.mrb[186].mxu0 }
 0x995   : > { %13589 = vst [vmem:[#allocation73_spill] sm:$0xff] %v11989_v21  ;;  %5103 = vmatprep.mubr.bf16.mxu1 %v4644_v22  ;;  %v4643_v20 = vpack.c.bf16 %v4591_v46, %v4587_v8  ;;  %v11995_v59 = vadd.f32 %v13591_v47, %v11250_v13  ;;  %v11999_v34 = vadd.f32 %v13592_v18, %v11253_v32  ;;  %13594 = vst [vmem:[#allocation63_spill] sm:$0xff] %v12005_v44  ;;  %v12011_v8 = vpop.f32.mrb[187].mxu0 }
 0x996   : > { %v12003_v6 = vadd.f32 %v11655_v45, %v11256_v41  ;;  %v4243_v19 = vmul.f32 0.044715, %v4179_v38  ;;  %v4181_v15 = vmul.f32 %v4117_v28, %v11970_v53  ;;  %v4180_v22 = vmul.f32 %v4116_v42, %v11974_v25  ;;  %5182 = vmatprep.subr.bf16.mxu1 %v8490_v61  ;;  %13595 = vst [vmem:[#allocation71_spill] sm:$0xff] %v12011_v8  ;;  %v12013_v32 = vpop.eup %8895  ;;  %v13597_v38 = vld [vmem:[#allocation97_spill] sm:$0xff] }
 0x997   : > { %13593 = vst [vmem:[#allocation92_spill] sm:$0xff] %v11999_v34  ;;  %v4118_v13 = vmul.f32 %v11989_v21, %v11989_v21  ;;  %13596 = vst [vmem:[#allocation93_spill] sm:$0xff] %v12013_v32  ;;  %5104 = vmatmul.mubr.bf16.gmra.mrb[104].mxu1 %v4643_v20  ;;  %v4119_v41 = vmul.f32 %v11995_v59, %v11995_v59  ;;  %v4121_v45 = vmul.f32 %v11999_v34, %v11999_v34  ;;  %v12025_v42 = vpop.eup %8897  ;;  %v8491_v32 = vld [vmem:[#allocation13 + $0x1a0] ss:$8 sps:$4 sm:$0xff]  }
 0x998   : > { %v4120_v46 = vmul.f32 %v12003_v6, %v12003_v6  ;;  %v12023_v28 = vadd.f32 %v13597_v38, %v11259_v12  ;;  %v4307_v61 = vadd.f32 %v4243_v19, %v11963_v14  ;;  %v4245_v47 = vmul.f32 0.044715, %v4181_v15  ;;  %5183 = vmatpush1.bf16.msra.mxu1 %v8488_v60  ;;  %v12029_v16 = vpop.eup %8899  ;;  %v8496_v38 = vld [vmem:[#allocation13 + $0x1b4] ss:$8 sps:$4 sm:$0xff]  }
 0x999   : > { %v4244_v18 = vmul.f32 0.044715, %v4180_v22  ;;  %v4182_v20 = vmul.f32 %v4118_v13, %v11989_v21  ;;  %13599 = vst [vmem:[#allocation95_spill] sm:$0xff] %v12029_v16  ;;  %v4183_v8 = vmul.f32 %v4119_v41, %v11995_v59  ;;  %v4185_v44 = vmul.f32 %v4121_v45, %v11999_v34  ;;  %5184 = vmatprep.subr.bf16.mxu1 %v8493_v24  ;;  %v12036_v19 = vpop.eup %8901  ;;  %v8494_v16 = vld [vmem:[#allocation13 + $0x1b0] ss:$8 sps:$4 sm:$0xff]  }
 0x99a   : > { %13598 = vst [vmem:[#allocation94_spill] sm:$0xff] %v12023_v28  ;;  %v4184_v43 = vmul.f32 %v4120_v46, %v12003_v6  ;;  %v4122_v12 = vmul.f32 %v12023_v28, %v12023_v28  ;;  %v4371_v15 = vmul.f32 0.7978846, %v4307_v61  ;;  %v4309_v22 = vadd.f32 %v4245_v47, %v11970_v53  ;;  %v12040_v27 = vpop.eup %8903  ;;  %v12049_v47 = vld [vmem:[%s13494_s21 + $0x4] sm:$0xf] }
 0x99b   : > { %v4308_v60 = vadd.f32 %v4244_v18, %v11974_v25  ;;  %v4246_v13 = vmul.f32 0.044715, %v4182_v20  ;;  %13600 = vst [vmem:[#allocation97_spill] sm:$0xff] %v12040_v27  ;;  %v4247_v41 = vmul.f32 0.044715, %v4183_v8  ;;  %v12043_v40 = vpop.eup %8905  ;;  %13601 = vst [vmem:[#allocation139_spill] sm:$0xff] %v12049_v47 }
 0x99c   : > { %v4249_v45 = vmul.f32 0.044715, %v4185_v44  ;;  %v4248_v51 = vmul.f32 0.044715, %v4184_v43  ;;  %v4186_v46 = vmul.f32 %v4122_v12, %v12023_v28  ;;  %8909 = vtanh.f32 %v4371_v15  ;;  %5185 = vmatpush1.bf16.msra.mxu1 %v8491_v32  ;;  %v12051_v18 = vpop.f32.mrb[188].mxu0  ;;  %v12053_v8 = vpop.eup %8907 }
 0x99d   : > { %v4373_v24 = vmul.f32 0.7978846, %v4309_v22  ;;  %v4372_v50 = vmul.f32 0.7978846, %v4308_v60  ;;  %v4310_v61 = vadd.f32 %v4246_v13, %v11989_v21  ;;  %13602 = vst [vmem:[#allocation140_spill] sm:$0xff] %v12053_v8  ;;  %v4311_v44 = vadd.f32 %v4247_v41, %v11995_v59  ;;  %5186 = vmatprep.subr.bf16.mxu1 %v8496_v38  ;;  %v12058_v22 = vpop.f32.mrb[189].mxu0 }
 0x99e   : > { %v4313_v43 = vadd.f32 %v4249_v45, %v11999_v34  ;;  %v4312_v20 = vadd.f32 %v4248_v51, %v12003_v6  ;;  %v4250_v12 = vmul.f32 0.044715, %v4186_v46  ;;  %v8499_v15 = vld [vmem:[#allocation13 + $0x1c4] ss:$8 sps:$4 sm:$0xff]   ;;  %v4468_v13 = vadd.f32 1.0, %v11712_v31  ;;  %v12062_v53 = vpop.f32.mrb[190].mxu0 }
 0x99f   : > { %8911 = vtanh.f32 %v4373_v24  ;;  %v4374_v60 = vmul.f32 0.7978846, %v4310_v61  ;;  %v4472_v32 = vadd.f32 1.0, %v11741_v52  ;;  %v4375_v21 = vmul.f32 0.7978846, %v4311_v44  ;;  %v12065_v34 = vpop.f32.mrb[191].mxu0 }
 0x9a0   : > { %8913 = vtanh.f32 %v4372_v50  ;;  %v4377_v41 = vmul.f32 0.7978846, %v4313_v43  ;;  %v4376_v27 = vmul.f32 0.7978846, %v4312_v20  ;;  %v4314_v51 = vadd.f32 %v4250_v12, %v12023_v28  ;;  %5187 = vmatpush1.bf16.msra.mxu1 %v8494_v16  ;;  %v8497_v46 = vld [vmem:[#allocation13 + $0x1c0] ss:$8 sps:$4 sm:$0xff]  }
 0x9a1   : > { %8915 = vtanh.f32 %v4374_v60  ;;  %v4532_v45 = vmul.f32 0.5, %v4468_v13  ;;  %v4536_v38 = vmul.f32 0.5, %v4472_v32  ;;  %13603 = vst [vmem:[#allocation141_spill] sm:$0xff] %v12065_v34  ;;  %v4467_v31 = vadd.f32 1.0, %v11683_v33  ;;  %v13604_v24 = vld [vmem:[#allocation21_spill] sm:$0xff]  ;;  %5188 = vmatprep.subr.bf16.mxu1 %v8499_v15  ;;  %v13605_v43 = vld [vmem:[#allocation79_spill] sm:$0xff] }
 0x9a2   : > { %8917 = vtanh.f32 %v4375_v21  ;;  %v4471_v52 = vadd.f32 1.0, %v11729_v9  ;;  %v12071_v50 = vrot.slane %v12049_v47, %v13604_v24  ;;  %v8502_v61 = vld [vmem:[#allocation13 + $0x1d4] ss:$8 sps:$4 sm:$0xff]   ;;  %v4378_v44 = vmul.f32 0.7978846, %v4314_v51  ;;  %v13606_v12 = vld [vmem:[#allocation85_spill] sm:$0xff] }
 0x9a3   : > { %8919 = vtanh.f32 %v4377_v41  ;;  %v4596_v20 = vmul.f32 %v4532_v45, %v13605_v43  ;;  %v4600_v16 = vmul.f32 %v4536_v38, %v13606_v12  ;;  %v4531_v60 = vmul.f32 0.5, %v4467_v31  ;;  %v13607_v21 = vld [vmem:[#allocation101_spill] sm:$0xff]  ;;  %v12079_v9 = vpop.f32.mrb[192].mxu0  ;;  %v13609_v24 = vld [vmem:[#allocation20_spill] sm:$0xff] }
 0x9a4   : > { %8921 = vtanh.f32 %v4376_v27  ;;  %v4535_v13 = vmul.f32 0.5, %v4471_v52  ;;  %v12077_v33 = vadd.f32 %v13607_v21, %v12071_v50  ;;  %13608 = vst [vmem:[#allocation79_spill] sm:$0xff] %v12079_v9  ;;  %v12083_v15 = vrot.slane %v12049_v47, %v13609_v24  ;;  %v13610_v41 = vld [vmem:[#allocation105_spill] sm:$0xff]  ;;  %5189 = vmatpush1.bf16.msra.mxu1 %v8497_v46  ;;  %v8500_v27 = vld [vmem:[#allocation13 + $0x1d0] ss:$8 sps:$4 sm:$0xff]   ;;  %v12089_v45 = vpop.f32.mrb[193].mxu0 }
 0x9a5   : > { %8923 = vtanh.f32 %v4378_v44  ;;  %v4648_v32 = vpack.c.bf16 %v4600_v16, %v4596_v20  ;;  %v12087_v51 = vadd.f32 %v13610_v41, %v12071_v50  ;;  %13611 = vst [vmem:[#allocation85_spill] sm:$0xff] %v12089_v45  ;;  %v13612_v38 = vld [vmem:[#allocation77_spill] sm:$0xff]  ;;  %v13613_v52 = vld [vmem:[#allocation82_spill] sm:$0xff]  ;;  %v4476_v20 = vadd.f32 1.0, %v11808_v62  ;;  %5190 = vmatprep.subr.bf16.mxu1 %v8502_v61  ;;  %v12096_v16 = vpop.f32.mrb[194].mxu0  ;;  %v13615_v46 = vld [vmem:[#allocation104_spill] sm:$0xff] }
 0x9a6   : > { %v4595_v31 = vmul.f32 %v4531_v60, %v13612_v38  ;;  %v4599_v43 = vmul.f32 %v4535_v13, %v13613_v52  ;;  %v5941_v44 = vmul.f32 %v12077_v33, %v12077_v33  ;;  %v8505_v12 = vld [vmem:[#allocation13 + $0x1e4] ss:$8 sps:$4 sm:$0xff]   ;;  %13614 = vst [vmem:[#allocation101_spill] sm:$0xff] %v12096_v16  ;;  %v12098_v21 = vpop.eup %8909  ;;  %v12102_v41 = vadd.f32 %v13615_v46, %v12083_v15  ;;  %v13617_v38 = vld [vmem:[#allocation106_spill] sm:$0xff]  ;;  %v12111_v62 = vpop.f32.mrb[195].mxu0 }
 0x9a7   : > { %5113 = vmatprep.mubr.bf16.mxu1 %v4648_v32  ;;  %v5945_v60 = vmul.f32 %v12087_v51, %v12087_v51  ;;  %v4480_v13 = vadd.f32 1.0, %v11838_v49  ;;  %v12109_v52 = vadd.f32 %v13617_v38, %v12083_v15  ;;  %13619 = vst [vmem:[#allocation82_spill] sm:$0xff] %v12111_v62  ;;  %v4540_v28 = vmul.f32 0.5, %v4476_v20  ;;  %v8503_v16 = vld [vmem:[#allocation13 + $0x1e0] ss:$8 sps:$4 sm:$0xff]  }
 0x9a8   : > { %13616 = vst [vmem:[#allocation105_spill] sm:$0xff] %v12102_v41  ;;  %v4647_v61 = vpack.c.bf16 %v4599_v43, %v4595_v31  ;;  %v6005_v24 = vmul.f32 %v5941_v44, %v12077_v33  ;;  %v4475_v32 = vadd.f32 1.0, %v11773_v55  ;;  %v5942_v46 = vmul.f32 %v12102_v41, %v12102_v41  ;;  %5191 = vmatpush1.bf16.msra.mxu1 %v8500_v27  ;;  %v13621_v43 = vld [vmem:[#allocation98_spill] sm:$0xff] }
 0x9a9   : > { %13618 = vst [vmem:[#allocation77_spill] sm:$0xff] %v12109_v52  ;;  %v12115_v8 = vpop.eup %8911  ;;  %v6009_v45 = vmul.f32 %v5945_v60, %v12087_v51  ;;  %v4544_v49 = vmul.f32 0.5, %v4480_v13  ;;  %v5946_v38 = vmul.f32 %v12109_v52, %v12109_v52  ;;  %v4604_v44 = vmul.f32 %v4540_v28, %v13621_v43  ;;  %5192 = vmatprep.subr.bf16.mxu1 %v8505_v12  ;;  %v13623_v28 = vld [vmem:[#allocation89_spill] sm:$0xff]  ;;  %v8506_v12 = vld [vmem:[#allocation13 + $0x1f0] ss:$8 sps:$4 sm:$0xff]  }
 0x9aa   : > { %13620 = vst [vmem:[#allocation104_spill] sm:$0xff] %v12115_v8  ;;  %v12122_v62 = vpop.eup %8913  ;;  %5114 = vmatmul.mubr.bf16.gmra.mrb[108].mxu1 %v4647_v61  ;;  %v6069_v31 = vmul.f32 0.044715, %v6005_v24  ;;  %v4479_v55 = vadd.f32 1.0, %v11830_v3  ;;  %v4539_v20 = vmul.f32 0.5, %v4475_v32  ;;  %v6006_v60 = vmul.f32 %v5942_v46, %v12102_v41  ;;  %v12139_v32 = vpop.f32.mrb[196].mxu0 }
 0x9ab   : > { %v8508_v8 = vld [vmem:[#allocation13 + $0x1f4] ss:$8 sps:$4 sm:$0xff]   ;;  %v12126_v9 = vpop.eup %8915  ;;  %v6073_v13 = vmul.f32 0.044715, %v6009_v45  ;;  %v4608_v47 = vmul.f32 %v4544_v49, %v11703_v4  ;;  %v6010_v27 = vmul.f32 %v5946_v38, %v12109_v52  ;;  %v12137_v3 = vadd.f32 %v11734_v48, %v12071_v50 }
 0x9ac   : > { %13622 = vst [vmem:[#allocation106_spill] sm:$0xff] %v12126_v9  ;;  %v12131_v34 = vpop.eup %8917  ;;  %v6133_v24 = vadd.f32 %v6069_v31, %v12077_v33  ;;  %v4543_v61 = vmul.f32 0.5, %v4479_v55  ;;  %v4603_v43 = vmul.f32 %v4539_v20, %v13623_v28  ;;  %v6070_v45 = vmul.f32 0.044715, %v6006_v60  ;;  %5193 = vmatpush1.bf16.msra.mxu1 %v8503_v16  ;;  %v12144_v9 = vpop.f32.mrb[197].mxu0 }
 0x9ad   : > { %13624 = vst [vmem:[#allocation98_spill] sm:$0xff] %v12137_v3  ;;  %v12141_v46 = vpop.eup %8919  ;;  %v6137_v4 = vadd.f32 %v6073_v13, %v12087_v51  ;;  %v4652_v49 = vpack.c.bf16 %v4608_v47, %v4604_v44  ;;  %v6074_v38 = vmul.f32 0.044715, %v6010_v27  ;;  %v5949_v48 = vmul.f32 %v12137_v3, %v12137_v3  ;;  %5194 = vmatprep.subr.bf16.mxu1 %v8508_v8  ;;  %v8511_v60 = vld [vmem:[#allocation13 + $0x204] ss:$8 sps:$4 sm:$0xff]   ;;  %v12155_v13 = vpop.f32.mrb[198].mxu0 }
 0x9ae   : > { %13625 = vst [vmem:[#allocation89_spill] sm:$0xff] %v12141_v46  ;;  %v12146_v31 = vpop.eup %8921  ;;  %v6197_v55 = vmul.f32 0.7978846, %v6133_v24  ;;  %v4607_v20 = vmul.f32 %v4543_v61, %v11681_v58  ;;  %v12153_v28 = vadd.f32 %v11739_v10, %v12083_v15  ;;  %v6134_v16 = vadd.f32 %v6070_v45, %v12102_v41  ;;  %v13628_v58 = vld [vmem:[#allocation111_spill] sm:$0xff]  ;;  %v12165_v61 = vpop.f32.mrb[199].mxu0  ;;  %v13640_v41 = vld [vmem:[#allocation124_spill] sm:$0xff] }
 0x9af   : > { %v12157_v47 = vpop.eup %8923  ;;  %v6201_v44 = vmul.f32 0.7978846, %v6137_v4  ;;  %5123 = vmatprep.mubr.bf16.mxu1 %v4652_v49  ;;  %v6138_v27 = vadd.f32 %v6074_v38, %v12109_v52  ;;  %v12163_v24 = vadd.f32 %v13628_v58, %v12071_v50  ;;  %v6013_v8 = vmul.f32 %v5949_v48, %v12137_v3  ;;  %v13633_v52 = vld [vmem:[#allocation110_spill] sm:$0xff] }
 0x9b0   : > { %13626 = vst [vmem:[#allocation142_spill] sm:$0xff] %v12153_v28  ;;  %13627 = vst [vmem:[#allocation143_spill] sm:$0xff] %v12157_v47  ;;  %8925 = vtanh.f32 %v6197_v55  ;;  %v4651_v10 = vpack.c.bf16 %v4607_v20, %v4603_v43  ;;  %v5950_v46 = vmul.f32 %v12153_v28, %v12153_v28  ;;  %v6198_v47 = vmul.f32 0.7978846, %v6134_v16  ;;  %5195 = vmatpush1.bf16.msra.mxu1 %v8506_v12  ;;  %v13630_v20 = vld [vmem:[#allocation113_spill] sm:$0xff] }
 0x9b1   : > { %13629 = vst [vmem:[#allocation111_spill] sm:$0xff] %v12163_v24  ;;  %8927 = vtanh.f32 %v6201_v44  ;;  %v6202_v45 = vmul.f32 0.7978846, %v6138_v27  ;;  %v5953_v4 = vmul.f32 %v12163_v24, %v12163_v24  ;;  %v6077_v49 = vmul.f32 0.044715, %v6013_v8  ;;  %6933 = vmatprep.subr.bf16.mxu1 %v8511_v60 }
 0x9b2   : > { %5124 = vmatmul.mubr.bf16.gmra.mrb[112].mxu1 %v4651_v10  ;;  %v6014_v38 = vmul.f32 %v5950_v46, %v12153_v28  ;;  %v4484_v58 = vadd.f32 1.0, %v11905_v11  ;;  %v4488_v43 = vadd.f32 1.0, %v11938_v5  ;;  %8929 = vtanh.f32 %v6198_v47  ;;  %v12182_v46 = vpop.f32.mrb[200].mxu0 }
 0x9b3   : > { %v6017_v55 = vmul.f32 %v5953_v4, %v12163_v24  ;;  %v12178_v48 = vadd.f32 %v13630_v20, %v12083_v15  ;;  %v4483_v16 = vadd.f32 1.0, %v11879_v30  ;;  %8931 = vtanh.f32 %v6202_v45  ;;  %v12187_v47 = vpop.f32.mrb[201].mxu0  ;;  %v13632_v30 = vld [vmem:[#allocation115_spill] sm:$0xff] }
 0x9b4   : > { %v6141_v12 = vadd.f32 %v6077_v49, %v12137_v3  ;;  %v6078_v44 = vmul.f32 0.044715, %v6014_v38  ;;  %v4548_v27 = vmul.f32 0.5, %v4484_v58  ;;  %v4552_v10 = vmul.f32 0.5, %v4488_v43  ;;  %v12191_v49 = vpop.f32.mrb[202].mxu0 }
 0x9b5   : > { %13631 = vst [vmem:[#allocation113_spill] sm:$0xff] %v12178_v48  ;;  %v6081_v11 = vmul.f32 0.044715, %v6017_v55  ;;  %v5954_v5 = vmul.f32 %v12178_v48, %v12178_v48  ;;  %v4487_v60 = vadd.f32 1.0, %v11929_v36  ;;  %v4547_v20 = vmul.f32 0.5, %v4483_v16  ;;  %v12196_v3 = vpop.f32.mrb[203].mxu0 }
 0x9b6   : > { %v6205_v8 = vmul.f32 0.7978846, %v6141_v12  ;;  %v6142_v4 = vadd.f32 %v6078_v44, %v12153_v28  ;;  %v4612_v45 = vmul.f32 %v4548_v27, %v13632_v30  ;;  %v4616_v58 = vmul.f32 %v4552_v10, %v11797_v26  ;;  %v13634_v44 = vld [vmem:[#allocation119_spill] sm:$0xff]  ;;  %v13636_v10 = vld [vmem:[#allocation120_spill] sm:$0xff] }
 0x9b7   : > { %v6145_v38 = vadd.f32 %v6081_v11, %v12163_v24  ;;  %v6018_v43 = vmul.f32 %v5954_v5, %v12178_v48  ;;  %v4551_v55 = vmul.f32 0.5, %v4487_v60  ;;  %v4611_v12 = vmul.f32 %v4547_v20, %v13633_v52  ;;  %v13638_v52 = vld [vmem:[#allocation122_spill] sm:$0xff] }
 0x9b8   : > { %8933 = vtanh.f32 %v6205_v8  ;;  %v6206_v36 = vmul.f32 0.7978846, %v6142_v4  ;;  %v12201_v28 = vadd.f32 %v13634_v44, %v12071_v50  ;;  %v4656_v27 = vpack.c.bf16 %v4616_v58, %v4612_v45 }
 0x9b9   : > { %v6209_v16 = vmul.f32 0.7978846, %v6145_v38  ;;  %v6082_v30 = vmul.f32 0.044715, %v6018_v43  ;;  %v4615_v11 = vmul.f32 %v4551_v55, %v11785_v2  ;;  %v12208_v5 = vadd.f32 %v13636_v10, %v12083_v15  ;;  %v12220_v55 = vpop.f32.mrb[204].mxu0 }
 0x9ba   : > { %13635 = vst [vmem:[#allocation115_spill] sm:$0xff] %v12201_v28  ;;  %v8926_v24 = vpop.eup %8925  ;;  %8935 = vtanh.f32 %v6206_v36  ;;  %v5957_v26 = vmul.f32 %v12201_v28, %v12201_v28  ;;  %v12212_v60 = vadd.f32 %v13638_v52, %v12071_v50  ;;  %5133 = vmatprep.mubr.bf16.mxu1 %v4656_v27  ;;  %v12226_v27 = vpop.f32.mrb[205].mxu0 }
 0x9bb   : > { %13637 = vst [vmem:[#allocation110_spill] sm:$0xff] %v12208_v5  ;;  %v8928_v8 = vpop.eup %8927  ;;  %v6325_v4 = vadd.f32 1.0, %v8926_v24  ;;  %8937 = vtanh.f32 %v6209_v16  ;;  %v6146_v45 = vadd.f32 %v6082_v30, %v12178_v48  ;;  %v4655_v2 = vpack.c.bf16 %v4615_v11, %v4611_v12 }
 0x9bc   : > { %13639 = vst [vmem:[#allocation119_spill] sm:$0xff] %v12212_v60  ;;  %v6329_v20 = vadd.f32 1.0, %v8928_v8  ;;  %v6021_v38 = vmul.f32 %v5957_v26, %v12201_v28  ;;  %v5958_v58 = vmul.f32 %v12208_v5, %v12208_v5  ;;  %v5961_v43 = vmul.f32 %v12212_v60, %v12212_v60  ;;  %v12222_v36 = vpop.eup %8929  ;;  %v12232_v8 = vpop.f32.mrb[206].mxu0 }
 0x9bd   : > { %v6389_v44 = vmul.f32 0.5, %v6325_v4  ;;  %v6210_v24 = vmul.f32 0.7978846, %v6146_v45  ;;  %5134 = vmatmul.mubr.bf16.gmra.mrb[116].mxu1 %v4655_v2  ;;  %v4492_v16 = vadd.f32 1.0, %v12025_v42  ;;  %v4496_v12 = vadd.f32 1.0, %v12043_v40  ;;  %v12228_v30 = vpop.eup %8931  ;;  %v12237_v2 = vpop.f32.mrb[207].mxu0 }
 0x9be   : > { %v6393_v11 = vmul.f32 0.5, %v6329_v20  ;;  %v6085_v26 = vmul.f32 0.044715, %v6021_v38  ;;  %v6022_v10 = vmul.f32 %v5958_v58, %v12208_v5  ;;  %v6025_v52 = vmul.f32 %v5961_v43, %v12212_v60 }
 0x9bf   : > { %v12235_v4 = vmul.f32 %v6389_v44, %v12077_v33  ;;  %8939 = vtanh.f32 %v6210_v24  ;;  %v4556_v45 = vmul.f32 0.5, %v4492_v16  ;;  %v4560_v42 = vmul.f32 0.5, %v4496_v12 }
 0x9c0   : > { %v12240_v40 = vmul.f32 %v6393_v11, %v12087_v51  ;;  %v6149_v20 = vadd.f32 %v6085_v26, %v12201_v28  ;;  %v6086_v38 = vmul.f32 0.044715, %v6022_v10  ;;  %v6089_v48 = vmul.f32 0.044715, %v6025_v52 }
 0x9c1   : > { %v4620_v58 = vmul.f32 %v4556_v45, %v11871_v1  ;;  %v4624_v43 = vmul.f32 %v4560_v42, %v11901_v63  ;;  %v12247_v33 = vadd.f32 %v13640_v41, %v12083_v15  ;;  %v4491_v44 = vadd.f32 1.0, %v11980_v35  ;;  %v12265_v42 = vpop.f32.mrb[208].mxu0 }
 0x9c2   : > { %v12250_v24 = vpop.eup %8933  ;;  %v6213_v16 = vmul.f32 0.7978846, %v6149_v20  ;;  %v6150_v12 = vadd.f32 %v6086_v38, %v12208_v5  ;;  %v6153_v11 = vadd.f32 %v6089_v48, %v12212_v60  ;;  %v4495_v63 = vadd.f32 1.0, %v12036_v19 }
 0x9c3   : > { %13641 = vst [vmem:[#allocation120_spill] sm:$0xff] %v12247_v33  ;;  %v4660_v26 = vpack.c.bf16 %v4624_v43, %v4620_v58  ;;  %v5962_v1 = vmul.f32 %v12247_v33, %v12247_v33  ;;  %v4555_v41 = vmul.f32 0.5, %v4491_v44  ;;  %v12263_v45 = vadd.f32 %v11842_v57, %v12071_v50  ;;  %v12275_v43 = vpop.f32.mrb[209].mxu0 }
 0x9c4   : > { %v12259_v10 = vpop.eup %8935  ;;  %8941 = vtanh.f32 %v6213_v16  ;;  %v6214_v35 = vmul.f32 0.7978846, %v6150_v12  ;;  %v6217_v52 = vmul.f32 0.7978846, %v6153_v11  ;;  %v4559_v38 = vmul.f32 0.5, %v4495_v63  ;;  %v12284_v12 = vpop.f32.mrb[210].mxu0 }
 0x9c5   : > { %13642 = vst [vmem:[#allocation122_spill] sm:$0xff] %v12263_v45  ;;  %v12267_v20 = vpop.eup %8937  ;;  %5143 = vmatprep.mubr.bf16.mxu1 %v4660_v26  ;;  %v6026_v48 = vmul.f32 %v5962_v1, %v12247_v33  ;;  %v4619_v19 = vmul.f32 %v4555_v41, %v11856_v0  ;;  %v12273_v58 = vadd.f32 %v11845_v37, %v12083_v15  ;;  %v4500_v16 = vadd.f32 1.0, %v12122_v62  ;;  %v12289_v26 = vpop.f32.mrb[211].mxu0 }
 0x9c6   : > { %8943 = vtanh.f32 %v6214_v35  ;;  %v5965_v57 = vmul.f32 %v12263_v45, %v12263_v45  ;;  %v12281_v44 = vadd.f32 %v11851_v7, %v12071_v50  ;;  %v4623_v11 = vmul.f32 %v4559_v38, %v11887_v39 }
 0x9c7   : > { %13643 = vst [vmem:[#allocation124_spill] sm:$0xff] %v12273_v58  ;;  %8945 = vtanh.f32 %v6217_v52  ;;  %v6090_v0 = vmul.f32 0.044715, %v6026_v48  ;;  %v5966_v37 = vmul.f32 %v12273_v58, %v12273_v58  ;;  %v4504_v7 = vadd.f32 1.0, %v12146_v31 }
 0x9c8   : > { %13644 = vst [vmem:[#allocation144_spill] sm:$0xff] %v12281_v44  ;;  %v6029_v1 = vmul.f32 %v5965_v57, %v12263_v45  ;;  %v5969_v63 = vmul.f32 %v12281_v44, %v12281_v44  ;;  %v4564_v41 = vmul.f32 0.5, %v4500_v16  ;;  %v4659_v52 = vpack.c.bf16 %v4623_v11, %v4619_v19 }
 0x9c9   : > { %v12295_v62 = vpop.eup %8939  ;;  %v6154_v35 = vadd.f32 %v6090_v0, %v12247_v33  ;;  %v6030_v39 = vmul.f32 %v5966_v37, %v12273_v58  ;;  %v12301_v48 = vadd.f32 %v11858_v23, %v12083_v15  ;;  %v4568_v51 = vmul.f32 0.5, %v4504_v7 }
 0x9ca   : > { %v6093_v38 = vmul.f32 0.044715, %v6029_v1  ;;  %v6033_v57 = vmul.f32 %v5969_v63, %v12281_v44  ;;  %v4628_v60 = vmul.f32 %v4564_v41, %v11974_v25  ;;  %5144 = vmatmul.mubr.bf16.gmra.mrb[120].mxu1 %v4659_v52  ;;  %v4499_v19 = vadd.f32 1.0, %v12098_v21  ;;  %v12311_v1 = vpop.f32.mrb[212].mxu0 }
 0x9cb   : > { %13645 = vst [vmem:[#allocation145_spill] sm:$0xff] %v12301_v48  ;;  %v6218_v28 = vmul.f32 0.7978846, %v6154_v35  ;;  %v6094_v31 = vmul.f32 0.044715, %v6030_v39  ;;  %v5970_v16 = vmul.f32 %v12301_v48, %v12301_v48  ;;  %v4632_v23 = vmul.f32 %v4568_v51, %v12003_v6  ;;  %v12315_v41 = vpop.f32.mrb[213].mxu0 }
 0x9cc   : > { %v6157_v0 = vadd.f32 %v6093_v38, %v12263_v45  ;;  %v6097_v11 = vmul.f32 0.044715, %v6033_v57  ;;  %v4503_v37 = vadd.f32 1.0, %v12131_v34  ;;  %v4563_v7 = vmul.f32 0.5, %v4499_v19  ;;  %v12320_v6 = vpop.f32.mrb[214].mxu0  ;;  %v13647_v57 = vld [vmem:[#allocation62_spill] sm:$0xff] }
 0x9cd   : > { %8947 = vtanh.f32 %v6218_v28  ;;  %v6158_v25 = vadd.f32 %v6094_v31, %v12273_v58  ;;  %v6034_v63 = vmul.f32 %v5970_v16, %v12301_v48  ;;  %v4664_v39 = vpack.c.bf16 %v4632_v23, %v4628_v60  ;;  %v12324_v45 = vpop.f32.mrb[215].mxu0  ;;  %v13666_v58 = vld [vmem:[#allocation136_spill] sm:$0xff] }
 0x9ce   : > { %v12317_v35 = vpop.eup %8941  ;;  %v6221_v21 = vmul.f32 0.7978846, %v6157_v0  ;;  %v6161_v52 = vadd.f32 %v6097_v11, %v12281_v44  ;;  %v4567_v38 = vmul.f32 0.5, %v4503_v37  ;;  %v4627_v28 = vmul.f32 %v4563_v7, %v11963_v14  ;;  %v13648_v11 = vld [vmem:[#allocation65_spill] sm:$0xff] }
 0x9cf   : > { %13646 = vst [vmem:[#allocation146_spill] sm:$0xff] %v12317_v35  ;;  %v6222_v34 = vmul.f32 0.7978846, %v6158_v25  ;;  %v6098_v51 = vmul.f32 0.044715, %v6034_v63  ;;  %v4446_v31 = vadd.f32 1.0, %v13647_v57  ;;  %5153 = vmatprep.mubr.bf16.mxu1 %v4664_v39  ;;  %v12335_v14 = vadd.f32 %v11893_v17, %v12071_v50 }
 0x9d0   : > { %v12326_v16 = vpop.eup %8943  ;;  %8949 = vtanh.f32 %v6221_v21  ;;  %v6225_v19 = vmul.f32 0.7978846, %v6161_v52  ;;  %v4631_v0 = vmul.f32 %v4567_v38, %v11995_v59  ;;  %v4450_v60 = vadd.f32 1.0, %v13648_v11  ;;  %v13652_v52 = vld [vmem:[#allocation56_spill] sm:$0xff]  ;;  %v13654_v17 = vld [vmem:[#allocation57_spill] sm:$0xff] }
 0x9d1   : > { %v12330_v23 = vpop.eup %8945  ;;  %8951 = vtanh.f32 %v6222_v34  ;;  %v6162_v37 = vadd.f32 %v6098_v51, %v12301_v48  ;;  %v4510_v25 = vmul.f32 0.5, %v4446_v31  ;;  %13650 = vst [vmem:[#allocation65_spill] sm:$0xff] %v12335_v14  ;;  %v12339_v21 = vadd.f32 %v11903_v29, %v12083_v15  ;;  %v13655_v57 = vld [vmem:[#allocation133_spill] sm:$0xff]  ;;  %v13657_v31 = vld [vmem:[#allocation74_spill] sm:$0xff] }
 0x9d2   : > { %13649 = vst [vmem:[#allocation62_spill] sm:$0xff] %v12330_v23  ;;  %8953 = vtanh.f32 %v6225_v19  ;;  %v4663_v63 = vpack.c.bf16 %v4631_v0, %v4627_v28  ;;  %v4514_v7 = vmul.f32 0.5, %v4450_v60  ;;  %v5973_v38 = vmul.f32 %v12335_v14, %v12335_v14  ;;  %v12356_v0 = vpop.f32.mrb[216].mxu0  ;;  %v13659_v60 = vld [vmem:[#allocation81_spill] sm:$0xff] }
 0x9d3   : > { %13651 = vst [vmem:[#allocation147_spill] sm:$0xff] %v12339_v21  ;;  %v6226_v59 = vmul.f32 0.7978846, %v6162_v37  ;;  %v4574_v39 = vmul.f32 %v4510_v25, %v13652_v52  ;;  %v12346_v34 = vadd.f32 %v11913_v54, %v12071_v50  ;;  %v5974_v28 = vmul.f32 %v12339_v21, %v12339_v21  ;;  %13658 = vst [vmem:[#allocation133_spill] sm:$0xff] %v12356_v0  ;;  %v12362_v25 = vpop.f32.mrb[217].mxu0  ;;  %v13668_v35 = vld [vmem:[#allocation61_spill] sm:$0xff] }
 0x9d4   : > { %5154 = vmatmul.mubr.bf16.gmra.mrb[124].mxu1 %v4663_v63  ;;  %v4578_v51 = vmul.f32 %v4514_v7, %v13654_v17  ;;  %v12353_v29 = vadd.f32 %v13655_v57, %v12083_v15  ;;  %v4454_v19 = vadd.f32 1.0, %v13657_v31  ;;  %v6037_v11 = vmul.f32 %v5973_v38, %v12335_v14  ;;  %13660 = vst [vmem:[#allocation74_spill] sm:$0xff] %v12362_v25  ;;  %v12367_v57 = vpop.f32.mrb[218].mxu0  ;;  %v13675_v25 = vld [vmem:[#allocation64_spill] sm:$0xff] }
 0x9d5   : > { %13653 = vst [vmem:[#allocation56_spill] sm:$0xff] %v12346_v34  ;;  %8955 = vtanh.f32 %v6226_v59  ;;  %v5977_v54 = vmul.f32 %v12346_v34, %v12346_v34  ;;  %v4458_v37 = vadd.f32 1.0, %v13659_v60  ;;  %v6038_v7 = vmul.f32 %v5974_v28, %v12339_v21  ;;  %13661 = vst [vmem:[#allocation81_spill] sm:$0xff] %v12367_v57  ;;  %v12376_v48 = vpop.f32.mrb[219].mxu0  ;;  %v13665_v28 = vld [vmem:[#allocation59_spill] sm:$0xff]  ;;  %v13709_v0 = vld [vmem:[#allocation72_spill] sm:$0xff] }
 0x9d6   : > { %13656 = vst [vmem:[#allocation57_spill] sm:$0xff] %v12353_v29  ;;  %v4638_v63 = vpack.c.bf16 %v4578_v51, %v4574_v39  ;;  %v5978_v52 = vmul.f32 %v12353_v29, %v12353_v29  ;;  %v4518_v17 = vmul.f32 0.5, %v4454_v19  ;;  %v6101_v59 = vmul.f32 0.044715, %v6037_v11  ;;  %13664 = vst [vmem:[#allocation150_spill] sm:$0xff] %v12376_v48 }
 0x9d7   : > { %v12369_v31 = vpop.eup %8947  ;;  %v6041_v38 = vmul.f32 %v5977_v54, %v12346_v34  ;;  %v4522_v44 = vmul.f32 0.5, %v4458_v37  ;;  %v12374_v60 = vadd.f32 %v11946_v56, %v12071_v50  ;;  %v6102_v39 = vmul.f32 0.044715, %v6038_v7  ;;  %v8509_v37 = vld [vmem:[#allocation13 + $0x200] ss:$8 sps:$4 sm:$0xff]  }
 0x9d8   : > { %13662 = vst [vmem:[#allocation148_spill] sm:$0xff] %v12369_v31  ;;  %5196 = vmatprep.mubr.bf16.mxu1 %v4638_v63  ;;  %v6042_v51 = vmul.f32 %v5978_v52, %v12353_v29  ;;  %v4582_v19 = vmul.f32 %v4518_v17, %v13665_v28  ;;  %v12382_v23 = vadd.f32 %v13666_v58, %v12083_v15  ;;  %v8514_v52 = vld [vmem:[#allocation13 + $0x214] ss:$8 sps:$4 sm:$0xff]   ;;  %v13670_v58 = vld [vmem:[#allocation137_spill] sm:$0xff] }
 0x9d9   : > { %13663 = vst [vmem:[#allocation149_spill] sm:$0xff] %v12374_v60  ;;  %v6165_v11 = vadd.f32 %v6101_v59, %v12335_v14  ;;  %v6105_v54 = vmul.f32 0.044715, %v6041_v38  ;;  %v4586_v57 = vmul.f32 %v4522_v44, %v13668_v35  ;;  %v5981_v56 = vmul.f32 %v12374_v60, %v12374_v60 }
 0x9da   : > { %13667 = vst [vmem:[#allocation59_spill] sm:$0xff] %v12382_v23  ;;  %v12388_v48 = vpop.eup %8949  ;;  %v6166_v63 = vadd.f32 %v6102_v39, %v12339_v21  ;;  %v6106_v7 = vmul.f32 0.044715, %v6042_v51  ;;  %v5982_v17 = vmul.f32 %v12382_v23, %v12382_v23  ;;  %v12395_v28 = vadd.f32 %v13670_v58, %v12071_v50  ;;  %v13674_v21 = vld [vmem:[#allocation69_spill] sm:$0xff] }
 0x9db   : > { %13669 = vst [vmem:[#allocation136_spill] sm:$0xff] %v12388_v48  ;;  %v12397_v59 = vpop.eup %8951  ;;  %v6229_v38 = vmul.f32 0.7978846, %v6165_v11  ;;  %v6169_v44 = vadd.f32 %v6105_v54, %v12346_v34  ;;  %v4642_v35 = vpack.c.bf16 %v4586_v57, %v4582_v19  ;;  %v6045_v14 = vmul.f32 %v5981_v56, %v12374_v60  ;;  %v8512_v48 = vld [vmem:[#allocation13 + $0x210] ss:$8 sps:$4 sm:$0xff]   ;;  %v12410_v54 = vpop.f32.mrb[220].mxu0 }
 0x9dc   : > { %13671 = vst [vmem:[#allocation61_spill] sm:$0xff] %v12395_v28  ;;  %13672 = vst [vmem:[#allocation137_spill] sm:$0xff] %v12397_v59  ;;  %v12401_v33 = vpop.eup %8953  ;;  %v6230_v39 = vmul.f32 0.7978846, %v6166_v63  ;;  %v6170_v51 = vadd.f32 %v6106_v7, %v12353_v29  ;;  %v13676_v5 = vpack.c.bf16 %v13674_v21, %v13675_v25  ;;  %v6046_v58 = vmul.f32 %v5982_v17, %v12382_v23  ;;  %v8517_v59 = vld [vmem:[#allocation13 + $0x224] ss:$8 sps:$4 sm:$0xff]  }
 0x9dd   : > { %13673 = vst [vmem:[#allocation151_spill] sm:$0xff] %v12401_v33  ;;  %v5985_v11 = vmul.f32 %v12395_v28, %v12395_v28  ;;  %13677 = vst [vmem:[#allocation69_spill] sm:$0xff] %v12410_v54  ;;  %8957 = vtanh.f32 %v6229_v38  ;;  %v6233_v57 = vmul.f32 0.7978846, %v6169_v44  ;;  %v6109_v19 = vmul.f32 0.044715, %v6045_v14 }
 0x9de   : > { %5197 = vmatmul.mubr.bf16.vlgmr.msra.gmra.mrb[96].mxu1 %v13676_v5  ;;  %v13678_v56 = vld [vmem:[#allocation138_spill] sm:$0xff]  ;;  %v12416_v7 = vpop.f32.mrb[221].mxu0  ;;  %8959 = vtanh.f32 %v6230_v39  ;;  %v6234_v5 = vmul.f32 0.7978846, %v6170_v51  ;;  %v6110_v21 = vmul.f32 0.044715, %v6046_v58 }
 0x9df   : > { %5206 = vmatprep.mubr.bf16.mxu1 %v4642_v35  ;;  %6934 = vmatpush1.bf16.msra.mxu1 %v8509_v37  ;;  %v12414_v63 = vadd.f32 %v13678_v56, %v12083_v15  ;;  %13680 = vst [vmem:[#allocation138_spill] sm:$0xff] %v12416_v7  ;;  %v6049_v25 = vmul.f32 %v5985_v11, %v12395_v28  ;;  %v12419_v17 = vpop.f32.mrb[222].mxu0  ;;  %v12421_v34 = vpop.eup %8955  ;;  %8961 = vtanh.f32 %v6233_v57  ;;  %v13683_v38 = vld [vmem:[#allocation70_spill] sm:$0xff]  ;;  %v13685_v51 = vld [vmem:[#allocation75_spill] sm:$0xff]  ;;  %v8515_v29 = vld [vmem:[#allocation13 + $0x220] ss:$8 sps:$4 sm:$0xff]  }
 0x9e0   : > { %6935 = vmatprep.subr.bf16.mxu1 %v8514_v52  ;;  %13681 = vst [vmem:[#allocation152_spill] sm:$0xff] %v12419_v17  ;;  %13682 = vst [vmem:[#allocation153_spill] sm:$0xff] %v12421_v34  ;;  %v6173_v37 = vadd.f32 %v6109_v19, %v12374_v60  ;;  %v4453_v44 = vadd.f32 1.0, %v13683_v38  ;;  %v12427_v35 = vpop.f32.mrb[223].mxu0  ;;  %8963 = vtanh.f32 %v6234_v5  ;;  %v6174_v52 = vadd.f32 %v6110_v21, %v12382_v23  ;;  %v13686_v19 = vld [vmem:[#allocation88_spill] sm:$0xff] }
 0x9e1   : > { %13679 = vst [vmem:[#allocation64_spill] sm:$0xff] %v12414_v63  ;;  %v5986_v14 = vmul.f32 %v12414_v63, %v12414_v63  ;;  %13684 = vst [vmem:[#allocation70_spill] sm:$0xff] %v12427_v35  ;;  %v6113_v39 = vmul.f32 0.044715, %v6049_v25  ;;  %v4457_v58 = vadd.f32 1.0, %v13685_v51  ;;  %v4462_v60 = vadd.f32 1.0, %v13686_v19 }
 0x9e2   : > { %v6237_v11 = vmul.f32 0.7978846, %v6173_v37  ;;  %v4517_v57 = vmul.f32 0.5, %v4453_v44  ;;  %v6238_v33 = vmul.f32 0.7978846, %v6174_v52  ;;  %v13687_v35 = vld [vmem:[#allocation100_spill] sm:$0xff] }
 0x9e3   : > { %6936 = vmatpush1.bf16.msra.mxu1 %v8512_v48  ;;  %v6050_v56 = vmul.f32 %v5986_v14, %v12414_v63  ;;  %v6177_v17 = vadd.f32 %v6113_v39, %v12395_v28  ;;  %v4521_v38 = vmul.f32 0.5, %v4457_v58  ;;  %v4466_v5 = vadd.f32 1.0, %v13687_v35  ;;  %v8520_v7 = vld [vmem:[#allocation13 + $0x234] ss:$8 sps:$4 sm:$0xff]   ;;  %v13689_v14 = vld [vmem:[#allocation60_spill] sm:$0xff] }
 0x9e4   : > { %6937 = vmatprep.subr.bf16.mxu1 %v8517_v59  ;;  %8965 = vtanh.f32 %v6237_v11  ;;  %v13688_v25 = vld [vmem:[#allocation58_spill] sm:$0xff]  ;;  %v4526_v37 = vmul.f32 0.5, %v4462_v60  ;;  %v13690_v52 = vld [vmem:[#allocation68_spill] sm:$0xff]  ;;  %v13691_v59 = vld [vmem:[#allocation67_spill] sm:$0xff] }
 0x9e5   : > { %v6114_v21 = vmul.f32 0.044715, %v6050_v56  ;;  %v4581_v51 = vmul.f32 %v4517_v57, %v13688_v25  ;;  %8967 = vtanh.f32 %v6238_v33  ;;  %v6241_v48 = vmul.f32 0.7978846, %v6177_v17  ;;  %v8518_v35 = vld [vmem:[#allocation13 + $0x230] ss:$8 sps:$4 sm:$0xff]  }
 0x9e6   : > { %v4585_v44 = vmul.f32 %v4521_v38, %v13689_v14  ;;  %v4530_v23 = vmul.f32 0.5, %v4466_v5  ;;  %v4590_v54 = vmul.f32 %v4526_v37, %v13690_v52  ;;  %v12441_v39 = vadd.f32 %v13691_v59, %v12071_v50  ;;  %v13693_v58 = vld [vmem:[#allocation90_spill] sm:$0xff]  ;;  %v13695_v60 = vld [vmem:[#allocation76_spill] sm:$0xff]  ;;  %v13696_v56 = vld [vmem:[#allocation63_spill] sm:$0xff] }
 0x9e7   : > { %v6178_v19 = vadd.f32 %v6114_v21, %v12414_v63  ;;  %6938 = vmatpush1.bf16.msra.mxu1 %v8515_v29  ;;  %v12445_v11 = vadd.f32 %v13693_v58, %v12083_v15  ;;  %8969 = vtanh.f32 %v6241_v48  ;;  %v12450_v57 = vadd.f32 %v13696_v56, %v12071_v50  ;;  %v8523_v38 = vld [vmem:[#allocation13 + $0x244] ss:$8 sps:$4 sm:$0xff]   ;;  %v12452_v29 = vpop.eup %8957  ;;  %v13699_v37 = vld [vmem:[#allocation71_spill] sm:$0xff]  ;;  %v13702_v14 = vld [vmem:[#allocation86_spill] sm:$0xff] }
 0x9e8   : > { %13692 = vst [vmem:[#allocation75_spill] sm:$0xff] %v12441_v39  ;;  %v4641_v33 = vpack.c.bf16 %v4585_v44, %v4581_v51  ;;  %v4594_v17 = vmul.f32 %v4530_v23, %v13695_v60  ;;  %6939 = vmatprep.subr.bf16.mxu1 %v8520_v7  ;;  %13698 = vst [vmem:[#allocation58_spill] sm:$0xff] %v12452_v29  ;;  %v5989_v21 = vmul.f32 %v12441_v39, %v12441_v39  ;;  %v12462_v23 = vpop.eup %8959 }
 0x9e9   : > { %13694 = vst [vmem:[#allocation88_spill] sm:$0xff] %v12445_v11  ;;  %13697 = vst [vmem:[#allocation100_spill] sm:$0xff] %v12450_v57  ;;  %v6242_v5 = vmul.f32 0.7978846, %v6178_v19  ;;  %v5990_v25 = vmul.f32 %v12445_v11, %v12445_v11  ;;  %v12460_v51 = vadd.f32 %v13699_v37, %v12083_v15  ;;  %v5993_v48 = vmul.f32 %v12450_v57, %v12450_v57  ;;  %v13703_v19 = vld [vmem:[#allocation96_spill] sm:$0xff]  ;;  %v12468_v59 = vpop.eup %8961 }
 0x9ea   : > { %13701 = vst [vmem:[#allocation68_spill] sm:$0xff] %v12462_v23  ;;  %5207 = vmatmul.mubr.bf16.gmra.mrb[100].mxu1 %v4641_v33  ;;  %v4646_v7 = vpack.c.bf16 %v4594_v17, %v4590_v54  ;;  %v4461_v44 = vadd.f32 1.0, %v13702_v14  ;;  %v4465_v52 = vadd.f32 1.0, %v13703_v19  ;;  %13704 = vst [vmem:[#allocation67_spill] sm:$0xff] %v12468_v59  ;;  %v6053_v58 = vmul.f32 %v5989_v21, %v12441_v39  ;;  %v8521_v33 = vld [vmem:[#allocation13 + $0x240] ss:$8 sps:$4 sm:$0xff]   ;;  %v12474_v54 = vpop.eup %8963 }
 0x9eb   : > { %13700 = vst [vmem:[#allocation60_spill] sm:$0xff] %v12460_v51  ;;  %8971 = vtanh.f32 %v6242_v5  ;;  %v6054_v60 = vmul.f32 %v5990_v25, %v12445_v11  ;;  %6940 = vmatpush1.bf16.msra.mxu1 %v8518_v35  ;;  %v5994_v56 = vmul.f32 %v12460_v51, %v12460_v51  ;;  %13705 = vst [vmem:[#allocation90_spill] sm:$0xff] %v12474_v54  ;;  %v13706_v19 = vld [vmem:[#allocation108_spill] sm:$0xff]  ;;  %v8526_v5 = vld [vmem:[#allocation13 + $0x254] ss:$8 sps:$4 sm:$0xff]  }
 0x9ec   : > { %5216 = vmatprep.mubr.bf16.mxu1 %v4646_v7  ;;  %v6057_v17 = vmul.f32 %v5993_v48, %v12450_v57  ;;  %v4525_v37 = vmul.f32 0.5, %v4461_v44  ;;  %v4529_v14 = vmul.f32 0.5, %v4465_v52  ;;  %6941 = vmatprep.subr.bf16.mxu1 %v8523_v38  ;;  %v4470_v28 = vadd.f32 1.0, %v13706_v19  ;;  %v13707_v35 = vld [vmem:[#allocation114_spill] sm:$0xff]  ;;  %v13710_v19 = vld [vmem:[#allocation80_spill] sm:$0xff] }
 0x9ed   : > { %v6117_v63 = vmul.f32 0.044715, %v6053_v58  ;;  %v6118_v21 = vmul.f32 0.044715, %v6054_v60  ;;  %v6058_v25 = vmul.f32 %v5994_v56, %v12460_v51  ;;  %v4474_v59 = vadd.f32 1.0, %v13707_v35  ;;  %v13708_v23 = vld [vmem:[#allocation66_spill] sm:$0xff] }
 0x9ee   : > { %v6121_v29 = vmul.f32 0.044715, %v6057_v17  ;;  %v4589_v34 = vmul.f32 %v4525_v37, %v13708_v23  ;;  %v4593_v54 = vmul.f32 %v4529_v14, %v13709_v0  ;;  %v4534_v7 = vmul.f32 0.5, %v4470_v28  ;;  %v12482_v31 = vpop.eup %8965  ;;  %v8524_v58 = vld [vmem:[#allocation13 + $0x250] ss:$8 sps:$4 sm:$0xff]   ;;  %v13715_v35 = vld [vmem:[#allocation141_spill] sm:$0xff] }
 0x9ef   : > { %v6181_v48 = vadd.f32 %v6117_v63, %v12441_v39  ;;  %v6182_v38 = vadd.f32 %v6118_v21, %v12445_v11  ;;  %v6122_v44 = vmul.f32 0.044715, %v6058_v25  ;;  %v4538_v52 = vmul.f32 0.5, %v4474_v59  ;;  %6942 = vmatpush1.bf16.msra.mxu1 %v8521_v33  ;;  %v12486_v60 = vpop.eup %8967  ;;  %v8529_v28 = vld [vmem:[#allocation13 + $0x264] ss:$8 sps:$4 sm:$0xff]   ;;  %v13712_v59 = vld [vmem:[#allocation87_spill] sm:$0xff] }
 0x9f0   : > { %v6185_v56 = vadd.f32 %v6121_v29, %v12450_v57  ;;  %v4645_v17 = vpack.c.bf16 %v4593_v54, %v4589_v34  ;;  %v4598_v23 = vmul.f32 %v4534_v7, %v13710_v19  ;;  %v12492_v0 = vadd.f32 %v12051_v18, %v12071_v50  ;;  %6943 = vmatprep.subr.bf16.mxu1 %v8526_v5 }
 0x9f1   : > { %v6245_v63 = vmul.f32 0.7978846, %v6181_v48  ;;  %v6246_v37 = vmul.f32 0.7978846, %v6182_v38  ;;  %v6186_v14 = vadd.f32 %v6122_v44, %v12460_v51  ;;  %v4602_v33 = vmul.f32 %v4538_v52, %v13712_v59  ;;  %v12496_v21 = vpop.eup %8969  ;;  %v8527_v48 = vld [vmem:[#allocation13 + $0x260] ss:$8 sps:$4 sm:$0xff]  }
 0x9f2   : > { %13711 = vst [vmem:[#allocation76_spill] sm:$0xff] %v12492_v0  ;;  %v6249_v25 = vmul.f32 0.7978846, %v6185_v56  ;;  %5217 = vmatmul.mubr.bf16.gmra.mrb[104].mxu1 %v4645_v17  ;;  %v5997_v34 = vmul.f32 %v12492_v0, %v12492_v0  ;;  %v12502_v29 = vadd.f32 %v12058_v22, %v12083_v15  ;;  %v12506_v18 = vadd.f32 %v12062_v53, %v12071_v50  ;;  %v8532_v53 = vld [vmem:[#allocation13 + $0x274] ss:$8 sps:$4 sm:$0xff]   ;;  %v13718_v56 = vld [vmem:[#allocation109_spill] sm:$0xff] }
 0x9f3   : > { %8973 = vtanh.f32 %v6245_v63  ;;  %v6250_v54 = vmul.f32 0.7978846, %v6186_v14  ;;  %v4650_v5 = vpack.c.bf16 %v4602_v33, %v4598_v23  ;;  %6944 = vmatpush1.bf16.msra.mxu1 %v8524_v58  ;;  %v12510_v7 = vadd.f32 %v13715_v35, %v12083_v15  ;;  %v13717_v52 = vld [vmem:[#allocation102_spill] sm:$0xff]  ;;  %v13719_v33 = vld [vmem:[#allocation123_spill] sm:$0xff] }
 0x9f4   : > { %13713 = vst [vmem:[#allocation63_spill] sm:$0xff] %v12502_v29  ;;  %13714 = vst [vmem:[#allocation71_spill] sm:$0xff] %v12506_v18  ;;  %8975 = vtanh.f32 %v6246_v37  ;;  %v6061_v38 = vmul.f32 %v5997_v34, %v12492_v0  ;;  %v5998_v22 = vmul.f32 %v12502_v29, %v12502_v29  ;;  %v6001_v44 = vmul.f32 %v12506_v18, %v12506_v18  ;;  %v8530_v37 = vld [vmem:[#allocation13 + $0x270] ss:$8 sps:$4 sm:$0xff]   ;;  %v8535_v34 = vld [vmem:[#allocation13 + $0x284] ss:$8 sps:$4 sm:$0xff]  }
 0x9f5   : > { %13716 = vst [vmem:[#allocation86_spill] sm:$0xff] %v12510_v7  ;;  %6945 = vmatprep.subr.bf16.mxu1 %v8529_v28  ;;  %v12517_v50 = vpop.eup %8971  ;;  %8977 = vtanh.f32 %v6249_v25  ;;  %5226 = vmatprep.mubr.bf16.mxu1 %v4650_v5  ;;  %v6002_v15 = vmul.f32 %v12510_v7, %v12510_v7  ;;  %v4469_v58 = vadd.f32 1.0, %v13717_v52  ;;  %v4473_v17 = vadd.f32 1.0, %v13718_v56  ;;  %v13720_v56 = vld [vmem:[#allocation126_spill] sm:$0xff] }
 0x9f6   : > { %8979 = vtanh.f32 %v6250_v54  ;;  %v6125_v19 = vmul.f32 0.044715, %v6061_v38  ;;  %v6062_v23 = vmul.f32 %v5998_v22, %v12502_v29  ;;  %v6065_v63 = vmul.f32 %v6001_v44, %v12506_v18  ;;  %v13721_v22 = vld [vmem:[#allocation78_spill] sm:$0xff]  ;;  %v13722_v44 = vld [vmem:[#allocation84_spill] sm:$0xff] }
 0x9f7   : > { %v6066_v28 = vmul.f32 %v6002_v15, %v12510_v7  ;;  %v4533_v14 = vmul.f32 0.5, %v4469_v58  ;;  %v4537_v59 = vmul.f32 0.5, %v4473_v17  ;;  %v4478_v25 = vadd.f32 1.0, %v13719_v33  ;;  %6946 = vmatpush1.bf16.msra.mxu1 %v8527_v48 }
 0x9f8   : > { %v6189_v5 = vadd.f32 %v6125_v19, %v12492_v0  ;;  %v6126_v35 = vmul.f32 0.044715, %v6062_v23  ;;  %v6129_v52 = vmul.f32 0.044715, %v6065_v63  ;;  %v4482_v54 = vadd.f32 1.0, %v13720_v56  ;;  %6947 = vmatprep.subr.bf16.mxu1 %v8532_v53  ;;  %v13723_v23 = vld [vmem:[#allocation99_spill] sm:$0xff] }
 0x9f9   : > { %v6130_v38 = vmul.f32 0.044715, %v6066_v28  ;;  %v4597_v57 = vmul.f32 %v4533_v14, %v13721_v22  ;;  %v4601_v39 = vmul.f32 %v4537_v59, %v13722_v44  ;;  %v4542_v51 = vmul.f32 0.5, %v4478_v25  ;;  %v13724_v0 = vld [vmem:[#allocation22_spill] sm:$0xff]  ;;  %v13725_v56 = vld [vmem:[#allocation139_spill] sm:$0xff] }
 0x9fa   : > { %v6253_v15 = vmul.f32 0.7978846, %v6189_v5  ;;  %v6190_v58 = vadd.f32 %v6126_v35, %v12502_v29  ;;  %v6193_v17 = vadd.f32 %v6129_v52, %v12506_v18  ;;  %v4546_v48 = vmul.f32 0.5, %v4482_v54  ;;  %v8533_v28 = vld [vmem:[#allocation13 + $0x280] ss:$8 sps:$4 sm:$0xff]   ;;  %v13726_v25 = vld [vmem:[#allocation107_spill] sm:$0xff] }
 0x9fb   : > { %v6194_v33 = vadd.f32 %v6130_v38, %v12510_v7  ;;  %v4649_v19 = vpack.c.bf16 %v4601_v39, %v4597_v57  ;;  %v4606_v63 = vmul.f32 %v4542_v51, %v13723_v23  ;;  %v12537_v53 = vrot.slane %v13725_v56, %v13724_v0  ;;  %6948 = vmatpush1.bf16.msra.mxu1 %v8530_v37  ;;  %v8538_v35 = vld [vmem:[#allocation13 + $0x294] ss:$8 sps:$4 sm:$0xff]   ;;  %v9085_v51 = vld [vmem:[%s13494_s21 + $0x4] sm:$0xf]  ;;  %v13730_v38 = vld [vmem:[#allocation101_spill] sm:$0xff] }
 0x9fc   : > { %8981 = vtanh.f32 %v6253_v15  ;;  %v6254_v14 = vmul.f32 0.7978846, %v6190_v58  ;;  %v6257_v59 = vmul.f32 0.7978846, %v6193_v17  ;;  %v4610_v5 = vmul.f32 %v4546_v48, %v13726_v25  ;;  %6949 = vmatprep.subr.bf16.mxu1 %v8535_v34  ;;  %v13728_v39 = vld [vmem:[#allocation79_spill] sm:$0xff]  ;;  %v13731_v15 = vld [vmem:[#allocation117_spill] sm:$0xff] }
 0x9fd   : > { %v12540_v52 = vpop.eup %8973  ;;  %v6258_v54 = vmul.f32 0.7978846, %v6194_v33  ;;  %5227 = vmatmul.mubr.bf16.gmra.mrb[108].mxu1 %v4649_v19  ;;  %v12544_v57 = vadd.f32 %v13728_v39, %v12537_v53  ;;  %v13729_v0 = vld [vmem:[#allocation23_spill] sm:$0xff]  ;;  %v12554_v22 = vadd.f32 %v13730_v38, %v12537_v53  ;;  %v4477_v58 = vadd.f32 1.0, %v13731_v15  ;;  %v13732_v17 = vld [vmem:[#allocation125_spill] sm:$0xff] }
 0x9fe   : > { %13727 = vst [vmem:[#allocation96_spill] sm:$0xff] %v12540_v52  ;;  %v12550_v37 = vrot.slane %v9085_v51, %v13729_v0  ;;  %v12556_v34 = vpop.eup %8975  ;;  %8983 = vtanh.f32 %v6254_v14  ;;  %v4654_v44 = vpack.c.bf16 %v4610_v5, %v4606_v63  ;;  %v4481_v48 = vadd.f32 1.0, %v13732_v17  ;;  %v13734_v23 = vld [vmem:[#allocation85_spill] sm:$0xff]  ;;  %v8536_v14 = vld [vmem:[#allocation13 + $0x290] ss:$8 sps:$4 sm:$0xff]  }
 0x9ff   : > { %v12560_v33 = vpop.eup %8977  ;;  %8985 = vtanh.f32 %v6257_v59  ;;  %v5943_v19 = vmul.f32 %v12544_v57, %v12544_v57  ;;  %v5947_v25 = vmul.f32 %v12554_v22, %v12554_v22  ;;  %6950 = vmatpush1.bf16.msra.mxu1 %v8533_v28  ;;  %v13737_v5 = vld [vmem:[#allocation82_spill] sm:$0xff]  ;;  %v4541_v59 = vmul.f32 0.5, %v4477_v58  ;;  %v8541_v0 = vld [vmem:[#allocation13 + $0x2a4] ss:$8 sps:$4 sm:$0xff]   ;;  %v13739_v17 = vld [vmem:[#allocation131_spill] sm:$0xff] }
 0xa00   : > { %13733 = vst [vmem:[#allocation108_spill] sm:$0xff] %v12560_v33  ;;  %v12566_v56 = vadd.f32 %v13734_v23, %v12550_v37  ;;  %v12570_v63 = vpop.eup %8979  ;;  %8987 = vtanh.f32 %v6258_v54  ;;  %5236 = vmatprep.mubr.bf16.mxu1 %v4654_v44  ;;  %v12574_v39 = vadd.f32 %v13737_v5, %v12550_v37  ;;  %v4545_v51 = vmul.f32 0.5, %v4481_v48  ;;  %6951 = vmatprep.subr.bf16.mxu1 %v8538_v35  ;;  %v13740_v44 = vld [vmem:[#allocation91_spill] sm:$0xff]  ;;  %v8539_v35 = vld [vmem:[#allocation13 + $0x2a0] ss:$8 sps:$4 sm:$0xff]  }
 0xa01   : > { %13736 = vst [vmem:[#allocation66_spill] sm:$0xff] %v12570_v63  ;;  %v6007_v38 = vmul.f32 %v5943_v19, %v12544_v57  ;;  %v6011_v28 = vmul.f32 %v5947_v25, %v12554_v22  ;;  %v4486_v23 = vadd.f32 1.0, %v13739_v17  ;;  %v4605_v18 = vmul.f32 %v4541_v59, %v13740_v44  ;;  %v13741_v5 = vld [vmem:[#allocation103_spill] sm:$0xff] }
 0xa02   : > { %13735 = vst [vmem:[#allocation114_spill] sm:$0xff] %v12566_v56  ;;  %13738 = vst [vmem:[#allocation72_spill] sm:$0xff] %v12574_v39  ;;  %v5944_v15 = vmul.f32 %v12566_v56, %v12566_v56  ;;  %v5948_v54 = vmul.f32 %v12574_v39, %v12574_v39  ;;  %v4609_v7 = vmul.f32 %v4545_v51, %v13741_v5  ;;  %v13742_v58 = vld [vmem:[#allocation135_spill] sm:$0xff]  ;;  %v13744_v5 = vld [vmem:[#allocation116_spill] sm:$0xff] }
 0xa03   : > { %v4490_v48 = vadd.f32 1.0, %v13742_v58  ;;  %v6071_v29 = vmul.f32 0.044715, %v6007_v38  ;;  %v6075_v11 = vmul.f32 0.044715, %v6011_v28  ;;  %v4550_v33 = vmul.f32 0.5, %v4486_v23  ;;  %6952 = vmatpush1.bf16.msra.mxu1 %v8536_v14 }
 0xa04   : > { %v6008_v19 = vmul.f32 %v5944_v15, %v12566_v56  ;;  %v6012_v25 = vmul.f32 %v5948_v54, %v12574_v39  ;;  %v4653_v52 = vpack.c.bf16 %v4609_v7, %v4605_v18  ;;  %v12590_v63 = vadd.f32 %v12139_v32, %v12537_v53  ;;  %6953 = vmatprep.subr.bf16.mxu1 %v8541_v0  ;;  %v8544_v59 = vld [vmem:[#allocation13 + $0x2b4] ss:$8 sps:$4 sm:$0xff]   ;;  %v13746_v23 = vld [vmem:[#allocation121_spill] sm:$0xff] }
 0xa05   : > { %v4554_v17 = vmul.f32 0.5, %v4490_v48  ;;  %v6135_v51 = vadd.f32 %v6071_v29, %v12544_v57  ;;  %v6139_v38 = vadd.f32 %v6075_v11, %v12554_v22  ;;  %v4614_v15 = vmul.f32 %v4550_v33, %v13744_v5  ;;  %v8542_v33 = vld [vmem:[#allocation13 + $0x2b0] ss:$8 sps:$4 sm:$0xff]  }
 0xa06   : > { %13743 = vst [vmem:[#allocation80_spill] sm:$0xff] %v12590_v63  ;;  %v6072_v44 = vmul.f32 0.044715, %v6008_v19  ;;  %v12595_v28 = vpop.eup %8981  ;;  %v6076_v14 = vmul.f32 0.044715, %v6012_v25  ;;  %5237 = vmatmul.mubr.bf16.gmra.mrb[112].mxu1 %v4653_v52  ;;  %v5951_v7 = vmul.f32 %v12590_v63, %v12590_v63  ;;  %v12602_v32 = vadd.f32 %v12144_v9, %v12550_v37 }
 0xa07   : > { %13745 = vst [vmem:[#allocation87_spill] sm:$0xff] %v12595_v28  ;;  %v4618_v18 = vmul.f32 %v4554_v17, %v13746_v23  ;;  %v6199_v0 = vmul.f32 0.7978846, %v6135_v51  ;;  %v6203_v54 = vmul.f32 0.7978846, %v6139_v38  ;;  %v12607_v11 = vadd.f32 %v12155_v13, %v12537_v53  ;;  %6954 = vmatpush1.bf16.msra.mxu1 %v8539_v35  ;;  %v13748_v23 = vld [vmem:[#allocation130_spill] sm:$0xff] }
 0xa08   : > { %v6136_v29 = vadd.f32 %v6072_v44, %v12566_v56  ;;  %v12609_v52 = vpop.eup %8983  ;;  %v6140_v58 = vadd.f32 %v6076_v14, %v12574_v39  ;;  %v6015_v19 = vmul.f32 %v5951_v7, %v12590_v63  ;;  %v5952_v9 = vmul.f32 %v12602_v32, %v12602_v32  ;;  %6955 = vmatprep.subr.bf16.mxu1 %v8544_v59  ;;  %v8547_v25 = vld [vmem:[#allocation13 + $0x2c4] ss:$8 sps:$4 sm:$0xff]   ;;  %v8545_v7 = vld [vmem:[#allocation13 + $0x2c0] ss:$8 sps:$4 sm:$0xff]  }
 0xa09   : > { %v4658_v48 = vpack.c.bf16 %v4618_v18, %v4614_v15  ;;  %v12615_v17 = vpop.eup %8985  ;;  %8989 = vtanh.f32 %v6199_v0  ;;  %v5955_v13 = vmul.f32 %v12607_v11, %v12607_v11  ;;  %v12621_v35 = vadd.f32 %v12165_v61, %v12550_v37 }
 0xa0a   : > { %13747 = vst [vmem:[#allocation141_spill] sm:$0xff] %v12615_v17  ;;  %v6200_v51 = vmul.f32 0.7978846, %v6136_v29  ;;  %v12623_v44 = vpop.eup %8987  ;;  %8991 = vtanh.f32 %v6203_v54  ;;  %v6204_v38 = vmul.f32 0.7978846, %v6140_v58  ;;  %v6016_v59 = vmul.f32 %v5952_v9, %v12602_v32  ;;  %v13749_v29 = vld [vmem:[#allocation134_spill] sm:$0xff] }
 0xa0b   : > { %5246 = vmatprep.mubr.bf16.mxu1 %v4658_v48  ;;  %v6079_v5 = vmul.f32 0.044715, %v6015_v19  ;;  %v6019_v15 = vmul.f32 %v5955_v13, %v12607_v11  ;;  %v5956_v14 = vmul.f32 %v12621_v35, %v12621_v35  ;;  %v4485_v18 = vadd.f32 1.0, %v13748_v23  ;;  %6956 = vmatpush1.bf16.msra.mxu1 %v8542_v33  ;;  %v8550_v58 = vld [vmem:[#allocation13 + $0x2d4] ss:$8 sps:$4 sm:$0xff]   ;;  %v13751_v33 = vld [vmem:[#allocation140_spill] sm:$0xff] }
 0xa0c   : > { %8993 = vtanh.f32 %v6200_v51  ;;  %v6080_v0 = vmul.f32 0.044715, %v6016_v59  ;;  %v4489_v54 = vadd.f32 1.0, %v13749_v29  ;;  %6957 = vmatprep.subr.bf16.mxu1 %v8547_v25  ;;  %v13750_v51 = vld [vmem:[#allocation95_spill] sm:$0xff]  ;;  %v4498_v17 = vadd.f32 1.0, %v13751_v33  ;;  %v13752_v59 = vld [vmem:[#allocation112_spill] sm:$0xff] }
 0xa0d   : > { %8995 = vtanh.f32 %v6204_v38  ;;  %v6143_v61 = vadd.f32 %v6079_v5, %v12590_v63  ;;  %v6083_v48 = vmul.f32 0.044715, %v6019_v15  ;;  %v6020_v19 = vmul.f32 %v5956_v14, %v12621_v35  ;;  %v8548_v25 = vld [vmem:[#allocation13 + $0x2d0] ss:$8 sps:$4 sm:$0xff]  }
 0xa0e   : > { %v4549_v9 = vmul.f32 0.5, %v4485_v18  ;;  %v4494_v13 = vadd.f32 1.0, %v13750_v51  ;;  %v6144_v56 = vadd.f32 %v6080_v0, %v12602_v32  ;;  %v4553_v23 = vmul.f32 0.5, %v4489_v54  ;;  %v13753_v14 = vld [vmem:[#allocation118_spill] sm:$0xff]  ;;  %v13754_v54 = vld [vmem:[#allocation128_spill] sm:$0xff] }
 0xa0f   : > { %v6207_v39 = vmul.f32 0.7978846, %v6143_v61  ;;  %v6147_v38 = vadd.f32 %v6083_v48, %v12607_v11  ;;  %v6084_v5 = vmul.f32 0.044715, %v6020_v19  ;;  %6958 = vmatpush1.bf16.msra.mxu1 %v8545_v7  ;;  %v4562_v28 = vmul.f32 0.5, %v4498_v17  ;;  %v13756_v7 = vld [vmem:[#allocation132_spill] sm:$0xff] }
 0xa10   : > { %v4613_v63 = vmul.f32 %v4549_v9, %v13752_v59  ;;  %v4558_v29 = vmul.f32 0.5, %v4494_v13  ;;  %v6208_v15 = vmul.f32 0.7978846, %v6144_v56  ;;  %v4617_v18 = vmul.f32 %v4553_v23, %v13753_v14  ;;  %6959 = vmatprep.subr.bf16.mxu1 %v8550_v58  ;;  %v8553_v61 = vld [vmem:[#allocation13 + $0x2e4] ss:$8 sps:$4 sm:$0xff]  }
 0xa11   : > { %8997 = vtanh.f32 %v6207_v39  ;;  %v6211_v51 = vmul.f32 0.7978846, %v6147_v38  ;;  %v6148_v0 = vadd.f32 %v6084_v5, %v12621_v35  ;;  %v12643_v48 = vadd.f32 %v12182_v46, %v12537_v53  ;;  %v8551_v46 = vld [vmem:[#allocation13 + $0x2e0] ss:$8 sps:$4 sm:$0xff]   ;;  %v8556_v5 = vld [vmem:[#allocation13 + $0x2f4] ss:$8 sps:$4 sm:$0xff]  }
 0xa12   : > { %v4622_v33 = vmul.f32 %v4558_v29, %v13754_v54  ;;  %8999 = vtanh.f32 %v6208_v15  ;;  %v4657_v19 = vpack.c.bf16 %v4617_v18, %v4613_v63  ;;  %v4626_v9 = vmul.f32 %v4562_v28, %v13756_v7 }
 0xa13   : > { %13755 = vst [vmem:[#allocation102_spill] sm:$0xff] %v12643_v48  ;;  %v12648_v56 = vadd.f32 %v12187_v47, %v12550_v37  ;;  %v8990_v39 = vpop.eup %8989  ;;  %9001 = vtanh.f32 %v6211_v51  ;;  %v6212_v17 = vmul.f32 0.7978846, %v6148_v0  ;;  %v5959_v58 = vmul.f32 %v12643_v48, %v12643_v48  ;;  %6960 = vmatpush1.bf16.msra.mxu1 %v8548_v25 }
 0xa14   : > { %v12654_v13 = vadd.f32 %v12191_v49, %v12537_v53  ;;  %v8992_v23 = vpop.eup %8991  ;;  %v6327_v63 = vadd.f32 1.0, %v8990_v39  ;;  %5247 = vmatmul.mubr.bf16.gmra.mrb[116].mxu1 %v4657_v19  ;;  %v4662_v28 = vpack.c.bf16 %v4626_v9, %v4622_v33  ;;  %v12660_v38 = vadd.f32 %v12196_v3, %v12550_v37  ;;  %6961 = vmatprep.subr.bf16.mxu1 %v8553_v61  ;;  %v13758_v61 = vld [vmem:[#allocation93_spill] sm:$0xff]  ;;  %v8554_v9 = vld [vmem:[#allocation13 + $0x2f0] ss:$8 sps:$4 sm:$0xff]  }
 0xa15   : > { %v5960_v47 = vmul.f32 %v12648_v56, %v12648_v56  ;;  %v6331_v29 = vadd.f32 1.0, %v8992_v23  ;;  %9003 = vtanh.f32 %v6212_v17  ;;  %v6023_v49 = vmul.f32 %v5959_v58, %v12643_v48  ;;  %v13759_v19 = vld [vmem:[#allocation97_spill] sm:$0xff] }
 0xa16   : > { %13757 = vst [vmem:[#allocation109_spill] sm:$0xff] %v12654_v13  ;;  %v12662_v59 = vpop.eup %8993  ;;  %v5963_v25 = vmul.f32 %v12654_v13, %v12654_v13  ;;  %v6391_v14 = vmul.f32 0.5, %v6327_v63  ;;  %5256 = vmatprep.mubr.bf16.mxu1 %v4662_v28  ;;  %v5964_v3 = vmul.f32 %v12660_v38, %v12660_v38  ;;  %v4493_v51 = vadd.f32 1.0, %v13758_v61  ;;  %v8559_v63 = vld [vmem:[#allocation13 + $0x304] ss:$8 sps:$4 sm:$0xff]  }
 0xa17   : > { %v12667_v15 = vpop.eup %8995  ;;  %v6024_v18 = vmul.f32 %v5960_v47, %v12648_v56  ;;  %v6395_v0 = vmul.f32 0.5, %v6331_v29  ;;  %v6087_v54 = vmul.f32 0.044715, %v6023_v49  ;;  %v4497_v7 = vadd.f32 1.0, %v13759_v19  ;;  %6962 = vmatpush1.bf16.msra.mxu1 %v8551_v46 }
 0xa18   : > { %v6027_v33 = vmul.f32 %v5963_v25, %v12654_v13  ;;  %v12676_v39 = vmul.f32 %v6391_v14, %v12544_v57  ;;  %v6028_v58 = vmul.f32 %v5964_v3, %v12660_v38  ;;  %v4557_v23 = vmul.f32 0.5, %v4493_v51  ;;  %6963 = vmatprep.subr.bf16.mxu1 %v8556_v5  ;;  %v13762_v57 = vld [vmem:[#allocation127_spill] sm:$0xff]  ;;  %v13764_v51 = vld [vmem:[#allocation129_spill] sm:$0xff] }
 0xa19   : > { %v6088_v17 = vmul.f32 0.044715, %v6024_v18  ;;  %v12680_v28 = vmul.f32 %v6395_v0, %v12554_v22  ;;  %v6151_v47 = vadd.f32 %v6087_v54, %v12643_v48  ;;  %v4561_v49 = vmul.f32 0.5, %v4497_v7  ;;  %v13763_v18 = vld [vmem:[#allocation106_spill] sm:$0xff] }
 0xa1a   : > { %13760 = vst [vmem:[#allocation123_spill] sm:$0xff] %v12676_v39  ;;  %v6091_v29 = vmul.f32 0.044715, %v6027_v33  ;;  %v6092_v61 = vmul.f32 0.044715, %v6028_v58  ;;  %v4621_v14 = vmul.f32 %v4557_v23, %v13762_v57  ;;  %v4502_v19 = vadd.f32 1.0, %v13763_v18 }
 0xa1b   : > { %13761 = vst [vmem:[#allocation126_spill] sm:$0xff] %v12680_v28  ;;  %v12683_v25 = vpop.eup %8997  ;;  %v6152_v46 = vadd.f32 %v6088_v17, %v12648_v56  ;;  %v6215_v3 = vmul.f32 0.7978846, %v6151_v47  ;;  %v4625_v0 = vmul.f32 %v4561_v49, %v13764_v51  ;;  %6964 = vmatpush1.bf16.msra.mxu1 %v8554_v9  ;;  %v13765_v17 = vld [vmem:[#allocation143_spill] sm:$0xff]  ;;  %v12700_v47 = vadd.f32 %v12220_v55, %v12537_v53  ;;  %v13766_v49 = vld [vmem:[#allocation73_spill] sm:$0xff]  ;;  %v13771_v39 = vld [vmem:[#allocation92_spill] sm:$0xff] }
 0xa1c   : > { %v6155_v22 = vadd.f32 %v6091_v29, %v12654_v13  ;;  %v12692_v54 = vpop.eup %8999  ;;  %v6156_v7 = vadd.f32 %v6092_v61, %v12660_v38  ;;  %v4506_v58 = vadd.f32 1.0, %v13765_v17  ;;  %v4566_v48 = vmul.f32 0.5, %v4502_v19  ;;  %7046 = vmatprep.subr.bf16.mxu1 %v8559_v63 }
 0xa1d   : > { %v6216_v33 = vmul.f32 0.7978846, %v6152_v46  ;;  %v12696_v23 = vpop.eup %9001  ;;  %9005 = vtanh.f32 %v6215_v3  ;;  %v4661_v18 = vpack.c.bf16 %v4625_v0, %v4621_v14  ;;  %v5967_v63 = vmul.f32 %v12700_v47, %v12700_v47  ;;  %v13767_v14 = vld [vmem:[#allocation94_spill] sm:$0xff]  ;;  %v13768_v3 = vld [vmem:[#allocation104_spill] sm:$0xff] }
 0xa1e   : > { %v6219_v57 = vmul.f32 0.7978846, %v6155_v22  ;;  %v6220_v9 = vmul.f32 0.7978846, %v6156_v7  ;;  %v4570_v29 = vmul.f32 0.5, %v4506_v58  ;;  %v4630_v46 = vmul.f32 %v4566_v48, %v13766_v49  ;;  %v13769_v7 = vld [vmem:[#allocation89_spill] sm:$0xff] }
 0xa1f   : > { %9007 = vtanh.f32 %v6216_v33  ;;  %v12703_v51 = vpop.eup %9003  ;;  %5257 = vmatmul.mubr.bf16.gmra.mrb[120].mxu1 %v4661_v18  ;;  %v12709_v61 = vadd.f32 %v12226_v27, %v12550_v37  ;;  %v12713_v55 = vadd.f32 %v12232_v8, %v12537_v53  ;;  %v12718_v48 = vadd.f32 %v12237_v2, %v12550_v37 }
 0xa20   : > { %9009 = vtanh.f32 %v6219_v57  ;;  %v4634_v19 = vmul.f32 %v4570_v29, %v13767_v14  ;;  %v4501_v22 = vadd.f32 1.0, %v13768_v3  ;;  %v6031_v0 = vmul.f32 %v5967_v63, %v12700_v47  ;;  %v13770_v14 = vld [vmem:[#allocation83_spill] sm:$0xff] }
 0xa21   : > { %9011 = vtanh.f32 %v6220_v9  ;;  %v5968_v33 = vmul.f32 %v12709_v61, %v12709_v61  ;;  %v5971_v27 = vmul.f32 %v12713_v55, %v12713_v55  ;;  %v4505_v8 = vadd.f32 1.0, %v13769_v7 }
 0xa22   : > { %v4666_v17 = vpack.c.bf16 %v4634_v19, %v4630_v46  ;;  %v5972_v58 = vmul.f32 %v12718_v48, %v12718_v48  ;;  %v4565_v57 = vmul.f32 0.5, %v4501_v22  ;;  %v6326_v2 = vadd.f32 1.0, %v12222_v36 }
 0xa23   : > { %v6095_v18 = vmul.f32 0.044715, %v6031_v0  ;;  %v6032_v9 = vmul.f32 %v5968_v33, %v12709_v61  ;;  %v6035_v29 = vmul.f32 %v5971_v27, %v12713_v55  ;;  %v4569_v49 = vmul.f32 0.5, %v4505_v8  ;;  %v13772_v33 = vld [vmem:[#allocation105_spill] sm:$0xff] }
 0xa24   : > { %5266 = vmatprep.mubr.bf16.mxu1 %v4666_v17  ;;  %v6036_v63 = vmul.f32 %v5972_v58, %v12718_v48  ;;  %v4629_v3 = vmul.f32 %v4565_v57, %v13770_v14  ;;  %v6330_v7 = vadd.f32 1.0, %v12228_v30  ;;  %v6390_v46 = vmul.f32 0.5, %v6326_v2 }
 0xa25   : > { %v6159_v19 = vadd.f32 %v6095_v18, %v12700_v47  ;;  %v6096_v5 = vmul.f32 0.044715, %v6032_v9  ;;  %v6099_v22 = vmul.f32 0.044715, %v6035_v29  ;;  %v4633_v36 = vmul.f32 %v4569_v49, %v13771_v39  ;;  %v13774_v18 = vld [vmem:[#allocation77_spill] sm:$0xff] }
 0xa26   : > { %v6100_v0 = vmul.f32 0.044715, %v6036_v63  ;;  %v6394_v28 = vmul.f32 0.5, %v6330_v7  ;;  %v6454_v13 = vmul.f32 %v6390_v46, %v13772_v33  ;;  %v12740_v27 = vadd.f32 %v12265_v42, %v12537_v53 }
 0xa27   : > { %v12742_v8 = vpop.eup %9005  ;;  %v6223_v17 = vmul.f32 0.7978846, %v6159_v19  ;;  %v6160_v30 = vadd.f32 %v6096_v5, %v12709_v61  ;;  %v6163_v58 = vadd.f32 %v6099_v22, %v12713_v55  ;;  %v4665_v57 = vpack.c.bf16 %v4633_v36, %v4629_v3 }
 0xa28   : > { %13773 = vst [vmem:[#allocation78_spill] sm:$0xff] %v12740_v27  ;;  %v6164_v39 = vadd.f32 %v6100_v0, %v12718_v48  ;;  %v6458_v9 = vmul.f32 %v6394_v28, %v13774_v18  ;;  %v5975_v29 = vmul.f32 %v12740_v27, %v12740_v27  ;;  %v12754_v42 = vadd.f32 %v12275_v43, %v12550_v37 }
 0xa29   : > { %v12746_v2 = vpop.eup %9007  ;;  %9013 = vtanh.f32 %v6223_v17  ;;  %v6224_v5 = vmul.f32 0.7978846, %v6160_v30  ;;  %v6227_v63 = vmul.f32 0.7978846, %v6163_v58  ;;  %5267 = vmatmul.mubr.bf16.gmra.mrb[124].mxu1 %v4665_v57  ;;  %v12760_v14 = vadd.f32 %v12284_v12, %v12537_v53  ;;  %v8557_v57 = vld [vmem:[#allocation13 + $0x300] ss:$8 sps:$4 sm:$0xff]  }
 0xa2a   : > { %13775 = vst [vmem:[#allocation84_spill] sm:$0xff] %v12754_v42  ;;  %v12756_v49 = vpop.eup %9009  ;;  %v6228_v28 = vmul.f32 0.7978846, %v6164_v39  ;;  %v6518_v7 = vpack.c.bf16 %v6458_v9, %v6454_v13  ;;  %v6039_v46 = vmul.f32 %v5975_v29, %v12740_v27  ;;  %v5976_v43 = vmul.f32 %v12754_v42, %v12754_v42 }
 0xa2b   : > { %13776 = vst [vmem:[#allocation99_spill] sm:$0xff] %v12760_v14  ;;  %v12762_v3 = vpop.eup %9011  ;;  %9015 = vtanh.f32 %v6224_v5  ;;  %v5979_v19 = vmul.f32 %v12760_v14, %v12760_v14  ;;  %v12771_v22 = vadd.f32 %v12289_v26, %v12550_v37  ;;  %v6334_v12 = vadd.f32 1.0, %v12259_v10  ;;  %v8562_v5 = vld [vmem:[#allocation13 + $0x314] ss:$8 sps:$4 sm:$0xff]  }
 0xa2c   : > { %9017 = vtanh.f32 %v6227_v63  ;;  %6965 = vmatprep.mubr.bf16.mxu1 %v6518_v7  ;;  %v6103_v36 = vmul.f32 0.044715, %v6039_v46  ;;  %v6040_v13 = vmul.f32 %v5976_v43, %v12754_v42  ;;  %v6338_v0 = vadd.f32 1.0, %v12295_v62  ;;  %v13779_v62 = vld [vmem:[#allocation142_spill] sm:$0xff]  ;;  %v13781_v46 = vld [vmem:[#allocation113_spill] sm:$0xff] }
 0xa2d   : > { %13777 = vst [vmem:[#allocation22_spill] sm:$0xff] %v12771_v22  ;;  %9019 = vtanh.f32 %v6228_v28  ;;  %v6043_v33 = vmul.f32 %v5979_v19, %v12760_v14  ;;  %v5980_v17 = vmul.f32 %v12771_v22, %v12771_v22  ;;  %v6398_v30 = vmul.f32 0.5, %v6334_v12 }
 0xa2e   : > { %v6167_v58 = vadd.f32 %v6103_v36, %v12740_v27  ;;  %v6104_v26 = vmul.f32 0.044715, %v6040_v13  ;;  %v6402_v39 = vmul.f32 0.5, %v6338_v0  ;;  %v12782_v10 = vadd.f32 %v12311_v1, %v12537_v53  ;;  %v13803_v27 = vld [vmem:[#allocation153_spill] sm:$0xff] }
 0xa2f   : > { %v6107_v18 = vmul.f32 0.044715, %v6043_v33  ;;  %v6044_v9 = vmul.f32 %v5980_v17, %v12771_v22  ;;  %v6462_v29 = vmul.f32 %v6398_v30, %v13779_v62  ;;  %v12788_v63 = vadd.f32 %v12315_v41, %v12550_v37  ;;  %v8560_v30 = vld [vmem:[#allocation13 + $0x310] ss:$8 sps:$4 sm:$0xff]  }
 0xa30   : > { %13778 = vst [vmem:[#allocation139_spill] sm:$0xff] %v12782_v10  ;;  %v6231_v28 = vmul.f32 0.7978846, %v6167_v58  ;;  %v6168_v7 = vadd.f32 %v6104_v26, %v12754_v42  ;;  %v6466_v43 = vmul.f32 %v6402_v39, %v13781_v46  ;;  %v5983_v19 = vmul.f32 %v12782_v10, %v12782_v10 }
 0xa31   : > { %13780 = vst [vmem:[#allocation107_spill] sm:$0xff] %v12788_v63  ;;  %v6171_v1 = vadd.f32 %v6107_v18, %v12760_v14  ;;  %v6108_v12 = vmul.f32 0.044715, %v6044_v9  ;;  %v13782_v36 = vpack.c.bf16 %v12240_v40, %v12235_v4  ;;  %v5984_v13 = vmul.f32 %v12788_v63, %v12788_v63 }
 0xa32   : > { %v12802_v41 = vadd.f32 %v12320_v6, %v12537_v53  ;;  %9021 = vtanh.f32 %v6231_v28  ;;  %v6232_v0 = vmul.f32 0.7978846, %v6168_v7  ;;  %v6522_v33 = vpack.c.bf16 %v6466_v43, %v6462_v29  ;;  %v8565_v6 = vld [vmem:[#allocation13 + $0x324] ss:$8 sps:$4 sm:$0xff]  }
 0xa33   : > { %6966 = vmatmul.mubr.bf16.vlgmr.msra.gmra.mrb[96].mxu1 %v13782_v36  ;;  %v6047_v17 = vmul.f32 %v5983_v19, %v12782_v10  ;;  %v12805_v58 = vpop.eup %9013  ;;  %v6235_v26 = vmul.f32 0.7978846, %v6171_v1  ;;  %v6172_v4 = vadd.f32 %v6108_v12, %v12771_v22  ;;  %v6048_v40 = vmul.f32 %v5984_v13, %v12788_v63  ;;  %v8563_v1 = vld [vmem:[#allocation13 + $0x320] ss:$8 sps:$4 sm:$0xff]   ;;  %v13804_v22 = vld [vmem:[#allocation119_spill] sm:$0xff] }
 0xa34   : > { %13783 = vst [vmem:[#allocation79_spill] sm:$0xff] %v12802_v41  ;;  %7047 = vmatpush1.bf16.msra.mxu1 %v8557_v57  ;;  %v5987_v39 = vmul.f32 %v12802_v41, %v12802_v41  ;;  %9023 = vtanh.f32 %v6232_v0  ;;  %6975 = vmatprep.mubr.bf16.mxu1 %v6522_v33  ;;  %v12813_v57 = vadd.f32 %v12324_v45, %v12550_v37  ;;  %v6333_v9 = vadd.f32 1.0, %v12250_v24  ;;  %v8568_v0 = vld [vmem:[#allocation13 + $0x334] ss:$8 sps:$4 sm:$0xff]  }
 0xa35   : > { %7048 = vmatprep.subr.bf16.mxu1 %v8562_v5  ;;  %v6111_v18 = vmul.f32 0.044715, %v6047_v17  ;;  %v12816_v62 = vpop.eup %9015  ;;  %9025 = vtanh.f32 %v6235_v26  ;;  %v6236_v29 = vmul.f32 0.7978846, %v6172_v4  ;;  %v6112_v5 = vmul.f32 0.044715, %v6048_v40 }
 0xa36   : > { %13784 = vst [vmem:[#allocation23_spill] sm:$0xff] %v12813_v57  ;;  %v6051_v28 = vmul.f32 %v5987_v39, %v12802_v41  ;;  %v12819_v7 = vpop.eup %9017  ;;  %v5988_v43 = vmul.f32 %v12813_v57, %v12813_v57  ;;  %v6337_v45 = vadd.f32 1.0, %v12267_v20  ;;  %v6397_v19 = vmul.f32 0.5, %v6333_v9  ;;  %v13785_v26 = vld [vmem:[#allocation98_spill] sm:$0xff]  ;;  %v13786_v39 = vld [vmem:[#allocation148_spill] sm:$0xff] }
 0xa37   : > { %v6175_v46 = vadd.f32 %v6111_v18, %v12782_v10  ;;  %v12825_v24 = vpop.eup %9019  ;;  %9027 = vtanh.f32 %v6236_v29  ;;  %v6176_v12 = vadd.f32 %v6112_v5, %v12788_v63  ;;  %v6342_v13 = vadd.f32 1.0, %v12326_v16  ;;  %v13787_v5 = vld [vmem:[#allocation111_spill] sm:$0xff]  ;;  %v13788_v16 = vld [vmem:[#allocation133_spill] sm:$0xff] }
 0xa38   : > { %7049 = vmatpush1.bf16.msra.mxu1 %v8560_v30  ;;  %v6115_v36 = vmul.f32 0.044715, %v6051_v28  ;;  %v6052_v17 = vmul.f32 %v5988_v43, %v12813_v57  ;;  %v6401_v30 = vmul.f32 0.5, %v6337_v45  ;;  %v6461_v4 = vmul.f32 %v6397_v19, %v13785_v26  ;;  %v13790_v45 = vld [vmem:[#allocation110_spill] sm:$0xff]  ;;  %v8571_v26 = vld [vmem:[#allocation13 + $0x344] ss:$8 sps:$4 sm:$0xff]  }
 0xa39   : > { %7050 = vmatprep.subr.bf16.mxu1 %v8565_v6  ;;  %v6239_v33 = vmul.f32 0.7978846, %v6175_v46  ;;  %v6240_v40 = vmul.f32 0.7978846, %v6176_v12  ;;  %v6346_v18 = vadd.f32 1.0, %v13786_v39  ;;  %v6406_v9 = vmul.f32 0.5, %v6342_v13 }
 0xa3a   : > { %v6179_v20 = vadd.f32 %v6115_v36, %v12802_v41  ;;  %v6116_v29 = vmul.f32 0.044715, %v6052_v17  ;;  %v6465_v28 = vmul.f32 %v6401_v30, %v13787_v5  ;;  %v12836_v6 = vadd.f32 %v13788_v16, %v12537_v53  ;;  %v8566_v12 = vld [vmem:[#allocation13 + $0x330] ss:$8 sps:$4 sm:$0xff]   ;;  %v13794_v39 = vld [vmem:[#allocation81_spill] sm:$0xff] }
 0xa3b   : > { %9029 = vtanh.f32 %v6239_v33  ;;  %v6410_v43 = vmul.f32 0.5, %v6346_v18  ;;  %v6470_v19 = vmul.f32 %v6406_v9, %v13790_v45  ;;  %v12851_v18 = vadd.f32 %v13794_v39, %v12537_v53  ;;  %v13798_v16 = vld [vmem:[#allocation146_spill] sm:$0xff] }
 0xa3c   : > { %7051 = vmatpush1.bf16.msra.mxu1 %v8563_v1  ;;  %13789 = vst [vmem:[#allocation101_spill] sm:$0xff] %v12836_v6  ;;  %9031 = vtanh.f32 %v6240_v40  ;;  %v6243_v46 = vmul.f32 0.7978846, %v6179_v20  ;;  %v12839_v36 = vpop.eup %9021  ;;  %v6180_v13 = vadd.f32 %v6116_v29, %v12813_v57  ;;  %v6521_v33 = vpack.c.bf16 %v6465_v28, %v6461_v4  ;;  %v13791_v1 = vld [vmem:[#allocation74_spill] sm:$0xff]  ;;  %v13793_v40 = vld [vmem:[#allocation120_spill] sm:$0xff]  ;;  %v13801_v57 = vld [vmem:[#allocation137_spill] sm:$0xff] }
 0xa3d   : > { %7052 = vmatprep.subr.bf16.mxu1 %v8568_v0  ;;  %v5991_v17 = vmul.f32 %v12836_v6, %v12836_v6  ;;  %v12846_v30 = vadd.f32 %v13791_v1, %v12550_v37  ;;  %v6474_v20 = vmul.f32 %v6410_v43, %v13793_v40  ;;  %13795 = vst [vmem:[#allocation125_spill] sm:$0xff] %v12851_v18  ;;  %v13796_v0 = vld [vmem:[#allocation150_spill] sm:$0xff]  ;;  %v6350_v63 = vadd.f32 1.0, %v13801_v57  ;;  %v13806_v57 = vld [vmem:[#allocation69_spill] sm:$0xff] }
 0xa3e   : > { %9033 = vtanh.f32 %v6243_v46  ;;  %v12855_v9 = vadd.f32 %v13796_v0, %v12550_v37  ;;  %v12857_v4 = vpop.eup %9023  ;;  %v6244_v29 = vmul.f32 0.7978846, %v6180_v13  ;;  %6976 = vmatmul.mubr.bf16.gmra.mrb[100].mxu1 %v6521_v33  ;;  %v6341_v46 = vadd.f32 1.0, %v13798_v16  ;;  %v13800_v39 = vld [vmem:[#allocation62_spill] sm:$0xff]  ;;  %v8569_v33 = vld [vmem:[#allocation13 + $0x340] ss:$8 sps:$4 sm:$0xff]  }
 0xa3f   : > { %13792 = vst [vmem:[#allocation117_spill] sm:$0xff] %v12846_v30  ;;  %v6055_v5 = vmul.f32 %v5991_v17, %v12836_v6  ;;  %v5992_v28 = vmul.f32 %v12846_v30, %v12846_v30  ;;  %v12863_v43 = vpop.eup %9025  ;;  %v6526_v45 = vpack.c.bf16 %v6474_v20, %v6470_v19  ;;  %v5995_v1 = vmul.f32 %v12851_v18, %v12851_v18  ;;  %v8574_v16 = vld [vmem:[#allocation13 + $0x354] ss:$8 sps:$4 sm:$0xff]  }
 0xa40   : > { %13797 = vst [vmem:[#allocation85_spill] sm:$0xff] %v12855_v9  ;;  %13799 = vst [vmem:[#allocation82_spill] sm:$0xff] %v12863_v43  ;;  %7053 = vmatpush1.bf16.msra.mxu1 %v8566_v12  ;;  %v5996_v40 = vmul.f32 %v12855_v9, %v12855_v9  ;;  %v6345_v13 = vadd.f32 1.0, %v13800_v39  ;;  %9035 = vtanh.f32 %v6244_v29  ;;  %v6405_v41 = vmul.f32 0.5, %v6341_v46  ;;  %v13802_v29 = vld [vmem:[#allocation115_spill] sm:$0xff] }
 0xa41   : > { %v6119_v17 = vmul.f32 0.044715, %v6055_v5  ;;  %v6056_v0 = vmul.f32 %v5992_v28, %v12846_v30  ;;  %7054 = vmatprep.subr.bf16.mxu1 %v8571_v26  ;;  %v12871_v10 = vpop.eup %9027  ;;  %6985 = vmatprep.mubr.bf16.mxu1 %v6526_v45  ;;  %v6059_v19 = vmul.f32 %v5995_v1, %v12851_v18  ;;  %v6354_v28 = vadd.f32 1.0, %v13803_v27 }
 0xa42   : > { %v6060_v12 = vmul.f32 %v5996_v40, %v12855_v9  ;;  %v6409_v20 = vmul.f32 0.5, %v6345_v13  ;;  %v6469_v5 = vmul.f32 %v6405_v41, %v13802_v29  ;;  %v6414_v43 = vmul.f32 0.5, %v6350_v63 }
 0xa43   : > { %v6183_v39 = vadd.f32 %v6119_v17, %v12836_v6  ;;  %v6120_v14 = vmul.f32 0.044715, %v6056_v0  ;;  %v6123_v46 = vmul.f32 0.044715, %v6059_v19  ;;  %v6418_v13 = vmul.f32 0.5, %v6354_v28 }
 0xa44   : > { %v6124_v26 = vmul.f32 0.044715, %v6060_v12  ;;  %v6473_v42 = vmul.f32 %v6409_v20, %v13804_v22  ;;  %7055 = vmatpush1.bf16.msra.mxu1 %v8569_v33  ;;  %v12885_v17 = vadd.f32 %v13806_v57, %v12537_v53  ;;  %v8572_v0 = vld [vmem:[#allocation13 + $0x350] ss:$8 sps:$4 sm:$0xff]   ;;  %v13809_v33 = vld [vmem:[#allocation124_spill] sm:$0xff] }
 0xa45   : > { %v12880_v45 = vpop.eup %9029  ;;  %v6247_v1 = vmul.f32 0.7978846, %v6183_v39  ;;  %v6184_v40 = vadd.f32 %v6120_v14, %v12846_v30  ;;  %7056 = vmatprep.subr.bf16.mxu1 %v8574_v16  ;;  %v6187_v27 = vadd.f32 %v6123_v46, %v12851_v18  ;;  %v6478_v19 = vmul.f32 %v6414_v43, %v13809_v33  ;;  %v8577_v12 = vld [vmem:[#allocation13 + $0x364] ss:$8 sps:$4 sm:$0xff]   ;;  %v13812_v46 = vld [vmem:[#allocation138_spill] sm:$0xff] }
 0xa46   : > { %13805 = vst [vmem:[#allocation131_spill] sm:$0xff] %v12880_v45  ;;  %13807 = vst [vmem:[#allocation91_spill] sm:$0xff] %v12885_v17  ;;  %v12887_v41 = vpop.eup %9031  ;;  %v6188_v22 = vadd.f32 %v6124_v26, %v12855_v9  ;;  %v6525_v63 = vpack.c.bf16 %v6473_v42, %v6469_v5  ;;  %v13810_v14 = vld [vmem:[#allocation145_spill] sm:$0xff]  ;;  %v5999_v29 = vmul.f32 %v12885_v17, %v12885_v17  ;;  %v13813_v42 = vld [vmem:[#allocation152_spill] sm:$0xff] }
 0xa47   : > { %13808 = vst [vmem:[#allocation103_spill] sm:$0xff] %v12887_v41  ;;  %9037 = vtanh.f32 %v6247_v1  ;;  %v6248_v20 = vmul.f32 0.7978846, %v6184_v40  ;;  %v6482_v39 = vmul.f32 %v6418_v13, %v13810_v14  ;;  %v6251_v16 = vmul.f32 0.7978846, %v6187_v27  ;;  %v13814_v1 = vld [vmem:[#allocation70_spill] sm:$0xff] }
 0xa48   : > { %v12895_v28 = vpop.eup %9033  ;;  %v6252_v57 = vmul.f32 0.7978846, %v6188_v22  ;;  %6986 = vmatmul.mubr.bf16.gmra.mrb[104].mxu1 %v6525_v63  ;;  %v12899_v18 = vadd.f32 %v13812_v46, %v12550_v37  ;;  %v12903_v43 = vadd.f32 %v13813_v42, %v12537_v53  ;;  %v6063_v26 = vmul.f32 %v5999_v29, %v12885_v17  ;;  %v8575_v13 = vld [vmem:[#allocation13 + $0x360] ss:$8 sps:$4 sm:$0xff]   ;;  %v8580_v33 = vld [vmem:[#allocation13 + $0x374] ss:$8 sps:$4 sm:$0xff]  }
 0xa49   : > { %13811 = vst [vmem:[#allocation135_spill] sm:$0xff] %v12895_v28  ;;  %9039 = vtanh.f32 %v6248_v20  ;;  %v6530_v5 = vpack.c.bf16 %v6482_v39, %v6478_v19  ;;  %7057 = vmatpush1.bf16.msra.mxu1 %v8572_v0  ;;  %v12908_v40 = vadd.f32 %v13814_v1, %v12550_v37  ;;  %v13815_v63 = vld [vmem:[#allocation136_spill] sm:$0xff]  ;;  %v13817_v20 = vld [vmem:[#allocation151_spill] sm:$0xff] }
 0xa4a   : > { %9041 = vtanh.f32 %v6251_v16  ;;  %v6000_v27 = vmul.f32 %v12899_v18, %v12899_v18  ;;  %v6003_v22 = vmul.f32 %v12903_v43, %v12903_v43  ;;  %v6349_v53 = vadd.f32 1.0, %v13815_v63  ;;  %7058 = vmatprep.subr.bf16.mxu1 %v8577_v12  ;;  %v12915_v19 = vpop.eup %9035  ;;  %v13818_v46 = vld [vmem:[#allocation68_spill] sm:$0xff] }
 0xa4b   : > { %13816 = vst [vmem:[#allocation116_spill] sm:$0xff] %v12915_v19  ;;  %9043 = vtanh.f32 %v6252_v57  ;;  %6995 = vmatprep.mubr.bf16.mxu1 %v6530_v5  ;;  %v6127_v0 = vmul.f32 0.044715, %v6063_v26  ;;  %v6004_v37 = vmul.f32 %v12908_v40, %v12908_v40  ;;  %v6353_v14 = vadd.f32 1.0, %v13817_v20  ;;  %v13819_v57 = vld [vmem:[#allocation90_spill] sm:$0xff]  ;;  %v13821_v45 = vld [vmem:[#allocation144_spill] sm:$0xff] }
 0xa4c   : > { %v6064_v39 = vmul.f32 %v6000_v27, %v12899_v18  ;;  %v6067_v29 = vmul.f32 %v6003_v22, %v12903_v43  ;;  %v6413_v16 = vmul.f32 0.5, %v6349_v53  ;;  %v6358_v42 = vadd.f32 1.0, %v13818_v46  ;;  %v8578_v26 = vld [vmem:[#allocation13 + $0x370] ss:$8 sps:$4 sm:$0xff]   ;;  %v8583_v6 = vld [vmem:[#allocation13 + $0x384] ss:$8 sps:$4 sm:$0xff]  }
 0xa4d   : > { %v6191_v12 = vadd.f32 %v6127_v0, %v12885_v17  ;;  %v6068_v1 = vmul.f32 %v6004_v37, %v12908_v40  ;;  %v6417_v63 = vmul.f32 0.5, %v6353_v14  ;;  %v6362_v5 = vadd.f32 1.0, %v13819_v57  ;;  %7059 = vmatpush1.bf16.msra.mxu1 %v8575_v13  ;;  %v13820_v20 = vld [vmem:[#allocation122_spill] sm:$0xff]  ;;  %v13822_v14 = vld [vmem:[#allocation147_spill] sm:$0xff] }
 0xa4e   : > { %v6128_v9 = vmul.f32 0.044715, %v6064_v39  ;;  %v6131_v30 = vmul.f32 0.044715, %v6067_v29  ;;  %v6477_v28 = vmul.f32 %v6413_v16, %v13820_v20  ;;  %v6422_v27 = vmul.f32 0.5, %v6358_v42  ;;  %7060 = vmatprep.subr.bf16.mxu1 %v8580_v33  ;;  %v13823_v13 = vld [vmem:[#allocation58_spill] sm:$0xff] }
 0xa4f   : > { %v6255_v22 = vmul.f32 0.7978846, %v6191_v12  ;;  %v6132_v53 = vmul.f32 0.044715, %v6068_v1  ;;  %v6481_v46 = vmul.f32 %v6417_v63, %v13821_v45  ;;  %v6426_v19 = vmul.f32 0.5, %v6362_v5  ;;  %v13824_v33 = vld [vmem:[#allocation57_spill] sm:$0xff] }
 0xa50   : > { %v6192_v0 = vadd.f32 %v6128_v9, %v12899_v18  ;;  %v6195_v37 = vadd.f32 %v6131_v30, %v12903_v43  ;;  %v6486_v57 = vmul.f32 %v6422_v27, %v13822_v14  ;;  %v6357_v17 = vadd.f32 1.0, %v13823_v13  ;;  %v8581_v42 = vld [vmem:[#allocation13 + $0x380] ss:$8 sps:$4 sm:$0xff]   ;;  %v8586_v45 = vld [vmem:[#allocation13 + $0x394] ss:$8 sps:$4 sm:$0xff]  }
 0xa51   : > { %v12932_v41 = vpop.eup %9037  ;;  %9045 = vtanh.f32 %v6255_v22  ;;  %v6196_v39 = vadd.f32 %v6132_v53, %v12908_v40  ;;  %v6529_v29 = vpack.c.bf16 %v6481_v46, %v6477_v28  ;;  %v6490_v16 = vmul.f32 %v6426_v19, %v13824_v33  ;;  %7061 = vmatpush1.bf16.msra.mxu1 %v8578_v26  ;;  %v13825_v9 = vld [vmem:[#allocation67_spill] sm:$0xff]  ;;  %v13826_v26 = vld [vmem:[#allocation65_spill] sm:$0xff] }
 0xa52   : > { %v6256_v12 = vmul.f32 0.7978846, %v6192_v0  ;;  %v6259_v1 = vmul.f32 0.7978846, %v6195_v37  ;;  %v6361_v63 = vadd.f32 1.0, %v13825_v9  ;;  %v6421_v30 = vmul.f32 0.5, %v6357_v17  ;;  %7062 = vmatprep.subr.bf16.mxu1 %v8583_v6 }
 0xa53   : > { %v12937_v5 = vpop.eup %9039  ;;  %v6260_v20 = vmul.f32 0.7978846, %v6196_v39  ;;  %6996 = vmatmul.mubr.bf16.gmra.mrb[108].mxu1 %v6529_v29  ;;  %v6534_v27 = vpack.c.bf16 %v6490_v16, %v6486_v57  ;;  %v6366_v22 = vadd.f32 1.0, %v12486_v60  ;;  %v6370_v28 = vadd.f32 1.0, %v12517_v50  ;;  %v8584_v14 = vld [vmem:[#allocation13 + $0x390] ss:$8 sps:$4 sm:$0xff]  }
 0xa54   : > { %v12941_v53 = vpop.eup %9041  ;;  %9047 = vtanh.f32 %v6256_v12  ;;  %v6425_v19 = vmul.f32 0.5, %v6361_v63  ;;  %v6485_v46 = vmul.f32 %v6421_v30, %v13826_v26  ;;  %v6365_v0 = vadd.f32 1.0, %v12482_v31  ;;  %v13827_v50 = vld [vmem:[#allocation56_spill] sm:$0xff]  ;;  %v13828_v33 = vld [vmem:[#allocation59_spill] sm:$0xff]  ;;  %v13830_v9 = vld [vmem:[#allocation66_spill] sm:$0xff] }
 0xa55   : > { %v12945_v37 = vpop.eup %9043  ;;  %9049 = vtanh.f32 %v6259_v1  ;;  %7005 = vmatprep.mubr.bf16.mxu1 %v6534_v27  ;;  %v6430_v6 = vmul.f32 0.5, %v6366_v22  ;;  %v6434_v17 = vmul.f32 0.5, %v6370_v28  ;;  %7063 = vmatpush1.bf16.msra.mxu1 %v8581_v42  ;;  %v6369_v60 = vadd.f32 1.0, %v12496_v21  ;;  %v8589_v39 = vld [vmem:[#allocation13 + $0x3a4] ss:$8 sps:$4 sm:$0xff]  }
 0xa56   : > { %9051 = vtanh.f32 %v6260_v20  ;;  %v6489_v57 = vmul.f32 %v6425_v19, %v13827_v50  ;;  %7064 = vmatprep.subr.bf16.mxu1 %v8586_v45  ;;  %v6429_v13 = vmul.f32 0.5, %v6365_v0  ;;  %v6374_v29 = vadd.f32 1.0, %v12556_v34  ;;  %v13829_v16 = vld [vmem:[#allocation64_spill] sm:$0xff]  ;;  %v13831_v42 = vld [vmem:[#allocation149_spill] sm:$0xff] }
 0xa57   : > { %v6494_v31 = vmul.f32 %v6430_v6, %v13828_v33  ;;  %v6498_v12 = vmul.f32 %v6434_v17, %v13829_v16  ;;  %v6433_v1 = vmul.f32 0.5, %v6369_v60  ;;  %v6378_v63 = vadd.f32 1.0, %v13830_v9  ;;  %v13832_v21 = vld [vmem:[#allocation96_spill] sm:$0xff]  ;;  %v13833_v45 = vld [vmem:[#allocation61_spill] sm:$0xff]  ;;  %v8592_v60 = vld [vmem:[#allocation13 + $0x3b4] ss:$8 sps:$4 sm:$0xff]  }
 0xa58   : > { %v6533_v30 = vpack.c.bf16 %v6489_v57, %v6485_v46  ;;  %v6493_v27 = vmul.f32 %v6429_v13, %v13831_v42  ;;  %v6438_v22 = vmul.f32 0.5, %v6374_v29  ;;  %v6373_v20 = vadd.f32 1.0, %v13832_v21  ;;  %v8587_v26 = vld [vmem:[#allocation13 + $0x3a0] ss:$8 sps:$4 sm:$0xff]   ;;  %v13838_v9 = vld [vmem:[#allocation75_spill] sm:$0xff] }
 0xa59   : > { %v6538_v28 = vpack.c.bf16 %v6498_v12, %v6494_v31  ;;  %7065 = vmatpush1.bf16.msra.mxu1 %v8584_v14  ;;  %v6497_v19 = vmul.f32 %v6433_v1, %v13833_v45  ;;  %v6442_v0 = vmul.f32 0.5, %v6378_v63  ;;  %v13834_v34 = vld [vmem:[#allocation108_spill] sm:$0xff]  ;;  %v6382_v46 = vadd.f32 1.0, %v12609_v52  ;;  %v13837_v12 = vld [vmem:[#allocation87_spill] sm:$0xff] }
 0xa5a   : > { %v6377_v50 = vadd.f32 1.0, %v13834_v34  ;;  %7066 = vmatprep.subr.bf16.mxu1 %v8589_v39  ;;  %v13835_v6 = vld [vmem:[#allocation88_spill] sm:$0xff]  ;;  %v6437_v33 = vmul.f32 0.5, %v6373_v20  ;;  %v6386_v57 = vadd.f32 1.0, %v12623_v44  ;;  %v6381_v1 = vadd.f32 1.0, %v13837_v12  ;;  %v13844_v12 = vld [vmem:[#allocation71_spill] sm:$0xff] }
 0xa5b   : > { %v6502_v17 = vmul.f32 %v6438_v22, %v13835_v6  ;;  %v12960_v13 = vpop.eup %9045  ;;  %7006 = vmatmul.mubr.bf16.gmra.mrb[112].mxu1 %v6533_v30  ;;  %v6537_v29 = vpack.c.bf16 %v6497_v19, %v6493_v27  ;;  %v13836_v14 = vld [vmem:[#allocation60_spill] sm:$0xff]  ;;  %v6446_v63 = vmul.f32 0.5, %v6382_v46  ;;  %v13839_v22 = vld [vmem:[#allocation141_spill] sm:$0xff]  ;;  %v8590_v44 = vld [vmem:[#allocation13 + $0x3b0] ss:$8 sps:$4 sm:$0xff]   ;;  %v6328_v27 = vadd.f32 1.0, %v12662_v59 }
 0xa5c   : > { %v6506_v31 = vmul.f32 %v6442_v0, %v13836_v14  ;;  %v6441_v16 = vmul.f32 0.5, %v6377_v50  ;;  %7015 = vmatprep.mubr.bf16.mxu1 %v6538_v28  ;;  %v12965_v39 = vmul.f32 %v6437_v33, %v13838_v9  ;;  %v6450_v42 = vmul.f32 0.5, %v6386_v57  ;;  %v13840_v20 = vld [vmem:[#allocation100_spill] sm:$0xff]  ;;  %v13841_v0 = vld [vmem:[#allocation63_spill] sm:$0xff]  ;;  %v13842_v50 = vld [vmem:[#allocation86_spill] sm:$0xff] }
 0xa5d   : > { %v6385_v21 = vadd.f32 1.0, %v13839_v22  ;;  %7067 = vmatpush1.bf16.msra.mxu1 %v8587_v26  ;;  %v6445_v30 = vmul.f32 0.5, %v6381_v1  ;;  %v8595_v28 = vld [vmem:[#allocation13 + $0x3c4] ss:$8 sps:$4 sm:$0xff]   ;;  %v12975_v34 = vmul.f32 %v6446_v63, %v13841_v0  ;;  %v6332_v26 = vadd.f32 1.0, %v12667_v15 }
 0xa5e   : > { %v6542_v52 = vpack.c.bf16 %v6506_v31, %v6502_v17  ;;  %v12969_v45 = vmul.f32 %v6441_v16, %v13840_v20  ;;  %v12972_v19 = vpop.eup %9047  ;;  %7068 = vmatprep.subr.bf16.mxu1 %v8592_v60  ;;  %v12978_v6 = vmul.f32 %v6450_v42, %v13842_v50  ;;  %v13843_v57 = vld [vmem:[#allocation76_spill] sm:$0xff]  ;;  %v6392_v14 = vmul.f32 0.5, %v6328_v27  ;;  %v8598_v20 = vld [vmem:[#allocation13 + $0x3d4] ss:$8 sps:$4 sm:$0xff]  }
 0xa5f   : > { %v6449_v33 = vmul.f32 0.5, %v6385_v21  ;;  %v12981_v17 = vpop.eup %9049  ;;  %v12986_v59 = vmul.f32 %v6445_v30, %v13843_v57  ;;  %v6336_v60 = vadd.f32 1.0, %v12692_v54  ;;  %v6396_v15 = vmul.f32 0.5, %v6332_v26  ;;  %v8593_v63 = vld [vmem:[#allocation13 + $0x3c0] ss:$8 sps:$4 sm:$0xff]  }
 0xa60   : > { %v6541_v46 = vpack.c.bf16 %v12969_v45, %v12965_v39  ;;  %v12989_v31 = vpop.eup %9051  ;;  %v6546_v16 = vpack.c.bf16 %v12978_v6, %v12975_v34  ;;  %v6340_v9 = vadd.f32 1.0, %v12703_v51  ;;  %v13845_v39 = vld [vmem:[#allocation114_spill] sm:$0xff]  ;;  %v6335_v21 = vadd.f32 1.0, %v12683_v25  ;;  %v13846_v30 = vld [vmem:[#allocation72_spill] sm:$0xff] }
 0xa61   : > { %v12994_v1 = vmul.f32 %v6449_v33, %v13844_v12  ;;  %7069 = vmatpush1.bf16.msra.mxu1 %v8590_v44  ;;  %v12998_v42 = vmul.f32 %v6392_v14, %v13845_v39  ;;  %v6400_v22 = vmul.f32 0.5, %v6336_v60  ;;  %v6339_v54 = vadd.f32 1.0, %v12696_v23 }
 0xa62   : > { %7070 = vmatprep.subr.bf16.mxu1 %v8595_v28  ;;  %v13005_v27 = vmul.f32 %v6396_v15, %v13846_v30  ;;  %v6404_v0 = vmul.f32 0.5, %v6340_v9  ;;  %v6344_v51 = vadd.f32 1.0, %v12746_v2  ;;  %v6399_v34 = vmul.f32 0.5, %v6335_v21  ;;  %v8596_v2 = vld [vmem:[#allocation13 + $0x3d0] ss:$8 sps:$4 sm:$0xff]  }
 0xa63   : > { %v6545_v45 = vpack.c.bf16 %v12994_v1, %v12986_v59  ;;  %7016 = vmatmul.mubr.bf16.gmra.mrb[116].mxu1 %v6537_v29  ;;  %v13009_v44 = vmul.f32 %v6400_v22, %v12602_v32  ;;  %v6403_v50 = vmul.f32 0.5, %v6339_v54  ;;  %v6348_v25 = vadd.f32 1.0, %v12762_v3  ;;  %v13847_v29 = vld [vmem:[#allocation80_spill] sm:$0xff]  ;;  %v13848_v9 = vld [vmem:[#allocation102_spill] sm:$0xff]  ;;  %v13849_v54 = vld [vmem:[#allocation109_spill] sm:$0xff] }
 0xa64   : > { %7025 = vmatprep.mubr.bf16.mxu1 %v6542_v52  ;;  %v6520_v23 = vpack.c.bf16 %v13005_v27, %v12998_v42  ;;  %v13015_v28 = vmul.f32 %v6404_v0, %v12621_v35  ;;  %v6408_v6 = vmul.f32 0.5, %v6344_v51  ;;  %v6343_v33 = vadd.f32 1.0, %v12742_v8  ;;  %v8601_v52 = vld [vmem:[#allocation13 + $0x3e4] ss:$8 sps:$4 sm:$0xff]   ;;  %v8599_v21 = vld [vmem:[#allocation13 + $0x3e0] ss:$8 sps:$4 sm:$0xff]  }
 0xa65   : > { %7071 = vmatpush1.bf16.msra.mxu1 %v8593_v63  ;;  %v13019_v26 = vmul.f32 %v6399_v34, %v13847_v29  ;;  %v13022_v32 = vmul.f32 %v6403_v50, %v12607_v11  ;;  %v6412_v57 = vmul.f32 0.5, %v6348_v25  ;;  %v6347_v3 = vadd.f32 1.0, %v12756_v49  ;;  %v13864_v59 = vld [vmem:[#allocation85_spill] sm:$0xff] }
 0xa66   : > { %7072 = vmatprep.subr.bf16.mxu1 %v8598_v20  ;;  %v6524_v35 = vpack.c.bf16 %v13015_v28, %v13009_v44  ;;  %v13028_v14 = vmul.f32 %v6408_v6, %v12648_v56  ;;  %v6407_v8 = vmul.f32 0.5, %v6343_v33  ;;  %v6352_v60 = vadd.f32 1.0, %v12816_v62  ;;  %v13865_v42 = vld [vmem:[#allocation101_spill] sm:$0xff]  ;;  %v13873_v44 = vld [vmem:[#allocation20_spill] sm:$0xff] }
 0xa67   : > { %v6523_v12 = vpack.c.bf16 %v13022_v32, %v13019_v26  ;;  %v13034_v11 = vmul.f32 %v6412_v57, %v12660_v38  ;;  %v6411_v15 = vmul.f32 0.5, %v6347_v3  ;;  %v6356_v49 = vadd.f32 1.0, %v12825_v24  ;;  %v8604_v24 = vld [vmem:[#allocation13 + $0x3f4] ss:$8 sps:$4 sm:$0xff]   ;;  %v13874_v26 = vld [vmem:[#allocation24_spill] sm:$0xff] }
 0xa68   : > { %v13038_v63 = vmul.f32 %v6407_v8, %v13848_v9  ;;  %v6416_v39 = vmul.f32 0.5, %v6352_v60  ;;  %v6351_v22 = vadd.f32 1.0, %v12805_v58  ;;  %v6355_v56 = vadd.f32 1.0, %v12819_v7  ;;  %v13854_v60 = vld [vmem:[#allocation116_spill] sm:$0xff] }
 0xa69   : > { %7073 = vmatpush1.bf16.msra.mxu1 %v8596_v2  ;;  %v6528_v62 = vpack.c.bf16 %v13034_v11, %v13028_v14  ;;  %v13045_v20 = vmul.f32 %v6411_v15, %v13849_v54  ;;  %v6420_v38 = vmul.f32 0.5, %v6356_v49  ;;  %v6360_v30 = vadd.f32 1.0, %v12857_v4  ;;  %v13850_v2 = vld [vmem:[#allocation82_spill] sm:$0xff]  ;;  %v13875_v14 = vld [vmem:[#allocation25_spill] sm:$0xff] }
 0xa6a   : > { %7074 = vmatprep.subr.bf16.mxu1 %v8601_v52  ;;  %v13049_v0 = vmul.f32 %v6416_v39, %v12709_v61  ;;  %v6415_v51 = vmul.f32 0.5, %v6351_v22  ;;  %v6419_v58 = vmul.f32 0.5, %v6355_v56  ;;  %v6364_v7 = vadd.f32 1.0, %v12871_v10  ;;  %v13852_v52 = vld [vmem:[#allocation103_spill] sm:$0xff]  ;;  %v13855_v49 = vld [vmem:[#allocation78_spill] sm:$0xff] }
 0xa6b   : > { %7026 = vmatmul.mubr.bf16.gmra.mrb[120].mxu1 %v6541_v46  ;;  %v6527_v34 = vpack.c.bf16 %v13045_v20, %v13038_v63  ;;  %v13055_v50 = vmul.f32 %v6420_v38, %v12718_v48  ;;  %v6424_v25 = vmul.f32 0.5, %v6360_v30  ;;  %v6359_v6 = vadd.f32 1.0, %v12839_v36  ;;  %v8602_v46 = vld [vmem:[#allocation13 + $0x3f0] ss:$8 sps:$4 sm:$0xff]   ;;  %v13851_v48 = vld [vmem:[#allocation84_spill] sm:$0xff] }
 0xa6c   : > { %7035 = vmatprep.mubr.bf16.mxu1 %v6546_v16  ;;  %v13059_v4 = vmul.f32 %v6415_v51, %v12700_v47  ;;  %v13062_v61 = vmul.f32 %v6419_v58, %v12713_v55  ;;  %v6428_v33 = vmul.f32 0.5, %v6364_v7  ;;  %v6363_v10 = vadd.f32 1.0, %v13850_v2  ;;  %v13853_v16 = vld [vmem:[#allocation22_spill] sm:$0xff]  ;;  %v13856_v22 = vld [vmem:[#allocation131_spill] sm:$0xff] }
 0xa6d   : > { %7075 = vmatpush1.bf16.msra.mxu1 %v8599_v21  ;;  %v6532_v29 = vpack.c.bf16 %v13055_v50, %v13049_v0  ;;  %v6488_v57 = vmul.f32 %v6424_v25, %v13851_v48  ;;  %v6423_v3 = vmul.f32 0.5, %v6359_v6  ;;  %v6368_v36 = vadd.f32 1.0, %v13852_v52  ;;  %v13857_v21 = vld [vmem:[#allocation135_spill] sm:$0xff] }
 0xa6e   : > { %7076 = vmatprep.subr.bf16.mxu1 %v8604_v24  ;;  %v6531_v47 = vpack.c.bf16 %v13062_v61, %v13059_v4  ;;  %v6492_v55 = vmul.f32 %v6428_v33, %v13853_v16  ;;  %v6427_v8 = vmul.f32 0.5, %v6363_v10  ;;  %v6372_v15 = vadd.f32 1.0, %v13854_v60  ;;  %v13858_v30 = vld [vmem:[#allocation99_spill] sm:$0xff] }
 0xa6f   : > { %v6487_v9 = vmul.f32 %v6423_v3, %v13855_v49  ;;  %v6432_v39 = vmul.f32 0.5, %v6368_v36  ;;  %v6367_v56 = vadd.f32 1.0, %v13856_v22  ;;  %v6371_v54 = vadd.f32 1.0, %v13857_v21  ;;  %v13859_v58 = vld [vmem:[#allocation107_spill] sm:$0xff]  ;;  %v13863_v36 = vld [vmem:[#allocation117_spill] sm:$0xff] }
 0xa70   : > { %v6536_v38 = vpack.c.bf16 %v6492_v55, %v6488_v57  ;;  %v6491_v0 = vmul.f32 %v6427_v8, %v13858_v30  ;;  %v6436_v51 = vmul.f32 0.5, %v6372_v15  ;;  %v6376_v24 = vadd.f32 1.0, %v12937_v5  ;;  %v13860_v61 = vld [vmem:[#allocation23_spill] sm:$0xff] }
 0xa71   : > { %7077 = vmatpush1.bf16.msra.mxu1 %v8602_v46  ;;  %v6496_v7 = vmul.f32 %v6432_v39, %v13859_v58  ;;  %v6431_v50 = vmul.f32 0.5, %v6367_v56  ;;  %v6435_v25 = vmul.f32 0.5, %v6371_v54  ;;  %v6380_v6 = vadd.f32 1.0, %v12945_v37  ;;  %v13861_v48 = vld [vmem:[#allocation139_spill] sm:$0xff] }
 0xa72   : > { %v6535_v4 = vpack.c.bf16 %v6491_v0, %v6487_v9  ;;  %v6500_v33 = vmul.f32 %v6436_v51, %v13860_v61  ;;  %v6440_v2 = vmul.f32 0.5, %v6376_v24  ;;  %v6375_v10 = vadd.f32 1.0, %v12932_v41  ;;  %v13862_v5 = vld [vmem:[#allocation79_spill] sm:$0xff] }
 0xa73   : > { %7036 = vmatmul.mubr.bf16.gmra.mrb[124].mxu1 %v6545_v45  ;;  %v6495_v57 = vmul.f32 %v6431_v50, %v13861_v48  ;;  %v6499_v46 = vmul.f32 %v6435_v25, %v13862_v5  ;;  %v6444_v3 = vmul.f32 0.5, %v6380_v6  ;;  %v6379_v52 = vadd.f32 1.0, %v12941_v53  ;;  %v13867_v0 = vld [vmem:[#allocation91_spill] sm:$0xff]  ;;  %v13880_v5 = vld [vmem:[#allocation30_spill] sm:$0xff] }
 0xa74   : > { %7078 = vmatprep.mubr.bf16.mxu1 %v6520_v23  ;;  %v6540_v37 = vpack.c.bf16 %v6500_v33, %v6496_v7  ;;  %v6504_v16 = vmul.f32 %v6440_v2, %v13863_v36  ;;  %v6439_v55 = vmul.f32 0.5, %v6375_v10  ;;  %v6384_v41 = vadd.f32 1.0, %v12972_v19  ;;  %v13866_v23 = vld [vmem:[#allocation125_spill] sm:$0xff]  ;;  %v13869_v24 = vld [vmem:[#allocation123_spill] sm:$0xff] }
 0xa75   : > { %v6539_v8 = vpack.c.bf16 %v6499_v46, %v6495_v57  ;;  %v6508_v1 = vmul.f32 %v6444_v3, %v13864_v59  ;;  %v6443_v45 = vmul.f32 0.5, %v6379_v52  ;;  %v6388_v60 = vadd.f32 1.0, %v12989_v31  ;;  %v13879_v2 = vld [vmem:[#allocation29_spill] sm:$0xff] }
 0xa76   : > { %v6448_v15 = vmul.f32 0.5, %v6384_v41  ;;  %v6383_v49 = vadd.f32 1.0, %v12960_v13  ;;  %v6387_v53 = vadd.f32 1.0, %v12981_v17  ;;  %v6503_v27 = vmul.f32 %v6439_v55, %v13865_v42  ;;  %v13868_v13 = vld [vmem:[#allocation126_spill] sm:$0xff] }
 0xa77   : > { %v6544_v9 = vpack.c.bf16 %v6508_v1, %v6504_v16  ;;  %v6507_v39 = vmul.f32 %v6443_v45, %v13866_v23  ;;  %v6452_v22 = vmul.f32 0.5, %v6388_v60  ;;  %v13870_v17 = vpack.c.bf16 %v13868_v13, %v13869_v24  ;;  %v13883_v45 = vld [vmem:[#allocation33_spill] sm:$0xff]  ;;  %v13885_v23 = vld [vmem:[#allocation35_spill] sm:$0xff]  ;;  %v13888_v24 = vld [vmem:[#allocation38_spill] sm:$0xff] }
 0xa78   : > { %v6447_v56 = vmul.f32 0.5, %v6383_v49  ;;  %v6451_v21 = vmul.f32 0.5, %v6387_v53  ;;  %v6512_v54 = vmul.f32 %v6448_v15, %v12899_v18  ;;  %v3383_v18 = vld [vmem:[%s13871_s22] sm:$0x3]  ;;  %v13884_v53 = vld [vmem:[#allocation34_spill] sm:$0xff] }
 0xa79   : > { %v6543_v19 = vpack.c.bf16 %v6507_v39, %v6503_v27  ;;  %v6516_v30 = vmul.f32 %v6452_v22, %v12908_v40  ;;  %v13125_v28 = vrot.slane %v3383_v18, %v13873_v44 }
 0xa7a   : > { %v6511_v31 = vmul.f32 %v6447_v56, %v13867_v0  ;;  %v6515_v51 = vmul.f32 %v6451_v21, %v12903_v43  ;;  %v13872_v43 = vld [vmem:[#allocation21_spill] sm:$0xff] }
 0xa7b   : > { %7079 = vmatmul.mubr.bf16.vlgmr.msra.gmra.mrb[96].mxu1 %v13870_v17  ;;  %v6548_v58 = vpack.c.bf16 %v6516_v30, %v6512_v54  ;;  %v13122_v40 = vrot.slane %v3383_v18, %v13872_v43  ;;  %v3400_v10 = vadd.f32 %v13125_v28, %v13879_v2  ;;  %v3404_v60 = vadd.f32 %v13125_v28, %v13883_v45  ;;  %v13887_v0 = vld [vmem:[#allocation37_spill] sm:$0xff]  ;;  %v13889_v18 = vld [vmem:[#allocation39_spill] sm:$0xff] }
 0xa7c   : > { %7088 = vmatprep.mubr.bf16.mxu1 %v6524_v35  ;;  %v6547_v7 = vpack.c.bf16 %v6515_v51, %v6511_v31  ;;  %v3406_v39 = vadd.f32 %v13125_v28, %v13885_v23  ;;  %v3408_v31 = vadd.f32 %v13125_v28, %v13887_v0  ;;  %v3410_v43 = vadd.f32 %v13125_v28, %v13889_v18 }
 0xa7d   : > { %v3395_v32 = vadd.f32 %v13122_v40, %v13874_v26  ;;  %v3401_v46 = vadd.f32 %v13122_v40, %v13880_v5  ;;  %v3409_v17 = vadd.f32 %v13122_v40, %v13888_v24 }
 0xa83   : > { %7089 = vmatmul.mubr.bf16.gmra.mrb[100].mxu1 %v6523_v12  ;;  %v3396_v12 = vadd.f32 %v13125_v28, %v13875_v14 }
 0xa84   : > { %7098 = vmatprep.mubr.bf16.mxu1 %v6528_v62  ;;  %v13876_v62 = vld [vmem:[#allocation26_spill] sm:$0xff] }
 0xa85   : > { %v3397_v20 = vadd.f32 %v13122_v40, %v13876_v62 }
 0xa8b   : > { %7099 = vmatmul.mubr.bf16.gmra.mrb[104].mxu1 %v6527_v34 }
 0xa8c   : > { %7108 = vmatprep.mubr.bf16.mxu1 %v6532_v29 }
 0xa93   : > { %7109 = vmatmul.mubr.bf16.gmra.mrb[108].mxu1 %v6531_v47  ;;  %v13877_v47 = vld [vmem:[#allocation27_spill] sm:$0xff] }
 0xa94   : > { %7118 = vmatprep.mubr.bf16.mxu1 %v6536_v38  ;;  %v3398_v38 = vadd.f32 %v13125_v28, %v13877_v47 }
 0xa9b   : > { %7119 = vmatmul.mubr.bf16.gmra.mrb[112].mxu1 %v6535_v4  ;;  %v13878_v4 = vld [vmem:[#allocation28_spill] sm:$0xff] }
 0xa9c   : > { %7128 = vmatprep.mubr.bf16.mxu1 %v6540_v37  ;;  %v3399_v61 = vadd.f32 %v13122_v40, %v13878_v4  ;;  %v13881_v37 = vld [vmem:[#allocation31_spill] sm:$0xff] }
 0xa9d   : > { %v3402_v36 = vadd.f32 %v13125_v28, %v13881_v37 }
 0xaa3   : > { %7129 = vmatmul.mubr.bf16.gmra.mrb[116].mxu1 %v6539_v8  ;;  %v13882_v8 = vld [vmem:[#allocation32_spill] sm:$0xff] }
 0xaa4   : > { %7138 = vmatprep.mubr.bf16.mxu1 %v6544_v9  ;;  %v3403_v59 = vadd.f32 %v13122_v40, %v13882_v8  ;;  %v3405_v9 = vadd.f32 %v13122_v40, %v13884_v53 }
 0xaab   : > { %7139 = vmatmul.mubr.bf16.gmra.mrb[120].mxu1 %v6543_v19  ;;  %v13886_v19 = vld [vmem:[#allocation36_spill] sm:$0xff] }
 0xaac   : > { %7148 = vmatprep.mubr.bf16.mxu1 %v6548_v58  ;;  %v3407_v54 = vadd.f32 %v13122_v40, %v13886_v19 }
 0xab3   : > { %7149 = vmatmul.mubr.bf16.gmra.mrb[124].mxu1 %v6547_v7 }
 0xb4e   : > { %v7080_v35 = vpop.f32.mrb[96].mxu1 }
 0xb4f   : > { %v7976_v11 = vadd.f32 %v7080_v35, %v3395_v32  ;;  %v7082_v63 = vpop.f32.mrb[97].mxu1  ;;  %v13890_v35 = vld [vmem:[#allocation40_spill] sm:$0xff] }
 0xb50   : > { %v7977_v34 = vadd.f32 %v7082_v63, %v3396_v12  ;;  %v7084_v29 = vpop.f32.mrb[98].mxu1  ;;  %v3411_v14 = vadd.f32 %v13122_v40, %v13890_v35 }
 0xb51   : > { %7191 = vst [vmem:[%s13137_s29] sm:$0xff] %v7976_v11  ;;  %v7978_v50 = vadd.f32 %v7084_v29, %v3397_v20  ;;  %v7086_v25 = vpop.f32.mrb[99].mxu1  ;;  %v13891_v11 = vld [vmem:[#allocation41_spill] sm:$0xff] }
 0xb52   : > { %7192 = vst [vmem:[%s13137_s29 + $0x8] sm:$0xff] %v7977_v34  ;;  %v7979_v6 = vadd.f32 %v7086_v25, %v3398_v38  ;;  %v3412_v63 = vadd.f32 %v13125_v28, %v13891_v11  ;;  %v13892_v34 = vld [vmem:[#allocation42_spill] sm:$0xff] }
 0xb53   : > { %7193 = vst [vmem:[%s13137_s29 + $0x10] sm:$0xff] %v7978_v50  ;;  %v3413_v29 = vadd.f32 %v13122_v40, %v13892_v34  ;;  %v13893_v50 = vld [vmem:[#allocation43_spill] sm:$0xff] }
 0xb54   : > { %7194 = vst [vmem:[%s13137_s29 + $0x18] sm:$0xff] %v7979_v6  ;;  %v3414_v25 = vadd.f32 %v13125_v28, %v13893_v50 }
 0xb56   : > { %v7090_v33 = vpop.f32.mrb[100].mxu1 }
 0xb57   : > { %v7980_v48 = vadd.f32 %v7090_v33, %v3399_v61  ;;  %v7092_v57 = vpop.f32.mrb[101].mxu1  ;;  %v13894_v33 = vld [vmem:[#allocation44_spill] sm:$0xff] }
 0xb58   : > { %v7981_v3 = vadd.f32 %v7092_v57, %v3400_v10  ;;  %v7094_v52 = vpop.f32.mrb[102].mxu1  ;;  %v3415_v2 = vadd.f32 %v13122_v40, %v13894_v33 }
 0xb59   : > { %7195 = vst [vmem:[%s13137_s29 + $0x20] sm:$0xff] %v7980_v48  ;;  %v7982_v16 = vadd.f32 %v7094_v52, %v3401_v46  ;;  %v7096_v55 = vpop.f32.mrb[103].mxu1  ;;  %v13895_v48 = vld [vmem:[#allocation45_spill] sm:$0xff] }
 0xb5a   : > { %7196 = vst [vmem:[%s13137_s29 + $0x28] sm:$0xff] %v7981_v3  ;;  %v7983_v41 = vadd.f32 %v7096_v55, %v3402_v36  ;;  %v3416_v57 = vadd.f32 %v13125_v28, %v13895_v48  ;;  %v13896_v3 = vld [vmem:[#allocation46_spill] sm:$0xff] }
 0xb5b   : > { %7197 = vst [vmem:[%s13137_s29 + $0x30] sm:$0xff] %v7982_v16  ;;  %v3417_v52 = vadd.f32 %v13122_v40, %v13896_v3  ;;  %v13897_v16 = vld [vmem:[#allocation47_spill] sm:$0xff] }
 0xb5c   : > { %7198 = vst [vmem:[%s13137_s29 + $0x38] sm:$0xff] %v7983_v41  ;;  %v3418_v55 = vadd.f32 %v13125_v28, %v13897_v16 }
 0xb5e   : > { %v7100_v1 = vpop.f32.mrb[104].mxu1 }
 0xb5f   : > { %v7984_v15 = vadd.f32 %v7100_v1, %v3403_v59  ;;  %v7102_v49 = vpop.f32.mrb[105].mxu1  ;;  %v13898_v1 = vld [vmem:[#allocation48_spill] sm:$0xff] }
 0xb60   : > { %v7985_v42 = vadd.f32 %v7102_v49, %v3404_v60  ;;  %v7104_v27 = vpop.f32.mrb[106].mxu1  ;;  %v3419_v45 = vadd.f32 %v13122_v40, %v13898_v1 }
 0xb61   : > { %7199 = vst [vmem:[%s13137_s29 + $0x40] sm:$0xff] %v7984_v15  ;;  %v7986_v22 = vadd.f32 %v7104_v27, %v3405_v9  ;;  %v7106_v56 = vpop.f32.mrb[107].mxu1  ;;  %v13899_v15 = vld [vmem:[#allocation49_spill] sm:$0xff] }
 0xb62   : > { %7200 = vst [vmem:[%s13137_s29 + $0x48] sm:$0xff] %v7985_v42  ;;  %v7987_v21 = vadd.f32 %v7106_v56, %v3406_v39  ;;  %v3420_v49 = vadd.f32 %v13125_v28, %v13899_v15  ;;  %v13900_v42 = vld [vmem:[#allocation50_spill] sm:$0xff] }
 0xb63   : > { %7201 = vst [vmem:[%s13137_s29 + $0x50] sm:$0xff] %v7986_v22  ;;  %v3421_v27 = vadd.f32 %v13122_v40, %v13900_v42  ;;  %v13901_v22 = vld [vmem:[#allocation51_spill] sm:$0xff] }
 0xb64   : > { %7202 = vst [vmem:[%s13137_s29 + $0x58] sm:$0xff] %v7987_v21  ;;  %v3422_v56 = vadd.f32 %v13125_v28, %v13901_v22 }
 0xb66   : > { %v7110_v30 = vpop.f32.mrb[108].mxu1 }
 0xb67   : > { %v7988_v51 = vadd.f32 %v7110_v30, %v3407_v54  ;;  %v7112_v13 = vpop.f32.mrb[109].mxu1  ;;  %v13902_v30 = vld [vmem:[#allocation52_spill] sm:$0xff] }
 0xb68   : > { %v7989_v58 = vadd.f32 %v7112_v13, %v3408_v31  ;;  %v7114_v7 = vpop.f32.mrb[110].mxu1  ;;  %v3423_v0 = vadd.f32 %v13122_v40, %v13902_v30 }
 0xb69   : > { %7203 = vst [vmem:[%s13137_s29 + $0x60] sm:$0xff] %v7988_v51  ;;  %v7990_v44 = vadd.f32 %v7114_v7, %v3409_v17  ;;  %v7116_v26 = vpop.f32.mrb[111].mxu1  ;;  %v13903_v51 = vld [vmem:[#allocation53_spill] sm:$0xff] }
 0xb6a   : > { %7204 = vst [vmem:[%s13137_s29 + $0x68] sm:$0xff] %v7989_v58  ;;  %v7991_v32 = vadd.f32 %v7116_v26, %v3410_v43  ;;  %v3424_v13 = vadd.f32 %v13125_v28, %v13903_v51  ;;  %v13904_v58 = vld [vmem:[#allocation54_spill] sm:$0xff] }
 0xb6b   : > { %7205 = vst [vmem:[%s13137_s29 + $0x70] sm:$0xff] %v7990_v44  ;;  %v3425_v7 = vadd.f32 %v13122_v40, %v13904_v58  ;;  %v13905_v44 = vld [vmem:[#allocation55_spill] sm:$0xff] }
 0xb6c   : > { %7206 = vst [vmem:[%s13137_s29 + $0x78] sm:$0xff] %v7991_v32  ;;  %v3426_v26 = vadd.f32 %v13125_v28, %v13905_v44 }
 0xb6e   : > { %v7120_v12 = vpop.f32.mrb[112].mxu1 }
 0xb6f   : > { %v7992_v62 = vadd.f32 %v7120_v12, %v3411_v14  ;;  %v7122_v20 = vpop.f32.mrb[113].mxu1 }
 0xb70   : > { %v7993_v47 = vadd.f32 %v7122_v20, %v3412_v63  ;;  %v7124_v38 = vpop.f32.mrb[114].mxu1 }
 0xb71   : > { %7207 = vst [vmem:[%s13137_s29 + $0x80] sm:$0xff] %v7992_v62  ;;  %v7994_v6 = vadd.f32 %v7124_v38, %v3413_v29  ;;  %v7126_v4 = vpop.f32.mrb[115].mxu1 }
 0xb72   : > { %7208 = vst [vmem:[%s13137_s29 + $0x88] sm:$0xff] %v7993_v47  ;;  %v7995_v61 = vadd.f32 %v7126_v4, %v3414_v25 }
 0xb73   : > { %7209 = vst [vmem:[%s13137_s29 + $0x90] sm:$0xff] %v7994_v6 }
 0xb74   : > { %7210 = vst [vmem:[%s13137_s29 + $0x98] sm:$0xff] %v7995_v61 }
 0xb76   : > { %v7130_v10 = vpop.f32.mrb[116].mxu1 }
 0xb77   : > { %v7996_v5 = vadd.f32 %v7130_v10, %v3415_v2  ;;  %v7132_v46 = vpop.f32.mrb[117].mxu1 }
 0xb78   : > { %v7997_v37 = vadd.f32 %v7132_v46, %v3416_v57  ;;  %v7134_v36 = vpop.f32.mrb[118].mxu1 }
 0xb79   : > { %7211 = vst [vmem:[%s13137_s29 + $0xa0] sm:$0xff] %v7996_v5  ;;  %v7998_v41 = vadd.f32 %v7134_v36, %v3417_v52  ;;  %v7136_v8 = vpop.f32.mrb[119].mxu1 }
 0xb7a   : > { %7212 = vst [vmem:[%s13137_s29 + $0xa8] sm:$0xff] %v7997_v37  ;;  %v7999_v59 = vadd.f32 %v7136_v8, %v3418_v55 }
 0xb7b   : > { %7213 = vst [vmem:[%s13137_s29 + $0xb0] sm:$0xff] %v7998_v41 }
 0xb7c   : > { %7214 = vst [vmem:[%s13137_s29 + $0xb8] sm:$0xff] %v7999_v59 }
 0xb7e   : > { %v7140_v60 = vpop.f32.mrb[120].mxu1 }
 0xb7f   : > { %v8000_v53 = vadd.f32 %v7140_v60, %v3419_v45  ;;  %v7142_v9 = vpop.f32.mrb[121].mxu1 }
 0xb80   : > { %v8001_v23 = vadd.f32 %v7142_v9, %v3420_v49  ;;  %v7144_v39 = vpop.f32.mrb[122].mxu1 }
 0xb81   : > { %7215 = vst [vmem:[%s13137_s29 + $0xc0] sm:$0xff] %v8000_v53  ;;  %v8002_v21 = vadd.f32 %v7144_v39, %v3421_v27  ;;  %v7146_v19 = vpop.f32.mrb[123].mxu1 }
 0xb82   : > { %7216 = vst [vmem:[%s13137_s29 + $0xc8] sm:$0xff] %v8001_v23  ;;  %v8003_v54 = vadd.f32 %v7146_v19, %v3422_v56 }
 0xb83   : > { %7217 = vst [vmem:[%s13137_s29 + $0xd0] sm:$0xff] %v8002_v21 }
 0xb84   : > { %7218 = vst [vmem:[%s13137_s29 + $0xd8] sm:$0xff] %v8003_v54 }
 0xb86   : > { %v7150_v31 = vpop.f32.mrb[124].mxu1 }
 0xb87   : > { %v8004_v24 = vadd.f32 %v7150_v31, %v3423_v0  ;;  %v7152_v17 = vpop.f32.mrb[125].mxu1 }
 0xb88   : > { %v8005_v18 = vadd.f32 %v7152_v17, %v3424_v13  ;;  %v7154_v43 = vpop.f32.mrb[126].mxu1 }
 0xb89   : > { %7219 = vst [vmem:[%s13137_s29 + $0xe0] sm:$0xff] %v8004_v24  ;;  %v8006_v32 = vadd.f32 %v7154_v43, %v3425_v7  ;;  %v7156_v35 = vpop.f32.mrb[127].mxu1 }
 0xb8a   : > { %7220 = vst [vmem:[%s13137_s29 + $0xe8] sm:$0xff] %v8005_v18  ;;  %v8007_v40 = vadd.f32 %v7156_v35, %v3426_v26 }
 0xb8b   : > { %7221 = vst [vmem:[%s13137_s29 + $0xf0] sm:$0xff] %v8006_v32 }
 0xb8c   : > { %7222 = vst [vmem:[%s13137_s29 + $0xf8] sm:$0xff] %v8007_v40 }
 0xb8d   : > { %9297 = shalt.err (!%p9294_p8)
}
 0xb8e   : > { %s9298_s16 = scalar_lea.hbm %s13229_s10, 4096  ;;  %s9302_s1 = scalar_lea.hbm %s13906_s14, 8192 }
 0xb8f   : > { %p9299_p13 = scmp.ne.s32.totalorder %s13229_s10, %s9298_s16  ;;  %p9303_p9 = scmp.lt.u32.totalorder %s13229_s10, %s13906_s14 }
 0xb90   : > { %p9304_p10 = scmp.lt.u32.totalorder %s9302_s1, %s9298_s16  ;;  %p9306_p6 = scmp.lt.u32.totalorder %s9298_s16, %s13229_s10 }
 0xb91   : > { %p9300_p0 = pnand %p9299_p13, %p13907_p12 }
 0xb92   : > { %p9305_p11 = por %p9304_p10, %p9303_p9 }
 0xb93   : > { %p9301_p2 = pneg %p9300_p0 }
 0xb94   : > { %p9307_p5 = por %p9306_p6, %p9305_p11 }
 0xb96   : > { %p9308_p7 = pnand %p9307_p5, %p9301_p2 }
 0xb98   : > { %9311 = shalt.err (!%p9308_p7)
}
 0xb99   : > { %s9380_s13 = smov 256   ;;  %s9381_s24 = smov 16  }
 0xb9a   : > { %8130 = dma.vmem_to_hbm [thread:$0]  (%p13907_p12), %s13231_s17, 4096, %s13229_s10, %s7224_s15, %s9380_s13, %s9380_s13, %s9381_s24  }
 0xb9b PF: > { %s7253_s23 = sand.u32 1, %s9350_s25   ;;  %p13908_p4 = scmp.ne.s32.totalorder %s13446_s7, 0 }
 0xb9c   : > { %p13909_p1 = scmp.ge.s32.totalorder %s9362_s28, 2  ;;  %s7254_s19 = scalar_lea.sflag [#allocation4], %s7253_s23 }
 0xb9e   : > { %p8156_p3 = pnand %p13909_p1, %p13908_p4 }
 0xba0   : > { %9345 = dma.done.wait (!%p8156_p3), %s7254_s19, 4096  }
 0xba1   : > { %9347 = vsyncadd (!%p8156_p3), %s7254_s19, 4294963200  ;;  %p29_p8 = scmp.ge.s32.totalorder %s9621_s18, 4   ;;  %s13910_s25 = smov %s9354_s26 }
 0xba2   : > { %s13911_s26 = smov %s9358_s27  ;;  %s13912_s27 = smov %s9632_s20 }
 0xba3   : > { %s13913_s28 = smov %s9621_s18  ;;  %31 = sbr.rel (!%p29_p8) target bundleno = 16 (0x10), region = 141 }
 0xbaa   :  { %7259 = vsyncpa [#allocation3], 1 }
 0xbab   :  { %7261 = vsyncpa [#allocation3 + $0x1], 1 }
 0xbac   :  { %7262 = vsyncpa [#allocation6], 1 }
 0xbad   :  { %7263 = vsyncpa [#allocation9], 1 }
 0xbae   :  { %7264 = vsyncpa [#allocation12], 1 }
 0xbaf   :  { %7265 = vsyncpa [#allocation4], 1 }
 0xbb0   :  { %7267 = vsyncpa [#allocation4 + $0x1], 1 }

</bundles_post_ra>
